<compile_context>
chip_gen: v7x
topology: tpu7x:2x2x1
jax: 0.10.0
libtpu: 0.0.40
codegen_flags: <defaults>
</compile_context>

<pallas_src>
import math

import numpy as np

import jax
import jax.numpy as jnp
from jax import lax
from jax.experimental import pallas as pl
from jax.experimental.pallas import tpu as pltpu

_SELU_ALPHA = 1.6732632423543772
_SELU_SCALE = 1.0507009873554805
_BN_EPS = 1e-5


# ---------------------------------------------------------------------------
# Host-side folding: conv / convT -> (S_dy, Wfold_dy, shift) banded matmuls
# ---------------------------------------------------------------------------
def _fold_conv_layer(w_khwc, bias, bn, act, *, Hin, Win, Hout, Wout,
                     s_eff, vr_off, vr_step, vc_off, vc_step):
    """Fold one (direct-form) conv layer.

    Virtual (padded / dilated) input index of real row iy is
    vr_off + vr_step*iy (same for columns).  Output row oy reads virtual rows
    s_eff*oy + dy, dy in [0, kh).
    """
    kh, kw, Cin, Cout = w_khwc.shape
    w64 = np.asarray(w_khwc, np.float64)
    bias = np.asarray(bias, np.float64)
    if bn is not None:
        gamma, beta, mean, var = (np.asarray(t, np.float64) for t in bn)
        scale = gamma / np.sqrt(var + _BN_EPS)
        shift = (bias - mean) * scale + beta
    else:
        scale = np.ones((Cout,), np.float64)
        shift = bias.copy()

    S = np.zeros((kh, Hout, Hin), np.float32)
    Wf = np.zeros((kh, Win * Cin, Wout * Cout), np.float32)
    for dy in range(kh):
        for oy in range(Hout):
            v = s_eff * oy + dy - vr_off
            if v % vr_step == 0 and 0 <= v // vr_step < Hin:
                S[dy, oy, v // vr_step] = 1.0
        for ox in range(Wout):
            for dx in range(kw):
                v = s_eff * ox + dx - vc_off
                if v % vc_step == 0 and 0 <= v // vc_step < Win:
                    ix = v // vc_step
                    Wf[dy, ix * Cin:(ix + 1) * Cin, ox * Cout:(ox + 1) * Cout] += (
                        w64[dy, dx] * scale[None, :]).astype(np.float32)

    shift_row = np.tile(shift.astype(np.float32), Wout).reshape(1, Wout * Cout)
    skip_S = (kh == 1 and kw == 1 and s_eff == 1 and vr_off == 0
              and vr_step == 1 and Hout == Hin)
    return {"kh": kh, "skip_S": skip_S, "act": act,
            "S": S, "W": Wf, "shift": shift_row}


def build_fused_model(params):
    """Returns (plan, flat_weights): static layer plan + flat list of arrays."""
    P = params

    def npa(a):
        return np.asarray(a, np.float64)

    def np_bn(bn):
        return tuple(npa(t) for t in bn)

    layers = []

    def add_conv(wt, b, bn, act, Hin, k, s, p):
        Hout = (Hin + 2 * p - k) // s + 1
        w_khwc = np.transpose(npa(wt), (2, 3, 1, 0))          # (kh,kw,Cin,Cout)
        layers.append(_fold_conv_layer(
            w_khwc, npa(b), np_bn(bn) if bn is not None else None, act,
            Hin=Hin, Win=Hin, Hout=Hout, Wout=Hout,
            s_eff=s, vr_off=p, vr_step=1, vc_off=p, vc_step=1))
        return Hout

    def add_convT(wt, b, bn, act, Hin, k, s, p, op):
        Hout = (Hin - 1) * s - 2 * p + k + op
        # equivalent direct conv on the (virtually) dilated input: swap
        # channel axes and flip the kernel; stride 1, offset k-1-p, step s.
        w_khwc = np.flip(np.transpose(npa(wt), (2, 3, 0, 1)), axis=(0, 1))
        layers.append(_fold_conv_layer(
            w_khwc, npa(b), np_bn(bn) if bn is not None else None, act,
            Hin=Hin, Win=Hin, Hout=Hout, Wout=Hout,
            s_eff=1, vr_off=k - 1 - p, vr_step=s, vc_off=k - 1 - p, vc_step=s))
        return Hout

    h = 16
    h = add_conv(P["e1_w"], P["e1_b"], P["e1_bn"], "selu", h, 3, 2, 1)   # 16->8
    h = add_conv(P["e2_w"], P["e2_b"], P["e2_bn"], "selu", h, 3, 2, 1)   # 8->4
    h = add_conv(P["e3_w"], P["e3_b"], P["e3_bn"], "selu", h, 3, 2, 1)   # 4->2

    # merged bottleneck: (Conv1x1 64->16, linear) o (Conv1x1 16->128 + SELU)
    Wbt = npa(P["bt_w"]).reshape(16, 64).T                   # (64,16)
    Wpbt = npa(P["pbt_w"]).reshape(128, 16).T                # (16,128)
    Wm = (Wbt @ Wpbt)[None, None]                            # (1,1,64,128)
    bm = npa(P["bt_b"]) @ Wpbt + npa(P["pbt_b"])             # (128,)
    layers.append(_fold_conv_layer(
        Wm, bm, None, "selu", Hin=h, Win=h, Hout=h, Wout=h,
        s_eff=1, vr_off=0, vr_step=1, vc_off=0, vc_step=1))

    h = add_convT(P["d4_w"], P["d4_b"], P["d4_bn"], "relu", h, 3, 2, 1, 1)  # 2->4
    h = add_convT(P["d3_w"], P["d3_b"], P["d3_bn"], "relu", h, 3, 2, 1, 1)  # 4->8
    h = add_convT(P["d2_w"], P["d2_b"], P["d2_bn"], "relu", h, 3, 2, 1, 1)  # 8->16
    h = add_convT(P["d1_w"], P["d1_b"], None, "relu", h, 3, 1, 1, 0)        # 16->16
    h = add_conv(P["f_w"], P["f_b"], None, None, h, 1, 1, 0)                # 16->16 (1x1, 32->1)

    plan, flat = [], []
    for L in layers:
        plan.append({"kh": L["kh"], "skip_S": L["skip_S"], "act": L["act"]})
        for dy in range(L["kh"]):
            if not L["skip_S"]:
                flat.append(jnp.asarray(L["S"][dy], jnp.bfloat16))
            flat.append(jnp.asarray(L["W"][dy], jnp.bfloat16))
        flat.append(jnp.asarray(L["shift"], jnp.float32))
    return plan, flat


# ---------------------------------------------------------------------------
# Pallas kernel: full network, one grid step per image
# ---------------------------------------------------------------------------
def _selu_f32(y):
    return _SELU_SCALE * jnp.where(
        y > 0.0, y, _SELU_ALPHA * (jnp.exp(jnp.minimum(y, 0.0)) - 1.0))


def _make_ae_kernel(plan):
    def kernel(*refs):
        x_ref = refs[0]
        out_ref = refs[-1]
        wrefs = refs[1:-1]

        X = x_ref[...].astype(jnp.float32)          # (H, W*Cin) for this image
        idx = 0
        for L in plan:
            Xb = X.astype(jnp.bfloat16)
            acc = None
            for _dy in range(L["kh"]):
                if L["skip_S"]:
                    t = Xb
                else:
                    S = wrefs[idx][...]; idx += 1
                    t = jnp.dot(S, Xb,
                                preferred_element_type=jnp.float32
                                ).astype(jnp.bfloat16)
                Wd = wrefs[idx][...]; idx += 1
                c = jnp.dot(t, Wd, preferred_element_type=jnp.float32)
                acc = c if acc is None else acc + c
            shift = wrefs[idx][...]; idx += 1        # (1, Wout*Cout), f32
            y = acc + shift
            if L["act"] == "selu":
                y = _selu_f32(y)
            elif L["act"] == "relu":
                y = jnp.maximum(y, 0.0)
            X = y
        out_ref[...] = X.astype(out_ref.dtype)
    return kernel


def custom_ae_forward_fused(x_nchw, flat_weights, plan):
    N, Cin, H, W = x_nchw.shape
    assert (Cin, H, W) == (1, 16, 16), (Cin, H, W)
    # boundary layout conversion only: NCHW -> per-image (h, w*c) rows
    x2d = jnp.transpose(x_nchw, (0, 2, 3, 1)).reshape(N * H, W * Cin)

    in_specs = [pl.BlockSpec((H, W * Cin), lambda n: (n, 0))]
    in_specs += [pl.BlockSpec(w.shape, lambda n: (0, 0)) for w in flat_weights]
    out_spec = pl.BlockSpec((16, 16), lambda n: (n, 0))

    out2d = pl.pallas_call(
        _make_ae_kernel(plan),
        out_shape=jax.ShapeDtypeStruct((N * 16, 16), jnp.float32),
        grid=(N,),
        in_specs=in_specs,
        out_specs=out_spec,
        compiler_params=pltpu.CompilerParams(
            dimension_semantics=("parallel",),
            vmem_limit_bytes=40 * 1024 * 1024),
    )(x2d, *flat_weights)

    return out2d.reshape(N, 16, 16, 1).transpose(0, 3, 1, 2)   # back to NCHW


# ---------------------------------------------------------------------------
# Deterministic parameter initialization (synthetic weights)
# ---------------------------------------------------------------------------
def _init_conv(key, cout, cin, k):
    kw_, kb = jax.random.split(key)
    fan_in = cin * k * k
    w = jax.random.normal(kw_, (cout, cin, k, k), jnp.float32) / math.sqrt(fan_in)
    b = 0.1 * jax.random.normal(kb, (cout,), jnp.float32)
    return w, b


def _init_convT(key, cin, cout, k):
    kw_, kb = jax.random.split(key)
    fan_in = cout * k * k
    w = jax.random.normal(kw_, (cin, cout, k, k), jnp.float32) / math.sqrt(fan_in)
    b = 0.1 * jax.random.normal(kb, (cout,), jnp.float32)
    return w, b


def _init_bn(key, c):
    k1, k2, k3, k4 = jax.random.split(key, 4)
    gamma = 1.0 + 0.1 * jax.random.normal(k1, (c,), jnp.float32)
    beta = 0.1 * jax.random.normal(k2, (c,), jnp.float32)
    mean = 0.1 * jax.random.normal(k3, (c,), jnp.float32)
    var = 1.0 + 0.1 * jax.random.uniform(k4, (c,), jnp.float32)
    return gamma, beta, mean, var


def init_custom_ae_params(seed=42):
    master = jax.random.PRNGKey(seed)
    keys = jax.random.split(master, 32)
    p = {}
    p["e1_w"], p["e1_b"] = _init_conv(keys[0], 32, 1, 3)
    p["e1_bn"] = _init_bn(keys[1], 32)
    p["e2_w"], p["e2_b"] = _init_conv(keys[2], 64, 32, 3)
    p["e2_bn"] = _init_bn(keys[3], 64)
    p["e3_w"], p["e3_b"] = _init_conv(keys[4], 64, 64, 3)
    p["e3_bn"] = _init_bn(keys[5], 64)
    p["bt_w"], p["bt_b"] = _init_conv(keys[6], 16, 64, 1)            # no BN / no act
    p["pbt_w"], p["pbt_b"] = _init_conv(keys[7], 128, 16, 1)         # no BN / SELU
    p["d4_w"], p["d4_b"] = _init_convT(keys[8], 128, 128, 3)
    p["d4_bn"] = _init_bn(keys[9], 128)
    p["d3_w"], p["d3_b"] = _init_convT(keys[10], 128, 64, 3)
    p["d3_bn"] = _init_bn(keys[11], 64)
    p["d2_w"], p["d2_b"] = _init_convT(keys[12], 64, 32, 3)
    p["d2_bn"] = _init_bn(keys[13], 32)
    p["d1_w"], p["d1_b"] = _init_convT(keys[14], 32, 32, 3)          # no BN / ReLU
    p["f_w"], p["f_b"] = _init_conv(keys[15], 1, 32, 1)              # no BN / no act
    return p


# ---------------------------------------------------------------------------
# Pure-JAX f32 reference (mirrors custom_AE.forward, eval semantics)
# ---------------------------------------------------------------------------
def _bn_eval(x, bn):
    gamma, beta, mean, var = bn
    inv = gamma / jnp.sqrt(var + _BN_EPS)
    return (x - mean[None, :, None, None]) * inv[None, :, None, None] \
        + beta[None, :, None, None]


def _conv_ref(x, w, b, s, p):
    y = lax.conv_general_dilated(x, w, (s, s), [(p, p), (p, p)],
                                 dimension_numbers=("NCHW", "OIHW", "NCHW"))
    return y + b[None, :, None, None]


def _convT_ref(x, w, b, s, p, op):
    k = w.shape[2]
    wc = jnp.flip(jnp.transpose(w, (1, 0, 2, 3)), axis=(2, 3))
    lo, hi = k - 1 - p, k - 1 - p + op
    y = lax.conv_general_dilated(x, wc, (1, 1), [(lo, hi), (lo, hi)],
                                 lhs_dilation=(s, s),
                                 dimension_numbers=("NCHW", "OIHW", "NCHW"))
    return y + b[None, :, None, None]


def custom_ae_reference(params, x):
    p = params
    h = _selu_f32(_bn_eval(_conv_ref(x, p["e1_w"], p["e1_b"], 2, 1), p["e1_bn"]))
    h = _selu_f32(_bn_eval(_conv_ref(h, p["e2_w"], p["e2_b"], 2, 1), p["e2_bn"]))
    h = _selu_f32(_bn_eval(_conv_ref(h, p["e3_w"], p["e3_b"], 2, 1), p["e3_bn"]))
    h = _conv_ref(h, p["bt_w"], p["bt_b"], 1, 0)
    h = _selu_f32(_conv_ref(h, p["pbt_w"], p["pbt_b"], 1, 0))
    h = jnp.maximum(_bn_eval(_convT_ref(h, p["d4_w"], p["d4_b"], 2, 1, 1), p["d4_bn"]), 0.0)
    h = jnp.maximum(_bn_eval(_convT_ref(h, p["d3_w"], p["d3_b"], 2, 1, 1), p["d3_bn"]), 0.0)
    h = jnp.maximum(_bn_eval(_convT_ref(h, p["d2_w"], p["d2_b"], 2, 1, 1), p["d2_bn"]), 0.0)
    h = jnp.maximum(_convT_ref(h, p["d1_w"], p["d1_b"], 1, 1, 0), 0.0)
    return _conv_ref(h, p["f_w"], p["f_b"], 1, 0)


# ---------------------------------------------------------------------------
if __name__ == "__main__":
    params = init_custom_ae_params(seed=42)
    x = jax.random.normal(jax.random.PRNGKey(0), (2, 1, 16, 16), jnp.float32)

    plan, flat_w = build_fused_model(params)

    fwd = jax.jit(lambda xx, ws: custom_ae_forward_fused(xx, ws, plan))
    out = jax.block_until_ready(fwd(x, tuple(flat_w)))

    assert out.shape == (2, 1, 16, 16), out.shape
    assert out.dtype == jnp.float32
    assert bool(jnp.all(jnp.isfinite(out)))

    # bf16-matmul kernel vs f32 lax.conv reference (loose tolerance for bf16)
    ref = jax.block_until_ready(jax.jit(custom_ae_reference)(params, x))
    rel_l2 = float(jnp.linalg.norm(out - ref) / (jnp.linalg.norm(ref) + 1e-12))
    assert rel_l2 < 5e-2, f"relative L2 error too large: {rel_l2}"

    print("KERNEL_OK")
</pallas_src>

<mosaic_0001>
module attributes {stable_mosaic.version = 11 : i64} {
  func.func @kernel(%arg0: i32, %arg1: memref<16x16xf32, #tpu.memory_space<vmem>>, %arg2: memref<8x16xbf16, #tpu.memory_space<vmem>>, %arg3: memref<16x256xbf16, #tpu.memory_space<vmem>>, %arg4: memref<8x16xbf16, #tpu.memory_space<vmem>>, %arg5: memref<16x256xbf16, #tpu.memory_space<vmem>>, %arg6: memref<8x16xbf16, #tpu.memory_space<vmem>>, %arg7: memref<16x256xbf16, #tpu.memory_space<vmem>>, %arg8: memref<1x256xf32, #tpu.memory_space<vmem>>, %arg9: memref<4x8xbf16, #tpu.memory_space<vmem>>, %arg10: memref<256x256xbf16, #tpu.memory_space<vmem>>, %arg11: memref<4x8xbf16, #tpu.memory_space<vmem>>, %arg12: memref<256x256xbf16, #tpu.memory_space<vmem>>, %arg13: memref<4x8xbf16, #tpu.memory_space<vmem>>, %arg14: memref<256x256xbf16, #tpu.memory_space<vmem>>, %arg15: memref<1x256xf32, #tpu.memory_space<vmem>>, %arg16: memref<2x4xbf16, #tpu.memory_space<vmem>>, %arg17: memref<256x128xbf16, #tpu.memory_space<vmem>>, %arg18: memref<2x4xbf16, #tpu.memory_space<vmem>>, %arg19: memref<256x128xbf16, #tpu.memory_space<vmem>>, %arg20: memref<2x4xbf16, #tpu.memory_space<vmem>>, %arg21: memref<256x128xbf16, #tpu.memory_space<vmem>>, %arg22: memref<1x128xf32, #tpu.memory_space<vmem>>, %arg23: memref<128x256xbf16, #tpu.memory_space<vmem>>, %arg24: memref<1x256xf32, #tpu.memory_space<vmem>>, %arg25: memref<4x2xbf16, #tpu.memory_space<vmem>>, %arg26: memref<256x512xbf16, #tpu.memory_space<vmem>>, %arg27: memref<4x2xbf16, #tpu.memory_space<vmem>>, %arg28: memref<256x512xbf16, #tpu.memory_space<vmem>>, %arg29: memref<4x2xbf16, #tpu.memory_space<vmem>>, %arg30: memref<256x512xbf16, #tpu.memory_space<vmem>>, %arg31: memref<1x512xf32, #tpu.memory_space<vmem>>, %arg32: memref<8x4xbf16, #tpu.memory_space<vmem>>, %arg33: memref<512x512xbf16, #tpu.memory_space<vmem>>, %arg34: memref<8x4xbf16, #tpu.memory_space<vmem>>, %arg35: memref<512x512xbf16, #tpu.memory_space<vmem>>, %arg36: memref<8x4xbf16, #tpu.memory_space<vmem>>, %arg37: memref<512x512xbf16, #tpu.memory_space<vmem>>, %arg38: memref<1x512xf32, #tpu.memory_space<vmem>>, %arg39: memref<16x8xbf16, #tpu.memory_space<vmem>>, %arg40: memref<512x512xbf16, #tpu.memory_space<vmem>>, %arg41: memref<16x8xbf16, #tpu.memory_space<vmem>>, %arg42: memref<512x512xbf16, #tpu.memory_space<vmem>>, %arg43: memref<16x8xbf16, #tpu.memory_space<vmem>>, %arg44: memref<512x512xbf16, #tpu.memory_space<vmem>>, %arg45: memref<1x512xf32, #tpu.memory_space<vmem>>, %arg46: memref<16x16xbf16, #tpu.memory_space<vmem>>, %arg47: memref<512x512xbf16, #tpu.memory_space<vmem>>, %arg48: memref<16x16xbf16, #tpu.memory_space<vmem>>, %arg49: memref<512x512xbf16, #tpu.memory_space<vmem>>, %arg50: memref<16x16xbf16, #tpu.memory_space<vmem>>, %arg51: memref<512x512xbf16, #tpu.memory_space<vmem>>, %arg52: memref<1x512xf32, #tpu.memory_space<vmem>>, %arg53: memref<512x16xbf16, #tpu.memory_space<vmem>>, %arg54: memref<1x16xf32, #tpu.memory_space<vmem>>, %arg55: memref<16x16xf32, #tpu.memory_space<vmem>>) attributes {dimension_semantics = [#tpu.dimension_semantics<parallel>], iteration_bounds = array<i64: 2>, scalar_prefetch = 0 : i64, scratch_operands = 0 : i64, tpu.core_type = #tpu.core_type<tc>, window_params = [{transform_indices = @transform_0, window_bounds = array<i64: 16, 16>}, {pipeline_mode = #tpu.pipeline_mode<synchronous>, transform_indices = @transform_1, window_bounds = array<i64: 8, 16>}, {pipeline_mode = #tpu.pipeline_mode<synchronous>, transform_indices = @transform_2, window_bounds = array<i64: 16, 256>}, {pipeline_mode = #tpu.pipeline_mode<synchronous>, transform_indices = @transform_3, window_bounds = array<i64: 8, 16>}, {pipeline_mode = #tpu.pipeline_mode<synchronous>, transform_indices = @transform_4, window_bounds = array<i64: 16, 256>}, {pipeline_mode = #tpu.pipeline_mode<synchronous>, transform_indices = @transform_5, window_bounds = array<i64: 8, 16>}, {pipeline_mode = #tpu.pipeline_mode<synchronous>, transform_indices = @transform_6, window_bounds = array<i64: 16, 256>}, {pipeline_mode = #tpu.pipeline_mode<synchronous>, transform_indices = @transform_7, window_bounds = array<i64: 1, 256>}, {pipeline_mode = #tpu.pipeline_mode<synchronous>, transform_indices = @transform_8, window_bounds = array<i64: 4, 8>}, {pipeline_mode = #tpu.pipeline_mode<synchronous>, transform_indices = @transform_9, window_bounds = array<i64: 256, 256>}, {pipeline_mode = #tpu.pipeline_mode<synchronous>, transform_indices = @transform_10, window_bounds = array<i64: 4, 8>}, {pipeline_mode = #tpu.pipeline_mode<synchronous>, transform_indices = @transform_11, window_bounds = array<i64: 256, 256>}, {pipeline_mode = #tpu.pipeline_mode<synchronous>, transform_indices = @transform_12, window_bounds = array<i64: 4, 8>}, {pipeline_mode = #tpu.pipeline_mode<synchronous>, transform_indices = @transform_13, window_bounds = array<i64: 256, 256>}, {pipeline_mode = #tpu.pipeline_mode<synchronous>, transform_indices = @transform_14, window_bounds = array<i64: 1, 256>}, {pipeline_mode = #tpu.pipeline_mode<synchronous>, transform_indices = @transform_15, window_bounds = array<i64: 2, 4>}, {pipeline_mode = #tpu.pipeline_mode<synchronous>, transform_indices = @transform_16, window_bounds = array<i64: 256, 128>}, {pipeline_mode = #tpu.pipeline_mode<synchronous>, transform_indices = @transform_17, window_bounds = array<i64: 2, 4>}, {pipeline_mode = #tpu.pipeline_mode<synchronous>, transform_indices = @transform_18, window_bounds = array<i64: 256, 128>}, {pipeline_mode = #tpu.pipeline_mode<synchronous>, transform_indices = @transform_19, window_bounds = array<i64: 2, 4>}, {pipeline_mode = #tpu.pipeline_mode<synchronous>, transform_indices = @transform_20, window_bounds = array<i64: 256, 128>}, {pipeline_mode = #tpu.pipeline_mode<synchronous>, transform_indices = @transform_21, window_bounds = array<i64: 1, 128>}, {pipeline_mode = #tpu.pipeline_mode<synchronous>, transform_indices = @transform_22, window_bounds = array<i64: 128, 256>}, {pipeline_mode = #tpu.pipeline_mode<synchronous>, transform_indices = @transform_23, window_bounds = array<i64: 1, 256>}, {pipeline_mode = #tpu.pipeline_mode<synchronous>, transform_indices = @transform_24, window_bounds = array<i64: 4, 2>}, {pipeline_mode = #tpu.pipeline_mode<synchronous>, transform_indices = @transform_25, window_bounds = array<i64: 256, 512>}, {pipeline_mode = #tpu.pipeline_mode<synchronous>, transform_indices = @transform_26, window_bounds = array<i64: 4, 2>}, {pipeline_mode = #tpu.pipeline_mode<synchronous>, transform_indices = @transform_27, window_bounds = array<i64: 256, 512>}, {pipeline_mode = #tpu.pipeline_mode<synchronous>, transform_indices = @transform_28, window_bounds = array<i64: 4, 2>}, {pipeline_mode = #tpu.pipeline_mode<synchronous>, transform_indices = @transform_29, window_bounds = array<i64: 256, 512>}, {pipeline_mode = #tpu.pipeline_mode<synchronous>, transform_indices = @transform_30, window_bounds = array<i64: 1, 512>}, {pipeline_mode = #tpu.pipeline_mode<synchronous>, transform_indices = @transform_31, window_bounds = array<i64: 8, 4>}, {pipeline_mode = #tpu.pipeline_mode<synchronous>, transform_indices = @transform_32, window_bounds = array<i64: 512, 512>}, {pipeline_mode = #tpu.pipeline_mode<synchronous>, transform_indices = @transform_33, window_bounds = array<i64: 8, 4>}, {pipeline_mode = #tpu.pipeline_mode<synchronous>, transform_indices = @transform_34, window_bounds = array<i64: 512, 512>}, {pipeline_mode = #tpu.pipeline_mode<synchronous>, transform_indices = @transform_35, window_bounds = array<i64: 8, 4>}, {pipeline_mode = #tpu.pipeline_mode<synchronous>, transform_indices = @transform_36, window_bounds = array<i64: 512, 512>}, {pipeline_mode = #tpu.pipeline_mode<synchronous>, transform_indices = @transform_37, window_bounds = array<i64: 1, 512>}, {pipeline_mode = #tpu.pipeline_mode<synchronous>, transform_indices = @transform_38, window_bounds = array<i64: 16, 8>}, {pipeline_mode = #tpu.pipeline_mode<synchronous>, transform_indices = @transform_39, window_bounds = array<i64: 512, 512>}, {pipeline_mode = #tpu.pipeline_mode<synchronous>, transform_indices = @transform_40, window_bounds = array<i64: 16, 8>}, {pipeline_mode = #tpu.pipeline_mode<synchronous>, transform_indices = @transform_41, window_bounds = array<i64: 512, 512>}, {pipeline_mode = #tpu.pipeline_mode<synchronous>, transform_indices = @transform_42, window_bounds = array<i64: 16, 8>}, {pipeline_mode = #tpu.pipeline_mode<synchronous>, transform_indices = @transform_43, window_bounds = array<i64: 512, 512>}, {pipeline_mode = #tpu.pipeline_mode<synchronous>, transform_indices = @transform_44, window_bounds = array<i64: 1, 512>}, {pipeline_mode = #tpu.pipeline_mode<synchronous>, transform_indices = @transform_45, window_bounds = array<i64: 16, 16>}, {pipeline_mode = #tpu.pipeline_mode<synchronous>, transform_indices = @transform_46, window_bounds = array<i64: 512, 512>}, {pipeline_mode = #tpu.pipeline_mode<synchronous>, transform_indices = @transform_47, window_bounds = array<i64: 16, 16>}, {pipeline_mode = #tpu.pipeline_mode<synchronous>, transform_indices = @transform_48, window_bounds = array<i64: 512, 512>}, {pipeline_mode = #tpu.pipeline_mode<synchronous>, transform_indices = @transform_49, window_bounds = array<i64: 16, 16>}, {pipeline_mode = #tpu.pipeline_mode<synchronous>, transform_indices = @transform_50, window_bounds = array<i64: 512, 512>}, {pipeline_mode = #tpu.pipeline_mode<synchronous>, transform_indices = @transform_51, window_bounds = array<i64: 1, 512>}, {pipeline_mode = #tpu.pipeline_mode<synchronous>, transform_indices = @transform_52, window_bounds = array<i64: 512, 16>}, {pipeline_mode = #tpu.pipeline_mode<synchronous>, transform_indices = @transform_53, window_bounds = array<i64: 1, 16>}, {transform_indices = @transform_54, window_bounds = array<i64: 16, 16>}]} {
    %c0 = arith.constant 0 : index
    %c0_0 = arith.constant 0 : index
    %0 = vector.load %arg1[%c0, %c0_0] : memref<16x16xf32, #tpu.memory_space<vmem>>, vector<16x16xf32>
    %1 = arith.truncf %0 : vector<16x16xf32> to vector<16x16xbf16>
    %c0_1 = arith.constant 0 : index
    %c0_2 = arith.constant 0 : index
    %2 = vector.load %arg2[%c0_1, %c0_2] : memref<8x16xbf16, #tpu.memory_space<vmem>>, vector<8x16xbf16>
    %cst = arith.constant dense<0.000000e+00> : vector<8x16xf32>
    %3 = tpu.matmul %2, %1, %cst {dimension_numbers = #tpu.dot_dimension_numbers<[1], [0], [0], [1], [0, 0, 1, 1], [], []>} : vector<8x16xbf16>, vector<16x16xbf16>, vector<8x16xf32> -> vector<8x16xf32>
    %4 = arith.truncf %3 : vector<8x16xf32> to vector<8x16xbf16>
    %c0_3 = arith.constant 0 : index
    %c0_4 = arith.constant 0 : index
    %5 = vector.load %arg3[%c0_3, %c0_4] : memref<16x256xbf16, #tpu.memory_space<vmem>>, vector<16x256xbf16>
    %cst_5 = arith.constant dense<0.000000e+00> : vector<8x256xf32>
    %6 = tpu.matmul %4, %5, %cst_5 {dimension_numbers = #tpu.dot_dimension_numbers<[1], [0], [0], [1], [0, 0, 1, 1], [], []>} : vector<8x16xbf16>, vector<16x256xbf16>, vector<8x256xf32> -> vector<8x256xf32>
    %c0_6 = arith.constant 0 : index
    %c0_7 = arith.constant 0 : index
    %7 = vector.load %arg4[%c0_6, %c0_7] : memref<8x16xbf16, #tpu.memory_space<vmem>>, vector<8x16xbf16>
    %cst_8 = arith.constant dense<0.000000e+00> : vector<8x16xf32>
    %8 = tpu.matmul %7, %1, %cst_8 {dimension_numbers = #tpu.dot_dimension_numbers<[1], [0], [0], [1], [0, 0, 1, 1], [], []>} : vector<8x16xbf16>, vector<16x16xbf16>, vector<8x16xf32> -> vector<8x16xf32>
    %9 = arith.truncf %8 : vector<8x16xf32> to vector<8x16xbf16>
    %c0_9 = arith.constant 0 : index
    %c0_10 = arith.constant 0 : index
    %10 = vector.load %arg5[%c0_9, %c0_10] : memref<16x256xbf16, #tpu.memory_space<vmem>>, vector<16x256xbf16>
    %cst_11 = arith.constant dense<0.000000e+00> : vector<8x256xf32>
    %11 = tpu.matmul %9, %10, %cst_11 {dimension_numbers = #tpu.dot_dimension_numbers<[1], [0], [0], [1], [0, 0, 1, 1], [], []>} : vector<8x16xbf16>, vector<16x256xbf16>, vector<8x256xf32> -> vector<8x256xf32>
    %12 = arith.addf %6, %11 : vector<8x256xf32>
    %c0_12 = arith.constant 0 : index
    %c0_13 = arith.constant 0 : index
    %13 = vector.load %arg6[%c0_12, %c0_13] : memref<8x16xbf16, #tpu.memory_space<vmem>>, vector<8x16xbf16>
    %cst_14 = arith.constant dense<0.000000e+00> : vector<8x16xf32>
    %14 = tpu.matmul %13, %1, %cst_14 {dimension_numbers = #tpu.dot_dimension_numbers<[1], [0], [0], [1], [0, 0, 1, 1], [], []>} : vector<8x16xbf16>, vector<16x16xbf16>, vector<8x16xf32> -> vector<8x16xf32>
    %15 = arith.truncf %14 : vector<8x16xf32> to vector<8x16xbf16>
    %c0_15 = arith.constant 0 : index
    %c0_16 = arith.constant 0 : index
    %16 = vector.load %arg7[%c0_15, %c0_16] : memref<16x256xbf16, #tpu.memory_space<vmem>>, vector<16x256xbf16>
    %cst_17 = arith.constant dense<0.000000e+00> : vector<8x256xf32>
    %17 = tpu.matmul %15, %16, %cst_17 {dimension_numbers = #tpu.dot_dimension_numbers<[1], [0], [0], [1], [0, 0, 1, 1], [], []>} : vector<8x16xbf16>, vector<16x256xbf16>, vector<8x256xf32> -> vector<8x256xf32>
    %18 = arith.addf %12, %17 : vector<8x256xf32>
    %c0_18 = arith.constant 0 : index
    %c0_19 = arith.constant 0 : index
    %19 = vector.load %arg8[%c0_18, %c0_19] : memref<1x256xf32, #tpu.memory_space<vmem>>, vector<1x256xf32>
    %20 = vector.broadcast %19 : vector<1x256xf32> to vector<8x256xf32>
    %21 = arith.addf %18, %20 : vector<8x256xf32>
    %cst_20 = arith.constant 0.000000e+00 : f32
    %22 = vector.broadcast %cst_20 : f32 to vector<8x256xf32>
    %23 = arith.cmpf ogt, %21, %22 : vector<8x256xf32>
    %cst_21 = arith.constant 0.000000e+00 : f32
    %24 = vector.broadcast %cst_21 : f32 to vector<8x256xf32>
    %25 = arith.minimumf %21, %24 : vector<8x256xf32>
    %26 = math.exp %25 : vector<8x256xf32>
    %cst_22 = arith.constant 1.000000e+00 : f32
    %27 = vector.broadcast %cst_22 : f32 to vector<8x256xf32>
    %28 = arith.subf %26, %27 : vector<8x256xf32>
    %cst_23 = arith.constant 1.67326319 : f32
    %29 = vector.broadcast %cst_23 : f32 to vector<8x256xf32>
    %30 = arith.mulf %29, %28 : vector<8x256xf32>
    %31 = arith.select %23, %21, %30 : vector<8x256xi1>, vector<8x256xf32>
    %cst_24 = arith.constant 1.05070102 : f32
    %32 = vector.broadcast %cst_24 : f32 to vector<8x256xf32>
    %33 = arith.mulf %32, %31 : vector<8x256xf32>
    %34 = arith.truncf %33 : vector<8x256xf32> to vector<8x256xbf16>
    %c0_25 = arith.constant 0 : index
    %c0_26 = arith.constant 0 : index
    %35 = vector.load %arg9[%c0_25, %c0_26] : memref<4x8xbf16, #tpu.memory_space<vmem>>, vector<4x8xbf16>
    %cst_27 = arith.constant dense<0.000000e+00> : vector<4x256xf32>
    %36 = tpu.matmul %35, %34, %cst_27 {dimension_numbers = #tpu.dot_dimension_numbers<[1], [0], [0], [1], [0, 0, 1, 1], [], []>} : vector<4x8xbf16>, vector<8x256xbf16>, vector<4x256xf32> -> vector<4x256xf32>
    %37 = arith.truncf %36 : vector<4x256xf32> to vector<4x256xbf16>
    %c0_28 = arith.constant 0 : index
    %c0_29 = arith.constant 0 : index
    %38 = vector.load %arg10[%c0_28, %c0_29] : memref<256x256xbf16, #tpu.memory_space<vmem>>, vector<256x256xbf16>
    %cst_30 = arith.constant dense<0.000000e+00> : vector<4x256xf32>
    %39 = tpu.matmul %37, %38, %cst_30 {dimension_numbers = #tpu.dot_dimension_numbers<[1], [0], [0], [1], [0, 0, 1, 1], [], []>} : vector<4x256xbf16>, vector<256x256xbf16>, vector<4x256xf32> -> vector<4x256xf32>
    %c0_31 = arith.constant 0 : index
    %c0_32 = arith.constant 0 : index
    %40 = vector.load %arg11[%c0_31, %c0_32] : memref<4x8xbf16, #tpu.memory_space<vmem>>, vector<4x8xbf16>
    %cst_33 = arith.constant dense<0.000000e+00> : vector<4x256xf32>
    %41 = tpu.matmul %40, %34, %cst_33 {dimension_numbers = #tpu.dot_dimension_numbers<[1], [0], [0], [1], [0, 0, 1, 1], [], []>} : vector<4x8xbf16>, vector<8x256xbf16>, vector<4x256xf32> -> vector<4x256xf32>
    %42 = arith.truncf %41 : vector<4x256xf32> to vector<4x256xbf16>
    %c0_34 = arith.constant 0 : index
    %c0_35 = arith.constant 0 : index
    %43 = vector.load %arg12[%c0_34, %c0_35] : memref<256x256xbf16, #tpu.memory_space<vmem>>, vector<256x256xbf16>
    %cst_36 = arith.constant dense<0.000000e+00> : vector<4x256xf32>
    %44 = tpu.matmul %42, %43, %cst_36 {dimension_numbers = #tpu.dot_dimension_numbers<[1], [0], [0], [1], [0, 0, 1, 1], [], []>} : vector<4x256xbf16>, vector<256x256xbf16>, vector<4x256xf32> -> vector<4x256xf32>
    %45 = arith.addf %39, %44 : vector<4x256xf32>
    %c0_37 = arith.constant 0 : index
    %c0_38 = arith.constant 0 : index
    %46 = vector.load %arg13[%c0_37, %c0_38] : memref<4x8xbf16, #tpu.memory_space<vmem>>, vector<4x8xbf16>
    %cst_39 = arith.constant dense<0.000000e+00> : vector<4x256xf32>
    %47 = tpu.matmul %46, %34, %cst_39 {dimension_numbers = #tpu.dot_dimension_numbers<[1], [0], [0], [1], [0, 0, 1, 1], [], []>} : vector<4x8xbf16>, vector<8x256xbf16>, vector<4x256xf32> -> vector<4x256xf32>
    %48 = arith.truncf %47 : vector<4x256xf32> to vector<4x256xbf16>
    %c0_40 = arith.constant 0 : index
    %c0_41 = arith.constant 0 : index
    %49 = vector.load %arg14[%c0_40, %c0_41] : memref<256x256xbf16, #tpu.memory_space<vmem>>, vector<256x256xbf16>
    %cst_42 = arith.constant dense<0.000000e+00> : vector<4x256xf32>
    %50 = tpu.matmul %48, %49, %cst_42 {dimension_numbers = #tpu.dot_dimension_numbers<[1], [0], [0], [1], [0, 0, 1, 1], [], []>} : vector<4x256xbf16>, vector<256x256xbf16>, vector<4x256xf32> -> vector<4x256xf32>
    %51 = arith.addf %45, %50 : vector<4x256xf32>
    %c0_43 = arith.constant 0 : index
    %c0_44 = arith.constant 0 : index
    %52 = vector.load %arg15[%c0_43, %c0_44] : memref<1x256xf32, #tpu.memory_space<vmem>>, vector<1x256xf32>
    %53 = vector.broadcast %52 : vector<1x256xf32> to vector<4x256xf32>
    %54 = arith.addf %51, %53 : vector<4x256xf32>
    %cst_45 = arith.constant 0.000000e+00 : f32
    %55 = vector.broadcast %cst_45 : f32 to vector<4x256xf32>
    %56 = arith.cmpf ogt, %54, %55 : vector<4x256xf32>
    %cst_46 = arith.constant 0.000000e+00 : f32
    %57 = vector.broadcast %cst_46 : f32 to vector<4x256xf32>
    %58 = arith.minimumf %54, %57 : vector<4x256xf32>
    %59 = math.exp %58 : vector<4x256xf32>
    %cst_47 = arith.constant 1.000000e+00 : f32
    %60 = vector.broadcast %cst_47 : f32 to vector<4x256xf32>
    %61 = arith.subf %59, %60 : vector<4x256xf32>
    %cst_48 = arith.constant 1.67326319 : f32
    %62 = vector.broadcast %cst_48 : f32 to vector<4x256xf32>
    %63 = arith.mulf %62, %61 : vector<4x256xf32>
    %64 = arith.select %56, %54, %63 : vector<4x256xi1>, vector<4x256xf32>
    %cst_49 = arith.constant 1.05070102 : f32
    %65 = vector.broadcast %cst_49 : f32 to vector<4x256xf32>
    %66 = arith.mulf %65, %64 : vector<4x256xf32>
    %67 = arith.truncf %66 : vector<4x256xf32> to vector<4x256xbf16>
    %c0_50 = arith.constant 0 : index
    %c0_51 = arith.constant 0 : index
    %68 = vector.load %arg16[%c0_50, %c0_51] : memref<2x4xbf16, #tpu.memory_space<vmem>>, vector<2x4xbf16>
    %cst_52 = arith.constant dense<0.000000e+00> : vector<2x256xf32>
    %69 = tpu.matmul %68, %67, %cst_52 {dimension_numbers = #tpu.dot_dimension_numbers<[1], [0], [0], [1], [0, 0, 1, 1], [], []>} : vector<2x4xbf16>, vector<4x256xbf16>, vector<2x256xf32> -> vector<2x256xf32>
    %70 = arith.truncf %69 : vector<2x256xf32> to vector<2x256xbf16>
    %c0_53 = arith.constant 0 : index
    %c0_54 = arith.constant 0 : index
    %71 = vector.load %arg17[%c0_53, %c0_54] : memref<256x128xbf16, #tpu.memory_space<vmem>>, vector<256x128xbf16>
    %cst_55 = arith.constant dense<0.000000e+00> : vector<2x128xf32>
    %72 = tpu.matmul %70, %71, %cst_55 {dimension_numbers = #tpu.dot_dimension_numbers<[1], [0], [0], [1], [0, 0, 1, 1], [], []>} : vector<2x256xbf16>, vector<256x128xbf16>, vector<2x128xf32> -> vector<2x128xf32>
    %c0_56 = arith.constant 0 : index
    %c0_57 = arith.constant 0 : index
    %73 = vector.load %arg18[%c0_56, %c0_57] : memref<2x4xbf16, #tpu.memory_space<vmem>>, vector<2x4xbf16>
    %cst_58 = arith.constant dense<0.000000e+00> : vector<2x256xf32>
    %74 = tpu.matmul %73, %67, %cst_58 {dimension_numbers = #tpu.dot_dimension_numbers<[1], [0], [0], [1], [0, 0, 1, 1], [], []>} : vector<2x4xbf16>, vector<4x256xbf16>, vector<2x256xf32> -> vector<2x256xf32>
    %75 = arith.truncf %74 : vector<2x256xf32> to vector<2x256xbf16>
    %c0_59 = arith.constant 0 : index
    %c0_60 = arith.constant 0 : index
    %76 = vector.load %arg19[%c0_59, %c0_60] : memref<256x128xbf16, #tpu.memory_space<vmem>>, vector<256x128xbf16>
    %cst_61 = arith.constant dense<0.000000e+00> : vector<2x128xf32>
    %77 = tpu.matmul %75, %76, %cst_61 {dimension_numbers = #tpu.dot_dimension_numbers<[1], [0], [0], [1], [0, 0, 1, 1], [], []>} : vector<2x256xbf16>, vector<256x128xbf16>, vector<2x128xf32> -> vector<2x128xf32>
    %78 = arith.addf %72, %77 : vector<2x128xf32>
    %c0_62 = arith.constant 0 : index
    %c0_63 = arith.constant 0 : index
    %79 = vector.load %arg20[%c0_62, %c0_63] : memref<2x4xbf16, #tpu.memory_space<vmem>>, vector<2x4xbf16>
    %cst_64 = arith.constant dense<0.000000e+00> : vector<2x256xf32>
    %80 = tpu.matmul %79, %67, %cst_64 {dimension_numbers = #tpu.dot_dimension_numbers<[1], [0], [0], [1], [0, 0, 1, 1], [], []>} : vector<2x4xbf16>, vector<4x256xbf16>, vector<2x256xf32> -> vector<2x256xf32>
    %81 = arith.truncf %80 : vector<2x256xf32> to vector<2x256xbf16>
    %c0_65 = arith.constant 0 : index
    %c0_66 = arith.constant 0 : index
    %82 = vector.load %arg21[%c0_65, %c0_66] : memref<256x128xbf16, #tpu.memory_space<vmem>>, vector<256x128xbf16>
    %cst_67 = arith.constant dense<0.000000e+00> : vector<2x128xf32>
    %83 = tpu.matmul %81, %82, %cst_67 {dimension_numbers = #tpu.dot_dimension_numbers<[1], [0], [0], [1], [0, 0, 1, 1], [], []>} : vector<2x256xbf16>, vector<256x128xbf16>, vector<2x128xf32> -> vector<2x128xf32>
    %84 = arith.addf %78, %83 : vector<2x128xf32>
    %c0_68 = arith.constant 0 : index
    %c0_69 = arith.constant 0 : index
    %85 = vector.load %arg22[%c0_68, %c0_69] : memref<1x128xf32, #tpu.memory_space<vmem>>, vector<1x128xf32>
    %86 = vector.broadcast %85 : vector<1x128xf32> to vector<2x128xf32>
    %87 = arith.addf %84, %86 : vector<2x128xf32>
    %cst_70 = arith.constant 0.000000e+00 : f32
    %88 = vector.broadcast %cst_70 : f32 to vector<2x128xf32>
    %89 = arith.cmpf ogt, %87, %88 : vector<2x128xf32>
    %cst_71 = arith.constant 0.000000e+00 : f32
    %90 = vector.broadcast %cst_71 : f32 to vector<2x128xf32>
    %91 = arith.minimumf %87, %90 : vector<2x128xf32>
    %92 = math.exp %91 : vector<2x128xf32>
    %cst_72 = arith.constant 1.000000e+00 : f32
    %93 = vector.broadcast %cst_72 : f32 to vector<2x128xf32>
    %94 = arith.subf %92, %93 : vector<2x128xf32>
    %cst_73 = arith.constant 1.67326319 : f32
    %95 = vector.broadcast %cst_73 : f32 to vector<2x128xf32>
    %96 = arith.mulf %95, %94 : vector<2x128xf32>
    %97 = arith.select %89, %87, %96 : vector<2x128xi1>, vector<2x128xf32>
    %cst_74 = arith.constant 1.05070102 : f32
    %98 = vector.broadcast %cst_74 : f32 to vector<2x128xf32>
    %99 = arith.mulf %98, %97 : vector<2x128xf32>
    %100 = arith.truncf %99 : vector<2x128xf32> to vector<2x128xbf16>
    %c0_75 = arith.constant 0 : index
    %c0_76 = arith.constant 0 : index
    %101 = vector.load %arg23[%c0_75, %c0_76] : memref<128x256xbf16, #tpu.memory_space<vmem>>, vector<128x256xbf16>
    %cst_77 = arith.constant dense<0.000000e+00> : vector<2x256xf32>
    %102 = tpu.matmul %100, %101, %cst_77 {dimension_numbers = #tpu.dot_dimension_numbers<[1], [0], [0], [1], [0, 0, 1, 1], [], []>} : vector<2x128xbf16>, vector<128x256xbf16>, vector<2x256xf32> -> vector<2x256xf32>
    %c0_78 = arith.constant 0 : index
    %c0_79 = arith.constant 0 : index
    %103 = vector.load %arg24[%c0_78, %c0_79] : memref<1x256xf32, #tpu.memory_space<vmem>>, vector<1x256xf32>
    %104 = vector.broadcast %103 : vector<1x256xf32> to vector<2x256xf32>
    %105 = arith.addf %102, %104 : vector<2x256xf32>
    %cst_80 = arith.constant 0.000000e+00 : f32
    %106 = vector.broadcast %cst_80 : f32 to vector<2x256xf32>
    %107 = arith.cmpf ogt, %105, %106 : vector<2x256xf32>
    %cst_81 = arith.constant 0.000000e+00 : f32
    %108 = vector.broadcast %cst_81 : f32 to vector<2x256xf32>
    %109 = arith.minimumf %105, %108 : vector<2x256xf32>
    %110 = math.exp %109 : vector<2x256xf32>
    %cst_82 = arith.constant 1.000000e+00 : f32
    %111 = vector.broadcast %cst_82 : f32 to vector<2x256xf32>
    %112 = arith.subf %110, %111 : vector<2x256xf32>
    %cst_83 = arith.constant 1.67326319 : f32
    %113 = vector.broadcast %cst_83 : f32 to vector<2x256xf32>
    %114 = arith.mulf %113, %112 : vector<2x256xf32>
    %115 = arith.select %107, %105, %114 : vector<2x256xi1>, vector<2x256xf32>
    %cst_84 = arith.constant 1.05070102 : f32
    %116 = vector.broadcast %cst_84 : f32 to vector<2x256xf32>
    %117 = arith.mulf %116, %115 : vector<2x256xf32>
    %118 = arith.truncf %117 : vector<2x256xf32> to vector<2x256xbf16>
    %c0_85 = arith.constant 0 : index
    %c0_86 = arith.constant 0 : index
    %119 = vector.load %arg25[%c0_85, %c0_86] : memref<4x2xbf16, #tpu.memory_space<vmem>>, vector<4x2xbf16>
    %cst_87 = arith.constant dense<0.000000e+00> : vector<4x256xf32>
    %120 = tpu.matmul %119, %118, %cst_87 {dimension_numbers = #tpu.dot_dimension_numbers<[1], [0], [0], [1], [0, 0, 1, 1], [], []>} : vector<4x2xbf16>, vector<2x256xbf16>, vector<4x256xf32> -> vector<4x256xf32>
    %121 = arith.truncf %120 : vector<4x256xf32> to vector<4x256xbf16>
    %c0_88 = arith.constant 0 : index
    %c0_89 = arith.constant 0 : index
    %122 = vector.load %arg26[%c0_88, %c0_89] : memref<256x512xbf16, #tpu.memory_space<vmem>>, vector<256x512xbf16>
    %cst_90 = arith.constant dense<0.000000e+00> : vector<4x512xf32>
    %123 = tpu.matmul %121, %122, %cst_90 {dimension_numbers = #tpu.dot_dimension_numbers<[1], [0], [0], [1], [0, 0, 1, 1], [], []>} : vector<4x256xbf16>, vector<256x512xbf16>, vector<4x512xf32> -> vector<4x512xf32>
    %c0_91 = arith.constant 0 : index
    %c0_92 = arith.constant 0 : index
    %124 = vector.load %arg27[%c0_91, %c0_92] : memref<4x2xbf16, #tpu.memory_space<vmem>>, vector<4x2xbf16>
    %cst_93 = arith.constant dense<0.000000e+00> : vector<4x256xf32>
    %125 = tpu.matmul %124, %118, %cst_93 {dimension_numbers = #tpu.dot_dimension_numbers<[1], [0], [0], [1], [0, 0, 1, 1], [], []>} : vector<4x2xbf16>, vector<2x256xbf16>, vector<4x256xf32> -> vector<4x256xf32>
    %126 = arith.truncf %125 : vector<4x256xf32> to vector<4x256xbf16>
    %c0_94 = arith.constant 0 : index
    %c0_95 = arith.constant 0 : index
    %127 = vector.load %arg28[%c0_94, %c0_95] : memref<256x512xbf16, #tpu.memory_space<vmem>>, vector<256x512xbf16>
    %cst_96 = arith.constant dense<0.000000e+00> : vector<4x512xf32>
    %128 = tpu.matmul %126, %127, %cst_96 {dimension_numbers = #tpu.dot_dimension_numbers<[1], [0], [0], [1], [0, 0, 1, 1], [], []>} : vector<4x256xbf16>, vector<256x512xbf16>, vector<4x512xf32> -> vector<4x512xf32>
    %129 = arith.addf %123, %128 : vector<4x512xf32>
    %c0_97 = arith.constant 0 : index
    %c0_98 = arith.constant 0 : index
    %130 = vector.load %arg29[%c0_97, %c0_98] : memref<4x2xbf16, #tpu.memory_space<vmem>>, vector<4x2xbf16>
    %cst_99 = arith.constant dense<0.000000e+00> : vector<4x256xf32>
    %131 = tpu.matmul %130, %118, %cst_99 {dimension_numbers = #tpu.dot_dimension_numbers<[1], [0], [0], [1], [0, 0, 1, 1], [], []>} : vector<4x2xbf16>, vector<2x256xbf16>, vector<4x256xf32> -> vector<4x256xf32>
    %132 = arith.truncf %131 : vector<4x256xf32> to vector<4x256xbf16>
    %c0_100 = arith.constant 0 : index
    %c0_101 = arith.constant 0 : index
    %133 = vector.load %arg30[%c0_100, %c0_101] : memref<256x512xbf16, #tpu.memory_space<vmem>>, vector<256x512xbf16>
    %cst_102 = arith.constant dense<0.000000e+00> : vector<4x512xf32>
    %134 = tpu.matmul %132, %133, %cst_102 {dimension_numbers = #tpu.dot_dimension_numbers<[1], [0], [0], [1], [0, 0, 1, 1], [], []>} : vector<4x256xbf16>, vector<256x512xbf16>, vector<4x512xf32> -> vector<4x512xf32>
    %135 = arith.addf %129, %134 : vector<4x512xf32>
    %c0_103 = arith.constant 0 : index
    %c0_104 = arith.constant 0 : index
    %136 = vector.load %arg31[%c0_103, %c0_104] : memref<1x512xf32, #tpu.memory_space<vmem>>, vector<1x512xf32>
    %137 = vector.broadcast %136 : vector<1x512xf32> to vector<4x512xf32>
    %138 = arith.addf %135, %137 : vector<4x512xf32>
    %cst_105 = arith.constant 0.000000e+00 : f32
    %139 = vector.broadcast %cst_105 : f32 to vector<4x512xf32>
    %140 = arith.maximumf %138, %139 : vector<4x512xf32>
    %141 = arith.truncf %140 : vector<4x512xf32> to vector<4x512xbf16>
    %c0_106 = arith.constant 0 : index
    %c0_107 = arith.constant 0 : index
    %142 = vector.load %arg32[%c0_106, %c0_107] : memref<8x4xbf16, #tpu.memory_space<vmem>>, vector<8x4xbf16>
    %cst_108 = arith.constant dense<0.000000e+00> : vector<8x512xf32>
    %143 = tpu.matmul %142, %141, %cst_108 {dimension_numbers = #tpu.dot_dimension_numbers<[1], [0], [0], [1], [0, 0, 1, 1], [], []>} : vector<8x4xbf16>, vector<4x512xbf16>, vector<8x512xf32> -> vector<8x512xf32>
    %144 = arith.truncf %143 : vector<8x512xf32> to vector<8x512xbf16>
    %c0_109 = arith.constant 0 : index
    %c0_110 = arith.constant 0 : index
    %145 = vector.load %arg33[%c0_109, %c0_110] : memref<512x512xbf16, #tpu.memory_space<vmem>>, vector<512x512xbf16>
    %cst_111 = arith.constant dense<0.000000e+00> : vector<8x512xf32>
    %146 = tpu.matmul %144, %145, %cst_111 {dimension_numbers = #tpu.dot_dimension_numbers<[1], [0], [0], [1], [0, 0, 1, 1], [], []>} : vector<8x512xbf16>, vector<512x512xbf16>, vector<8x512xf32> -> vector<8x512xf32>
    %c0_112 = arith.constant 0 : index
    %c0_113 = arith.constant 0 : index
    %147 = vector.load %arg34[%c0_112, %c0_113] : memref<8x4xbf16, #tpu.memory_space<vmem>>, vector<8x4xbf16>
    %cst_114 = arith.constant dense<0.000000e+00> : vector<8x512xf32>
    %148 = tpu.matmul %147, %141, %cst_114 {dimension_numbers = #tpu.dot_dimension_numbers<[1], [0], [0], [1], [0, 0, 1, 1], [], []>} : vector<8x4xbf16>, vector<4x512xbf16>, vector<8x512xf32> -> vector<8x512xf32>
    %149 = arith.truncf %148 : vector<8x512xf32> to vector<8x512xbf16>
    %c0_115 = arith.constant 0 : index
    %c0_116 = arith.constant 0 : index
    %150 = vector.load %arg35[%c0_115, %c0_116] : memref<512x512xbf16, #tpu.memory_space<vmem>>, vector<512x512xbf16>
    %cst_117 = arith.constant dense<0.000000e+00> : vector<8x512xf32>
    %151 = tpu.matmul %149, %150, %cst_117 {dimension_numbers = #tpu.dot_dimension_numbers<[1], [0], [0], [1], [0, 0, 1, 1], [], []>} : vector<8x512xbf16>, vector<512x512xbf16>, vector<8x512xf32> -> vector<8x512xf32>
    %152 = arith.addf %146, %151 : vector<8x512xf32>
    %c0_118 = arith.constant 0 : index
    %c0_119 = arith.constant 0 : index
    %153 = vector.load %arg36[%c0_118, %c0_119] : memref<8x4xbf16, #tpu.memory_space<vmem>>, vector<8x4xbf16>
    %cst_120 = arith.constant dense<0.000000e+00> : vector<8x512xf32>
    %154 = tpu.matmul %153, %141, %cst_120 {dimension_numbers = #tpu.dot_dimension_numbers<[1], [0], [0], [1], [0, 0, 1, 1], [], []>} : vector<8x4xbf16>, vector<4x512xbf16>, vector<8x512xf32> -> vector<8x512xf32>
    %155 = arith.truncf %154 : vector<8x512xf32> to vector<8x512xbf16>
    %c0_121 = arith.constant 0 : index
    %c0_122 = arith.constant 0 : index
    %156 = vector.load %arg37[%c0_121, %c0_122] : memref<512x512xbf16, #tpu.memory_space<vmem>>, vector<512x512xbf16>
    %cst_123 = arith.constant dense<0.000000e+00> : vector<8x512xf32>
    %157 = tpu.matmul %155, %156, %cst_123 {dimension_numbers = #tpu.dot_dimension_numbers<[1], [0], [0], [1], [0, 0, 1, 1], [], []>} : vector<8x512xbf16>, vector<512x512xbf16>, vector<8x512xf32> -> vector<8x512xf32>
    %158 = arith.addf %152, %157 : vector<8x512xf32>
    %c0_124 = arith.constant 0 : index
    %c0_125 = arith.constant 0 : index
    %159 = vector.load %arg38[%c0_124, %c0_125] : memref<1x512xf32, #tpu.memory_space<vmem>>, vector<1x512xf32>
    %160 = vector.broadcast %159 : vector<1x512xf32> to vector<8x512xf32>
    %161 = arith.addf %158, %160 : vector<8x512xf32>
    %cst_126 = arith.constant 0.000000e+00 : f32
    %162 = vector.broadcast %cst_126 : f32 to vector<8x512xf32>
    %163 = arith.maximumf %161, %162 : vector<8x512xf32>
    %164 = arith.truncf %163 : vector<8x512xf32> to vector<8x512xbf16>
    %c0_127 = arith.constant 0 : index
    %c0_128 = arith.constant 0 : index
    %165 = vector.load %arg39[%c0_127, %c0_128] : memref<16x8xbf16, #tpu.memory_space<vmem>>, vector<16x8xbf16>
    %cst_129 = arith.constant dense<0.000000e+00> : vector<16x512xf32>
    %166 = tpu.matmul %165, %164, %cst_129 {dimension_numbers = #tpu.dot_dimension_numbers<[1], [0], [0], [1], [0, 0, 1, 1], [], []>} : vector<16x8xbf16>, vector<8x512xbf16>, vector<16x512xf32> -> vector<16x512xf32>
    %167 = arith.truncf %166 : vector<16x512xf32> to vector<16x512xbf16>
    %c0_130 = arith.constant 0 : index
    %c0_131 = arith.constant 0 : index
    %168 = vector.load %arg40[%c0_130, %c0_131] : memref<512x512xbf16, #tpu.memory_space<vmem>>, vector<512x512xbf16>
    %cst_132 = arith.constant dense<0.000000e+00> : vector<16x512xf32>
    %169 = tpu.matmul %167, %168, %cst_132 {dimension_numbers = #tpu.dot_dimension_numbers<[1], [0], [0], [1], [0, 0, 1, 1], [], []>} : vector<16x512xbf16>, vector<512x512xbf16>, vector<16x512xf32> -> vector<16x512xf32>
    %c0_133 = arith.constant 0 : index
    %c0_134 = arith.constant 0 : index
    %170 = vector.load %arg41[%c0_133, %c0_134] : memref<16x8xbf16, #tpu.memory_space<vmem>>, vector<16x8xbf16>
    %cst_135 = arith.constant dense<0.000000e+00> : vector<16x512xf32>
    %171 = tpu.matmul %170, %164, %cst_135 {dimension_numbers = #tpu.dot_dimension_numbers<[1], [0], [0], [1], [0, 0, 1, 1], [], []>} : vector<16x8xbf16>, vector<8x512xbf16>, vector<16x512xf32> -> vector<16x512xf32>
    %172 = arith.truncf %171 : vector<16x512xf32> to vector<16x512xbf16>
    %c0_136 = arith.constant 0 : index
    %c0_137 = arith.constant 0 : index
    %173 = vector.load %arg42[%c0_136, %c0_137] : memref<512x512xbf16, #tpu.memory_space<vmem>>, vector<512x512xbf16>
    %cst_138 = arith.constant dense<0.000000e+00> : vector<16x512xf32>
    %174 = tpu.matmul %172, %173, %cst_138 {dimension_numbers = #tpu.dot_dimension_numbers<[1], [0], [0], [1], [0, 0, 1, 1], [], []>} : vector<16x512xbf16>, vector<512x512xbf16>, vector<16x512xf32> -> vector<16x512xf32>
    %175 = arith.addf %169, %174 : vector<16x512xf32>
    %c0_139 = arith.constant 0 : index
    %c0_140 = arith.constant 0 : index
    %176 = vector.load %arg43[%c0_139, %c0_140] : memref<16x8xbf16, #tpu.memory_space<vmem>>, vector<16x8xbf16>
    %cst_141 = arith.constant dense<0.000000e+00> : vector<16x512xf32>
    %177 = tpu.matmul %176, %164, %cst_141 {dimension_numbers = #tpu.dot_dimension_numbers<[1], [0], [0], [1], [0, 0, 1, 1], [], []>} : vector<16x8xbf16>, vector<8x512xbf16>, vector<16x512xf32> -> vector<16x512xf32>
    %178 = arith.truncf %177 : vector<16x512xf32> to vector<16x512xbf16>
    %c0_142 = arith.constant 0 : index
    %c0_143 = arith.constant 0 : index
    %179 = vector.load %arg44[%c0_142, %c0_143] : memref<512x512xbf16, #tpu.memory_space<vmem>>, vector<512x512xbf16>
    %cst_144 = arith.constant dense<0.000000e+00> : vector<16x512xf32>
    %180 = tpu.matmul %178, %179, %cst_144 {dimension_numbers = #tpu.dot_dimension_numbers<[1], [0], [0], [1], [0, 0, 1, 1], [], []>} : vector<16x512xbf16>, vector<512x512xbf16>, vector<16x512xf32> -> vector<16x512xf32>
    %181 = arith.addf %175, %180 : vector<16x512xf32>
    %c0_145 = arith.constant 0 : index
    %c0_146 = arith.constant 0 : index
    %182 = vector.load %arg45[%c0_145, %c0_146] : memref<1x512xf32, #tpu.memory_space<vmem>>, vector<1x512xf32>
    %183 = vector.broadcast %182 : vector<1x512xf32> to vector<16x512xf32>
    %184 = arith.addf %181, %183 : vector<16x512xf32>
    %cst_147 = arith.constant 0.000000e+00 : f32
    %185 = vector.broadcast %cst_147 : f32 to vector<16x512xf32>
    %186 = arith.maximumf %184, %185 : vector<16x512xf32>
    %187 = arith.truncf %186 : vector<16x512xf32> to vector<16x512xbf16>
    %c0_148 = arith.constant 0 : index
    %c0_149 = arith.constant 0 : index
    %188 = vector.load %arg46[%c0_148, %c0_149] : memref<16x16xbf16, #tpu.memory_space<vmem>>, vector<16x16xbf16>
    %cst_150 = arith.constant dense<0.000000e+00> : vector<16x512xf32>
    %189 = tpu.matmul %188, %187, %cst_150 {dimension_numbers = #tpu.dot_dimension_numbers<[1], [0], [0], [1], [0, 0, 1, 1], [], []>} : vector<16x16xbf16>, vector<16x512xbf16>, vector<16x512xf32> -> vector<16x512xf32>
    %190 = arith.truncf %189 : vector<16x512xf32> to vector<16x512xbf16>
    %c0_151 = arith.constant 0 : index
    %c0_152 = arith.constant 0 : index
    %191 = vector.load %arg47[%c0_151, %c0_152] : memref<512x512xbf16, #tpu.memory_space<vmem>>, vector<512x512xbf16>
    %cst_153 = arith.constant dense<0.000000e+00> : vector<16x512xf32>
    %192 = tpu.matmul %190, %191, %cst_153 {dimension_numbers = #tpu.dot_dimension_numbers<[1], [0], [0], [1], [0, 0, 1, 1], [], []>} : vector<16x512xbf16>, vector<512x512xbf16>, vector<16x512xf32> -> vector<16x512xf32>
    %c0_154 = arith.constant 0 : index
    %c0_155 = arith.constant 0 : index
    %193 = vector.load %arg48[%c0_154, %c0_155] : memref<16x16xbf16, #tpu.memory_space<vmem>>, vector<16x16xbf16>
    %cst_156 = arith.constant dense<0.000000e+00> : vector<16x512xf32>
    %194 = tpu.matmul %193, %187, %cst_156 {dimension_numbers = #tpu.dot_dimension_numbers<[1], [0], [0], [1], [0, 0, 1, 1], [], []>} : vector<16x16xbf16>, vector<16x512xbf16>, vector<16x512xf32> -> vector<16x512xf32>
    %195 = arith.truncf %194 : vector<16x512xf32> to vector<16x512xbf16>
    %c0_157 = arith.constant 0 : index
    %c0_158 = arith.constant 0 : index
    %196 = vector.load %arg49[%c0_157, %c0_158] : memref<512x512xbf16, #tpu.memory_space<vmem>>, vector<512x512xbf16>
    %cst_159 = arith.constant dense<0.000000e+00> : vector<16x512xf32>
    %197 = tpu.matmul %195, %196, %cst_159 {dimension_numbers = #tpu.dot_dimension_numbers<[1], [0], [0], [1], [0, 0, 1, 1], [], []>} : vector<16x512xbf16>, vector<512x512xbf16>, vector<16x512xf32> -> vector<16x512xf32>
    %198 = arith.addf %192, %197 : vector<16x512xf32>
    %c0_160 = arith.constant 0 : index
    %c0_161 = arith.constant 0 : index
    %199 = vector.load %arg50[%c0_160, %c0_161] : memref<16x16xbf16, #tpu.memory_space<vmem>>, vector<16x16xbf16>
    %cst_162 = arith.constant dense<0.000000e+00> : vector<16x512xf32>
    %200 = tpu.matmul %199, %187, %cst_162 {dimension_numbers = #tpu.dot_dimension_numbers<[1], [0], [0], [1], [0, 0, 1, 1], [], []>} : vector<16x16xbf16>, vector<16x512xbf16>, vector<16x512xf32> -> vector<16x512xf32>
    %201 = arith.truncf %200 : vector<16x512xf32> to vector<16x512xbf16>
    %c0_163 = arith.constant 0 : index
    %c0_164 = arith.constant 0 : index
    %202 = vector.load %arg51[%c0_163, %c0_164] : memref<512x512xbf16, #tpu.memory_space<vmem>>, vector<512x512xbf16>
    %cst_165 = arith.constant dense<0.000000e+00> : vector<16x512xf32>
    %203 = tpu.matmul %201, %202, %cst_165 {dimension_numbers = #tpu.dot_dimension_numbers<[1], [0], [0], [1], [0, 0, 1, 1], [], []>} : vector<16x512xbf16>, vector<512x512xbf16>, vector<16x512xf32> -> vector<16x512xf32>
    %204 = arith.addf %198, %203 : vector<16x512xf32>
    %c0_166 = arith.constant 0 : index
    %c0_167 = arith.constant 0 : index
    %205 = vector.load %arg52[%c0_166, %c0_167] : memref<1x512xf32, #tpu.memory_space<vmem>>, vector<1x512xf32>
    %206 = vector.broadcast %205 : vector<1x512xf32> to vector<16x512xf32>
    %207 = arith.addf %204, %206 : vector<16x512xf32>
    %cst_168 = arith.constant 0.000000e+00 : f32
    %208 = vector.broadcast %cst_168 : f32 to vector<16x512xf32>
    %209 = arith.maximumf %207, %208 : vector<16x512xf32>
    %210 = arith.truncf %209 : vector<16x512xf32> to vector<16x512xbf16>
    %c0_169 = arith.constant 0 : index
    %c0_170 = arith.constant 0 : index
    %211 = vector.load %arg53[%c0_169, %c0_170] : memref<512x16xbf16, #tpu.memory_space<vmem>>, vector<512x16xbf16>
    %cst_171 = arith.constant dense<0.000000e+00> : vector<16x16xf32>
    %212 = tpu.matmul %210, %211, %cst_171 {dimension_numbers = #tpu.dot_dimension_numbers<[1], [0], [0], [1], [0, 0, 1, 1], [], []>} : vector<16x512xbf16>, vector<512x16xbf16>, vector<16x16xf32> -> vector<16x16xf32>
    %c0_172 = arith.constant 0 : index
    %c0_173 = arith.constant 0 : index
    %213 = vector.load %arg54[%c0_172, %c0_173] : memref<1x16xf32, #tpu.memory_space<vmem>>, vector<1x16xf32>
    %214 = vector.broadcast %213 : vector<1x16xf32> to vector<16x16xf32>
    %215 = arith.addf %212, %214 : vector<16x16xf32>
    %c0_174 = arith.constant 0 : index
    %c0_175 = arith.constant 0 : index
    %216 = vector.load %arg55[%c0_174, %c0_175] : memref<16x16xf32, #tpu.memory_space<vmem>>, vector<16x16xf32>
    tpu.vector_store %arg55[%c0_174, %c0_175], %215 {strides = array<i32>} : memref<16x16xf32, #tpu.memory_space<vmem>>, vector<16x16xf32>,
    return
  }
  func.func @transform_0(%arg0: i32) -> (i32, i32) {
    %c0_i32 = arith.constant 0 : i32
    %c0_i32_0 = arith.constant 0 : i32
    return %arg0, %c0_i32 : i32, i32
  }
  func.func @transform_1(%arg0: i32) -> (i32, i32) {
    %c0_i32 = arith.constant 0 : i32
    %c0_i32_0 = arith.constant 0 : i32
    %c0_i32_1 = arith.constant 0 : i32
    return %c0_i32, %c0_i32_0 : i32, i32
  }
  func.func @transform_2(%arg0: i32) -> (i32, i32) {
    %c0_i32 = arith.constant 0 : i32
    %c0_i32_0 = arith.constant 0 : i32
    %c0_i32_1 = arith.constant 0 : i32
    return %c0_i32, %c0_i32_0 : i32, i32
  }
  func.func @transform_3(%arg0: i32) -> (i32, i32) {
    %c0_i32 = arith.constant 0 : i32
    %c0_i32_0 = arith.constant 0 : i32
    %c0_i32_1 = arith.constant 0 : i32
    return %c0_i32, %c0_i32_0 : i32, i32
  }
  func.func @transform_4(%arg0: i32) -> (i32, i32) {
    %c0_i32 = arith.constant 0 : i32
    %c0_i32_0 = arith.constant 0 : i32
    %c0_i32_1 = arith.constant 0 : i32
    return %c0_i32, %c0_i32_0 : i32, i32
  }
  func.func @transform_5(%arg0: i32) -> (i32, i32) {
    %c0_i32 = arith.constant 0 : i32
    %c0_i32_0 = arith.constant 0 : i32
    %c0_i32_1 = arith.constant 0 : i32
    return %c0_i32, %c0_i32_0 : i32, i32
  }
  func.func @transform_6(%arg0: i32) -> (i32, i32) {
    %c0_i32 = arith.constant 0 : i32
    %c0_i32_0 = arith.constant 0 : i32
    %c0_i32_1 = arith.constant 0 : i32
    return %c0_i32, %c0_i32_0 : i32, i32
  }
  func.func @transform_7(%arg0: i32) -> (i32, i32) {
    %c0_i32 = arith.constant 0 : i32
    %c0_i32_0 = arith.constant 0 : i32
    %c0_i32_1 = arith.constant 0 : i32
    return %c0_i32, %c0_i32_0 : i32, i32
  }
  func.func @transform_8(%arg0: i32) -> (i32, i32) {
    %c0_i32 = arith.constant 0 : i32
    %c0_i32_0 = arith.constant 0 : i32
    %c0_i32_1 = arith.constant 0 : i32
    return %c0_i32, %c0_i32_0 : i32, i32
  }
  func.func @transform_9(%arg0: i32) -> (i32, i32) {
    %c0_i32 = arith.constant 0 : i32
    %c0_i32_0 = arith.constant 0 : i32
    %c0_i32_1 = arith.constant 0 : i32
    return %c0_i32, %c0_i32_0 : i32, i32
  }
  func.func @transform_10(%arg0: i32) -> (i32, i32) {
    %c0_i32 = arith.constant 0 : i32
    %c0_i32_0 = arith.constant 0 : i32
    %c0_i32_1 = arith.constant 0 : i32
    return %c0_i32, %c0_i32_0 : i32, i32
  }
  func.func @transform_11(%arg0: i32) -> (i32, i32) {
    %c0_i32 = arith.constant 0 : i32
    %c0_i32_0 = arith.constant 0 : i32
    %c0_i32_1 = arith.constant 0 : i32
    return %c0_i32, %c0_i32_0 : i32, i32
  }
  func.func @transform_12(%arg0: i32) -> (i32, i32) {
    %c0_i32 = arith.constant 0 : i32
    %c0_i32_0 = arith.constant 0 : i32
    %c0_i32_1 = arith.constant 0 : i32
    return %c0_i32, %c0_i32_0 : i32, i32
  }
  func.func @transform_13(%arg0: i32) -> (i32, i32) {
    %c0_i32 = arith.constant 0 : i32
    %c0_i32_0 = arith.constant 0 : i32
    %c0_i32_1 = arith.constant 0 : i32
    return %c0_i32, %c0_i32_0 : i32, i32
  }
  func.func @transform_14(%arg0: i32) -> (i32, i32) {
    %c0_i32 = arith.constant 0 : i32
    %c0_i32_0 = arith.constant 0 : i32
    %c0_i32_1 = arith.constant 0 : i32
    return %c0_i32, %c0_i32_0 : i32, i32
  }
  func.func @transform_15(%arg0: i32) -> (i32, i32) {
    %c0_i32 = arith.constant 0 : i32
    %c0_i32_0 = arith.constant 0 : i32
    %c0_i32_1 = arith.constant 0 : i32
    return %c0_i32, %c0_i32_0 : i32, i32
  }
  func.func @transform_16(%arg0: i32) -> (i32, i32) {
    %c0_i32 = arith.constant 0 : i32
    %c0_i32_0 = arith.constant 0 : i32
    %c0_i32_1 = arith.constant 0 : i32
    return %c0_i32, %c0_i32_0 : i32, i32
  }
  func.func @transform_17(%arg0: i32) -> (i32, i32) {
    %c0_i32 = arith.constant 0 : i32
    %c0_i32_0 = arith.constant 0 : i32
    %c0_i32_1 = arith.constant 0 : i32
    return %c0_i32, %c0_i32_0 : i32, i32
  }
  func.func @transform_18(%arg0: i32) -> (i32, i32) {
    %c0_i32 = arith.constant 0 : i32
    %c0_i32_0 = arith.constant 0 : i32
    %c0_i32_1 = arith.constant 0 : i32
    return %c0_i32, %c0_i32_0 : i32, i32
  }
  func.func @transform_19(%arg0: i32) -> (i32, i32) {
    %c0_i32 = arith.constant 0 : i32
    %c0_i32_0 = arith.constant 0 : i32
    %c0_i32_1 = arith.constant 0 : i32
    return %c0_i32, %c0_i32_0 : i32, i32
  }
  func.func @transform_20(%arg0: i32) -> (i32, i32) {
    %c0_i32 = arith.constant 0 : i32
    %c0_i32_0 = arith.constant 0 : i32
    %c0_i32_1 = arith.constant 0 : i32
    return %c0_i32, %c0_i32_0 : i32, i32
  }
  func.func @transform_21(%arg0: i32) -> (i32, i32) {
    %c0_i32 = arith.constant 0 : i32
    %c0_i32_0 = arith.constant 0 : i32
    %c0_i32_1 = arith.constant 0 : i32
    return %c0_i32, %c0_i32_0 : i32, i32
  }
  func.func @transform_22(%arg0: i32) -> (i32, i32) {
    %c0_i32 = arith.constant 0 : i32
    %c0_i32_0 = arith.constant 0 : i32
    %c0_i32_1 = arith.constant 0 : i32
    return %c0_i32, %c0_i32_0 : i32, i32
  }
  func.func @transform_23(%arg0: i32) -> (i32, i32) {
    %c0_i32 = arith.constant 0 : i32
    %c0_i32_0 = arith.constant 0 : i32
    %c0_i32_1 = arith.constant 0 : i32
    return %c0_i32, %c0_i32_0 : i32, i32
  }
  func.func @transform_24(%arg0: i32) -> (i32, i32) {
    %c0_i32 = arith.constant 0 : i32
    %c0_i32_0 = arith.constant 0 : i32
    %c0_i32_1 = arith.constant 0 : i32
    return %c0_i32, %c0_i32_0 : i32, i32
  }
  func.func @transform_25(%arg0: i32) -> (i32, i32) {
    %c0_i32 = arith.constant 0 : i32
    %c0_i32_0 = arith.constant 0 : i32
    %c0_i32_1 = arith.constant 0 : i32
    return %c0_i32, %c0_i32_0 : i32, i32
  }
  func.func @transform_26(%arg0: i32) -> (i32, i32) {
    %c0_i32 = arith.constant 0 : i32
    %c0_i32_0 = arith.constant 0 : i32
    %c0_i32_1 = arith.constant 0 : i32
    return %c0_i32, %c0_i32_0 : i32, i32
  }
  func.func @transform_27(%arg0: i32) -> (i32, i32) {
    %c0_i32 = arith.constant 0 : i32
    %c0_i32_0 = arith.constant 0 : i32
    %c0_i32_1 = arith.constant 0 : i32
    return %c0_i32, %c0_i32_0 : i32, i32
  }
  func.func @transform_28(%arg0: i32) -> (i32, i32) {
    %c0_i32 = arith.constant 0 : i32
    %c0_i32_0 = arith.constant 0 : i32
    %c0_i32_1 = arith.constant 0 : i32
    return %c0_i32, %c0_i32_0 : i32, i32
  }
  func.func @transform_29(%arg0: i32) -> (i32, i32) {
    %c0_i32 = arith.constant 0 : i32
    %c0_i32_0 = arith.constant 0 : i32
    %c0_i32_1 = arith.constant 0 : i32
    return %c0_i32, %c0_i32_0 : i32, i32
  }
  func.func @transform_30(%arg0: i32) -> (i32, i32) {
    %c0_i32 = arith.constant 0 : i32
    %c0_i32_0 = arith.constant 0 : i32
    %c0_i32_1 = arith.constant 0 : i32
    return %c0_i32, %c0_i32_0 : i32, i32
  }
  func.func @transform_31(%arg0: i32) -> (i32, i32) {
    %c0_i32 = arith.constant 0 : i32
    %c0_i32_0 = arith.constant 0 : i32
    %c0_i32_1 = arith.constant 0 : i32
    return %c0_i32, %c0_i32_0 : i32, i32
  }
  func.func @transform_32(%arg0: i32) -> (i32, i32) {
    %c0_i32 = arith.constant 0 : i32
    %c0_i32_0 = arith.constant 0 : i32
    %c0_i32_1 = arith.constant 0 : i32
    return %c0_i32, %c0_i32_0 : i32, i32
  }
  func.func @transform_33(%arg0: i32) -> (i32, i32) {
    %c0_i32 = arith.constant 0 : i32
    %c0_i32_0 = arith.constant 0 : i32
    %c0_i32_1 = arith.constant 0 : i32
    return %c0_i32, %c0_i32_0 : i32, i32
  }
  func.func @transform_34(%arg0: i32) -> (i32, i32) {
    %c0_i32 = arith.constant 0 : i32
    %c0_i32_0 = arith.constant 0 : i32
    %c0_i32_1 = arith.constant 0 : i32
    return %c0_i32, %c0_i32_0 : i32, i32
  }
  func.func @transform_35(%arg0: i32) -> (i32, i32) {
    %c0_i32 = arith.constant 0 : i32
    %c0_i32_0 = arith.constant 0 : i32
    %c0_i32_1 = arith.constant 0 : i32
    return %c0_i32, %c0_i32_0 : i32, i32
  }
  func.func @transform_36(%arg0: i32) -> (i32, i32) {
    %c0_i32 = arith.constant 0 : i32
    %c0_i32_0 = arith.constant 0 : i32
    %c0_i32_1 = arith.constant 0 : i32
    return %c0_i32, %c0_i32_0 : i32, i32
  }
  func.func @transform_37(%arg0: i32) -> (i32, i32) {
    %c0_i32 = arith.constant 0 : i32
    %c0_i32_0 = arith.constant 0 : i32
    %c0_i32_1 = arith.constant 0 : i32
    return %c0_i32, %c0_i32_0 : i32, i32
  }
  func.func @transform_38(%arg0: i32) -> (i32, i32) {
    %c0_i32 = arith.constant 0 : i32
    %c0_i32_0 = arith.constant 0 : i32
    %c0_i32_1 = arith.constant 0 : i32
    return %c0_i32, %c0_i32_0 : i32, i32
  }
  func.func @transform_39(%arg0: i32) -> (i32, i32) {
    %c0_i32 = arith.constant 0 : i32
    %c0_i32_0 = arith.constant 0 : i32
    %c0_i32_1 = arith.constant 0 : i32
    return %c0_i32, %c0_i32_0 : i32, i32
  }
  func.func @transform_40(%arg0: i32) -> (i32, i32) {
    %c0_i32 = arith.constant 0 : i32
    %c0_i32_0 = arith.constant 0 : i32
    %c0_i32_1 = arith.constant 0 : i32
    return %c0_i32, %c0_i32_0 : i32, i32
  }
  func.func @transform_41(%arg0: i32) -> (i32, i32) {
    %c0_i32 = arith.constant 0 : i32
    %c0_i32_0 = arith.constant 0 : i32
    %c0_i32_1 = arith.constant 0 : i32
    return %c0_i32, %c0_i32_0 : i32, i32
  }
  func.func @transform_42(%arg0: i32) -> (i32, i32) {
    %c0_i32 = arith.constant 0 : i32
    %c0_i32_0 = arith.constant 0 : i32
    %c0_i32_1 = arith.constant 0 : i32
    return %c0_i32, %c0_i32_0 : i32, i32
  }
  func.func @transform_43(%arg0: i32) -> (i32, i32) {
    %c0_i32 = arith.constant 0 : i32
    %c0_i32_0 = arith.constant 0 : i32
    %c0_i32_1 = arith.constant 0 : i32
    return %c0_i32, %c0_i32_0 : i32, i32
  }
  func.func @transform_44(%arg0: i32) -> (i32, i32) {
    %c0_i32 = arith.constant 0 : i32
    %c0_i32_0 = arith.constant 0 : i32
    %c0_i32_1 = arith.constant 0 : i32
    return %c0_i32, %c0_i32_0 : i32, i32
  }
  func.func @transform_45(%arg0: i32) -> (i32, i32) {
    %c0_i32 = arith.constant 0 : i32
    %c0_i32_0 = arith.constant 0 : i32
    %c0_i32_1 = arith.constant 0 : i32
    return %c0_i32, %c0_i32_0 : i32, i32
  }
  func.func @transform_46(%arg0: i32) -> (i32, i32) {
    %c0_i32 = arith.constant 0 : i32
    %c0_i32_0 = arith.constant 0 : i32
    %c0_i32_1 = arith.constant 0 : i32
    return %c0_i32, %c0_i32_0 : i32, i32
  }
  func.func @transform_47(%arg0: i32) -> (i32, i32) {
    %c0_i32 = arith.constant 0 : i32
    %c0_i32_0 = arith.constant 0 : i32
    %c0_i32_1 = arith.constant 0 : i32
    return %c0_i32, %c0_i32_0 : i32, i32
  }
  func.func @transform_48(%arg0: i32) -> (i32, i32) {
    %c0_i32 = arith.constant 0 : i32
    %c0_i32_0 = arith.constant 0 : i32
    %c0_i32_1 = arith.constant 0 : i32
    return %c0_i32, %c0_i32_0 : i32, i32
  }
  func.func @transform_49(%arg0: i32) -> (i32, i32) {
    %c0_i32 = arith.constant 0 : i32
    %c0_i32_0 = arith.constant 0 : i32
    %c0_i32_1 = arith.constant 0 : i32
    return %c0_i32, %c0_i32_0 : i32, i32
  }
  func.func @transform_50(%arg0: i32) -> (i32, i32) {
    %c0_i32 = arith.constant 0 : i32
    %c0_i32_0 = arith.constant 0 : i32
    %c0_i32_1 = arith.constant 0 : i32
    return %c0_i32, %c0_i32_0 : i32, i32
  }
  func.func @transform_51(%arg0: i32) -> (i32, i32) {
    %c0_i32 = arith.constant 0 : i32
    %c0_i32_0 = arith.constant 0 : i32
    %c0_i32_1 = arith.constant 0 : i32
    return %c0_i32, %c0_i32_0 : i32, i32
  }
  func.func @transform_52(%arg0: i32) -> (i32, i32) {
    %c0_i32 = arith.constant 0 : i32
    %c0_i32_0 = arith.constant 0 : i32
    %c0_i32_1 = arith.constant 0 : i32
    return %c0_i32, %c0_i32_0 : i32, i32
  }
  func.func @transform_53(%arg0: i32) -> (i32, i32) {
    %c0_i32 = arith.constant 0 : i32
    %c0_i32_0 = arith.constant 0 : i32
    %c0_i32_1 = arith.constant 0 : i32
    return %c0_i32, %c0_i32_0 : i32, i32
  }
  func.func @transform_54(%arg0: i32) -> (i32, i32) {
    %c0_i32 = arith.constant 0 : i32
    %c0_i32_0 = arith.constant 0 : i32
    return %arg0, %c0_i32 : i32, i32
  }
}

</mosaic_0001>

<bundles_post_ra>
// kernel: _lambda_.1
= control target key start
LH: loop header
LB: loop body
LE: loop exit
PB: predicated region body
PF: predicated region fallthrough
CT: control target
= control target key end

     0   :  { %s21561_s6 = smov 1   ;;  %s21562_s10 = smov 2   ;;  %s23044_s0 = inlined_call_operand.smem [shape: u32[55], index: -1, kind: input, shape index: {}] }
   0x1   :  { %s21671_s5 = sld [smem:[%s23044_s0]]   ;;  %s21563_s14 = smov 3  }
   0x2   :  { %s21676_s9 = sld [smem:[%s23044_s0 + %s21561_s6]]   ;;  %s21564_s18 = smov 4  }
   0x3   :  { %s21681_s13 = sld [smem:[%s23044_s0 + %s21562_s10]]   ;;  %s21565_s22 = smov 5  }
   0x4   :  { %s21686_s17 = sld [smem:[%s23044_s0 + %s21563_s14]]   ;;  %s21566_s26 = smov 6  }
   0x5   :  { %s21691_s21 = sld [smem:[%s23044_s0 + %s21564_s18]]   ;;  %s21567_s30 = smov 7  }
   0x6   :  { %s21696_s25 = sld [smem:[%s23044_s0 + %s21565_s22]]   ;;  %s21568_s4 = smov 8  }
   0x7   :  { %23108 = sst [smem:[#allocation75_spill]] %s21671_s5  ;;  %s21569_s10 = smov 9  }
   0x8   :  { %23109 = sst [smem:[#allocation76_spill]] %s21676_s9  ;;  %s21570_s15 = smov 10  }
   0x9   :  { %23110 = sst [smem:[#allocation77_spill]] %s21681_s13  ;;  %s21571_s20 = smov 11  }
   0xa   :  { %23111 = sst [smem:[#allocation78_spill]] %s21686_s17  ;;  %s21573_s1 = smov 13  }
   0xb   :  { %23112 = sst [smem:[#allocation79_spill]] %s21691_s21  ;;  %s21574_s7 = smov 14  }
   0xc   :  { %s21701_s29 = sld [smem:[%s23044_s0 + %s21566_s26]]   ;;  %s21572_s26 = smov 12  }
   0xd   :  { %s21706_s3 = sld [smem:[%s23044_s0 + %s21567_s30]]   ;;  %s21576_s22 = smov 16  }
   0xe   :  { %s21711_s8 = sld [smem:[%s23044_s0 + %s21568_s4]]   ;;  %s21577_s28 = smov 17  }
   0xf   :  { %s21716_s14 = sld [smem:[%s23044_s0 + %s21569_s10]]  }
  0x10   :  { %s21721_s19 = sld [smem:[%s23044_s0 + %s21570_s15]]   ;;  %s21575_s15 = smov 15  }
  0x11   :  { %s21726_s24 = sld [smem:[%s23044_s0 + %s21571_s20]]  }
  0x12   :  { %23113 = sst [smem:[#allocation80_spill]] %s21701_s29 }
  0x13   :  { %23114 = sst [smem:[#allocation81_spill]] %s21706_s3 }
  0x14   :  { %23115 = sst [smem:[#allocation82_spill]] %s21711_s8 }
  0x15   :  { %23116 = sst [smem:[#allocation83_spill]] %s21716_s14 }
  0x16   :  { %23117 = sst [smem:[#allocation84_spill]] %s21721_s19 }
  0x17   :  { %23118 = sst [smem:[#allocation85_spill]] %s21726_s24 }
  0x18   :  { %s21731_s30 = sld [smem:[%s23044_s0 + %s21572_s26]]  }
  0x19   :  { %s21736_s6 = sld [smem:[%s23044_s0 + %s21573_s1]]  }
  0x1a   :  { %s21741_s12 = sld [smem:[%s23044_s0 + %s21574_s7]]   ;;  %s21578_s7 = smov 18  }
  0x1b   :  { %s21746_s20 = sld [smem:[%s23044_s0 + %s21575_s15]]   ;;  %s21579_s15 = smov 19  }
  0x1c   :  { %s21751_s27 = sld [smem:[%s23044_s0 + %s21576_s22]]   ;;  %s21580_s22 = smov 20  }
  0x1d   :  { %s21756_s4 = sld [smem:[%s23044_s0 + %s21577_s28]]   ;;  %s21581_s28 = smov 21  }
  0x1e   :  { %s21761_s14 = sld [smem:[%s23044_s0 + %s21578_s7]]   ;;  %s21582_s7 = smov 22  }
  0x1f   :  { %23119 = sst [smem:[#allocation86_spill]] %s21736_s6 }
  0x20   :  { %23120 = sst [smem:[#allocation87_spill]] %s21741_s12 }
  0x21   :  { %23121 = sst [smem:[#allocation88_spill]] %s21746_s20 }
  0x22   :  { %23122 = sst [smem:[#allocation89_spill]] %s21751_s27 }
  0x23   :  { %23123 = sst [smem:[#allocation90_spill]] %s21756_s4 }
  0x24   :  { %23124 = sst [smem:[#allocation91_spill]] %s21761_s14 }
  0x25   :  { %s21766_s5 = sld [smem:[%s23044_s0 + %s21579_s15]]   ;;  %s21583_s15 = smov 23  }
  0x26   :  { %s21771_s27 = sld [smem:[%s23044_s0 + %s21580_s22]]   ;;  %s21584_s22 = smov 24  }
  0x27   :  { %s21776_s20 = sld [smem:[%s23044_s0 + %s21581_s28]]   ;;  %s21585_s28 = smov 25  }
  0x28   :  { %s21781_s14 = sld [smem:[%s23044_s0 + %s21582_s7]]   ;;  %s21586_s7 = smov 26  }
  0x29   :  { %s21786_s6 = sld [smem:[%s23044_s0 + %s21583_s15]]   ;;  %s21587_s15 = smov 27  }
  0x2a   :  { %s21796_s24 = sld [smem:[%s23044_s0 + %s21585_s28]]   ;;  %s21589_s28 = smov 29  }
  0x2b   :  { %23125 = sst [smem:[#allocation92_spill]] %s21766_s5 }
  0x2c   :  { %23126 = sst [smem:[#allocation93_spill]] %s21771_s27 }
  0x2d   :  { %s21791_s27 = sld [smem:[%s23044_s0 + %s21584_s22]]   ;;  %s21588_s22 = smov 28  }
  0x2e   :  { %23127 = sst [smem:[#allocation94_spill]] %s21781_s14 }
  0x2f   :  { %23128 = sst [smem:[#allocation95_spill]] %s21786_s6 }
  0x30   :  { %23130 = sst [smem:[#allocation97_spill]] %s21796_s24 }
  0x31   :  { %s21801_s14 = sld [smem:[%s23044_s0 + %s21586_s7]]   ;;  %s21590_s7 = smov 30  }
  0x32   :  { %s21806_s8 = sld [smem:[%s23044_s0 + %s21587_s15]]   ;;  %s21591_s15 = smov 31  }
  0x33   :  { %23129 = sst [smem:[#allocation96_spill]] %s21791_s27 }
  0x34   :  { %s21811_s27 = sld [smem:[%s23044_s0 + %s21588_s22]]   ;;  %s21592_s22 = smov 32  }
  0x35   :  { %s21816_s24 = sld [smem:[%s23044_s0 + %s21589_s28]]   ;;  %s21593_s28 = smov 33  }
  0x36   :  { %s21826_s29 = sld [smem:[%s23044_s0 + %s21591_s15]]   ;;  %s21595_s15 = smov 35  }
  0x37   :  { %23131 = sst [smem:[#allocation98_spill]] %s21801_s14 }
  0x38   :  { %23132 = sst [smem:[#allocation99_spill]] %s21806_s8 }
  0x39   :  { %s21821_s14 = sld [smem:[%s23044_s0 + %s21590_s7]]   ;;  %s21594_s7 = smov 34  }
  0x3a   :  { %23133 = sst [smem:[#allocation100_spill]] %s21811_s27 }
  0x3b   :  { %23134 = sst [smem:[#allocation101_spill]] %s21816_s24 }
  0x3c   :  { %23136 = sst [smem:[#allocation103_spill]] %s21826_s29 }
  0x3d   :  { %s21831_s27 = sld [smem:[%s23044_s0 + %s21592_s22]]   ;;  %s21596_s22 = smov 36  }
  0x3e   :  { %s21836_s24 = sld [smem:[%s23044_s0 + %s21593_s28]]   ;;  %s21597_s28 = smov 37  }
  0x3f   :  { %23135 = sst [smem:[#allocation102_spill]] %s21821_s14 }
  0x40   :  { %s21841_s14 = sld [smem:[%s23044_s0 + %s21594_s7]]   ;;  %s21598_s7 = smov 38  }
  0x41   :  { %s21846_s29 = sld [smem:[%s23044_s0 + %s21595_s15]]   ;;  %s21599_s15 = smov 39  }
  0x42   :  { %s21851_s21 = sld [smem:[%s23044_s0 + %s21596_s22]]   ;;  %s21600_s22 = smov 40  }
  0x43   :  { %s21871_s13 = sld [smem:[%s23044_s0 + %s21600_s22]]   ;;  %s21604_s22 = smov 44  }
  0x44   :  { %23137 = sst [smem:[#allocation104_spill]] %s21836_s24 }
  0x45   :  { %s21856_s24 = sld [smem:[%s23044_s0 + %s21597_s28]]   ;;  %s21601_s28 = smov 41  }
  0x46   :  { %23138 = sst [smem:[#allocation105_spill]] %s21841_s14 }
  0x47   :  { %23139 = sst [smem:[#allocation106_spill]] %s21846_s29 }
  0x48   :  { %s21861_s14 = sld [smem:[%s23044_s0 + %s21598_s7]]   ;;  %s21602_s7 = smov 42  }
  0x49   :  { %s21866_s29 = sld [smem:[%s23044_s0 + %s21599_s15]]   ;;  %s21603_s15 = smov 43  }
  0x4a   :  { %23143 = sst [smem:[#allocation110_spill]] %s21871_s13 }
  0x4b   :  { %23140 = sst [smem:[#allocation107_spill]] %s21856_s24 }
  0x4c   :  { %s21876_s24 = sld [smem:[%s23044_s0 + %s21601_s28]]   ;;  %s21605_s28 = smov 45  }
  0x4d   :  { %s21891_s13 = sld [smem:[%s23044_s0 + %s21604_s22]]   ;;  %s21608_s22 = smov 48  }
  0x4e   :  { %23141 = sst [smem:[#allocation108_spill]] %s21861_s14 }
  0x4f   :  { %23142 = sst [smem:[#allocation109_spill]] %s21866_s29 }
  0x50   :  { %s21881_s14 = sld [smem:[%s23044_s0 + %s21602_s7]]   ;;  %s21606_s7 = smov 46  }
  0x51   :  { %s21886_s29 = sld [smem:[%s23044_s0 + %s21603_s15]]   ;;  %s21607_s15 = smov 47  }
  0x52   :  { %23144 = sst [smem:[#allocation111_spill]] %s21876_s24 }
  0x53   :  { %23147 = sst [smem:[#allocation114_spill]] %s21891_s13 }
  0x54   :  { %s21896_s24 = sld [smem:[%s23044_s0 + %s21605_s28]]   ;;  %s21609_s28 = smov 49  }
  0x55   :  { %s21911_s13 = sld [smem:[%s23044_s0 + %s21608_s22]]   ;;  %s21612_s22 = smov 52  }
  0x56   :  { %23145 = sst [smem:[#allocation112_spill]] %s21881_s14 }
  0x57   :  { %23146 = sst [smem:[#allocation113_spill]] %s21886_s29 }
  0x58   :  { %s21901_s14 = sld [smem:[%s23044_s0 + %s21606_s7]]   ;;  %s21610_s7 = smov 50  }
  0x59   :  { %s21906_s29 = sld [smem:[%s23044_s0 + %s21607_s15]]   ;;  %s21611_s15 = smov 51  }
  0x5a   :  { %23148 = sst [smem:[#allocation115_spill]] %s21896_s24 }
  0x5b   :  { %23151 = sst [smem:[#allocation118_spill]] %s21911_s13 }
  0x5c   :  { %s21916_s24 = sld [smem:[%s23044_s0 + %s21609_s28]]   ;;  %s21613_s28 = smov 53  }
  0x5d   :  { %s21931_s13 = sld [smem:[%s23044_s0 + %s21612_s22]]  }
  0x5e   :  { %23149 = sst [smem:[#allocation116_spill]] %s21901_s14 }
  0x5f   :  { %23150 = sst [smem:[#allocation117_spill]] %s21906_s29 }
  0x60   :  { %s21921_s14 = sld [smem:[%s23044_s0 + %s21610_s7]]   ;;  %s21614_s7 = smov 54  }
  0x61   :  { %s21926_s29 = sld [smem:[%s23044_s0 + %s21611_s15]]  }
  0x62   :  { %23152 = sst [smem:[#allocation119_spill]] %s21916_s24 }
  0x63   :  { %s21936_s24 = sld [smem:[%s23044_s0 + %s21613_s28]]  }
  0x66   :  { %23153 = sst [smem:[#allocation120_spill]] %s21921_s14 }
  0x67   :  { %s21941_s14 = sld [smem:[%s23044_s0 + %s21614_s7]]  }
  0x68   :  { %114 = vsyncpa [#allocation3], 0 }
  0x69   :  { %116 = vsyncpa [#allocation3 + $0x1], 0 }
  0x6a   :  { %117 = vsyncpa [#allocation6], 0 }
  0x6b   :  { %118 = vsyncpa [#allocation9], 0 }
  0x6c   :  { %119 = vsyncpa [#allocation12], 0 }
  0x6d   :  { %120 = vsyncpa [#allocation15], 0 }
  0x6e   :  { %121 = vsyncpa [#allocation18], 0 }
  0x6f   :  { %122 = vsyncpa [#allocation21], 0 }
  0x70   :  { %123 = vsyncpa [#allocation24], 0 }
  0x71   :  { %124 = vsyncpa [#allocation27], 0 }
  0x72   :  { %125 = vsyncpa [#allocation30], 0 }
  0x73   :  { %126 = vsyncpa [#allocation33], 0 }
  0x74   :  { %127 = vsyncpa [#allocation36], 0 }
  0x75   :  { %128 = vsyncpa [#allocation39], 0 }
  0x76   :  { %129 = vsyncpa [#allocation42], 0 }
  0x77   :  { %130 = vsyncpa [#allocation45], 0 }
  0x78   :  { %131 = vsyncpa [#allocation48], 0 }
  0x79   :  { %132 = vsyncpa [#allocation51], 0 }
  0x7a   :  { %133 = vsyncpa [#allocation54], 0 }
  0x7b   :  { %134 = vsyncpa [#allocation4], 0 }
  0x7c   :  { %136 = vsyncpa [#allocation4 + $0x1], 0  ;;  %s21943_s0 = smov 0   ;;  %s21945_s15 = smov 0  }
  0x7d   :  { %s21947_s16 = smov 0   ;;  %s21949_s18 = smov 0  }
  0x7e LB: > { %s23154_s19 = sld [smem:[#allocation84_spill]]  ;;  %s23155_s17 = sld [smem:[#allocation78_spill]]  ;;  %s21547_s0 = sphi %s21943_s0, %s23262_s0   ;;  %s21559_s18 = sphi %s21949_s18, %s23260_s18   ;;  %s21555_s16 = sphi %s21947_s16, %s23264_s16   ;;  %s21551_s15 = sphi %s21945_s15, %s23263_s15  }
  0x7f   : > { %s23156_s12 = sld [smem:[#allocation87_spill]]  ;;  %s23157_s8 = sld [smem:[#allocation99_spill]] }
  0x80   : > { %s23158_s6 = sld [smem:[#allocation95_spill]]  ;;  %s23159_s5 = sld [smem:[#allocation92_spill]] }
  0x81   : > { %s23160_s4 = sld [smem:[#allocation90_spill]]  ;;  %s23161_s3 = sld [smem:[#allocation81_spill]] }
  0x82   : > { %s23162_s9 = sld [smem:[#allocation76_spill]]  ;;  %23163 = sst [smem:[#allocation121_spill]] %s21547_s0 }
  0x83   : > { %s21964_s22 = sadd.s32 4294967295, %s21559_s18   ;;  %s15993_s23 = sadd.s32 4294967294, %s21559_s18  }
  0x84   : > { %s21968_s26 = sadd.s32 1, %s21559_s18   ;;  %s149_s28 = sadd.s32 1, %s21555_s16 }
  0x85   : > { %23164 = sst [smem:[#allocation122_spill]] %s21968_s26  ;;  %s146_s1 = ssub.s32 %s21559_s18, %s21968_s26 }
  0x86   : > { %p156_p0 = scmp.ne.s32.totalorder %s21555_s16, %s21551_s15  ;;  %p147_p1 = scmp.eq.s32.totalorder %s146_s1, 0 }
  0x87   : > { %p157_p2 = scmp.eq.s32.totalorder %s21559_s18, 0  ;;  %p162_p3 = scmp.ne.s32.totalorder %s21551_s15, %s21547_s0 }
  0x88   : > { %p23106_p4 = scmp.eq.s32.totalorder %s21964_s22, 0  ;;  %p1299_p7 = scmp.eq.s32.totalorder %s21964_s22, 1 }
  0x89   : > { %s21980_s2 = scalar_select %p147_p1, %s21555_s16, %s149_s28  }
  0x8a   : > { %p21982_p5 = por %p157_p2, %p156_p0  ;;  %p21988_p6 = por %p23106_p4, %p162_p3 }
  0x8b   : > { %23165 = sst [smem:[#allocation123_spill]] %s21980_s2  ;;  %p1305_p8 = scmp.eq.s32.totalorder %s15993_s23, 1 }
  0x8c   : > { %s23167_s10 = scalar_select %p21988_p6, 1, 0 }
  0x8d   : > { %p15994_p9 = scmp.ge.s32.totalorder %s21559_s18, 1  ;;  %p1312_p10 = scmp.lt.s32.totalorder %s21559_s18, 3 }
  0x8e   : > { %p21995_p11 = por %p1299_p7, %p156_p0  ;;  %p21999_p12 = por %p1305_p8, %p162_p3 }
  0x8f   : > { %p22003_p13 = pnand %p15994_p9, %p1312_p10 }
  0x90   : > { %s23168_s11 = scalar_select %p21995_p11, 1, 0 }
  0x91   : > { %s23170_s28 = scalar_select %p21999_p12, 1, 0 }
  0x92   : > { %23169 = sst [smem:[#allocation124_spill]] %s23168_s11  ;;  %1316 = sbr.rel (%p22003_p13) target bundleno = 953 (0x3b9), region = 12 }
  0x93   : > { %23171 = sst [smem:[#allocation125_spill]] %s23170_s28  ;;  %s21615_s2 = smov (!%p22003_p13), [#allocation5]  }
  0x94   : > { %s23172_s1 = scalar_select %p22003_p13, 1, 0 }
  0x95   : > { %s1325_s23 = sshll.u32 (!%p22003_p13), %s21615_s2, 4  ;;  %s21616_s26 = smov (!%p22003_p13), [#allocation8]   ;;  %s1326_s23 = int_to_ptr.vmem [resolvable:$true] %s1325_s23 }
  0x96   : > { %s1349_s0 = sshll.u32 (!%p22003_p13), %s21616_s26, 4  ;;  %s20537_s11 = scalar_lea.hbm (!%p22003_p13), %s23162_s9, 64  ;;  %s1350_s0 = int_to_ptr.vmem [resolvable:$true] %s1349_s0 }
  0x97   : > { %p20538_p0 = scmp.ne.s32.totalorder (!%p22003_p13), %s23162_s9, %s20537_s11  ;;  %p20543_p3 = scmp.lt.u32.totalorder (!%p22003_p13), %s20537_s11, %s23162_s9 }
  0x99   : > { %p20539_p1 = pnand %p20538_p0, %p23106_p4 }
  0x9b   : > { %p20540_p2 = pneg %p20539_p1 }
  0x9d   : > { %p20545_p7 = pnand %p20543_p3, %p20540_p2 }
  0x9f   : > { %20548 = shalt.err (!%p20545_p7)
}
  0xa0   : > { %s20549_s28 = scalar_lea.vmem %s1326_s23, 64  ;;  %p20556_p12 = scmp.lt.s32.totalorder %s1326_s23, %s1326_s23 }
  0xa1   : > { %p20550_p8 = scmp.ne.s32.totalorder %s1326_s23, %s20549_s28  ;;  %p20557_p11 = scmp.lt.s32.totalorder %s20549_s28, %s20549_s28 }
  0xa3   : > { %p20551_p9 = pnand %p20550_p8, %p23106_p4  ;;  %p20558_p6 = por %p20557_p11, %p20556_p12 }
  0xa5   : > { %p20552_p10 = pneg %p20551_p9 }
  0xa7   : > { %p20559_p13 = pnand %p20558_p6, %p20552_p10 }
  0xa9   : > { %20562 = shalt.err (!%p20559_p13)
}
  0xaa   : > { %17901 = dma.hbm_to_vmem [thread:$0]  (%p23106_p4), %s23162_s9, 64, %s1326_s23, [#allocation6]  }
  0xab   : > { %s20563_s26 = scalar_lea.hbm %s23155_s17, 64 }
  0xac   : > { %p20564_p0 = scmp.ne.s32.totalorder %s23155_s17, %s20563_s26  ;;  %p20569_p3 = scmp.lt.u32.totalorder %s20563_s26, %s23155_s17 }
  0xae   : > { %p20565_p1 = pnand %p20564_p0, %p23106_p4 }
  0xb0   : > { %p20566_p2 = pneg %p20565_p1 }
  0xb2   : > { %p20571_p7 = pnand %p20569_p3, %p20566_p2 }
  0xb4   : > { %20574 = shalt.err (!%p20571_p7)
}
  0xb5   : > { %s20575_s2 = scalar_lea.vmem %s1350_s0, 64  ;;  %p20582_p13 = scmp.lt.s32.totalorder %s1350_s0, %s1350_s0 }
  0xb6   : > { %p20576_p6 = scmp.ne.s32.totalorder %s1350_s0, %s20575_s2  ;;  %p20583_p8 = scmp.lt.s32.totalorder %s20575_s2, %s20575_s2 }
  0xb8   : > { %p20577_p11 = pnand %p20576_p6, %p23106_p4  ;;  %p20584_p9 = por %p20583_p8, %p20582_p13 }
  0xba   : > { %p20578_p12 = pneg %p20577_p11 }
  0xbc   : > { %p20585_p10 = pnand %p20584_p9, %p20578_p12 }
  0xbe   : > { %20588 = shalt.err (!%p20585_p10)
}
  0xbf   : > { %17905 = dma.hbm_to_vmem [thread:$0]  (%p23106_p4), %s23155_s17, 64, %s1350_s0, [#allocation9]  }
  0xc0   : > { %s21617_s11 = smov [#allocation11]   ;;  %s21618_s23 = smov [#allocation14]  }
  0xc1   : > { %s1373_s28 = sshll.u32 %s21617_s11, 4  ;;  %s1397_s26 = sshll.u32 %s21618_s23, 4  ;;  %s1374_s28 = int_to_ptr.vmem [resolvable:$true] %s1373_s28  ;;  %s1398_s26 = int_to_ptr.vmem [resolvable:$true] %s1397_s26 }
  0xc2   : > { %s20589_s9 = scalar_lea.hbm %s21696_s25, 64 }
  0xc3   : > { %p20590_p0 = scmp.ne.s32.totalorder %s21696_s25, %s20589_s9  ;;  %p20595_p3 = scmp.lt.u32.totalorder %s20589_s9, %s21696_s25 }
  0xc5   : > { %p20591_p1 = pnand %p20590_p0, %p23106_p4 }
  0xc7   : > { %p20592_p2 = pneg %p20591_p1 }
  0xc9   : > { %p20597_p7 = pnand %p20595_p3, %p20592_p2 }
  0xcb   : > { %20600 = shalt.err (!%p20597_p7)
}
  0xcc   : > { %s20601_s2 = scalar_lea.vmem %s1374_s28, 64  ;;  %p20608_p13 = scmp.lt.s32.totalorder %s1374_s28, %s1374_s28 }
  0xcd   : > { %p20602_p6 = scmp.ne.s32.totalorder %s1374_s28, %s20601_s2  ;;  %p20609_p8 = scmp.lt.s32.totalorder %s20601_s2, %s20601_s2 }
  0xcf   : > { %p20603_p11 = pnand %p20602_p6, %p23106_p4  ;;  %p20610_p9 = por %p20609_p8, %p20608_p13 }
  0xd1   : > { %p20604_p12 = pneg %p20603_p11 }
  0xd3   : > { %p20611_p10 = pnand %p20610_p9, %p20604_p12 }
  0xd5   : > { %20614 = shalt.err (!%p20611_p10)
}
  0xd6   : > { %17909 = dma.hbm_to_vmem [thread:$0]  (%p23106_p4), %s21696_s25, 64, %s1374_s28, [#allocation12]  }
  0xd7   : > { %s20615_s9 = scalar_lea.hbm %s23161_s3, 32 }
  0xd8   : > { %p20616_p0 = scmp.ne.s32.totalorder %s23161_s3, %s20615_s9  ;;  %p20621_p3 = scmp.lt.u32.totalorder %s20615_s9, %s23161_s3 }
  0xda   : > { %p20617_p1 = pnand %p20616_p0, %p23106_p4 }
  0xdc   : > { %p20618_p2 = pneg %p20617_p1 }
  0xde   : > { %p20623_p7 = pnand %p20621_p3, %p20618_p2 }
  0xe0   : > { %20626 = shalt.err (!%p20623_p7)
}
  0xe1   : > { %s20627_s0 = scalar_lea.vmem %s1398_s26, 32  ;;  %p20634_p13 = scmp.lt.s32.totalorder %s1398_s26, %s1398_s26 }
  0xe2   : > { %p20628_p6 = scmp.ne.s32.totalorder %s1398_s26, %s20627_s0  ;;  %p20635_p8 = scmp.lt.s32.totalorder %s20627_s0, %s20627_s0 }
  0xe4   : > { %p20629_p11 = pnand %p20628_p6, %p23106_p4  ;;  %p20636_p9 = por %p20635_p8, %p20634_p13 }
  0xe6   : > { %p20630_p12 = pneg %p20629_p11 }
  0xe8   : > { %p20637_p10 = pnand %p20636_p9, %p20630_p12 }
  0xea   : > { %20640 = shalt.err (!%p20637_p10)
}
  0xeb   : > { %17913 = dma.hbm_to_vmem [thread:$0]  (%p23106_p4), %s23161_s3, 32, %s1398_s26, [#allocation15]  }
  0xec   : > { %s21619_s11 = smov [#allocation17]   ;;  %s21620_s23 = smov [#allocation20]  }
  0xed   : > { %s1422_s28 = sshll.u32 %s21619_s11, 4  ;;  %s1446_s2 = sshll.u32 %s21620_s23, 4  ;;  %s1423_s28 = int_to_ptr.vmem [resolvable:$true] %s1422_s28  ;;  %s1447_s2 = int_to_ptr.vmem [resolvable:$true] %s1446_s2 }
  0xee   : > { %s20641_s9 = scalar_lea.hbm %s23154_s19, 32 }
  0xef   : > { %p20642_p0 = scmp.ne.s32.totalorder %s23154_s19, %s20641_s9  ;;  %p20647_p3 = scmp.lt.u32.totalorder %s20641_s9, %s23154_s19 }
  0xf1   : > { %p20643_p1 = pnand %p20642_p0, %p23106_p4 }
  0xf3   : > { %p20644_p2 = pneg %p20643_p1 }
  0xf5   : > { %p20649_p7 = pnand %p20647_p3, %p20644_p2 }
  0xf7   : > { %20652 = shalt.err (!%p20649_p7)
}
  0xf8   : > { %s20653_s0 = scalar_lea.vmem %s1423_s28, 32  ;;  %p20660_p13 = scmp.lt.s32.totalorder %s1423_s28, %s1423_s28 }
  0xf9   : > { %p20654_p6 = scmp.ne.s32.totalorder %s1423_s28, %s20653_s0  ;;  %p20661_p8 = scmp.lt.s32.totalorder %s20653_s0, %s20653_s0 }
  0xfb   : > { %p20655_p11 = pnand %p20654_p6, %p23106_p4  ;;  %p20662_p9 = por %p20661_p8, %p20660_p13 }
  0xfd   : > { %p20656_p12 = pneg %p20655_p11 }
  0xff   : > { %p20663_p10 = pnand %p20662_p9, %p20656_p12 }
 0x101   : > { %20666 = shalt.err (!%p20663_p10)
}
 0x102   : > { %17917 = dma.hbm_to_vmem [thread:$0]  (%p23106_p4), %s23154_s19, 32, %s1423_s28, [#allocation18]  }
 0x103   : > { %s20667_s26 = scalar_lea.hbm %s21731_s30, 32 }
 0x104   : > { %p20668_p0 = scmp.ne.s32.totalorder %s21731_s30, %s20667_s26  ;;  %p20673_p3 = scmp.lt.u32.totalorder %s20667_s26, %s21731_s30 }
 0x106   : > { %p20669_p1 = pnand %p20668_p0, %p23106_p4 }
 0x108   : > { %p20670_p2 = pneg %p20669_p1 }
 0x10a   : > { %p20675_p7 = pnand %p20673_p3, %p20670_p2 }
 0x10c   : > { %20678 = shalt.err (!%p20675_p7)
}
 0x10d   : > { %s20679_s11 = scalar_lea.vmem %s1447_s2, 32  ;;  %p20686_p13 = scmp.lt.s32.totalorder %s1447_s2, %s1447_s2 }
 0x10e   : > { %p20680_p6 = scmp.ne.s32.totalorder %s1447_s2, %s20679_s11  ;;  %p20687_p8 = scmp.lt.s32.totalorder %s20679_s11, %s20679_s11 }
 0x110   : > { %p20681_p11 = pnand %p20680_p6, %p23106_p4  ;;  %p20688_p9 = por %p20687_p8, %p20686_p13 }
 0x112   : > { %p20682_p12 = pneg %p20681_p11 }
 0x114   : > { %p20689_p10 = pnand %p20688_p9, %p20682_p12 }
 0x116   : > { %20692 = shalt.err (!%p20689_p10)
}
 0x117   : > { %17921 = dma.hbm_to_vmem [thread:$0]  (%p23106_p4), %s21731_s30, 32, %s1447_s2, [#allocation21]  }
 0x118   : > { %s21621_s28 = smov [#allocation23]   ;;  %s21622_s9 = smov [#allocation26]  }
 0x119   : > { %s1470_s23 = sshll.u32 %s21621_s28, 4  ;;  %s1495_s0 = sshll.u32 %s21622_s9, 4  ;;  %s1471_s23 = int_to_ptr.vmem [resolvable:$true] %s1470_s23  ;;  %s1496_s0 = int_to_ptr.vmem [resolvable:$true] %s1495_s0 }
 0x11a   : > { %s20693_s26 = scalar_lea.hbm %s23156_s12, 32 }
 0x11b   : > { %p20694_p0 = scmp.ne.s32.totalorder %s23156_s12, %s20693_s26  ;;  %p20699_p3 = scmp.lt.u32.totalorder %s20693_s26, %s23156_s12 }
 0x11d   : > { %p20695_p1 = pnand %p20694_p0, %p23106_p4 }
 0x11f   : > { %p20696_p2 = pneg %p20695_p1 }
 0x121   : > { %p20701_p7 = pnand %p20699_p3, %p20696_p2 }
 0x123   : > { %20704 = shalt.err (!%p20701_p7)
}
 0x124   : > { %s20705_s11 = scalar_lea.vmem %s1471_s23, 32  ;;  %p20712_p13 = scmp.lt.s32.totalorder %s1471_s23, %s1471_s23 }
 0x125   : > { %p20706_p6 = scmp.ne.s32.totalorder %s1471_s23, %s20705_s11  ;;  %p20713_p8 = scmp.lt.s32.totalorder %s20705_s11, %s20705_s11 }
 0x127   : > { %p20707_p11 = pnand %p20706_p6, %p23106_p4  ;;  %p20714_p9 = por %p20713_p8, %p20712_p13 }
 0x129   : > { %p20708_p12 = pneg %p20707_p11 }
 0x12b   : > { %p20715_p10 = pnand %p20714_p9, %p20708_p12 }
 0x12d   : > { %20718 = shalt.err (!%p20715_p10)
}
 0x12e   : > { %17925 = dma.hbm_to_vmem [thread:$0]  (%p23106_p4), %s23156_s12, 32, %s1471_s23, [#allocation24]  }
 0x12f   : > { %s20719_s2 = scalar_lea.hbm %s23160_s4, 16 }
 0x130   : > { %p20720_p0 = scmp.ne.s32.totalorder %s23160_s4, %s20719_s2  ;;  %p20725_p3 = scmp.lt.u32.totalorder %s20719_s2, %s23160_s4 }
 0x132   : > { %p20721_p1 = pnand %p20720_p0, %p23106_p4 }
 0x134   : > { %p20722_p2 = pneg %p20721_p1 }
 0x136   : > { %p20727_p7 = pnand %p20725_p3, %p20722_p2 }
 0x138   : > { %20730 = shalt.err (!%p20727_p7)
}
 0x139   : > { %s20731_s28 = scalar_lea.vmem %s1496_s0, 16  ;;  %s20737_s9 = scalar_lea.vmem %s1496_s0, 32 }
 0x13a   : > { %p20732_p6 = scmp.ne.s32.totalorder %s1496_s0, %s20731_s28  ;;  %p20738_p13 = scmp.lt.s32.totalorder %s1496_s0, %s1496_s0 }
 0x13b   : > { %p20739_p8 = scmp.lt.s32.totalorder %s20737_s9, %s20731_s28 }
 0x13c   : > { %p20733_p11 = pnand %p20732_p6, %p23106_p4 }
 0x13d   : > { %p20740_p9 = por %p20739_p8, %p20738_p13 }
 0x13e   : > { %p20734_p12 = pneg %p20733_p11 }
 0x140   : > { %p20741_p10 = pnand %p20740_p9, %p20734_p12 }
 0x142   : > { %20744 = shalt.err (!%p20741_p10)
}
 0x143   : > { %17929 = dma.hbm_to_vmem [thread:$0]  (%p23106_p4), %s23160_s4, 16, %s1496_s0, [#allocation27]  }
 0x144   : > { %s21623_s23 = smov [#allocation29]   ;;  %s21624_s11 = smov [#allocation32]  }
 0x145   : > { %s1519_s26 = sshll.u32 %s21623_s23, 4  ;;  %s1543_s2 = sshll.u32 %s21624_s11, 4  ;;  %s1520_s26 = int_to_ptr.vmem [resolvable:$true] %s1519_s26  ;;  %s1544_s2 = int_to_ptr.vmem [resolvable:$true] %s1543_s2 }
 0x146   : > { %s20745_s3 = scalar_lea.hbm %s23159_s5, 16 }
 0x147   : > { %p20746_p0 = scmp.ne.s32.totalorder %s23159_s5, %s20745_s3  ;;  %p20751_p3 = scmp.lt.u32.totalorder %s20745_s3, %s23159_s5 }
 0x149   : > { %p20747_p1 = pnand %p20746_p0, %p23106_p4 }
 0x14b   : > { %p20748_p2 = pneg %p20747_p1 }
 0x14d   : > { %p20753_p7 = pnand %p20751_p3, %p20748_p2 }
 0x14f   : > { %20756 = shalt.err (!%p20753_p7)
}
 0x150   : > { %s20757_s28 = scalar_lea.vmem %s1520_s26, 16  ;;  %s20763_s0 = scalar_lea.vmem %s1520_s26, 32 }
 0x151   : > { %p20758_p6 = scmp.ne.s32.totalorder %s1520_s26, %s20757_s28  ;;  %p20764_p13 = scmp.lt.s32.totalorder %s1520_s26, %s1520_s26 }
 0x152   : > { %p20765_p8 = scmp.lt.s32.totalorder %s20763_s0, %s20757_s28 }
 0x153   : > { %p20759_p11 = pnand %p20758_p6, %p23106_p4 }
 0x154   : > { %p20766_p9 = por %p20765_p8, %p20764_p13 }
 0x155   : > { %p20760_p12 = pneg %p20759_p11 }
 0x157   : > { %p20767_p10 = pnand %p20766_p9, %p20760_p12 }
 0x159   : > { %20770 = shalt.err (!%p20767_p10)
}
 0x15a   : > { %17933 = dma.hbm_to_vmem [thread:$0]  (%p23106_p4), %s23159_s5, 16, %s1520_s26, [#allocation30]  }
 0x15b   : > { %s20771_s3 = scalar_lea.hbm %s21776_s20, 16 }
 0x15c   : > { %p20772_p0 = scmp.ne.s32.totalorder %s21776_s20, %s20771_s3  ;;  %p20777_p3 = scmp.lt.u32.totalorder %s20771_s3, %s21776_s20 }
 0x15e   : > { %p20773_p1 = pnand %p20772_p0, %p23106_p4 }
 0x160   : > { %p20774_p2 = pneg %p20773_p1 }
 0x162   : > { %p20779_p7 = pnand %p20777_p3, %p20774_p2 }
 0x164   : > { %20782 = shalt.err (!%p20779_p7)
}
 0x165   : > { %s20783_s9 = scalar_lea.vmem %s1544_s2, 16  ;;  %s20789_s23 = scalar_lea.vmem %s1544_s2, 32 }
 0x166   : > { %p20784_p6 = scmp.ne.s32.totalorder %s1544_s2, %s20783_s9  ;;  %p20790_p13 = scmp.lt.s32.totalorder %s1544_s2, %s1544_s2 }
 0x167   : > { %p20791_p8 = scmp.lt.s32.totalorder %s20789_s23, %s20783_s9 }
 0x168   : > { %p20785_p11 = pnand %p20784_p6, %p23106_p4 }
 0x169   : > { %p20792_p9 = por %p20791_p8, %p20790_p13 }
 0x16a   : > { %p20786_p12 = pneg %p20785_p11 }
 0x16c   : > { %p20793_p10 = pnand %p20792_p9, %p20786_p12 }
 0x16e   : > { %20796 = shalt.err (!%p20793_p10)
}
 0x16f   : > { %17937 = dma.hbm_to_vmem [thread:$0]  (%p23106_p4), %s21776_s20, 16, %s1544_s2, [#allocation33]  }
 0x170   : > { %s21625_s26 = smov [#allocation35]   ;;  %s20797_s28 = scalar_lea.hbm %s23158_s6, 32 }
 0x171   : > { %s1567_s11 = sshll.u32 %s21625_s26, 4  ;;  %p20798_p0 = scmp.ne.s32.totalorder %s23158_s6, %s20797_s28  ;;  %s1568_s11 = int_to_ptr.vmem [resolvable:$true] %s1567_s11 }
 0x172   : > { %p20803_p3 = scmp.lt.u32.totalorder %s20797_s28, %s23158_s6 }
 0x173   : > { %p20799_p1 = pnand %p20798_p0, %p23106_p4 }
 0x175   : > { %p20800_p2 = pneg %p20799_p1 }
 0x177   : > { %p20805_p7 = pnand %p20803_p3, %p20800_p2 }
 0x179   : > { %20808 = shalt.err (!%p20805_p7)
}
 0x17a   : > { %s20809_s0 = scalar_lea.vmem %s1568_s11, 32  ;;  %p20816_p13 = scmp.lt.s32.totalorder %s1568_s11, %s1568_s11 }
 0x17b   : > { %p20810_p6 = scmp.ne.s32.totalorder %s1568_s11, %s20809_s0  ;;  %p20817_p8 = scmp.lt.s32.totalorder %s20809_s0, %s20809_s0 }
 0x17d   : > { %p20811_p11 = pnand %p20810_p6, %p23106_p4  ;;  %p20818_p9 = por %p20817_p8, %p20816_p13 }
 0x17f   : > { %p20812_p12 = pneg %p20811_p11 }
 0x181   : > { %p20819_p10 = pnand %p20818_p9, %p20812_p12 }
 0x183   : > { %20822 = shalt.err (!%p20819_p10)
}
 0x184   : > { %17941 = dma.hbm_to_vmem [thread:$0]  (%p23106_p4), %s23158_s6, 32, %s1568_s11, [#allocation36]  }
 0x185   : > { %s21626_s2 = smov [#allocation38]   ;;  %s21627_s9 = smov [#allocation41]  }
 0x186   : > { %s1596_s3 = sshll.u32 %s21626_s2, 4  ;;  %s1631_s23 = sshll.u32 %s21627_s9, 4  ;;  %s1597_s3 = int_to_ptr.vmem [resolvable:$true] %s1596_s3  ;;  %s22119_s23 = int_to_ptr.vmem [resolvable:$true] %s1631_s23 }
 0x187   : > { %s20823_s26 = scalar_lea.hbm %s23157_s8, 8192 }
 0x188   : > { %p20824_p0 = scmp.ne.s32.totalorder %s23157_s8, %s20823_s26  ;;  %p20829_p3 = scmp.lt.u32.totalorder %s20823_s26, %s23157_s8 }
 0x18a   : > { %p20825_p1 = pnand %p20824_p0, %p23106_p4 }
 0x18c   : > { %p20826_p2 = pneg %p20825_p1 }
 0x18e   : > { %p20831_p7 = pnand %p20829_p3, %p20826_p2 }
 0x190   : > { %20834 = shalt.err (!%p20831_p7)
}
 0x191   : > { %s20835_s28 = scalar_lea.vmem %s1597_s3, 8192  ;;  %p20842_p13 = scmp.lt.s32.totalorder %s1597_s3, %s1597_s3 }
 0x192   : > { %p20836_p6 = scmp.ne.s32.totalorder %s1597_s3, %s20835_s28  ;;  %p20843_p8 = scmp.lt.s32.totalorder %s20835_s28, %s20835_s28 }
 0x194   : > { %p20837_p11 = pnand %p20836_p6, %p23106_p4  ;;  %p20844_p9 = por %p20843_p8, %p20842_p13 }
 0x196   : > { %p20838_p12 = pneg %p20837_p11 }
 0x198   : > { %p20845_p10 = pnand %p20844_p9, %p20838_p12 }
 0x19a   : > { %20848 = shalt.err (!%p20845_p10)
}
 0x19b   : > { %s23081_s11 = smov 256   ;;  %s23083_s0 = smov 16  }
 0x19c   : > { %17945 = dma.hbm_to_vmem [thread:$0]  (%p23106_p4), %s23157_s8, 8192, %s1597_s3, [#allocation39], %s23081_s11, %s23081_s11, %s23083_s0  }
 0x19d   : > { %s20849_s2 = scalar_lea.hbm %s21831_s27, 16384 }
 0x19e   : > { %p20850_p0 = scmp.ne.s32.totalorder %s21831_s27, %s20849_s2  ;;  %p20855_p3 = scmp.lt.u32.totalorder %s20849_s2, %s21831_s27 }
 0x1a0   : > { %p20851_p1 = pnand %p20850_p0, %p23106_p4 }
 0x1a2   : > { %p20852_p2 = pneg %p20851_p1 }
 0x1a4   : > { %p20857_p7 = pnand %p20855_p3, %p20852_p2 }
 0x1a6   : > { %20860 = shalt.err (!%p20857_p7)
}
 0x1a7   : > { %s20861_s9 = scalar_lea.vmem %s22119_s23, 16384  ;;  %p20868_p13 = scmp.lt.s32.totalorder %s22119_s23, %s22119_s23 }
 0x1a8   : > { %p20862_p6 = scmp.ne.s32.totalorder %s22119_s23, %s20861_s9  ;;  %p20869_p8 = scmp.lt.s32.totalorder %s20861_s9, %s20861_s9 }
 0x1aa   : > { %p20863_p11 = pnand %p20862_p6, %p23106_p4  ;;  %p20870_p9 = por %p20869_p8, %p20868_p13 }
 0x1ac   : > { %p20864_p12 = pneg %p20863_p11 }
 0x1ae   : > { %p20871_p10 = pnand %p20870_p9, %p20864_p12 }
 0x1b0   : > { %20874 = shalt.err (!%p20871_p10)
}
 0x1b1   : > { %17949 = dma.hbm_to_vmem [thread:$0]  (%p23106_p4), %s21831_s27, 16384, %s22119_s23, [#allocation42], %s23081_s11, %s23081_s11, %s23083_s0  }
 0x1b2   : > { %s21630_s3 = smov [#allocation44]   ;;  %s21631_s28 = smov [#allocation47]  }
 0x1b3   : > { %s1663_s26 = sshll.u32 %s21630_s3, 4  ;;  %s1698_s2 = sshll.u32 %s21631_s28, 4  ;;  %s1664_s26 = int_to_ptr.vmem [resolvable:$true] %s1663_s26  ;;  %s22152_s2 = int_to_ptr.vmem [resolvable:$true] %s1698_s2 }
 0x1b4   : > { %s20875_s9 = scalar_lea.hbm %s21851_s21, 16384 }
 0x1b5   : > { %p20876_p0 = scmp.ne.s32.totalorder %s21851_s21, %s20875_s9  ;;  %p20881_p3 = scmp.lt.u32.totalorder %s20875_s9, %s21851_s21 }
 0x1b7   : > { %p20877_p1 = pnand %p20876_p0, %p23106_p4 }
 0x1b9   : > { %p20878_p2 = pneg %p20877_p1 }
 0x1bb   : > { %p20883_p7 = pnand %p20881_p3, %p20878_p2 }
 0x1bd   : > { %20886 = shalt.err (!%p20883_p7)
}
 0x1be   : > { %s20887_s4 = scalar_lea.vmem %s1664_s26, 16384  ;;  %p20894_p13 = scmp.lt.s32.totalorder %s1664_s26, %s1664_s26 }
 0x1bf   : > { %p20888_p6 = scmp.ne.s32.totalorder %s1664_s26, %s20887_s4  ;;  %p20895_p8 = scmp.lt.s32.totalorder %s20887_s4, %s20887_s4 }
 0x1c1   : > { %p20889_p11 = pnand %p20888_p6, %p23106_p4  ;;  %p20896_p9 = por %p20895_p8, %p20894_p13 }
 0x1c3   : > { %p20890_p12 = pneg %p20889_p11 }
 0x1c5   : > { %p20897_p10 = pnand %p20896_p9, %p20890_p12 }
 0x1c7   : > { %20900 = shalt.err (!%p20897_p10)
}
 0x1c8   : > { %s23173_s23 = sld [smem:[#allocation111_spill]] }
 0x1c9   : > { %17953 = dma.hbm_to_vmem [thread:$0]  (%p23106_p4), %s21851_s21, 16384, %s1664_s26, [#allocation45], %s23081_s11, %s23081_s11, %s23083_s0  }
 0x1ce   : > { %s20901_s3 = scalar_lea.hbm %s23173_s23, 16384 }
 0x1cf   : > { %p20902_p0 = scmp.ne.s32.totalorder %s23173_s23, %s20901_s3  ;;  %p20907_p3 = scmp.lt.u32.totalorder %s20901_s3, %s23173_s23 }
 0x1d1   : > { %p20903_p1 = pnand %p20902_p0, %p23106_p4 }
 0x1d3   : > { %p20904_p2 = pneg %p20903_p1 }
 0x1d5   : > { %p20909_p7 = pnand %p20907_p3, %p20904_p2 }
 0x1d7   : > { %20912 = shalt.err (!%p20909_p7)
}
 0x1d8   : > { %s20913_s4 = scalar_lea.vmem %s22152_s2, 16384  ;;  %p20920_p13 = scmp.lt.s32.totalorder %s22152_s2, %s22152_s2 }
 0x1d9   : > { %p20914_p6 = scmp.ne.s32.totalorder %s22152_s2, %s20913_s4  ;;  %p20921_p8 = scmp.lt.s32.totalorder %s20913_s4, %s20913_s4 }
 0x1db   : > { %p20915_p11 = pnand %p20914_p6, %p23106_p4  ;;  %p20922_p9 = por %p20921_p8, %p20920_p13 }
 0x1dd   : > { %p20916_p12 = pneg %p20915_p11 }
 0x1df   : > { %p20923_p10 = pnand %p20922_p9, %p20916_p12 }
 0x1e1   : > { %20926 = shalt.err (!%p20923_p10)
}
 0x1e2   : > { %s23174_s26 = sld [smem:[#allocation116_spill]]  ;;  %s21632_s28 = smov [#allocation50]  }
 0x1e3   : > { %17957 = dma.hbm_to_vmem [thread:$0]  (%p23106_p4), %s23173_s23, 16384, %s22152_s2, [#allocation48], %s23081_s11, %s23081_s11, %s23083_s0  }
 0x1e4   : > { %s1733_s9 = sshll.u32 %s21632_s28, 4  ;;  %s21633_s3 = smov [#allocation7]   ;;  %s1734_s9 = int_to_ptr.vmem [resolvable:$true] %s1733_s9 }
 0x1e5   : > { %s1335_s5 = sshll.u32 %s21633_s3, 4  ;;  %s22185_s5 = int_to_ptr.vmem [resolvable:$true] %s1335_s5 }
 0x1e8   : > { %s20927_s4 = scalar_lea.hbm %s23174_s26, 16384 }
 0x1e9   : > { %p20928_p0 = scmp.ne.s32.totalorder %s23174_s26, %s20927_s4  ;;  %p20933_p3 = scmp.lt.u32.totalorder %s20927_s4, %s23174_s26 }
 0x1eb   : > { %p20929_p1 = pnand %p20928_p0, %p23106_p4 }
 0x1ed   : > { %p20930_p2 = pneg %p20929_p1 }
 0x1ef   : > { %p20935_p7 = pnand %p20933_p3, %p20930_p2 }
 0x1f1   : > { %20938 = shalt.err (!%p20935_p7)
}
 0x1f2   : > { %s20939_s6 = scalar_lea.vmem %s1734_s9, 16384  ;;  %p20946_p13 = scmp.lt.s32.totalorder %s1734_s9, %s1734_s9 }
 0x1f3   : > { %p20940_p6 = scmp.ne.s32.totalorder %s1734_s9, %s20939_s6  ;;  %p20947_p8 = scmp.lt.s32.totalorder %s20939_s6, %s20939_s6 }
 0x1f5   : > { %p20941_p11 = pnand %p20940_p6, %p23106_p4  ;;  %p20948_p9 = por %p20947_p8, %p20946_p13 }
 0x1f7   : > { %p20942_p12 = pneg %p20941_p11 }
 0x1f9   : > { %p20949_p10 = pnand %p20948_p9, %p20942_p12 }
 0x1fb   : > { %20952 = shalt.err (!%p20949_p10)
}
 0x1fc   : > { %s23175_s2 = sld [smem:[#allocation77_spill]] }
 0x1fd   : > { %17961 = dma.hbm_to_vmem [thread:$0]  (%p23106_p4), %s23174_s26, 16384, %s1734_s9, [#allocation51], %s23081_s11, %s23081_s11, %s23083_s0  }
 0x202   : > { %s20953_s28 = scalar_lea.hbm %s23175_s2, 256 }
 0x203   : > { %p20954_p0 = scmp.ne.s32.totalorder %s23175_s2, %s20953_s28  ;;  %p20959_p3 = scmp.lt.u32.totalorder %s20953_s28, %s23175_s2 }
 0x205   : > { %p20955_p1 = pnand %p20954_p0, %p23106_p4 }
 0x207   : > { %p20956_p2 = pneg %p20955_p1 }
 0x209   : > { %p20961_p7 = pnand %p20959_p3, %p20956_p2 }
 0x20b   : > { %20964 = shalt.err (!%p20961_p7)
}
 0x20c   : > { %s20965_s6 = scalar_lea.vmem %s22185_s5, 256  ;;  %p20972_p13 = scmp.lt.s32.totalorder %s22185_s5, %s22185_s5 }
 0x20d   : > { %p20966_p6 = scmp.ne.s32.totalorder %s22185_s5, %s20965_s6  ;;  %p20973_p8 = scmp.lt.s32.totalorder %s20965_s6, %s20965_s6 }
 0x20f   : > { %p20967_p11 = pnand %p20966_p6, %p23106_p4  ;;  %p20974_p9 = por %p20973_p8, %p20972_p13 }
 0x211   : > { %p20968_p12 = pneg %p20967_p11 }
 0x213   : > { %p20975_p10 = pnand %p20974_p9, %p20968_p12 }
 0x215   : > { %20978 = shalt.err (!%p20975_p10)
}
 0x216   : > { %s23091_s9 = smov 128   ;;  %s23176_s3 = sld [smem:[#allocation79_spill]] }
 0x217   : > { %s23092_s4 = smov 8   ;;  %s21636_s28 = smov [#allocation10]  }
 0x218   : > { %17903 = dma.hbm_to_vmem [thread:$0]  (%p23106_p4), %s23175_s2, 256, %s22185_s5, [#allocation6], %s23091_s9, %s23091_s9, %s23092_s4  }
 0x219   : > { %s1359_s11 = sshll.u32 %s21636_s28, 4  ;;  %s21637_s6 = smov [#allocation13]   ;;  %s1360_s11 = int_to_ptr.vmem [resolvable:$true] %s1359_s11 }
 0x21a   : > { %s1383_s0 = sshll.u32 %s21637_s6, 4  ;;  %s22218_s0 = int_to_ptr.vmem [resolvable:$true] %s1383_s0 }
 0x21c   : > { %s20979_s8 = scalar_lea.hbm %s23176_s3, 256 }
 0x21d   : > { %p20980_p0 = scmp.ne.s32.totalorder %s23176_s3, %s20979_s8  ;;  %p20985_p3 = scmp.lt.u32.totalorder %s20979_s8, %s23176_s3 }
 0x21f   : > { %p20981_p1 = pnand %p20980_p0, %p23106_p4 }
 0x221   : > { %p20982_p2 = pneg %p20981_p1 }
 0x223   : > { %p20987_p7 = pnand %p20985_p3, %p20982_p2 }
 0x225   : > { %20990 = shalt.err (!%p20987_p7)
}
 0x226   : > { %s20991_s12 = scalar_lea.vmem %s1360_s11, 256  ;;  %p20998_p13 = scmp.lt.s32.totalorder %s1360_s11, %s1360_s11 }
 0x227   : > { %p20992_p6 = scmp.ne.s32.totalorder %s1360_s11, %s20991_s12  ;;  %p20999_p8 = scmp.lt.s32.totalorder %s20991_s12, %s20991_s12 }
 0x229   : > { %p20993_p11 = pnand %p20992_p6, %p23106_p4  ;;  %p21000_p9 = por %p20999_p8, %p20998_p13 }
 0x22b   : > { %p20994_p12 = pneg %p20993_p11 }
 0x22d   : > { %p21001_p10 = pnand %p21000_p9, %p20994_p12 }
 0x22f   : > { %21004 = shalt.err (!%p21001_p10)
}
 0x230   : > { %s23177_s5 = sld [smem:[#allocation80_spill]] }
 0x231   : > { %17907 = dma.hbm_to_vmem [thread:$0]  (%p23106_p4), %s23176_s3, 256, %s1360_s11, [#allocation9], %s23091_s9, %s23091_s9, %s23092_s4  }
 0x236   : > { %s21005_s8 = scalar_lea.hbm %s23177_s5, 256 }
 0x237   : > { %p21006_p0 = scmp.ne.s32.totalorder %s23177_s5, %s21005_s8  ;;  %p21011_p3 = scmp.lt.u32.totalorder %s21005_s8, %s23177_s5 }
 0x239   : > { %p21007_p1 = pnand %p21006_p0, %p23106_p4 }
 0x23b   : > { %p21008_p2 = pneg %p21007_p1 }
 0x23d   : > { %p21013_p7 = pnand %p21011_p3, %p21008_p2 }
 0x23f   : > { %21016 = shalt.err (!%p21013_p7)
}
 0x240   : > { %s21017_s12 = scalar_lea.vmem %s22218_s0, 256  ;;  %p21024_p13 = scmp.lt.s32.totalorder %s22218_s0, %s22218_s0 }
 0x241   : > { %p21018_p6 = scmp.ne.s32.totalorder %s22218_s0, %s21017_s12  ;;  %p21025_p8 = scmp.lt.s32.totalorder %s21017_s12, %s21017_s12 }
 0x243   : > { %p21019_p11 = pnand %p21018_p6, %p23106_p4  ;;  %p21026_p9 = por %p21025_p8, %p21024_p13 }
 0x245   : > { %p21020_p12 = pneg %p21019_p11 }
 0x247   : > { %p21027_p10 = pnand %p21026_p9, %p21020_p12 }
 0x249   : > { %21030 = shalt.err (!%p21027_p10)
}
 0x24a   : > { %s23178_s11 = sld [smem:[#allocation82_spill]]  ;;  %s21638_s28 = smov [#allocation16]  }
 0x24b   : > { %17911 = dma.hbm_to_vmem [thread:$0]  (%p23106_p4), %s23177_s5, 256, %s22218_s0, [#allocation12], %s23091_s9, %s23091_s9, %s23092_s4  }
 0x24c   : > { %s1408_s6 = sshll.u32 %s21638_s28, 4  ;;  %s21639_s8 = smov [#allocation19]   ;;  %s1409_s6 = int_to_ptr.vmem [resolvable:$true] %s1408_s6 }
 0x24d   : > { %s1432_s2 = sshll.u32 %s21639_s8, 4  ;;  %s22251_s2 = int_to_ptr.vmem [resolvable:$true] %s1432_s2 }
 0x250   : > { %s21031_s12 = scalar_lea.hbm %s23178_s11, 32 }
 0x251   : > { %p21032_p0 = scmp.ne.s32.totalorder %s23178_s11, %s21031_s12  ;;  %p21037_p3 = scmp.lt.u32.totalorder %s21031_s12, %s23178_s11 }
 0x253   : > { %p21033_p1 = pnand %p21032_p0, %p23106_p4 }
 0x255   : > { %p21034_p2 = pneg %p21033_p1 }
 0x257   : > { %p21039_p7 = pnand %p21037_p3, %p21034_p2 }
 0x259   : > { %21042 = shalt.err (!%p21039_p7)
}
 0x25a   : > { %s21043_s3 = scalar_lea.vmem %s1409_s6, 32  ;;  %p21050_p13 = scmp.lt.s32.totalorder %s1409_s6, %s1409_s6 }
 0x25b   : > { %p21044_p6 = scmp.ne.s32.totalorder %s1409_s6, %s21043_s3  ;;  %p21051_p8 = scmp.lt.s32.totalorder %s21043_s3, %s21043_s3 }
 0x25d   : > { %p21045_p11 = pnand %p21044_p6, %p23106_p4  ;;  %p21052_p9 = por %p21051_p8, %p21050_p13 }
 0x25f   : > { %p21046_p12 = pneg %p21045_p11 }
 0x261   : > { %p21053_p10 = pnand %p21052_p9, %p21046_p12 }
 0x263   : > { %21056 = shalt.err (!%p21053_p10)
}
 0x264   : > { %s23179_s0 = sld [smem:[#allocation85_spill]] }
 0x265   : > { %17915 = dma.hbm_to_vmem [thread:$0]  (%p23106_p4), %s23178_s11, 32, %s1409_s6, [#allocation15]  }
 0x26a   : > { %s23180_s28 = smov %s23179_s0  ;;  %s21057_s8 = scalar_lea.hbm %s23179_s0, 4096 }
 0x26b   : > { %p21058_p0 = scmp.ne.s32.totalorder %s23180_s28, %s21057_s8  ;;  %p21063_p3 = scmp.lt.u32.totalorder %s21057_s8, %s23180_s28 }
 0x26d   : > { %p21059_p1 = pnand %p21058_p0, %p23106_p4 }
 0x26f   : > { %p21060_p2 = pneg %p21059_p1 }
 0x271   : > { %p21065_p7 = pnand %p21063_p3, %p21060_p2 }
 0x273   : > { %21068 = shalt.err (!%p21065_p7)
}
 0x274   : > { %s21069_s3 = scalar_lea.vmem %s22251_s2, 4096  ;;  %p21076_p13 = scmp.lt.s32.totalorder %s22251_s2, %s22251_s2 }
 0x275   : > { %p21070_p6 = scmp.ne.s32.totalorder %s22251_s2, %s21069_s3  ;;  %p21077_p8 = scmp.lt.s32.totalorder %s21069_s3, %s21069_s3 }
 0x277   : > { %p21071_p11 = pnand %p21070_p6, %p23106_p4  ;;  %p21078_p9 = por %p21077_p8, %p21076_p13 }
 0x279   : > { %p21072_p12 = pneg %p21071_p11 }
 0x27b   : > { %p21079_p10 = pnand %p21078_p9, %p21072_p12 }
 0x27d   : > { %21082 = shalt.err (!%p21079_p10)
}
 0x27e   : > { %s23181_s6 = sld [smem:[#allocation86_spill]]  ;;  %s21640_s12 = smov [#allocation22]  }
 0x27f   : > { %17919 = dma.hbm_to_vmem [thread:$0]  (%p23106_p4), %s23180_s28, 4096, %s22251_s2, [#allocation18], %s23091_s9, %s23091_s9, %s23092_s4  }
 0x280   : > { %s1456_s0 = sshll.u32 %s21640_s12, 4  ;;  %s21641_s8 = smov [#allocation25]   ;;  %s1457_s0 = int_to_ptr.vmem [resolvable:$true] %s1456_s0 }
 0x281   : > { %s1481_s5 = sshll.u32 %s21641_s8, 4  ;;  %s22281_s5 = int_to_ptr.vmem [resolvable:$true] %s1481_s5 }
 0x284   : > { %s21083_s3 = scalar_lea.hbm %s23181_s6, 4096 }
 0x285   : > { %p21084_p0 = scmp.ne.s32.totalorder %s23181_s6, %s21083_s3  ;;  %p21089_p3 = scmp.lt.u32.totalorder %s21083_s3, %s23181_s6 }
 0x287   : > { %p21085_p1 = pnand %p21084_p0, %p23106_p4 }
 0x289   : > { %p21086_p2 = pneg %p21085_p1 }
 0x28b   : > { %p21091_p7 = pnand %p21089_p3, %p21086_p2 }
 0x28d   : > { %21094 = shalt.err (!%p21091_p7)
}
 0x28e   : > { %s21095_s11 = scalar_lea.vmem %s1457_s0, 4096  ;;  %p21102_p13 = scmp.lt.s32.totalorder %s1457_s0, %s1457_s0 }
 0x28f   : > { %p21096_p6 = scmp.ne.s32.totalorder %s1457_s0, %s21095_s11  ;;  %p21103_p8 = scmp.lt.s32.totalorder %s21095_s11, %s21095_s11 }
 0x291   : > { %p21097_p11 = pnand %p21096_p6, %p23106_p4  ;;  %p21104_p9 = por %p21103_p8, %p21102_p13 }
 0x293   : > { %p21098_p12 = pneg %p21097_p11 }
 0x295   : > { %p21105_p10 = pnand %p21104_p9, %p21098_p12 }
 0x297   : > { %21108 = shalt.err (!%p21105_p10)
}
 0x298   : > { %s23182_s2 = sld [smem:[#allocation88_spill]] }
 0x299   : > { %17923 = dma.hbm_to_vmem [thread:$0]  (%p23106_p4), %s23181_s6, 4096, %s1457_s0, [#allocation21], %s23091_s9, %s23091_s9, %s23092_s4  }
 0x29e   : > { %s21109_s12 = scalar_lea.hbm %s23182_s2, 16 }
 0x29f   : > { %p21110_p0 = scmp.ne.s32.totalorder %s23182_s2, %s21109_s12  ;;  %p21115_p3 = scmp.lt.u32.totalorder %s21109_s12, %s23182_s2 }
 0x2a1   : > { %p21111_p1 = pnand %p21110_p0, %p23106_p4 }
 0x2a3   : > { %p21112_p2 = pneg %p21111_p1 }
 0x2a5   : > { %p21117_p7 = pnand %p21115_p3, %p21112_p2 }
 0x2a7   : > { %21120 = shalt.err (!%p21117_p7)
}
 0x2a8   : > { %s21121_s11 = scalar_lea.vmem %s22281_s5, 16  ;;  %s21127_s8 = scalar_lea.vmem %s22281_s5, 32 }
 0x2a9   : > { %p21122_p6 = scmp.ne.s32.totalorder %s22281_s5, %s21121_s11  ;;  %p21128_p13 = scmp.lt.s32.totalorder %s22281_s5, %s22281_s5 }
 0x2aa   : > { %p21129_p8 = scmp.lt.s32.totalorder %s21127_s8, %s21121_s11 }
 0x2ab   : > { %p21123_p11 = pnand %p21122_p6, %p23106_p4 }
 0x2ac   : > { %p21130_p9 = por %p21129_p8, %p21128_p13 }
 0x2ad   : > { %p21124_p12 = pneg %p21123_p11 }
 0x2af   : > { %p21131_p10 = pnand %p21130_p9, %p21124_p12 }
 0x2b1   : > { %21134 = shalt.err (!%p21131_p10)
}
 0x2b2   : > { %s23183_s0 = sld [smem:[#allocation91_spill]]  ;;  %s21642_s12 = smov [#allocation28]  }
 0x2b3   : > { %17927 = dma.hbm_to_vmem [thread:$0]  (%p23106_p4), %s23182_s2, 16, %s22281_s5, [#allocation24]  }
 0x2b4   : > { %s1505_s9 = sshll.u32 %s21642_s12, 4  ;;  %s1506_s9 = int_to_ptr.vmem [resolvable:$true] %s1505_s9 }
 0x2b8   : > { %s23184_s3 = smov %s23183_s0  ;;  %s21135_s4 = scalar_lea.hbm %s23183_s0, 2048 }
 0x2b9   : > { %p21136_p0 = scmp.ne.s32.totalorder %s23184_s3, %s21135_s4  ;;  %p21141_p3 = scmp.lt.u32.totalorder %s21135_s4, %s23184_s3 }
 0x2bb   : > { %p21137_p1 = pnand %p21136_p0, %p23106_p4 }
 0x2bd   : > { %p21138_p2 = pneg %p21137_p1 }
 0x2bf   : > { %p21143_p7 = pnand %p21141_p3, %p21138_p2 }
 0x2c1   : > { %21146 = shalt.err (!%p21143_p7)
}
 0x2c2   : > { %s21147_s11 = scalar_lea.vmem %s1506_s9, 2048  ;;  %p21154_p13 = scmp.lt.s32.totalorder %s1506_s9, %s1506_s9 }
 0x2c3   : > { %p21148_p6 = scmp.ne.s32.totalorder %s1506_s9, %s21147_s11  ;;  %p21155_p8 = scmp.lt.s32.totalorder %s21147_s11, %s21147_s11 }
 0x2c5   : > { %p21149_p11 = pnand %p21148_p6, %p23106_p4  ;;  %p21156_p9 = por %p21155_p8, %p21154_p13 }
 0x2c7   : > { %p21150_p12 = pneg %p21149_p11 }
 0x2c9   : > { %p21157_p10 = pnand %p21156_p9, %p21150_p12 }
 0x2cb   : > { %21160 = shalt.err (!%p21157_p10)
}
 0x2cc   : > { %s21643_s5 = smov 64   ;;  %s23185_s8 = sld [smem:[#allocation93_spill]] }
 0x2cd   : > { %s21644_s4 = smov 4   ;;  %s21645_s0 = smov [#allocation31]  }
 0x2ce   : > { %17931 = dma.hbm_to_vmem [thread:$0]  (%p23106_p4), %s23184_s3, 2048, %s1506_s9, [#allocation27], %s21643_s5, %s21643_s5, %s21644_s4  }
 0x2cf   : > { %s1529_s12 = sshll.u32 %s21645_s0, 4  ;;  %s21646_s2 = smov [#allocation34]   ;;  %s1530_s12 = int_to_ptr.vmem [resolvable:$true] %s1529_s12 }
 0x2d0   : > { %s1553_s6 = sshll.u32 %s21646_s2, 4  ;;  %s1554_s6 = int_to_ptr.vmem [resolvable:$true] %s1553_s6 }
 0x2d2   : > { %s21161_s17 = scalar_lea.hbm %s23185_s8, 2048 }
 0x2d3   : > { %p21162_p0 = scmp.ne.s32.totalorder %s23185_s8, %s21161_s17  ;;  %p21167_p3 = scmp.lt.u32.totalorder %s21161_s17, %s23185_s8 }
 0x2d5   : > { %p21163_p1 = pnand %p21162_p0, %p23106_p4 }
 0x2d7   : > { %p21164_p2 = pneg %p21163_p1 }
 0x2d9   : > { %p21169_p7 = pnand %p21167_p3, %p21164_p2 }
 0x2db   : > { %21172 = shalt.err (!%p21169_p7)
}
 0x2dc   : > { %s21173_s11 = scalar_lea.vmem %s1530_s12, 2048  ;;  %p21180_p13 = scmp.lt.s32.totalorder %s1530_s12, %s1530_s12 }
 0x2dd   : > { %p21174_p6 = scmp.ne.s32.totalorder %s1530_s12, %s21173_s11  ;;  %p21181_p8 = scmp.lt.s32.totalorder %s21173_s11, %s21173_s11 }
 0x2df   : > { %p21175_p11 = pnand %p21174_p6, %p23106_p4  ;;  %p21182_p9 = por %p21181_p8, %p21180_p13 }
 0x2e1   : > { %p21176_p12 = pneg %p21175_p11 }
 0x2e3   : > { %p21183_p10 = pnand %p21182_p9, %p21176_p12 }
 0x2e5   : > { %21186 = shalt.err (!%p21183_p10)
}
 0x2e6   : > { %s23186_s9 = sld [smem:[#allocation94_spill]] }
 0x2e7   : > { %17935 = dma.hbm_to_vmem [thread:$0]  (%p23106_p4), %s23185_s8, 2048, %s1530_s12, [#allocation30], %s21643_s5, %s21643_s5, %s21644_s4  }
 0x2ec   : > { %s21187_s17 = scalar_lea.hbm %s23186_s9, 2048 }
 0x2ed   : > { %p21188_p0 = scmp.ne.s32.totalorder %s23186_s9, %s21187_s17  ;;  %p21193_p3 = scmp.lt.u32.totalorder %s21187_s17, %s23186_s9 }
 0x2ef   : > { %p21189_p1 = pnand %p21188_p0, %p23106_p4 }
 0x2f1   : > { %p21190_p2 = pneg %p21189_p1 }
 0x2f3   : > { %p21195_p7 = pnand %p21193_p3, %p21190_p2 }
 0x2f5   : > { %21198 = shalt.err (!%p21195_p7)
}
 0x2f6   : > { %s21199_s2 = scalar_lea.vmem %s1554_s6, 2048  ;;  %p21206_p13 = scmp.lt.s32.totalorder %s1554_s6, %s1554_s6 }
 0x2f7   : > { %p21200_p6 = scmp.ne.s32.totalorder %s1554_s6, %s21199_s2  ;;  %p21207_p8 = scmp.lt.s32.totalorder %s21199_s2, %s21199_s2 }
 0x2f9   : > { %p21201_p11 = pnand %p21200_p6, %p23106_p4  ;;  %p21208_p9 = por %p21207_p8, %p21206_p13 }
 0x2fb   : > { %p21202_p12 = pneg %p21201_p11 }
 0x2fd   : > { %p21209_p10 = pnand %p21208_p9, %p21202_p12 }
 0x2ff   : > { %21212 = shalt.err (!%p21209_p10)
}
 0x300   : > { %s23187_s5 = smov 8   ;;  %s23188_s4 = smov 128  }
 0x301   : > { %s23189_s0 = sld [smem:[#allocation97_spill]]  ;;  %s21647_s11 = smov [#allocation37]  }
 0x302   : > { %17939 = dma.hbm_to_vmem [thread:$0]  (%p23106_p4), %s23186_s9, 2048, %s1554_s6, [#allocation33], %s23188_s4, %s23188_s4, %s23187_s5  }
 0x303   : > { %s1580_s17 = sshll.u32 %s21647_s11, 4  ;;  %s21648_s3 = smov [#allocation40]   ;;  %s1581_s17 = int_to_ptr.vmem [resolvable:$true] %s1580_s17 }
 0x304   : > { %s1612_s8 = sshll.u32 %s21648_s3, 4  ;;  %s1613_s8 = int_to_ptr.vmem [resolvable:$true] %s1612_s8 }
 0x307   : > { %s23190_s12 = smov %s23189_s0  ;;  %s21213_s2 = scalar_lea.hbm %s23189_s0, 8192 }
 0x308   : > { %p21214_p0 = scmp.ne.s32.totalorder %s23190_s12, %s21213_s2  ;;  %p21219_p3 = scmp.lt.u32.totalorder %s21213_s2, %s23190_s12 }
 0x30a   : > { %p21215_p1 = pnand %p21214_p0, %p23106_p4 }
 0x30c   : > { %p21216_p2 = pneg %p21215_p1 }
 0x30e   : > { %p21221_p7 = pnand %p21219_p3, %p21216_p2 }
 0x310   : > { %21224 = shalt.err (!%p21221_p7)
}
 0x311   : > { %s21225_s19 = scalar_lea.vmem %s1581_s17, 8192  ;;  %p21232_p13 = scmp.lt.s32.totalorder %s1581_s17, %s1581_s17 }
 0x312   : > { %p21226_p6 = scmp.ne.s32.totalorder %s1581_s17, %s21225_s19  ;;  %p21233_p8 = scmp.lt.s32.totalorder %s21225_s19, %s21225_s19 }
 0x314   : > { %p21227_p11 = pnand %p21226_p6, %p23106_p4  ;;  %p21234_p9 = por %p21233_p8, %p21232_p13 }
 0x316   : > { %p21228_p12 = pneg %p21227_p11 }
 0x318   : > { %p21235_p10 = pnand %p21234_p9, %p21228_p12 }
 0x31a   : > { %21238 = shalt.err (!%p21235_p10)
}
 0x31b   : > { %s23191_s6 = smov 16   ;;  %s23192_s3 = smov 256  }
 0x31c   : > { %s23193_s5 = sld [smem:[#allocation101_spill]] }
 0x31d   : > { %17943 = dma.hbm_to_vmem [thread:$0]  (%p23106_p4), %s23190_s12, 8192, %s1581_s17, [#allocation36], %s23192_s3, %s23192_s3, %s23191_s6  }
 0x322   : > { %s21239_s4 = scalar_lea.hbm %s23193_s5, 8192 }
 0x323   : > { %p21240_p0 = scmp.ne.s32.totalorder %s23193_s5, %s21239_s4  ;;  %p21245_p3 = scmp.lt.u32.totalorder %s21239_s4, %s23193_s5 }
 0x325   : > { %p21241_p1 = pnand %p21240_p0, %p23106_p4 }
 0x327   : > { %p21242_p2 = pneg %p21241_p1 }
 0x329   : > { %p21247_p7 = pnand %p21245_p3, %p21242_p2 }
 0x32b   : > { %21250 = shalt.err (!%p21247_p7)
}
 0x32c   : > { %s21251_s19 = scalar_lea.vmem %s1613_s8, 8192  ;;  %p21258_p13 = scmp.lt.s32.totalorder %s1613_s8, %s1613_s8 }
 0x32d   : > { %p21252_p6 = scmp.ne.s32.totalorder %s1613_s8, %s21251_s19  ;;  %p21259_p8 = scmp.lt.s32.totalorder %s21251_s19, %s21251_s19 }
 0x32f   : > { %p21253_p11 = pnand %p21252_p6, %p23106_p4  ;;  %p21260_p9 = por %p21259_p8, %p21258_p13 }
 0x331   : > { %p21254_p12 = pneg %p21253_p11 }
 0x333   : > { %p21261_p10 = pnand %p21260_p9, %p21254_p12 }
 0x335   : > { %21264 = shalt.err (!%p21261_p10)
}
 0x336   : > { %s23194_s0 = sld [smem:[#allocation105_spill]]  ;;  %s21649_s17 = smov [#allocation43]  }
 0x337   : > { %17947 = dma.hbm_to_vmem [thread:$0]  (%p23106_p4), %s23193_s5, 8192, %s1613_s8, [#allocation39], %s23192_s3, %s23192_s3, %s23191_s6  }
 0x338   : > { %s1647_s2 = sshll.u32 %s21649_s17, 4  ;;  %s21650_s4 = smov [#allocation46]   ;;  %s1648_s2 = int_to_ptr.vmem [resolvable:$true] %s1647_s2 }
 0x339   : > { %s1682_s9 = sshll.u32 %s21650_s4, 4  ;;  %s1683_s9 = int_to_ptr.vmem [resolvable:$true] %s1682_s9 }
 0x33c   : > { %s23195_s11 = smov %s23194_s0  ;;  %s21265_s19 = scalar_lea.hbm %s23194_s0, 16384 }
 0x33d   : > { %p21266_p0 = scmp.ne.s32.totalorder %s23195_s11, %s21265_s19  ;;  %p21271_p3 = scmp.lt.u32.totalorder %s21265_s19, %s23195_s11 }
 0x33f   : > { %p21267_p1 = pnand %p21266_p0, %p23106_p4 }
 0x341   : > { %p21268_p2 = pneg %p21267_p1 }
 0x343   : > { %p21273_p7 = pnand %p21271_p3, %p21268_p2 }
 0x345   : > { %21276 = shalt.err (!%p21273_p7)
}
 0x346   : > { %s21277_s12 = scalar_lea.vmem %s1648_s2, 16384  ;;  %p21284_p13 = scmp.lt.s32.totalorder %s1648_s2, %s1648_s2 }
 0x347   : > { %p21278_p6 = scmp.ne.s32.totalorder %s1648_s2, %s21277_s12  ;;  %p21285_p8 = scmp.lt.s32.totalorder %s21277_s12, %s21277_s12 }
 0x349   : > { %p21279_p11 = pnand %p21278_p6, %p23106_p4  ;;  %p21286_p9 = por %p21285_p8, %p21284_p13 }
 0x34b   : > { %p21280_p12 = pneg %p21279_p11 }
 0x34d   : > { %p21287_p10 = pnand %p21286_p9, %p21280_p12 }
 0x34f   : > { %21290 = shalt.err (!%p21287_p10)
}
 0x350   : > { %s23196_s8 = sld [smem:[#allocation109_spill]] }
 0x351   : > { %17951 = dma.hbm_to_vmem [thread:$0]  (%p23106_p4), %s23195_s11, 16384, %s1648_s2, [#allocation42], %s23192_s3, %s23192_s3, %s23191_s6  }
 0x356   : > { %s21291_s0 = scalar_lea.hbm %s23196_s8, 16384 }
 0x357   : > { %p21292_p0 = scmp.ne.s32.totalorder %s23196_s8, %s21291_s0  ;;  %p21297_p3 = scmp.lt.u32.totalorder %s21291_s0, %s23196_s8 }
 0x359   : > { %p21293_p1 = pnand %p21292_p0, %p23106_p4 }
 0x35b   : > { %p21294_p2 = pneg %p21293_p1 }
 0x35d   : > { %p21299_p7 = pnand %p21297_p3, %p21294_p2 }
 0x35f   : > { %21302 = shalt.err (!%p21299_p7)
}
 0x360   : > { %s21303_s12 = scalar_lea.vmem %s1683_s9, 16384  ;;  %p21310_p13 = scmp.lt.s32.totalorder %s1683_s9, %s1683_s9 }
 0x361   : > { %p21304_p6 = scmp.ne.s32.totalorder %s1683_s9, %s21303_s12  ;;  %p21311_p8 = scmp.lt.s32.totalorder %s21303_s12, %s21303_s12 }
 0x363   : > { %p21305_p11 = pnand %p21304_p6, %p23106_p4  ;;  %p21312_p9 = por %p21311_p8, %p21310_p13 }
 0x365   : > { %p21306_p12 = pneg %p21305_p11 }
 0x367   : > { %p21313_p10 = pnand %p21312_p9, %p21306_p12 }
 0x369   : > { %21316 = shalt.err (!%p21313_p10)
}
 0x36a   : > { %s23197_s17 = sld [smem:[#allocation113_spill]]  ;;  %s21651_s2 = smov [#allocation49]  }
 0x36b   : > { %17955 = dma.hbm_to_vmem [thread:$0]  (%p23106_p4), %s23196_s8, 16384, %s1683_s9, [#allocation45], %s23192_s3, %s23192_s3, %s23191_s6  }
 0x36c   : > { %s1714_s4 = sshll.u32 %s21651_s2, 4  ;;  %s21652_s19 = smov [#allocation52]   ;;  %s1715_s4 = int_to_ptr.vmem [resolvable:$true] %s1714_s4 }
 0x36d   : > { %s1749_s0 = sshll.u32 %s21652_s19, 4  ;;  %s1750_s0 = int_to_ptr.vmem [resolvable:$true] %s1749_s0 }
 0x370   : > { %s21317_s12 = scalar_lea.hbm %s23197_s17, 16384 }
 0x371   : > { %p21318_p0 = scmp.ne.s32.totalorder %s23197_s17, %s21317_s12  ;;  %p21323_p3 = scmp.lt.u32.totalorder %s21317_s12, %s23197_s17 }
 0x373   : > { %p21319_p1 = pnand %p21318_p0, %p23106_p4 }
 0x375   : > { %p21320_p2 = pneg %p21319_p1 }
 0x377   : > { %p21325_p7 = pnand %p21323_p3, %p21320_p2 }
 0x379   : > { %21328 = shalt.err (!%p21325_p7)
}
 0x37a   : > { %s21329_s5 = scalar_lea.vmem %s1715_s4, 16384  ;;  %p21336_p13 = scmp.lt.s32.totalorder %s1715_s4, %s1715_s4 }
 0x37b   : > { %p21330_p6 = scmp.ne.s32.totalorder %s1715_s4, %s21329_s5  ;;  %p21337_p8 = scmp.lt.s32.totalorder %s21329_s5, %s21329_s5 }
 0x37d   : > { %p21331_p11 = pnand %p21330_p6, %p23106_p4  ;;  %p21338_p9 = por %p21337_p8, %p21336_p13 }
 0x37f   : > { %p21332_p12 = pneg %p21331_p11 }
 0x381   : > { %p21339_p10 = pnand %p21338_p9, %p21332_p12 }
 0x383   : > { %21342 = shalt.err (!%p21339_p10)
}
 0x384   : > { %s23198_s9 = sld [smem:[#allocation118_spill]] }
 0x385   : > { %17959 = dma.hbm_to_vmem [thread:$0]  (%p23106_p4), %s23197_s17, 16384, %s1715_s4, [#allocation48], %s23192_s3, %s23192_s3, %s23191_s6  }
 0x38a   : > { %s21343_s2 = scalar_lea.hbm %s23198_s9, 16384 }
 0x38b   : > { %p21344_p0 = scmp.ne.s32.totalorder %s23198_s9, %s21343_s2  ;;  %p21349_p3 = scmp.lt.u32.totalorder %s21343_s2, %s23198_s9 }
 0x38d   : > { %p21345_p1 = pnand %p21344_p0, %p23106_p4 }
 0x38f   : > { %p21346_p2 = pneg %p21345_p1 }
 0x391   : > { %p21351_p7 = pnand %p21349_p3, %p21346_p2 }
 0x393   : > { %21354 = shalt.err (!%p21351_p7)
}
 0x394   : > { %s21355_s5 = scalar_lea.vmem %s1750_s0, 16384  ;;  %p21362_p13 = scmp.lt.s32.totalorder %s1750_s0, %s1750_s0 }
 0x395   : > { %p21356_p6 = scmp.ne.s32.totalorder %s1750_s0, %s21355_s5  ;;  %p21363_p8 = scmp.lt.s32.totalorder %s21355_s5, %s21355_s5 }
 0x397   : > { %p21357_p11 = pnand %p21356_p6, %p23106_p4  ;;  %p21364_p9 = por %p21363_p8, %p21362_p13 }
 0x399   : > { %p21358_p12 = pneg %p21357_p11 }
 0x39b   : > { %p21365_p10 = pnand %p21364_p9, %p21358_p12 }
 0x39d   : > { %21368 = shalt.err (!%p21365_p10)
}
 0x39e   : > { %s23199_s4 = sld [smem:[#allocation120_spill]]  ;;  %s21653_s19 = smov [#allocation53]  }
 0x39f   : > { %17963 = dma.hbm_to_vmem [thread:$0]  (%p23106_p4), %s23198_s9, 16384, %s1750_s0, [#allocation51], %s23192_s3, %s23192_s3, %s23191_s6  }
 0x3a0   : > { %s1765_s12 = sshll.u32 %s21653_s19, 4  ;;  %s1766_s12 = int_to_ptr.vmem [resolvable:$true] %s1765_s12 }
 0x3a4   : > { %s21369_s2 = scalar_lea.hbm %s23199_s4, 16384 }
 0x3a5   : > { %p21370_p0 = scmp.ne.s32.totalorder %s23199_s4, %s21369_s2  ;;  %p21375_p3 = scmp.lt.u32.totalorder %s21369_s2, %s23199_s4 }
 0x3a7   : > { %p21371_p1 = pnand %p21370_p0, %p23106_p4 }
 0x3a9   : > { %p21372_p2 = pneg %p21371_p1 }
 0x3ab   : > { %p21377_p7 = pnand %p21375_p3, %p21372_p2 }
 0x3ad   : > { %21380 = shalt.err (!%p21377_p7)
}
 0x3ae   : > { %s21381_s5 = scalar_lea.vmem %s1766_s12, 16384  ;;  %p21388_p13 = scmp.lt.s32.totalorder %s1766_s12, %s1766_s12 }
 0x3af   : > { %p21382_p6 = scmp.ne.s32.totalorder %s1766_s12, %s21381_s5  ;;  %p21389_p8 = scmp.lt.s32.totalorder %s21381_s5, %s21381_s5 }
 0x3b1   : > { %p21383_p11 = pnand %p21382_p6, %p23106_p4  ;;  %p21390_p9 = por %p21389_p8, %p21388_p13 }
 0x3b3   : > { %p21384_p12 = pneg %p21383_p11 }
 0x3b5   : > { %p21391_p10 = pnand %p21390_p9, %p21384_p12 }
 0x3b7   : > { %21394 = shalt.err (!%p21391_p10)
}
 0x3b8   : > { %17965 = dma.hbm_to_vmem [thread:$0]  (%p23106_p4), %s23199_s4, 16384, %s1766_s12, [#allocation54], %s23192_s3, %s23192_s3, %s23191_s6  }
 0x3b9 PF: > { %s23200_s0 = sld [smem:[#allocation75_spill]]  ;;  %p18077_p1 = scmp.lt.s32.totalorder %s21559_s18, 2 }
 0x3ba   : > { %s1788_s2 = sand.u32 1, %s21555_s16   ;;  %s17684_s5 = sshll.u32 %s21559_s18, 8 }
 0x3bb   : > { %s16029_s8 = sshll.u32 %s1788_s2, 4  ;;  %p22445_p2 = pnand %p18077_p1, %p21982_p5 }
 0x3bc   : > { %s1792_s6 = scalar_lea.vmem [#allocation2], %s16029_s8  ;;  %s22451_s4 = scalar_lea.sflag [#allocation3], %s1788_s2 }
 0x3bd   : > { %s1799_s3 = sshll.u32 %s1792_s6, 4  ;;  %p21397_p7 = pneg %p22445_p2  ;;  %s22449_s3 = int_to_ptr.vmem [resolvable:$true] %s1799_s3 }
 0x3bf   : > { %s23201_s19 = smov %s23200_s0  ;;  %s22441_s9 = scalar_lea.hbm %s23200_s0, %s17684_s5 }
 0x3c0   : > { %s21395_s11 = scalar_lea.hbm %s22441_s9, 256  ;;  %s21400_s8 = scalar_lea.hbm %s23201_s19, 512 }
 0x3c1   : > { %p21396_p3 = scmp.ne.s32.totalorder %s22441_s9, %s21395_s11  ;;  %p21401_p12 = scmp.lt.u32.totalorder %s22441_s9, %s23201_s19 }
 0x3c2   : > { %p21402_p5 = scmp.lt.u32.totalorder %s21400_s8, %s21395_s11  ;;  %p21404_p8 = scmp.lt.u32.totalorder %s21395_s11, %s22441_s9 }
 0x3c3   : > { %p21398_p6 = pnand %p21397_p7, %p21396_p3 }
 0x3c4   : > { %p21403_p13 = por %p21402_p5, %p21401_p12 }
 0x3c5   : > { %p21399_p11 = pneg %p21398_p6 }
 0x3c6   : > { %p21405_p9 = por %p21404_p8, %p21403_p13 }
 0x3c8   : > { %p21406_p10 = pnand %p21405_p9, %p21399_p11 }
 0x3ca   : > { %21409 = shalt.err (!%p21406_p10)
}
 0x3cb   : > { %s21410_s7 = scalar_lea.vmem %s22449_s3, 256  ;;  %s21654_s0 = smov [#allocation2]  }
 0x3cc   : > { %p21411_p1 = scmp.ne.s32.totalorder %s22449_s3, %s21410_s7  ;;  %s21415_s2 = sshll.u32 %s21654_s0, 4  ;;  %s21416_s2 = int_to_ptr.vmem [resolvable:$false] %s21415_s2 }
 0x3cd   : > { %s21417_s5 = scalar_lea.vmem %s21416_s2, 512  ;;  %p21418_p3 = scmp.lt.s32.totalorder %s22449_s3, %s21416_s2 }
 0x3ce   : > { %p21413_p0 = pnand %p21411_p1, %p21397_p7  ;;  %p21419_p6 = scmp.lt.s32.totalorder %s21417_s5, %s21410_s7 }
 0x3d0   : > { %p21414_p4 = pneg %p21413_p0  ;;  %p21420_p12 = por %p21419_p6, %p21418_p3 }
 0x3d2   : > { %p21421_p5 = pnand %p21420_p12, %p21414_p4 }
 0x3d4   : > { %21424 = shalt.err (!%p21421_p5)
}
 0x3d5   : > { %s21655_s11 = smov 128   ;;  %s21656_s6 = smov 8  }
 0x3d6   : > { %18039 = dma.hbm_to_vmem [thread:$0]  (!%p22445_p2), %s22441_s9, 256, %s22449_s3, %s22451_s4, %s21655_s11, %s21655_s11, %s21656_s6  }
 0x3d7   : > { %p23203_p7 = scmp.ne.s32.totalorder %s23172_s1, 0 }
 0x3d8   : > { %s22478_s8 = sand.u32 (!%p23203_p7), 1, %s21551_s15   ;;  %p23204_p4 = scmp.ne.s32.totalorder (!%p23203_p7), %s23167_s10, 0 }
 0x3d9   : > { %1811 = sbr.rel (%p23203_p7) target bundleno = 6864 (0x1ad0), region = 236  ;;  %s16033_s7 = sshll.u32 (!%p23203_p7), %s22478_s8, 4 }
 0x3da   : > { %s1814_s0 = scalar_lea.sflag (!%p23203_p7), [#allocation3], %s22478_s8  ;;  %s22484_s2 = scalar_lea.vmem (!%p23203_p7), [#allocation2], %s16033_s7 }
 0x3e0   : > { %21470 = dma.done.wait (%p23204_p4), %s1814_s0, 256  }
 0x3e1   : > { %21472 = vsyncadd (%p23204_p4), %s1814_s0, 4294967040  ;;  %p23205_p0 = scmp.eq.s32.totalorder %s21964_s22, 0 }
 0x3e3   : > { %21474 = dma.done.wait (%p23205_p0), [#allocation6], 320   ;;  %p23206_p2 = pmov %p23205_p0 }
 0x3e4   : > { %p23207_p11 = pmov %p23205_p0 }
 0x3e5   : > { %21476 = vsyncadd (%p23206_p2), [#allocation6], 4294966976 }
 0x3e6   : > { %21478 = dma.done.wait (%p23207_p11), [#allocation9], 320   ;;  %p23208_p13 = pmov %p23205_p0 }
 0x3e7   : > { %p23209_p8 = pmov %p23205_p0 }
 0x3e8   : > { %21480 = vsyncadd (%p23208_p13), [#allocation9], 4294966976 }
 0x3e9   : > { %21482 = dma.done.wait (%p23209_p8), [#allocation12], 320   ;;  %p23210_p9 = pmov %p23205_p0 }
 0x3ea   : > { %p23211_p10 = pmov %p23205_p0 }
 0x3eb   : > { %21484 = vsyncadd (%p23210_p9), [#allocation12], 4294966976 }
 0x3ec   : > { %21486 = dma.done.wait (%p23211_p10), [#allocation15], 64   ;;  %p23212_p1 = pmov %p23205_p0 }
 0x3ed   : > { %p23213_p3 = pmov %p23205_p0 }
 0x3ee   : > { %21488 = vsyncadd (%p23212_p1), [#allocation15], 4294967232 }
 0x3ef   : > { %21490 = dma.done.wait (%p23213_p3), [#allocation18], 4128   ;;  %p23214_p6 = pmov %p23205_p0 }
 0x3f0   : > { %p23215_p12 = pmov %p23205_p0 }
 0x3f1   : > { %21492 = vsyncadd (%p23214_p6), [#allocation18], 4294963168 }
 0x3f2   : > { %21494 = dma.done.wait (%p23215_p12), [#allocation21], 4128   ;;  %p23216_p5 = pmov %p23205_p0 }
 0x3f3   : > { %p23217_p7 = pmov %p23205_p0 }
 0x3f4   : > { %21496 = vsyncadd (%p23216_p5), [#allocation21], 4294963168 }
 0x3f5   : > { %21498 = dma.done.wait (%p23217_p7), [#allocation24], 48   ;;  %p23218_p4 = pmov %p23205_p0 }
 0x3f7   : > { %21500 = vsyncadd (%p23218_p4), [#allocation24], 4294967248 }
 0x3f8   : > { %21502 = dma.done.wait (%p23205_p0), [#allocation27], 2064   ;;  %p23219_p2 = pmov %p23205_p0 }
 0x3f9   : > { %p23220_p11 = pmov %p23205_p0 }
 0x3fa   : > { %21504 = vsyncadd (%p23219_p2), [#allocation27], 4294965232 }
 0x3fb   : > { %21506 = dma.done.wait (%p23220_p11), [#allocation30], 2064   ;;  %p23221_p13 = pmov %p23205_p0 }
 0x3fc   : > { %p23222_p8 = pmov %p23205_p0 }
 0x3fd   : > { %21508 = vsyncadd (%p23221_p13), [#allocation30], 4294965232 }
 0x3fe   : > { %21510 = dma.done.wait (%p23222_p8), [#allocation33], 2064   ;;  %p23223_p9 = pmov %p23205_p0 }
 0x3ff   : > { %p23224_p10 = pmov %p23205_p0 }
 0x400   : > { %21512 = vsyncadd (%p23223_p9), [#allocation33], 4294965232 }
 0x401   : > { %21514 = dma.done.wait (%p23224_p10), [#allocation36], 8224   ;;  %p23225_p1 = pmov %p23205_p0 }
 0x402   : > { %p23226_p3 = pmov %p23205_p0 }
 0x403   : > { %21516 = vsyncadd (%p23225_p1), [#allocation36], 4294959072 }
 0x404   : > { %21518 = dma.done.wait (%p23226_p3), [#allocation39], 16384   ;;  %p23227_p6 = pmov %p23205_p0 }
 0x405   : > { %p23228_p12 = pmov %p23205_p0 }
 0x406   : > { %21520 = vsyncadd (%p23227_p6), [#allocation39], 4294950912 }
 0x407   : > { %21522 = dma.done.wait (%p23228_p12), [#allocation42], 32768   ;;  %p23229_p5 = pmov %p23205_p0 }
 0x408   : > { %p23230_p7 = pmov %p23205_p0 }
 0x409   : > { %21524 = vsyncadd (%p23229_p5), [#allocation42], 4294934528 }
 0x40a   : > { %21526 = dma.done.wait (%p23230_p7), [#allocation45], 32768   ;;  %p23231_p4 = pmov %p23205_p0 }
 0x40c   : > { %21528 = vsyncadd (%p23231_p4), [#allocation45], 4294934528 }
 0x40d   : > { %21530 = dma.done.wait (%p23205_p0), [#allocation48], 32768   ;;  %p23232_p2 = pmov %p23205_p0 }
 0x40e   : > { %p23233_p11 = pmov %p23205_p0 }
 0x40f   : > { %21532 = vsyncadd (%p23232_p2), [#allocation48], 4294934528 }
 0x410   : > { %21534 = dma.done.wait (%p23233_p11), [#allocation51], 32768   ;;  %p23234_p13 = pmov %p23205_p0 }
 0x411   : > { %p23235_p8 = pmov %p23205_p0 }
 0x412   : > { %21536 = vsyncadd (%p23234_p13), [#allocation51], 4294934528 }
 0x413   : > { %21538 = dma.done.wait (%p23235_p8), [#allocation54], 16384   ;;  %p23236_p9 = pmov %p23205_p0 }
 0x414   : > { %v21657_v0 = vmov 0.0   ;;  %vm21658_vm0 = vmmov 0   ;;  %v2077_v1 = vld [vmem:[%s22484_s2] sm:$0xff]  ;;  %v2078_v2 = vld [vmem:[%s22484_s2 + $0x8] sm:$0xff]  ;;  %vm2081_vm1 = vcmask 130048   ;;  %v21659_v10 = vmov 0  }
 0x415   : > { %21540 = vsyncadd (%p23236_p9), [#allocation54], 4294950912  ;;  %17802 = vmatprep.subr.bf16.mxu0 %v21657_v0  ;;  %17808 = vmatprep.subr.bf16.mxu1 %v21657_v0  ;;  %v2079_v3 = vpack.c.bf16 %v2078_v2, %v2077_v1  ;;  %v2080_v4 = vld [vmem:[#allocation5] sm:$0xf]  ;;  %v2128_v5 = vld [vmem:[#allocation8] sm:$0xf]  ;;  %v2388_v39 = vlaneseq }
 0x416   : > { %17804 = vmatprep.mubr.msk.bf16.mxu0 %vm21658_vm0, %v21657_v0  ;;  %17810 = vmatprep.mubr.msk.bf16.mxu1 %vm21658_vm0, %v21657_v0  ;;  %v18244_v6 = vld [vmem:[#allocation10] ss:$8 sps:$4 sm:$0xff]   ;;  %v18246_v7 = vld [vmem:[#allocation10 + $0x4] ss:$8 sps:$4 sm:$0xff]   ;;  %v18249_v9 = vld [vmem:[#allocation7 + $0x4] ss:$8 sps:$4 sm:$0xff]  }
 0x417   : > { %17803 = vmatpush3.bf16.msra.mxu0 %v2079_v3  ;;  %17809 = vmatpush3.bf16.msra.mxu1 %v2079_v3  ;;  %v18247_v8 = vld [vmem:[#allocation7] ss:$8 sps:$4 sm:$0xff]   ;;  %v2283_v21 = vld [vmem:[#allocation11] sm:$0xf]  ;;  %v18252_v23 = vld [vmem:[#allocation13 + $0x4] ss:$8 sps:$4 sm:$0xff]  }
 0x418   : > { %2188 = vmatprep.subr.bf16.mxu0 %v18246_v7  ;;  %2242 = vmatprep.subr.bf16.mxu1 %v18249_v9  ;;  %v18250_v22 = vld [vmem:[#allocation13] ss:$8 sps:$4 sm:$0xff]   ;;  %v22574_v40 = vshrl.u32 %v2388_v39, 7  ;;  %v2386_v42 = vld [vmem:[#allocation14] sm:$0x3]  ;;  %s23237_s10 = sld [smem:[#allocation83_spill]] }
 0x419   : > { %vm2423_vm4 = vcmask 1043456   ;;  %v2418_v9 = vld [vmem:[#allocation16] sm:$0x3]  ;;  %vm2419_vm5 = vcmask 64512   ;;  %vm3305_vm8 = vcmask 1041408   ;;  %vm3301_vm9 = vcmask 31744  }
 0x41a   : > { %17805 = vmatmul.mubr.msk.bf16.vlgmr.msra.gmra.mrb[0].mxu0 %vm2081_vm1, %v2080_v4  ;;  %17811 = vmatmul.mubr.msk.bf16.vlgmr.msra.gmra.mrb[0].mxu1 %vm2081_vm1, %v2128_v5  ;;  %v22577_v41 = vsub.s32 0, %v22574_v40  ;;  %v22580_v43 = vsub.s32 1, %v22574_v40  ;;  %s23238_s1 = sld [smem:[#allocation89_spill]]  ;;  %s23239_s9 = sld [smem:[#allocation96_spill]]  ;;  %vm4143_vm13 = vcmask 1040384   ;;  %vm4139_vm14 = vcmask 15360  }
 0x41b   : > { %2189 = vmatpush1.bf16.msra.mxu0 %v18244_v6  ;;  %2243 = vmatpush1.bf16.msra.mxu1 %v18247_v8  ;;  %v18255_v6 = vld [vmem:[#allocation19 + $0x4] ss:$8 sps:$4 sm:$0xff]   ;;  %s23240_s4 = sld [smem:[#allocation98_spill]]  ;;  %s23241_s3 = sld [smem:[#allocation100_spill]] }
 0x41c   : > { %17814 = vmatprep.subr.bf16.mxu0 %v21657_v0  ;;  %2220 = vmatprep.mubr.bf16.mxu0 %v21659_v10  ;;  %v2391_v44 = vrot.slane %v2386_v42, %v22577_v41  ;;  %v2395_v46 = vrot.slane %v2386_v42, %v22580_v43  ;;  %v18274_v42 = vld [vmem:[#allocation19 + $0x70] ss:$8 sps:$4 sm:$0xff]   ;;  %s23242_s12 = sld [smem:[#allocation102_spill]]  ;;  %s23243_s5 = sld [smem:[#allocation103_spill]] }
 0x41d   : > { %2274 = vmatprep.mubr.bf16.mxu1 %v21659_v10  ;;  %2343 = vmatprep.subr.bf16.mxu1 %v18252_v23  ;;  %s23244_s11 = sld [smem:[#allocation104_spill]]  ;;  %s23245_s6 = sld [smem:[#allocation106_spill]] }
 0x41e   : > { %v18303_v7 = vld [vmem:[%s23237_s10 + $0x4] ss:$8 sps:$4 sm:$0xff]   ;;  %v18312_v23 = vld [vmem:[%s23237_s10 + $0x34] ss:$8 sps:$4 sm:$0xff]   ;;  %s23246_s0 = sld [smem:[#allocation107_spill]]  ;;  %s23247_s2 = sld [smem:[#allocation108_spill]] }
 0x41f   : > { %v18324_v39 = vld [vmem:[%s23237_s10 + $0x74] ss:$8 sps:$4 sm:$0xff]  }
 0x4ed   : > { %v2119_v11 = vpop.f32.mrb[0].mxu0  ;;  %v2166_v12 = vpop.f32.mrb[0].mxu1 }
 0x4ee   : > { %v2125_v13 = vpack.c.bf16 %v2119_v11, %v2119_v11  ;;  %v2172_v14 = vpack.c.bf16 %v2166_v12, %v2166_v12  ;;  %v17812_v15 = vpop.f32.mrb[1].mxu1  ;;  %v17806_v16 = vpop.f32.mrb[1].mxu0  ;;  %v2505_v11 = vld [vmem:[#allocation17] sm:$0x3]  ;;  %v18253_v12 = vld [vmem:[#allocation19] ss:$8 sps:$4 sm:$0xff]  }
 0x4ef   : > { %v2169_v17 = vpop.f32.mrb[2].mxu1  ;;  %v2122_v18 = vpop.f32.mrb[2].mxu0  ;;  %v18306_v15 = vld [vmem:[%s23237_s10 + $0x14] ss:$8 sps:$4 sm:$0xff]  }
 0x4f0   : > { %v17813_v19 = vpop.f32.mrb[3].mxu1  ;;  %16072 = vmatmul.mubr.msk.bf16.vlgmr.msra.gmra.mrb[4].mxu0 %vm2081_vm1, %v2172_v14  ;;  %16075 = vmatmul.mubr.msk.bf16.vlgmr.msra.gmra.mrb[4].mxu1 %vm2081_vm1, %v2125_v13  ;;  %v17807_v20 = vpop.f32.mrb[3].mxu0  ;;  %v18301_v13 = vld [vmem:[%s23237_s10] ss:$8 sps:$4 sm:$0xff]   ;;  %v18256_v16 = vld [vmem:[#allocation19 + $0x10] ss:$8 sps:$4 sm:$0xff]  }
 0x4f1   : > { %17815 = vmatpush3.bf16.msra.mxu0 %v2079_v3  ;;  %17816 = vmatprep.mubr.msk.bf16.mxu0 %vm21658_vm0, %v21657_v0  ;;  %v18258_v14 = vld [vmem:[#allocation19 + $0x14] ss:$8 sps:$4 sm:$0xff]   ;;  %v18261_v18 = vld [vmem:[#allocation19 + $0x24] ss:$8 sps:$4 sm:$0xff]   ;;  %v18259_v20 = vld [vmem:[#allocation19 + $0x20] ss:$8 sps:$4 sm:$0xff]  }
 0x4f2   : > { %2375 = vmatprep.mubr.bf16.mxu1 %v21659_v10  ;;  %2344 = vmatpush1.bf16.msra.mxu1 %v18250_v22  ;;  %v18304_v17 = vld [vmem:[%s23237_s10 + $0x10] ss:$8 sps:$4 sm:$0xff]   ;;  %v18309_v19 = vld [vmem:[%s23237_s10 + $0x24] ss:$8 sps:$4 sm:$0xff]  }
 0x4f3   : > { %v18264_v22 = vld [vmem:[#allocation19 + $0x34] ss:$8 sps:$4 sm:$0xff]  }
 0x4f8   : > { %17817 = vmatmul.mubr.msk.bf16.vlgmr.msra.gmra.mrb[8].mxu0 %vm2081_vm1, %v2283_v21  ;;  %v18307_v21 = vld [vmem:[%s23237_s10 + $0x20] ss:$8 sps:$4 sm:$0xff]  }
 0x4f9   : > { %2462 = vmatprep.mubr.bf16.mxu0 %v21659_v10 }
 0x5c3   : > { %v2222_v24 = vpop.f32.mrb[4].mxu0  ;;  %v2276_v25 = vpop.f32.mrb[4].mxu1 }
 0x5c4   : > { %v2277_v26 = vadd.f32 %v2276_v25, %v2222_v24  ;;  %v2224_v27 = vpop.f32.mrb[5].mxu0  ;;  %v2278_v28 = vpop.f32.mrb[5].mxu1  ;;  %v18262_v24 = vld [vmem:[#allocation19 + $0x30] ss:$8 sps:$4 sm:$0xff]  }
 0x5c5   : > { %v2279_v29 = vadd.f32 %v2278_v28, %v2224_v27  ;;  %v2226_v30 = vpop.f32.mrb[6].mxu0  ;;  %v2280_v31 = vpop.f32.mrb[6].mxu1  ;;  %v18310_v25 = vld [vmem:[%s23237_s10 + $0x30] ss:$8 sps:$4 sm:$0xff]   ;;  %v18315_v27 = vld [vmem:[%s23237_s10 + $0x44] ss:$8 sps:$4 sm:$0xff]  }
 0x5c6   : > { %v2227_v32 = vpop.f32.mrb[7].mxu0  ;;  %v2281_v33 = vpop.f32.mrb[7].mxu1  ;;  %v18265_v28 = vld [vmem:[#allocation19 + $0x40] ss:$8 sps:$4 sm:$0xff]   ;;  %v18270_v30 = vld [vmem:[#allocation19 + $0x54] ss:$8 sps:$4 sm:$0xff]  }
 0x5c7   : > { %v18318_v31 = vld [vmem:[%s23237_s10 + $0x54] ss:$8 sps:$4 sm:$0xff]   ;;  %v18316_v33 = vld [vmem:[%s23237_s10 + $0x50] ss:$8 sps:$4 sm:$0xff]  }
 0x5c8   : > { %v18268_v32 = vld [vmem:[#allocation19 + $0x50] ss:$8 sps:$4 sm:$0xff]  }
 0x5cb   : > { %v2321_v34 = vpop.f32.mrb[8].mxu0 }
 0x5cc   : > { %v2327_v35 = vpack.c.bf16 %v2321_v34, %v2321_v34  ;;  %v17818_v36 = vpop.f32.mrb[9].mxu0  ;;  %v18273_v34 = vld [vmem:[#allocation19 + $0x64] ss:$8 sps:$4 sm:$0xff]  }
 0x5cd   : > { %v2324_v37 = vpop.f32.mrb[10].mxu0  ;;  %v18271_v36 = vld [vmem:[#allocation19 + $0x60] ss:$8 sps:$4 sm:$0xff]  }
 0x5ce   : > { %v17819_v38 = vpop.f32.mrb[11].mxu0  ;;  %16079 = vmatmul.mubr.msk.bf16.vlgmr.msra.gmra.mrb[8].mxu1 %vm2081_vm1, %v2327_v35  ;;  %v18321_v35 = vld [vmem:[%s23237_s10 + $0x64] ss:$8 sps:$4 sm:$0xff]   ;;  %v18319_v37 = vld [vmem:[%s23237_s10 + $0x60] ss:$8 sps:$4 sm:$0xff]  }
 0x5cf   : > { %2541 = vmatprep.mubr.bf16.mxu1 %v21659_v10  ;;  %v18276_v38 = vld [vmem:[#allocation19 + $0x74] ss:$8 sps:$4 sm:$0xff]  }
 0x6a1   : > { %v2377_v45 = vpop.f32.mrb[8].mxu1 }
 0x6a2   : > { %v2384_v47 = vadd.f32 %v2377_v45, %v2277_v26  ;;  %v2379_v48 = vpop.f32.mrb[9].mxu1  ;;  %v18267_v26 = vld [vmem:[#allocation19 + $0x44] ss:$8 sps:$4 sm:$0xff]  }
 0x6a3   : > { %v2385_v49 = vadd.f32 %v2379_v48, %v2279_v29  ;;  %v2381_v50 = vpop.f32.mrb[10].mxu1  ;;  %v18313_v29 = vld [vmem:[%s23237_s10 + $0x40] ss:$8 sps:$4 sm:$0xff]  }
 0x6a4   : > { %v2398_v51 = vadd.f32 %v2391_v44, %v2384_v47  ;;  %v2382_v52 = vpop.f32.mrb[11].mxu1  ;;  %v18322_v44 = vld [vmem:[%s23237_s10 + $0x70] ss:$8 sps:$4 sm:$0xff]   ;;  %v18277_v47 = vld [vmem:[#allocation19 + $0x80] ss:$8 sps:$4 sm:$0xff]  }
 0x6a5   : > { %v2399_v53 = vadd.f32 %v2395_v46, %v2385_v49  ;;  %v18279_v45 = vld [vmem:[#allocation19 + $0x84] ss:$8 sps:$4 sm:$0xff]   ;;  %v18282_v49 = vld [vmem:[#allocation19 + $0x94] ss:$8 sps:$4 sm:$0xff]  }
 0x6a6   : > { %v2402_v54 = vmin.f32 %v2398_v51, 0.0  ;;  %vm2400_vm2 = vcmp.gt.f32.partialorder %v2398_v51, 0.0  ;;  %v18327_v46 = vld [vmem:[%s23237_s10 + $0x84] ss:$8 sps:$4 sm:$0xff]   ;;  %v18325_v48 = vld [vmem:[%s23237_s10 + $0x80] ss:$8 sps:$4 sm:$0xff]  }
 0x6a7   : > { %v2403_v55 = vmin.f32 %v2399_v53, 0.0  ;;  %vm2401_vm3 = vcmp.gt.f32.partialorder %v2399_v53, 0.0  ;;  %v18330_v50 = vld [vmem:[%s23237_s10 + $0x94] ss:$8 sps:$4 sm:$0xff]   ;;  %v18328_v52 = vld [vmem:[%s23237_s10 + $0x90] ss:$8 sps:$4 sm:$0xff]  }
 0x6a8   : > { %v2404_v56 = vmul.f32 1.442695, %v2402_v54  ;;  %v18333_v54 = vld [vmem:[%s23237_s10 + $0xa4] ss:$8 sps:$4 sm:$0xff]  }
 0x6a9   : > { %v2406_v57 = vmul.f32 1.442695, %v2403_v55  ;;  %v18283_v55 = vld [vmem:[#allocation19 + $0xa0] ss:$8 sps:$4 sm:$0xff]  }
 0x6aa   : > { %20523 = vpow2.f32 %v2404_v56  ;;  %v18331_v56 = vld [vmem:[%s23237_s10 + $0xa0] ss:$8 sps:$4 sm:$0xff]  }
 0x6ab   : > { %20525 = vpow2.f32 %v2406_v57  ;;  %v18288_v57 = vld [vmem:[#allocation19 + $0xb4] ss:$8 sps:$4 sm:$0xff]  }
 0x6b4   : > { %v20524_v58 = vpop.eup %20523 }
 0x6b5   : > { %v20526_v59 = vpop.eup %20525  ;;  %v16080_v60 = vadd.f32 -1.0, %v20524_v58  ;;  %v18336_v58 = vld [vmem:[%s23237_s10 + $0xb4] ss:$8 sps:$4 sm:$0xff]  }
 0x6b6   : > { %v16081_v61 = vadd.f32 -1.0, %v20526_v59  ;;  %v18286_v59 = vld [vmem:[#allocation19 + $0xb0] ss:$8 sps:$4 sm:$0xff]  }
 0x6b7   : > { %v2410_v62 = vmul.f32 1.6732632, %v16080_v60  ;;  %v18334_v60 = vld [vmem:[%s23237_s10 + $0xb0] ss:$8 sps:$4 sm:$0xff]  }
 0x6b8   : > { %v2411_v63 = vmul.f32 1.6732632, %v16081_v61  ;;  %v18291_v61 = vld [vmem:[#allocation19 + $0xc4] ss:$8 sps:$4 sm:$0xff]  }
 0x6b9   : > { %v2412_v0 = vsel %vm2400_vm2, %v2398_v51, %v2410_v62  ;;  %v18280_v51 = vld [vmem:[#allocation19 + $0x90] ss:$8 sps:$4 sm:$0xff]   ;;  %v18339_v62 = vld [vmem:[%s23237_s10 + $0xc4] ss:$8 sps:$4 sm:$0xff]  }
 0x6ba   : > { %v2413_v1 = vsel %vm2401_vm3, %v2399_v53, %v2411_v63  ;;  %v2414_v2 = vmul.f32 1.050701, %v2412_v0  ;;  %v18285_v53 = vld [vmem:[#allocation19 + $0xa4] ss:$8 sps:$4 sm:$0xff]   ;;  %v18289_v63 = vld [vmem:[#allocation19 + $0xc0] ss:$8 sps:$4 sm:$0xff]  }
 0x6bb   : > { %v2415_v3 = vmul.f32 1.050701, %v2413_v1  ;;  %v18337_v0 = vld [vmem:[%s23237_s10 + $0xc0] ss:$8 sps:$4 sm:$0xff]  }
 0x6bc   : > { %v2416_v4 = vpack.c.bf16 %v2414_v2, %v2414_v2  ;;  %v18294_v1 = vld [vmem:[#allocation19 + $0xd4] ss:$8 sps:$4 sm:$0xff]  }
 0x6bd   : > { %v22584_v5 = vpack.c.bf16 %v2415_v3, %v2415_v3  ;;  %v18342_v2 = vld [vmem:[%s23237_s10 + $0xd4] ss:$8 sps:$4 sm:$0xff]  }
 0x6be   : > { %v22588_v8 = vsel %vm2423_vm4, %v2416_v4, 0  ;;  %v18292_v3 = vld [vmem:[#allocation19 + $0xd0] ss:$8 sps:$4 sm:$0xff]  }
 0x6bf   : > { %16082 = vmatprep.subr.msk.bf16.mxu0 %vm2423_vm4, %v22584_v5  ;;  %16084 = vmatprep.subr.msk.bf16.mxu1 %vm2423_vm4, %v22584_v5  ;;  %v18340_v4 = vld [vmem:[%s23237_s10 + $0xd0] ss:$8 sps:$4 sm:$0xff]  }
 0x6c0   : > { %2431 = vmatpush1.bf16.msra.mxu0 %v22588_v8  ;;  %2510 = vmatpush1.bf16.msra.mxu1 %v22588_v8 }
 0x6c1   : > { %2744 = vmatprep.subr.bf16.mxu0 %v18255_v6  ;;  %2945 = vmatprep.subr.bf16.mxu1 %v18303_v7  ;;  %v18297_v6 = vld [vmem:[#allocation19 + $0xe4] ss:$8 sps:$4 sm:$0xff]  }
 0x6c2   : > { %v18345_v7 = vld [vmem:[%s23237_s10 + $0xe4] ss:$8 sps:$4 sm:$0xff]  }
 0x6c3   : > { %16083 = vmatmul.mubr.msk.bf16.vlgmr.msra.gmra.mrb[12].mxu0 %vm2419_vm5, %v2418_v9  ;;  %16085 = vmatmul.mubr.msk.bf16.vlgmr.msra.gmra.mrb[12].mxu1 %vm2419_vm5, %v2505_v11  ;;  %v18295_v9 = vld [vmem:[#allocation19 + $0xe0] ss:$8 sps:$4 sm:$0xff]  }
 0x6c4   : > { %2745 = vmatpush1.bf16.msra.mxu0 %v18253_v12  ;;  %2946 = vmatpush1.bf16.msra.mxu1 %v18301_v13  ;;  %v18343_v11 = vld [vmem:[%s23237_s10 + $0xe0] ss:$8 sps:$4 sm:$0xff]   ;;  %v18298_v13 = vld [vmem:[#allocation19 + $0xf0] ss:$8 sps:$4 sm:$0xff]  }
 0x6c5   : > { %2746 = vmatprep.subr.bf16.mxu0 %v18258_v14  ;;  %2947 = vmatprep.subr.bf16.mxu1 %v18306_v15  ;;  %v18300_v12 = vld [vmem:[#allocation19 + $0xf4] ss:$8 sps:$4 sm:$0xff]  }
 0x6c6   : > { %v18348_v14 = vld [vmem:[%s23237_s10 + $0xf4] ss:$8 sps:$4 sm:$0xff]   ;;  %v18346_v15 = vld [vmem:[%s23237_s10 + $0xf0] ss:$8 sps:$4 sm:$0xff]  }
 0x6c8   : > { %2747 = vmatpush1.bf16.msra.mxu0 %v18256_v16  ;;  %2948 = vmatpush1.bf16.msra.mxu1 %v18304_v17  ;;  %v18351_v16 = vld [vmem:[#allocation22 + $0x4] ss:$8 sps:$4 sm:$0xff]  }
 0x6c9   : > { %2748 = vmatprep.subr.bf16.mxu0 %v18261_v18  ;;  %2949 = vmatprep.subr.bf16.mxu1 %v18309_v19 }
 0x6cc   : > { %2749 = vmatpush1.bf16.msra.mxu0 %v18259_v20  ;;  %2950 = vmatpush1.bf16.msra.mxu1 %v18307_v21 }
 0x6cd   : > { %2750 = vmatprep.subr.bf16.mxu0 %v18264_v22  ;;  %2951 = vmatprep.subr.bf16.mxu1 %v18312_v23 }
 0x6d0   : > { %2751 = vmatpush1.bf16.msra.mxu0 %v18262_v24  ;;  %2952 = vmatpush1.bf16.msra.mxu1 %v18310_v25 }
 0x6d1   : > { %2752 = vmatprep.subr.bf16.mxu0 %v18267_v26  ;;  %2953 = vmatprep.subr.bf16.mxu1 %v18315_v27 }
 0x6d4   : > { %2753 = vmatpush1.bf16.msra.mxu0 %v18265_v28  ;;  %2954 = vmatpush1.bf16.msra.mxu1 %v18313_v29  ;;  %v18349_v29 = vld [vmem:[#allocation22] ss:$8 sps:$4 sm:$0xff]  }
 0x6d5   : > { %2754 = vmatprep.subr.bf16.mxu0 %v18270_v30  ;;  %2955 = vmatprep.subr.bf16.mxu1 %v18318_v31  ;;  %v18352_v30 = vld [vmem:[#allocation22 + $0x10] ss:$8 sps:$4 sm:$0xff]   ;;  %v18357_v31 = vld [vmem:[#allocation22 + $0x24] ss:$8 sps:$4 sm:$0xff]  }
 0x6d8   : > { %2755 = vmatpush1.bf16.msra.mxu0 %v18268_v32  ;;  %2956 = vmatpush1.bf16.msra.mxu1 %v18316_v33  ;;  %v2986_v32 = vld [vmem:[#allocation20] sm:$0x3]  ;;  %v18355_v33 = vld [vmem:[#allocation22 + $0x20] ss:$8 sps:$4 sm:$0xff]  }
 0x6d9   : > { %2756 = vmatprep.subr.bf16.mxu0 %v18273_v34  ;;  %2957 = vmatprep.subr.bf16.mxu1 %v18321_v35  ;;  %v18360_v34 = vld [vmem:[#allocation22 + $0x34] ss:$8 sps:$4 sm:$0xff]   ;;  %v18358_v35 = vld [vmem:[#allocation22 + $0x30] ss:$8 sps:$4 sm:$0xff]  }
 0x6dc   : > { %2757 = vmatpush1.bf16.msra.mxu0 %v18271_v36  ;;  %2958 = vmatpush1.bf16.msra.mxu1 %v18319_v37  ;;  %v18363_v36 = vld [vmem:[#allocation22 + $0x44] ss:$8 sps:$4 sm:$0xff]   ;;  %v18366_v37 = vld [vmem:[#allocation22 + $0x54] ss:$8 sps:$4 sm:$0xff]  }
 0x6dd   : > { %2758 = vmatprep.subr.bf16.mxu0 %v18276_v38  ;;  %2959 = vmatprep.subr.bf16.mxu1 %v18324_v39  ;;  %v18364_v38 = vld [vmem:[#allocation22 + $0x50] ss:$8 sps:$4 sm:$0xff]   ;;  %v18369_v39 = vld [vmem:[#allocation22 + $0x64] ss:$8 sps:$4 sm:$0xff]  }
 0x6e0   : > { %2759 = vmatpush1.bf16.msra.mxu0 %v18274_v42  ;;  %2960 = vmatpush1.bf16.msra.mxu1 %v18322_v44  ;;  %v18367_v42 = vld [vmem:[#allocation22 + $0x60] ss:$8 sps:$4 sm:$0xff]   ;;  %v18372_v44 = vld [vmem:[#allocation22 + $0x74] ss:$8 sps:$4 sm:$0xff]  }
 0x6e1   : > { %2760 = vmatprep.subr.bf16.mxu0 %v18279_v45  ;;  %2961 = vmatprep.subr.bf16.mxu1 %v18327_v46  ;;  %v18370_v45 = vld [vmem:[#allocation22 + $0x70] ss:$8 sps:$4 sm:$0xff]   ;;  %v18375_v46 = vld [vmem:[#allocation22 + $0x84] ss:$8 sps:$4 sm:$0xff]  }
 0x6e4   : > { %2761 = vmatpush1.bf16.msra.mxu0 %v18277_v47  ;;  %2962 = vmatpush1.bf16.msra.mxu1 %v18325_v48  ;;  %v18373_v47 = vld [vmem:[#allocation22 + $0x80] ss:$8 sps:$4 sm:$0xff]   ;;  %v18378_v48 = vld [vmem:[#allocation22 + $0x94] ss:$8 sps:$4 sm:$0xff]  }
 0x6e5   : > { %2762 = vmatprep.subr.bf16.mxu0 %v18282_v49  ;;  %2963 = vmatprep.subr.bf16.mxu1 %v18330_v50  ;;  %v18376_v49 = vld [vmem:[#allocation22 + $0x90] ss:$8 sps:$4 sm:$0xff]   ;;  %v18381_v50 = vld [vmem:[#allocation22 + $0xa4] ss:$8 sps:$4 sm:$0xff]  }
 0x6e8   : > { %2763 = vmatpush1.bf16.msra.mxu0 %v18280_v51  ;;  %2964 = vmatpush1.bf16.msra.mxu1 %v18328_v52  ;;  %v18379_v51 = vld [vmem:[#allocation22 + $0xa0] ss:$8 sps:$4 sm:$0xff]   ;;  %v18384_v52 = vld [vmem:[#allocation22 + $0xb4] ss:$8 sps:$4 sm:$0xff]  }
 0x6e9   : > { %2764 = vmatprep.subr.bf16.mxu0 %v18285_v53  ;;  %2965 = vmatprep.subr.bf16.mxu1 %v18333_v54  ;;  %v18382_v53 = vld [vmem:[#allocation22 + $0xb0] ss:$8 sps:$4 sm:$0xff]   ;;  %v18387_v54 = vld [vmem:[#allocation22 + $0xc4] ss:$8 sps:$4 sm:$0xff]  }
 0x6ec   : > { %2765 = vmatpush1.bf16.msra.mxu0 %v18283_v55  ;;  %2966 = vmatpush1.bf16.msra.mxu1 %v18331_v56  ;;  %v18385_v55 = vld [vmem:[#allocation22 + $0xc0] ss:$8 sps:$4 sm:$0xff]   ;;  %v18390_v56 = vld [vmem:[#allocation22 + $0xd4] ss:$8 sps:$4 sm:$0xff]  }
 0x6ed   : > { %2766 = vmatprep.subr.bf16.mxu0 %v18288_v57  ;;  %2967 = vmatprep.subr.bf16.mxu1 %v18336_v58  ;;  %v18388_v57 = vld [vmem:[#allocation22 + $0xd0] ss:$8 sps:$4 sm:$0xff]   ;;  %v18391_v58 = vld [vmem:[#allocation22 + $0xe0] ss:$8 sps:$4 sm:$0xff]  }
 0x6f0   : > { %2767 = vmatpush1.bf16.msra.mxu0 %v18286_v59  ;;  %2968 = vmatpush1.bf16.msra.mxu1 %v18334_v60  ;;  %v18393_v59 = vld [vmem:[#allocation22 + $0xe4] ss:$8 sps:$4 sm:$0xff]   ;;  %v18396_v60 = vld [vmem:[#allocation22 + $0xf4] ss:$8 sps:$4 sm:$0xff]  }
 0x6f1   : > { %2768 = vmatprep.subr.bf16.mxu0 %v18291_v61  ;;  %2969 = vmatprep.subr.bf16.mxu1 %v18339_v62  ;;  %v18394_v61 = vld [vmem:[#allocation22 + $0xf0] ss:$8 sps:$4 sm:$0xff]  }
 0x6f4   : > { %2769 = vmatpush1.bf16.msra.mxu0 %v18289_v63  ;;  %2970 = vmatpush1.bf16.msra.mxu1 %v18337_v0 }
 0x6f5   : > { %2770 = vmatprep.subr.bf16.mxu0 %v18294_v1  ;;  %2971 = vmatprep.subr.bf16.mxu1 %v18342_v2 }
 0x6f8   : > { %2771 = vmatpush1.bf16.msra.mxu0 %v18292_v3  ;;  %2972 = vmatpush1.bf16.msra.mxu1 %v18340_v4 }
 0x6f9   : > { %2772 = vmatprep.subr.bf16.mxu0 %v18297_v6  ;;  %2973 = vmatprep.subr.bf16.mxu1 %v18345_v7 }
 0x6fc   : > { %2773 = vmatpush1.bf16.msra.mxu0 %v18295_v9  ;;  %2974 = vmatpush1.bf16.msra.mxu1 %v18343_v11 }
 0x6fd   : > { %2774 = vmatprep.subr.bf16.mxu0 %v18300_v12  ;;  %2975 = vmatprep.subr.bf16.mxu1 %v18348_v14 }
 0x700   : > { %2775 = vmatpush1.bf16.msra.mxu0 %v18298_v13  ;;  %2976 = vmatpush1.bf16.msra.mxu1 %v18346_v15 }
 0x701   : > { %16150 = vmatprep.subr.msk.bf16.mxu0 %vm2423_vm4, %v22584_v5  ;;  %3225 = vmatprep.subr.bf16.mxu1 %v18351_v16  ;;  %v18354_v5 = vld [vmem:[#allocation22 + $0x14] ss:$8 sps:$4 sm:$0xff]  }
 0x796   : > { %v2464_v17 = vpop.f32.mrb[12].mxu0  ;;  %v2543_v18 = vpop.f32.mrb[12].mxu1 }
 0x797   : > { %v2471_v19 = vpack.c.bf16 %v2464_v17, %v2464_v17  ;;  %v2466_v20 = vpop.f32.mrb[13].mxu0  ;;  %v2545_v21 = vpop.f32.mrb[13].mxu1  ;;  %v2550_v26 = vpack.c.bf16 %v2543_v18, %v2543_v18  ;;  %v3268_v17 = vld [vmem:[#allocation23] sm:$0x3] }
 0x798   : > { %v2472_v22 = vpack.c.bf16 %v2466_v20, %v2466_v20  ;;  %v2551_v23 = vpack.c.bf16 %v2545_v21, %v2545_v21  ;;  %v2547_v24 = vpop.f32.mrb[14].mxu1  ;;  %v2468_v25 = vpop.f32.mrb[14].mxu0  ;;  %v3273_v18 = vrot.slane %v3268_v17, %v22577_v41  ;;  %v3277_v20 = vrot.slane %v3268_v17, %v22580_v43  ;;  %v18437_v17 = vld [vmem:[#allocation31 + $0x70] sm:$0xff]  }
 0x799   : > { %v2548_v27 = vpop.f32.mrb[15].mxu1  ;;  %v2469_v28 = vpop.f32.mrb[15].mxu0 }
 0x79a   : > { %2776 = vmatprep.mubr.bf16.mxu0 %v2551_v23  ;;  %2977 = vmatprep.mubr.bf16.mxu1 %v2472_v22 }
 0x79b   : > { %2777 = vmatmul.mubr.bf16.vlgmr.msra.gmra.mrb[16].mxu0 %v2550_v26  ;;  %2978 = vmatmul.mubr.bf16.vlgmr.msra.gmra.mrb[16].mxu1 %v2471_v19 }
 0x79c   : > { %2991 = vmatpush1.bf16.msra.mxu0 %v22588_v8  ;;  %3022 = vmatprep.mubr.bf16.mxu0 %v21659_v10  ;;  %v18361_v8 = vld [vmem:[#allocation22 + $0x40] ss:$8 sps:$4 sm:$0xff]  }
 0x79d   : > { %3226 = vmatpush1.bf16.msra.mxu1 %v18349_v29 }
 0x79e   : > { %3227 = vmatprep.subr.bf16.mxu1 %v18354_v5 }
 0x7a1   : > { %3228 = vmatpush1.bf16.msra.mxu1 %v18352_v30 }
 0x7a2   : > { %3229 = vmatprep.subr.bf16.mxu1 %v18357_v31 }
 0x7a3   : > { %16151 = vmatmul.mubr.msk.bf16.vlgmr.msra.gmra.mrb[20].mxu0 %vm2419_vm5, %v2986_v32 }
 0x7a4   : > { %3344 = vmatprep.mubr.bf16.mxu0 %v21659_v10 }
 0x7a5   : > { %3230 = vmatpush1.bf16.msra.mxu1 %v18355_v33 }
 0x7a6   : > { %3231 = vmatprep.subr.bf16.mxu1 %v18360_v34 }
 0x7a9   : > { %3232 = vmatpush1.bf16.msra.mxu1 %v18358_v35 }
 0x7aa   : > { %3233 = vmatprep.subr.bf16.mxu1 %v18363_v36 }
 0x7ad   : > { %3234 = vmatpush1.bf16.msra.mxu1 %v18361_v8 }
 0x7ae   : > { %3235 = vmatprep.subr.bf16.mxu1 %v18366_v37 }
 0x7b1   : > { %3236 = vmatpush1.bf16.msra.mxu1 %v18364_v38 }
 0x7b2   : > { %3237 = vmatprep.subr.bf16.mxu1 %v18369_v39 }
 0x7b5   : > { %3238 = vmatpush1.bf16.msra.mxu1 %v18367_v42 }
 0x7b6   : > { %3239 = vmatprep.subr.bf16.mxu1 %v18372_v44 }
 0x7b9   : > { %3240 = vmatpush1.bf16.msra.mxu1 %v18370_v45 }
 0x7ba   : > { %3241 = vmatprep.subr.bf16.mxu1 %v18375_v46  ;;  %v3300_v46 = vld [vmem:[#allocation25] sm:$0x1] }
 0x7bd   : > { %3242 = vmatpush1.bf16.msra.mxu1 %v18373_v47  ;;  %v3738_v47 = vld [vmem:[#allocation29] sm:$0x1] }
 0x7be   : > { %3243 = vmatprep.subr.bf16.mxu1 %v18378_v48  ;;  %v18397_v48 = vld [vmem:[#allocation28 + $0x40] sm:$0xff]  }
 0x7c1   : > { %3244 = vmatpush1.bf16.msra.mxu1 %v18376_v49  ;;  %v3387_v49 = vld [vmem:[#allocation26] sm:$0x1] }
 0x7c2   : > { %3245 = vmatprep.subr.bf16.mxu1 %v18381_v50  ;;  %v18398_v50 = vld [vmem:[#allocation28] sm:$0xff]  }
 0x7c5   : > { %3246 = vmatpush1.bf16.msra.mxu1 %v18379_v51  ;;  %v18399_v51 = vld [vmem:[#allocation28 + $0x48] sm:$0xff]  }
 0x7c6   : > { %3247 = vmatprep.subr.bf16.mxu1 %v18384_v52  ;;  %v18400_v52 = vld [vmem:[#allocation28 + $0x8] sm:$0xff]  }
 0x7c9   : > { %3248 = vmatpush1.bf16.msra.mxu1 %v18382_v53  ;;  %v18401_v53 = vld [vmem:[#allocation28 + $0x50] sm:$0xff]  }
 0x7ca   : > { %3249 = vmatprep.subr.bf16.mxu1 %v18387_v54  ;;  %v18402_v54 = vld [vmem:[#allocation28 + $0x10] sm:$0xff]  }
 0x7cd   : > { %3250 = vmatpush1.bf16.msra.mxu1 %v18385_v55  ;;  %v18403_v55 = vld [vmem:[#allocation28 + $0x58] sm:$0xff]  }
 0x7ce   : > { %3251 = vmatprep.subr.bf16.mxu1 %v18390_v56  ;;  %v18404_v56 = vld [vmem:[#allocation28 + $0x18] sm:$0xff]  }
 0x7d1   : > { %3252 = vmatpush1.bf16.msra.mxu1 %v18388_v57  ;;  %v18405_v57 = vld [vmem:[#allocation28 + $0x60] sm:$0xff]  }
 0x7d2   : > { %3253 = vmatprep.subr.bf16.mxu1 %v18393_v59  ;;  %v18407_v59 = vld [vmem:[#allocation28 + $0x68] sm:$0xff]  }
 0x7d5   : > { %3254 = vmatpush1.bf16.msra.mxu1 %v18391_v58  ;;  %v18406_v58 = vld [vmem:[#allocation28 + $0x20] sm:$0xff]  }
 0x7d6   : > { %3255 = vmatprep.subr.bf16.mxu1 %v18396_v60  ;;  %v18408_v60 = vld [vmem:[#allocation28 + $0x28] sm:$0xff]  }
 0x7d9   : > { %3256 = vmatpush1.bf16.msra.mxu1 %v18394_v61  ;;  %v18409_v61 = vld [vmem:[#allocation28 + $0x70] sm:$0xff]  }
 0x86e   : > { %v2778_v62 = vpop.f32.mrb[16].mxu0  ;;  %v2979_v63 = vpop.f32.mrb[16].mxu1 }
 0x86f   : > { %v2980_v0 = vadd.f32 %v2979_v63, %v2778_v62  ;;  %v2780_v1 = vpop.f32.mrb[17].mxu0  ;;  %v2981_v2 = vpop.f32.mrb[17].mxu1  ;;  %v18410_v62 = vld [vmem:[#allocation28 + $0x30] sm:$0xff]   ;;  %v18411_v63 = vld [vmem:[#allocation28 + $0x78] sm:$0xff]  }
 0x870   : > { %v2982_v3 = vadd.f32 %v2981_v2, %v2780_v1  ;;  %v2782_v4 = vpop.f32.mrb[18].mxu0  ;;  %v2983_v6 = vpop.f32.mrb[18].mxu1  ;;  %v18413_v1 = vld [vmem:[#allocation31 + $0x40] sm:$0xff]  }
 0x871   : > { %v2783_v7 = vpop.f32.mrb[19].mxu0  ;;  %v2984_v9 = vpop.f32.mrb[19].mxu1  ;;  %v18414_v2 = vld [vmem:[#allocation31] sm:$0xff]   ;;  %v18417_v4 = vld [vmem:[#allocation31 + $0x48] sm:$0xff]  }
 0x872   : > { %v18418_v6 = vld [vmem:[#allocation31 + $0x8] sm:$0xff]   ;;  %v18421_v7 = vld [vmem:[#allocation31 + $0x50] sm:$0xff]  }
 0x873   : > { %v18422_v9 = vld [vmem:[#allocation31 + $0x10] sm:$0xff]  }
 0x876   : > { %v3024_v11 = vpop.f32.mrb[20].mxu0 }
 0x877   : > { %v3026_v12 = vpop.f32.mrb[21].mxu0  ;;  %v3031_v15 = vpack.c.bf16 %v3024_v11, %v3024_v11  ;;  %v18425_v11 = vld [vmem:[#allocation31 + $0x58] sm:$0xff]  }
 0x878   : > { %v3032_v13 = vpack.c.bf16 %v3026_v12, %v3026_v12  ;;  %v3028_v14 = vpop.f32.mrb[22].mxu0  ;;  %v18426_v12 = vld [vmem:[#allocation31 + $0x18] sm:$0xff]  }
 0x879   : > { %v3029_v16 = vpop.f32.mrb[23].mxu0  ;;  %v18430_v14 = vld [vmem:[#allocation31 + $0x20] sm:$0xff]  }
 0x87a   : > { %3257 = vmatprep.mubr.bf16.mxu1 %v3032_v13  ;;  %v18429_v13 = vld [vmem:[#allocation31 + $0x60] sm:$0xff]   ;;  %v18434_v16 = vld [vmem:[#allocation31 + $0x28] sm:$0xff]  }
 0x87b   : > { %3258 = vmatmul.mubr.bf16.vlgmr.msra.gmra.mrb[20].mxu1 %v3031_v15  ;;  %v18433_v15 = vld [vmem:[#allocation31 + $0x68] sm:$0xff]  }
 0x87c   : > { %3774 = vmatprep.mubr.bf16.mxu1 %v21659_v10 }
 0x94e   : > { %v3259_v19 = vpop.f32.mrb[20].mxu1 }
 0x94f   : > { %v3266_v21 = vadd.f32 %v3259_v19, %v2980_v0  ;;  %v3261_v22 = vpop.f32.mrb[21].mxu1  ;;  %v18412_v0 = vld [vmem:[#allocation28 + $0x38] sm:$0xff]  }
 0x950   : > { %v3267_v23 = vadd.f32 %v3261_v22, %v2982_v3  ;;  %v3263_v24 = vpop.f32.mrb[22].mxu1  ;;  %v18415_v3 = vld [vmem:[%s23238_s1 + $0x40] sm:$0xff]  }
 0x951   : > { %v3280_v25 = vadd.f32 %v3273_v18, %v3266_v21  ;;  %v3264_v26 = vpop.f32.mrb[23].mxu1  ;;  %v18438_v18 = vld [vmem:[#allocation31 + $0x30] sm:$0xff]   ;;  %v18441_v19 = vld [vmem:[#allocation31 + $0x78] sm:$0xff]  }
 0x952   : > { %v3281_v27 = vadd.f32 %v3277_v20, %v3267_v23  ;;  %v18442_v20 = vld [vmem:[#allocation31 + $0x38] sm:$0xff]  }
 0x953   : > { %v3284_v28 = vmin.f32 %v3280_v25, 0.0  ;;  %vm3282_vm6 = vcmp.gt.f32.partialorder %v3280_v25, 0.0 }
 0x954   : > { %v3285_v29 = vmin.f32 %v3281_v27, 0.0  ;;  %vm3283_vm7 = vcmp.gt.f32.partialorder %v3281_v27, 0.0 }
 0x955   : > { %v3286_v5 = vmul.f32 1.442695, %v3284_v28 }
 0x956   : > { %v3288_v30 = vmul.f32 1.442695, %v3285_v29 }
 0x957   : > { %20527 = vpow2.f32 %v3286_v5 }
 0x958   : > { %20529 = vpow2.f32 %v3288_v30 }
 0x961   : > { %v20528_v31 = vpop.eup %20527 }
 0x962   : > { %v20530_v32 = vpop.eup %20529  ;;  %v16184_v33 = vadd.f32 -1.0, %v20528_v31 }
 0x963   : > { %v16185_v34 = vadd.f32 -1.0, %v20530_v32 }
 0x964   : > { %v3292_v35 = vmul.f32 1.6732632, %v16184_v33 }
 0x965   : > { %v3293_v36 = vmul.f32 1.6732632, %v16185_v34  ;;  %v18416_v34 = vld [vmem:[%s23238_s1] sm:$0xff]  }
 0x966   : > { %v3294_v8 = vsel %vm3282_vm6, %v3280_v25, %v3292_v35 }
 0x967   : > { %v3295_v37 = vsel %vm3283_vm7, %v3281_v27, %v3293_v36  ;;  %v3296_v38 = vmul.f32 1.050701, %v3294_v8  ;;  %v18419_v8 = vld [vmem:[%s23238_s1 + $0x48] sm:$0xff]  }
 0x968   : > { %v3297_v39 = vmul.f32 1.050701, %v3295_v37 }
 0x969   : > { %v3298_v42 = vpack.c.bf16 %v3296_v38, %v3296_v38  ;;  %v18420_v38 = vld [vmem:[%s23238_s1 + $0x8] sm:$0xff]  }
 0x96a   : > { %v3299_v44 = vpack.c.bf16 %v3297_v39, %v3297_v39  ;;  %v18423_v39 = vld [vmem:[%s23238_s1 + $0x50] sm:$0xff]  }
 0x96b   : > { %v3307_v45 = vsel %vm3305_vm8, %v3298_v42, 0  ;;  %v18424_v42 = vld [vmem:[%s23238_s1 + $0x10] sm:$0xff]  }
 0x96c   : > { %16186 = vmatprep.subr.msk.bf16.mxu0 %vm3305_vm8, %v3299_v44  ;;  %16222 = vmatprep.subr.msk.bf16.mxu1 %vm3305_vm8, %v3299_v44 }
 0x96d   : > { %3313 = vmatpush1.bf16.msra.mxu0 %v3307_v45  ;;  %3743 = vmatpush1.bf16.msra.mxu1 %v3307_v45 }
 0x96e   : > { %16188 = vmatprep.subr.msk.bf16.mxu0 %vm3305_vm8, %v3299_v44  ;;  %17736 = vmatprep.subr.bf16.mxu1 %v18413_v1  ;;  %v18427_v44 = vld [vmem:[%s23238_s1 + $0x58] sm:$0xff]   ;;  %v18462_v1 = vld [vmem:[#allocation34 + $0x54] ss:$8 sps:$4 sm:$0xff]  }
 0x970   : > { %16187 = vmatmul.mubr.msk.bf16.vlgmr.msra.gmra.mrb[24].mxu0 %vm3301_vm9, %v3300_v46  ;;  %16223 = vmatmul.mubr.msk.bf16.vlgmr.msra.gmra.mrb[24].mxu1 %vm3301_vm9, %v3738_v47  ;;  %v18431_v46 = vld [vmem:[%s23238_s1 + $0x60] sm:$0xff]  }
 0x971   : > { %3392 = vmatpush1.bf16.msra.mxu0 %v3307_v45  ;;  %3423 = vmatprep.mubr.bf16.mxu0 %v21659_v10  ;;  %v18428_v45 = vld [vmem:[%s23238_s1 + $0x18] sm:$0xff]   ;;  %v18432_v47 = vld [vmem:[%s23238_s1 + $0x20] sm:$0xff]  }
 0x972   : > { %17692 = vmatprep.subr.bf16.mxu0 %v18397_v48  ;;  %17737 = vmatpush3.bf16.msra.mxu1 %v18414_v2  ;;  %v18435_v48 = vld [vmem:[%s23238_s1 + $0x68] sm:$0xff]  }
 0x973   : > { %17738 = vmatprep.subr.bf16.mxu1 %v18417_v4  ;;  %v18460_v2 = vld [vmem:[#allocation34 + $0x50] ss:$8 sps:$4 sm:$0xff]   ;;  %v18463_v4 = vld [vmem:[#allocation34 + $0x60] ss:$8 sps:$4 sm:$0xff]  }
 0x976   : > { %17739 = vmatpush3.bf16.msra.mxu1 %v18418_v6  ;;  %v18468_v6 = vld [vmem:[#allocation34 + $0x74] ss:$8 sps:$4 sm:$0xff]  }
 0x977   : > { %17740 = vmatprep.subr.bf16.mxu1 %v18421_v7  ;;  %v18466_v7 = vld [vmem:[#allocation34 + $0x70] ss:$8 sps:$4 sm:$0xff]  }
 0x978   : > { %16189 = vmatmul.mubr.msk.bf16.vlgmr.msra.gmra.mrb[28].mxu0 %vm3301_vm9, %v3387_v49  ;;  %v18436_v49 = vld [vmem:[%s23238_s1 + $0x28] sm:$0xff]  }
 0x979   : > { %17693 = vmatpush3.bf16.msra.mxu0 %v18398_v50  ;;  %v18439_v50 = vld [vmem:[%s23238_s1 + $0x70] sm:$0xff]  }
 0x97a   : > { %17694 = vmatprep.subr.bf16.mxu0 %v18399_v51  ;;  %17741 = vmatpush3.bf16.msra.mxu1 %v18422_v9  ;;  %v18440_v51 = vld [vmem:[%s23238_s1 + $0x30] sm:$0xff]  }
 0x97b   : > { %17742 = vmatprep.subr.bf16.mxu1 %v18425_v11 }
 0x97d   : > { %17695 = vmatpush3.bf16.msra.mxu0 %v18400_v52  ;;  %v18443_v52 = vld [vmem:[%s23238_s1 + $0x78] sm:$0xff]  }
 0x97e   : > { %17696 = vmatprep.subr.bf16.mxu0 %v18401_v53  ;;  %17743 = vmatpush3.bf16.msra.mxu1 %v18426_v12  ;;  %v18444_v53 = vld [vmem:[%s23238_s1 + $0x38] sm:$0xff]  }
 0x97f   : > { %17744 = vmatprep.subr.bf16.mxu1 %v18429_v13 }
 0x981   : > { %17697 = vmatpush3.bf16.msra.mxu0 %v18402_v54 }
 0x982   : > { %17698 = vmatprep.subr.bf16.mxu0 %v18403_v55  ;;  %17745 = vmatpush3.bf16.msra.mxu1 %v18430_v14  ;;  %v18447_v55 = vld [vmem:[#allocation34 + $0x4] ss:$8 sps:$4 sm:$0xff]  }
 0x983   : > { %17746 = vmatprep.subr.bf16.mxu1 %v18433_v15 }
 0x985   : > { %17699 = vmatpush3.bf16.msra.mxu0 %v18404_v56  ;;  %v18445_v56 = vld [vmem:[#allocation34] ss:$8 sps:$4 sm:$0xff]  }
 0x986   : > { %17700 = vmatprep.subr.bf16.mxu0 %v18405_v57  ;;  %17747 = vmatpush3.bf16.msra.mxu1 %v18434_v16  ;;  %v18450_v57 = vld [vmem:[#allocation34 + $0x14] ss:$8 sps:$4 sm:$0xff]  }
 0x987   : > { %17748 = vmatprep.subr.bf16.mxu1 %v18437_v17 }
 0x989   : > { %17701 = vmatpush3.bf16.msra.mxu0 %v18406_v58  ;;  %v18448_v58 = vld [vmem:[#allocation34 + $0x10] ss:$8 sps:$4 sm:$0xff]  }
 0x98a   : > { %17702 = vmatprep.subr.bf16.mxu0 %v18407_v59  ;;  %17749 = vmatpush3.bf16.msra.mxu1 %v18438_v18  ;;  %v18453_v59 = vld [vmem:[#allocation34 + $0x24] ss:$8 sps:$4 sm:$0xff]  }
 0x98b   : > { %17750 = vmatprep.subr.bf16.mxu1 %v18441_v19 }
 0x98d   : > { %17703 = vmatpush3.bf16.msra.mxu0 %v18408_v60  ;;  %v18451_v60 = vld [vmem:[#allocation34 + $0x20] ss:$8 sps:$4 sm:$0xff]  }
 0x98e   : > { %17704 = vmatprep.subr.bf16.mxu0 %v18409_v61  ;;  %17751 = vmatpush3.bf16.msra.mxu1 %v18442_v20  ;;  %v18456_v61 = vld [vmem:[#allocation34 + $0x34] ss:$8 sps:$4 sm:$0xff]  }
 0x991   : > { %17705 = vmatpush3.bf16.msra.mxu0 %v18410_v62  ;;  %v18454_v62 = vld [vmem:[#allocation34 + $0x30] ss:$8 sps:$4 sm:$0xff]  }
 0x992   : > { %17706 = vmatprep.subr.bf16.mxu0 %v18411_v63  ;;  %v18459_v63 = vld [vmem:[#allocation34 + $0x44] ss:$8 sps:$4 sm:$0xff]  }
 0x995   : > { %17707 = vmatpush3.bf16.msra.mxu0 %v18412_v0  ;;  %v18457_v0 = vld [vmem:[#allocation34 + $0x40] ss:$8 sps:$4 sm:$0xff]  }
 0x996   : > { %17714 = vmatprep.subr.bf16.mxu0 %v18415_v3  ;;  %v18465_v3 = vld [vmem:[#allocation34 + $0x64] ss:$8 sps:$4 sm:$0xff]  }
 0xa43   : > { %v3346_v21 = vpop.f32.mrb[24].mxu0  ;;  %v3776_v22 = vpop.f32.mrb[24].mxu1 }
 0xa44   : > { %v3348_v23 = vpop.f32.mrb[25].mxu0  ;;  %v3783_v24 = vpack.c.bf16 %v3776_v22, %v3776_v22  ;;  %v3778_v25 = vpop.f32.mrb[25].mxu1  ;;  %v3353_v54 = vpack.c.bf16 %v3346_v21, %v3346_v21 }
 0xa45   : > { %v3350_v26 = vpop.f32.mrb[26].mxu0  ;;  %v3784_v27 = vpack.c.bf16 %v3778_v25, %v3778_v25  ;;  %v3780_v28 = vpop.f32.mrb[26].mxu1  ;;  %v3354_v37 = vpack.c.bf16 %v3348_v23, %v3348_v23 }
 0xa46   : > { %v3351_v29 = vpop.f32.mrb[27].mxu0  ;;  %v3781_v5 = vpop.f32.mrb[27].mxu1  ;;  %v16240_v26 = vld [vmem:[#allocation32] ss:$0 sm:$0xff] }
 0xa47   : > { %3945 = vmatprep.mubr.bf16.mxu1 %v3784_v27 }
 0xa48   : > { %3946 = vmatmul.mubr.bf16.vlgmr.msra.gmra.mrb[28].mxu1 %v3783_v24 }
 0xa49   : > { %4182 = vmatprep.mubr.bf16.mxu1 %v21659_v10 }
 0xa4b   : > { %v3425_v30 = vpop.f32.mrb[28].mxu0 }
 0xa4c   : > { %v3427_v31 = vpop.f32.mrb[29].mxu0  ;;  %v3432_v35 = vpack.c.bf16 %v3425_v30, %v3425_v30 }
 0xa4d   : > { %v3433_v32 = vpack.c.bf16 %v3427_v31, %v3427_v31  ;;  %v3429_v33 = vpop.f32.mrb[30].mxu0 }
 0xa4e   : > { %v3430_v36 = vpop.f32.mrb[31].mxu0 }
 0xa4f   : > { %3594 = vmatprep.mubr.bf16.mxu0 %v3433_v32  ;;  %v18469_v36 = vld [vmem:[#allocation38] ss:$16 sps:$4 sm:$0xff]  }
 0xa50   : > { %3595 = vmatmul.mubr.bf16.vlgmr.msra.gmra.mrb[32].mxu0 %v3432_v35 }
 0xa51   : > { %17715 = vmatpush3.bf16.msra.mxu0 %v18416_v34  ;;  %3730 = vmatprep.mubr.bf16.mxu0 %v3354_v37  ;;  %v18477_v37 = vld [vmem:[#allocation38 + $0x24] ss:$16 sps:$4 sm:$0xff]  }
 0xa52   : > { %17716 = vmatprep.subr.bf16.mxu0 %v18419_v8  ;;  %v18471_v8 = vld [vmem:[#allocation38 + $0x4] ss:$16 sps:$4 sm:$0xff]  }
 0xa55   : > { %17717 = vmatpush3.bf16.msra.mxu0 %v18420_v38  ;;  %v18475_v38 = vld [vmem:[#allocation38 + $0x20] ss:$16 sps:$4 sm:$0xff]  }
 0xa56   : > { %17718 = vmatprep.subr.bf16.mxu0 %v18423_v39  ;;  %v18483_v39 = vld [vmem:[#allocation38 + $0x44] ss:$16 sps:$4 sm:$0xff]  }
 0xa59   : > { %17719 = vmatpush3.bf16.msra.mxu0 %v18424_v42  ;;  %v18481_v42 = vld [vmem:[#allocation38 + $0x40] ss:$16 sps:$4 sm:$0xff]  }
 0xa5a   : > { %17720 = vmatprep.subr.bf16.mxu0 %v18427_v44  ;;  %v18489_v44 = vld [vmem:[#allocation38 + $0x64] ss:$16 sps:$4 sm:$0xff]  }
 0xa5d   : > { %17721 = vmatpush3.bf16.msra.mxu0 %v18428_v45  ;;  %v18487_v45 = vld [vmem:[#allocation38 + $0x60] ss:$16 sps:$4 sm:$0xff]  }
 0xa5e   : > { %17722 = vmatprep.subr.bf16.mxu0 %v18431_v46  ;;  %v18495_v46 = vld [vmem:[#allocation38 + $0x84] ss:$16 sps:$4 sm:$0xff]  }
 0xa61   : > { %17723 = vmatpush3.bf16.msra.mxu0 %v18432_v47  ;;  %v18493_v47 = vld [vmem:[#allocation38 + $0x80] ss:$16 sps:$4 sm:$0xff]  }
 0xa62   : > { %17724 = vmatprep.subr.bf16.mxu0 %v18435_v48  ;;  %v18501_v48 = vld [vmem:[#allocation38 + $0xa4] ss:$16 sps:$4 sm:$0xff]  }
 0xa65   : > { %17725 = vmatpush3.bf16.msra.mxu0 %v18436_v49  ;;  %v18499_v49 = vld [vmem:[#allocation38 + $0xa0] ss:$16 sps:$4 sm:$0xff]  }
 0xa66   : > { %17726 = vmatprep.subr.bf16.mxu0 %v18439_v50  ;;  %v18507_v50 = vld [vmem:[#allocation38 + $0xc4] ss:$16 sps:$4 sm:$0xff]  }
 0xa69   : > { %17727 = vmatpush3.bf16.msra.mxu0 %v18440_v51  ;;  %v18505_v51 = vld [vmem:[#allocation38 + $0xc0] ss:$16 sps:$4 sm:$0xff]  }
 0xa6a   : > { %17728 = vmatprep.subr.bf16.mxu0 %v18443_v52  ;;  %v18513_v52 = vld [vmem:[#allocation38 + $0xe4] ss:$16 sps:$4 sm:$0xff]  }
 0xa6d   : > { %17729 = vmatpush3.bf16.msra.mxu0 %v18444_v53  ;;  %v18511_v53 = vld [vmem:[#allocation38 + $0xe0] ss:$16 sps:$4 sm:$0xff]  }
 0xa6e   : > { %4079 = vmatprep.subr.bf16.mxu0 %v18447_v55  ;;  %v18517_v55 = vld [vmem:[#allocation38 + $0x100] ss:$16 sps:$4 sm:$0xff]  }
 0xa70   : > { %3731 = vmatmul.mubr.bf16.vlgmr.msra.gmra.mrb[36].mxu0 %v3353_v54  ;;  %v18519_v54 = vld [vmem:[#allocation38 + $0x104] ss:$16 sps:$4 sm:$0xff]  }
 0xa71   : > { %4111 = vmatprep.mubr.bf16.mxu0 %v21659_v10  ;;  %4080 = vmatpush1.bf16.msra.mxu0 %v18445_v56  ;;  %v18525_v56 = vld [vmem:[#allocation38 + $0x124] ss:$16 sps:$4 sm:$0xff]  }
 0xa72   : > { %4081 = vmatprep.subr.bf16.mxu0 %v18450_v57  ;;  %v18523_v57 = vld [vmem:[#allocation38 + $0x120] ss:$16 sps:$4 sm:$0xff]  }
 0xa75   : > { %4082 = vmatpush1.bf16.msra.mxu0 %v18448_v58  ;;  %v18531_v58 = vld [vmem:[#allocation38 + $0x144] ss:$16 sps:$4 sm:$0xff]  }
 0xa76   : > { %4083 = vmatprep.subr.bf16.mxu0 %v18453_v59  ;;  %v18529_v59 = vld [vmem:[#allocation38 + $0x140] ss:$16 sps:$4 sm:$0xff]  }
 0xa79   : > { %4084 = vmatpush1.bf16.msra.mxu0 %v18451_v60  ;;  %v18537_v60 = vld [vmem:[#allocation38 + $0x164] ss:$16 sps:$4 sm:$0xff]  }
 0xa7a   : > { %4085 = vmatprep.subr.bf16.mxu0 %v18456_v61  ;;  %v18535_v61 = vld [vmem:[#allocation38 + $0x160] ss:$16 sps:$4 sm:$0xff]  }
 0xa7d   : > { %4086 = vmatpush1.bf16.msra.mxu0 %v18454_v62  ;;  %v18543_v62 = vld [vmem:[#allocation38 + $0x184] ss:$16 sps:$4 sm:$0xff]  }
 0xa7e   : > { %4087 = vmatprep.subr.bf16.mxu0 %v18459_v63  ;;  %v18541_v63 = vld [vmem:[#allocation38 + $0x180] ss:$16 sps:$4 sm:$0xff]  }
 0xa81   : > { %4088 = vmatpush1.bf16.msra.mxu0 %v18457_v0  ;;  %v3987_v0 = vld [vmem:[#allocation35] sm:$0x3] }
 0xa82   : > { %4089 = vmatprep.subr.bf16.mxu0 %v18462_v1  ;;  %v3992_v1 = vrot.slane %v3987_v0, %v22577_v41 }
 0xa85   : > { %4090 = vmatpush1.bf16.msra.mxu0 %v18460_v2  ;;  %v3996_v2 = vrot.slane %v3987_v0, %v22580_v43  ;;  %v18553_v0 = vld [vmem:[#allocation38 + $0x1c0] ss:$16 sps:$4 sm:$0xff]  }
 0xa86   : > { %4091 = vmatprep.subr.bf16.mxu0 %v18465_v3 }
 0xa89   : > { %4092 = vmatpush1.bf16.msra.mxu0 %v18463_v4 }
 0xa8a   : > { %4093 = vmatprep.subr.bf16.mxu0 %v18468_v6 }
 0xa8d   : > { %4094 = vmatpush1.bf16.msra.mxu0 %v18466_v7 }
 0xa8e   : > { %4688 = vmatprep.subr.bf16.mxu0 %v18471_v8  ;;  %v18490_v8 = vld [vmem:[#allocation38 + $0x68] ss:$16 sps:$4 sm:$0xff]  }
 0xb1b   : > { %v17752_v9 = vpop.f32.mrb[28].mxu1 }
 0xb1c   : > { %v17753_v11 = vpop.f32.mrb[29].mxu1 }
 0xb1d   : > { %v17754_v12 = vadd.f32 %v17753_v11, %v17752_v9  ;;  %v17755_v13 = vpop.f32.mrb[30].mxu1 }
 0xb1e   : > { %v17756_v14 = vpop.f32.mrb[31].mxu1 }
 0xb23   : > { %v17708_v15 = vpop.f32.mrb[32].mxu0 }
 0xb24   : > { %v17709_v16 = vpop.f32.mrb[33].mxu0 }
 0xb25   : > { %v17710_v17 = vadd.f32 %v17709_v16, %v17708_v15  ;;  %v17711_v18 = vpop.f32.mrb[34].mxu0 }
 0xb26   : > { %v17712_v19 = vpop.f32.mrb[35].mxu0 }
 0xb43   : > { %v17730_v20 = vpop.f32.mrb[36].mxu0 }
 0xb44   : > { %v17731_v21 = vpop.f32.mrb[37].mxu0 }
 0xb45   : > { %v17732_v22 = vadd.f32 %v17731_v21, %v17730_v20  ;;  %v17733_v23 = vpop.f32.mrb[38].mxu0 }
 0xb46   : > { %v17734_v24 = vpop.f32.mrb[39].mxu0 }
 0xb47   : > { %v3733_v25 = vadd.f32 %v17732_v22, %v17710_v17 }
 0xb49   : > { %v3953_v27 = vadd.f32 %v17754_v12, %v3733_v25 }
 0xb4b   : > { %v3961_v28 = vadd.f32 %v16240_v26, %v3953_v27 }
 0xb4d   : > { %v3963_v29 = vmin.f32 %v3961_v28, 0.0  ;;  %vm3962_vm10 = vcmp.gt.f32.partialorder %v3961_v28, 0.0 }
 0xb4f   : > { %v3964_v5 = vmul.f32 1.442695, %v3963_v29  ;;  %v4138_v29 = vld [vmem:[%s23239_s9] sm:$0x3]  ;;  %s23248_s9 = sld [smem:[#allocation110_spill]] }
 0xb51   : > { %20531 = vpow2.f32 %v3964_v5  ;;  %v18474_v5 = vld [vmem:[#allocation38 + $0xc] ss:$16 sps:$4 sm:$0xff]  }
 0xb5b   : > { %v20532_v30 = vpop.eup %20531 }
 0xb5c   : > { %v16241_v31 = vadd.f32 -1.0, %v20532_v30  ;;  %v4257_v30 = vld [vmem:[%s23240_s4] sm:$0x3]  ;;  %s23249_s4 = sld [smem:[#allocation112_spill]] }
 0xb5e   : > { %v3967_v32 = vmul.f32 1.6732632, %v16241_v31  ;;  %v18472_v31 = vld [vmem:[#allocation38 + $0x8] ss:$16 sps:$4 sm:$0xff]  }
 0xb60   : > { %v3968_v33 = vsel %vm3962_vm10, %v3961_v28, %v3967_v32  ;;  %v18480_v32 = vld [vmem:[#allocation38 + $0x2c] ss:$16 sps:$4 sm:$0xff]  }
 0xb61   : > { %v3969_v34 = vmul.f32 1.050701, %v3968_v33  ;;  %v18478_v33 = vld [vmem:[#allocation38 + $0x28] ss:$16 sps:$4 sm:$0xff]  }
 0xb63   : > { %v3970_v35 = vpack.c.bf16 %v3969_v34, %v3969_v34  ;;  %v18486_v34 = vld [vmem:[#allocation38 + $0x4c] ss:$16 sps:$4 sm:$0xff]  }
 0xb65   : > { %4112 = vmatmul.mubr.bf16.vlgmr.msra.gmra.mrb[40].mxu0 %v3970_v35  ;;  %v18484_v35 = vld [vmem:[#allocation38 + $0x48] ss:$16 sps:$4 sm:$0xff]  }
 0xb66   : > { %4689 = vmatpush1.bf16.msra.mxu0 %v18469_v36  ;;  %v18492_v36 = vld [vmem:[#allocation38 + $0x6c] ss:$16 sps:$4 sm:$0xff]  }
 0xb67   : > { %4690 = vmatprep.subr.bf16.mxu0 %v18477_v37  ;;  %v18498_v37 = vld [vmem:[#allocation38 + $0x8c] ss:$16 sps:$4 sm:$0xff]  }
 0xb6a   : > { %4691 = vmatpush1.bf16.msra.mxu0 %v18475_v38  ;;  %v18496_v38 = vld [vmem:[#allocation38 + $0x88] ss:$16 sps:$4 sm:$0xff]  }
 0xb6b   : > { %4692 = vmatprep.subr.bf16.mxu0 %v18483_v39  ;;  %v18504_v39 = vld [vmem:[#allocation38 + $0xac] ss:$16 sps:$4 sm:$0xff]  }
 0xb6e   : > { %4693 = vmatpush1.bf16.msra.mxu0 %v18481_v42  ;;  %v18502_v42 = vld [vmem:[#allocation38 + $0xa8] ss:$16 sps:$4 sm:$0xff]  }
 0xb6f   : > { %4694 = vmatprep.subr.bf16.mxu0 %v18489_v44  ;;  %v18510_v44 = vld [vmem:[#allocation38 + $0xcc] ss:$16 sps:$4 sm:$0xff]  }
 0xb72   : > { %4695 = vmatpush1.bf16.msra.mxu0 %v18487_v45  ;;  %v18508_v45 = vld [vmem:[#allocation38 + $0xc8] ss:$16 sps:$4 sm:$0xff]  }
 0xb73   : > { %4696 = vmatprep.subr.bf16.mxu0 %v18495_v46  ;;  %v18516_v46 = vld [vmem:[#allocation38 + $0xec] ss:$16 sps:$4 sm:$0xff]  }
 0xb76   : > { %4697 = vmatpush1.bf16.msra.mxu0 %v18493_v47  ;;  %v18514_v47 = vld [vmem:[#allocation38 + $0xe8] ss:$16 sps:$4 sm:$0xff]  }
 0xb77   : > { %4698 = vmatprep.subr.bf16.mxu0 %v18501_v48  ;;  %v18522_v48 = vld [vmem:[#allocation38 + $0x10c] ss:$16 sps:$4 sm:$0xff]  }
 0xb7a   : > { %4699 = vmatpush1.bf16.msra.mxu0 %v18499_v49  ;;  %v18520_v49 = vld [vmem:[#allocation38 + $0x108] ss:$16 sps:$4 sm:$0xff]  }
 0xb7b   : > { %4700 = vmatprep.subr.bf16.mxu0 %v18507_v50  ;;  %v18528_v50 = vld [vmem:[#allocation38 + $0x12c] ss:$16 sps:$4 sm:$0xff]  }
 0xb7e   : > { %4701 = vmatpush1.bf16.msra.mxu0 %v18505_v51  ;;  %v18526_v51 = vld [vmem:[#allocation38 + $0x128] ss:$16 sps:$4 sm:$0xff]  }
 0xb7f   : > { %4702 = vmatprep.subr.bf16.mxu0 %v18513_v52  ;;  %v18534_v52 = vld [vmem:[#allocation38 + $0x14c] ss:$16 sps:$4 sm:$0xff]  }
 0xb82   : > { %4703 = vmatpush1.bf16.msra.mxu0 %v18511_v53  ;;  %v18532_v53 = vld [vmem:[#allocation38 + $0x148] ss:$16 sps:$4 sm:$0xff]  }
 0xb83   : > { %4704 = vmatprep.subr.bf16.mxu0 %v18519_v54  ;;  %v18540_v54 = vld [vmem:[#allocation38 + $0x16c] ss:$16 sps:$4 sm:$0xff]  }
 0xb86   : > { %4705 = vmatpush1.bf16.msra.mxu0 %v18517_v55  ;;  %v18538_v55 = vld [vmem:[#allocation38 + $0x168] ss:$16 sps:$4 sm:$0xff]  }
 0xb87   : > { %4706 = vmatprep.subr.bf16.mxu0 %v18525_v56  ;;  %v18546_v56 = vld [vmem:[#allocation38 + $0x18c] ss:$16 sps:$4 sm:$0xff]  }
 0xb8a   : > { %4707 = vmatpush1.bf16.msra.mxu0 %v18523_v57  ;;  %v18544_v57 = vld [vmem:[#allocation38 + $0x188] ss:$16 sps:$4 sm:$0xff]  }
 0xb8b   : > { %4708 = vmatprep.subr.bf16.mxu0 %v18531_v58  ;;  %v18549_v58 = vld [vmem:[#allocation38 + $0x1a4] ss:$16 sps:$4 sm:$0xff]  }
 0xb8e   : > { %4709 = vmatpush1.bf16.msra.mxu0 %v18529_v59  ;;  %v18552_v59 = vld [vmem:[#allocation38 + $0x1ac] ss:$16 sps:$4 sm:$0xff]  }
 0xb8f   : > { %4710 = vmatprep.subr.bf16.mxu0 %v18537_v60  ;;  %v18547_v60 = vld [vmem:[#allocation38 + $0x1a0] ss:$16 sps:$4 sm:$0xff]  }
 0xb92   : > { %4711 = vmatpush1.bf16.msra.mxu0 %v18535_v61  ;;  %v18550_v61 = vld [vmem:[#allocation38 + $0x1a8] ss:$16 sps:$4 sm:$0xff]  }
 0xb93   : > { %4712 = vmatprep.subr.bf16.mxu0 %v18543_v62  ;;  %v18555_v62 = vld [vmem:[#allocation38 + $0x1c4] ss:$16 sps:$4 sm:$0xff]  }
 0xb96   : > { %4713 = vmatpush1.bf16.msra.mxu0 %v18541_v63  ;;  %v18558_v63 = vld [vmem:[#allocation38 + $0x1cc] ss:$16 sps:$4 sm:$0xff]  }
 0xb97   : > { %4714 = vmatprep.subr.bf16.mxu0 %v18549_v58  ;;  %v18616_v58 = vld [vmem:[#allocation37 + $0x108] ss:$16 sps:$4 sm:$0xff]  }
 0xb9a   : > { %4715 = vmatpush1.bf16.msra.mxu0 %v18547_v60  ;;  %v18624_v60 = vld [vmem:[#allocation37 + $0x12c] ss:$16 sps:$4 sm:$0xff]  }
 0xb9b   : > { %4716 = vmatprep.subr.bf16.mxu0 %v18555_v62  ;;  %v18622_v62 = vld [vmem:[#allocation37 + $0x128] ss:$16 sps:$4 sm:$0xff]  }
 0xb9e   : > { %4717 = vmatpush1.bf16.msra.mxu0 %v18553_v0  ;;  %v18630_v0 = vld [vmem:[#allocation37 + $0x14c] ss:$16 sps:$4 sm:$0xff]  }
 0xc38   : > { %v4113_v3 = vpop.f32.mrb[40].mxu0 }
 0xc39   : > { %v4114_v4 = vadd.f32 %v4113_v3, %v3992_v1  ;;  %v4115_v6 = vpop.f32.mrb[41].mxu0  ;;  %v18556_v1 = vld [vmem:[#allocation38 + $0x1c8] ss:$16 sps:$4 sm:$0xff]   ;;  %v18564_v3 = vld [vmem:[#allocation38 + $0x1ec] ss:$16 sps:$4 sm:$0xff]  }
 0xc3a   : > { %v4116_v7 = vadd.f32 %v4115_v6, %v3996_v2  ;;  %v4117_v9 = vpop.f32.mrb[42].mxu0  ;;  %v18561_v2 = vld [vmem:[#allocation38 + $0x1e4] ss:$16 sps:$4 sm:$0xff]   ;;  %v18562_v6 = vld [vmem:[#allocation38 + $0x1e8] ss:$16 sps:$4 sm:$0xff]  }
 0xc3b   : > { %v4122_v11 = vmin.f32 %v4114_v4, 0.0  ;;  %v4118_v12 = vpop.f32.mrb[43].mxu0  ;;  %vm4120_vm11 = vcmp.gt.f32.partialorder %v4114_v4, 0.0  ;;  %4718 = vmatprep.subr.bf16.mxu0 %v18561_v2  ;;  %v18570_v9 = vld [vmem:[#allocation37 + $0xc] ss:$16 sps:$4 sm:$0xff]  }
 0xc3c   : > { %v4123_v13 = vmin.f32 %v4116_v7, 0.0  ;;  %vm4121_vm12 = vcmp.gt.f32.partialorder %v4116_v7, 0.0  ;;  %v18628_v2 = vld [vmem:[#allocation37 + $0x148] ss:$16 sps:$4 sm:$0xff]  }
 0xc3d   : > { %v4124_v14 = vmul.f32 1.442695, %v4122_v11 }
 0xc3e   : > { %v4126_v15 = vmul.f32 1.442695, %v4123_v13 }
 0xc3f   : > { %20533 = vpow2.f32 %v4124_v14 }
 0xc40   : > { %20535 = vpow2.f32 %v4126_v15 }
 0xc49   : > { %v20534_v16 = vpop.eup %20533 }
 0xc4a   : > { %v20536_v17 = vpop.eup %20535  ;;  %v16258_v18 = vadd.f32 -1.0, %v20534_v16 }
 0xc4b   : > { %v16259_v19 = vadd.f32 -1.0, %v20536_v17 }
 0xc4c   : > { %v4130_v20 = vmul.f32 1.6732632, %v16258_v18 }
 0xc4d   : > { %v4131_v21 = vmul.f32 1.6732632, %v16259_v19  ;;  %v18565_v19 = vld [vmem:[#allocation37] ss:$16 sps:$4 sm:$0xff]  }
 0xc4e   : > { %v4132_v22 = vsel %vm4120_vm11, %v4114_v4, %v4130_v20  ;;  %v18559_v4 = vld [vmem:[#allocation38 + $0x1e0] ss:$16 sps:$4 sm:$0xff]   ;;  %v18568_v20 = vld [vmem:[#allocation37 + $0x8] ss:$16 sps:$4 sm:$0xff]  }
 0xc4f   : > { %v4134_v23 = vmul.f32 1.050701, %v4132_v22  ;;  %v4133_v24 = vsel %vm4121_vm12, %v4116_v7, %v4131_v21  ;;  %4719 = vmatpush1.bf16.msra.mxu0 %v18559_v4  ;;  %v18567_v7 = vld [vmem:[#allocation37 + $0x4] ss:$16 sps:$4 sm:$0xff]   ;;  %v18636_v4 = vld [vmem:[#allocation37 + $0x16c] ss:$16 sps:$4 sm:$0xff]  }
 0xc50   : > { %v4135_v25 = vmul.f32 1.050701, %v4133_v24  ;;  %5090 = vmatprep.subr.bf16.mxu0 %v18567_v7  ;;  %v18576_v24 = vld [vmem:[#allocation37 + $0x2c] ss:$16 sps:$4 sm:$0xff]   ;;  %v18634_v7 = vld [vmem:[#allocation37 + $0x168] ss:$16 sps:$4 sm:$0xff]  }
 0xc51   : > { %v4136_v26 = vpack.c.bf16 %v4134_v23, %v4134_v23  ;;  %v18573_v23 = vld [vmem:[#allocation37 + $0x24] ss:$16 sps:$4 sm:$0xff]  }
 0xc52   : > { %v22666_v27 = vpack.c.bf16 %v4135_v25, %v4135_v25 }
 0xc53   : > { %v22669_v28 = vsel %vm4143_vm13, %v4136_v26, 0  ;;  %v18571_v26 = vld [vmem:[#allocation37 + $0x20] ss:$16 sps:$4 sm:$0xff]  }
 0xc54   : > { %16260 = vmatprep.subr.msk.bf16.mxu1 %vm4143_vm13, %v22666_v27 }
 0xc55   : > { %4151 = vmatpush1.bf16.msra.mxu1 %v22669_v28 }
 0xc56   : > { %16262 = vmatprep.subr.msk.bf16.mxu1 %vm4143_vm13, %v22666_v27 }
 0xc58   : > { %16261 = vmatmul.mubr.msk.bf16.vlgmr.msra.gmra.mrb[32].mxu1 %vm4139_vm14, %v4138_v29  ;;  %v18574_v29 = vld [vmem:[#allocation37 + $0x28] ss:$16 sps:$4 sm:$0xff]  }
 0xc59   : > { %4262 = vmatpush1.bf16.msra.mxu1 %v22669_v28  ;;  %4293 = vmatprep.mubr.bf16.mxu1 %v21659_v10 }
 0xc5a   : > { %4729 = vmatprep.subr.bf16.mxu1 %v18474_v5  ;;  %v18579_v5 = vld [vmem:[#allocation37 + $0x44] ss:$16 sps:$4 sm:$0xff]  }
 0xc60   : > { %16263 = vmatmul.mubr.msk.bf16.vlgmr.msra.gmra.mrb[36].mxu1 %vm4139_vm14, %v4257_v30  ;;  %v18582_v30 = vld [vmem:[#allocation37 + $0x4c] ss:$16 sps:$4 sm:$0xff]  }
 0xc61   : > { %4730 = vmatpush1.bf16.msra.mxu1 %v18472_v31  ;;  %v18577_v31 = vld [vmem:[#allocation37 + $0x40] ss:$16 sps:$4 sm:$0xff]  }
 0xc62   : > { %4731 = vmatprep.subr.bf16.mxu1 %v18480_v32  ;;  %v18580_v32 = vld [vmem:[#allocation37 + $0x48] ss:$16 sps:$4 sm:$0xff]  }
 0xc65   : > { %4732 = vmatpush1.bf16.msra.mxu1 %v18478_v33  ;;  %v18585_v33 = vld [vmem:[#allocation37 + $0x64] ss:$16 sps:$4 sm:$0xff]  }
 0xc66   : > { %4733 = vmatprep.subr.bf16.mxu1 %v18486_v34  ;;  %v18588_v34 = vld [vmem:[#allocation37 + $0x6c] ss:$16 sps:$4 sm:$0xff]  }
 0xc69   : > { %4734 = vmatpush1.bf16.msra.mxu1 %v18484_v35  ;;  %v18583_v35 = vld [vmem:[#allocation37 + $0x60] ss:$16 sps:$4 sm:$0xff]  }
 0xc6a   : > { %4735 = vmatprep.subr.bf16.mxu1 %v18492_v36  ;;  %v18586_v36 = vld [vmem:[#allocation37 + $0x68] ss:$16 sps:$4 sm:$0xff]  }
 0xc6d   : > { %4736 = vmatpush1.bf16.msra.mxu1 %v18490_v8  ;;  %v18591_v8 = vld [vmem:[#allocation37 + $0x84] ss:$16 sps:$4 sm:$0xff]  }
 0xc6e   : > { %4737 = vmatprep.subr.bf16.mxu1 %v18498_v37  ;;  %v18594_v37 = vld [vmem:[#allocation37 + $0x8c] ss:$16 sps:$4 sm:$0xff]  }
 0xc71   : > { %4738 = vmatpush1.bf16.msra.mxu1 %v18496_v38  ;;  %v18589_v38 = vld [vmem:[#allocation37 + $0x80] ss:$16 sps:$4 sm:$0xff]  }
 0xc72   : > { %4739 = vmatprep.subr.bf16.mxu1 %v18504_v39  ;;  %v18592_v39 = vld [vmem:[#allocation37 + $0x88] ss:$16 sps:$4 sm:$0xff]  }
 0xc75   : > { %4740 = vmatpush1.bf16.msra.mxu1 %v18502_v42  ;;  %v18597_v42 = vld [vmem:[#allocation37 + $0xa4] ss:$16 sps:$4 sm:$0xff]  }
 0xc76   : > { %4741 = vmatprep.subr.bf16.mxu1 %v18510_v44  ;;  %v18600_v44 = vld [vmem:[#allocation37 + $0xac] ss:$16 sps:$4 sm:$0xff]  }
 0xc79   : > { %4742 = vmatpush1.bf16.msra.mxu1 %v18508_v45  ;;  %v18595_v45 = vld [vmem:[#allocation37 + $0xa0] ss:$16 sps:$4 sm:$0xff]  }
 0xc7a   : > { %4743 = vmatprep.subr.bf16.mxu1 %v18516_v46  ;;  %v18598_v46 = vld [vmem:[#allocation37 + $0xa8] ss:$16 sps:$4 sm:$0xff]  }
 0xc7d   : > { %4744 = vmatpush1.bf16.msra.mxu1 %v18514_v47  ;;  %v18603_v47 = vld [vmem:[#allocation37 + $0xc4] ss:$16 sps:$4 sm:$0xff]  }
 0xc7e   : > { %4745 = vmatprep.subr.bf16.mxu1 %v18522_v48  ;;  %v18606_v48 = vld [vmem:[#allocation37 + $0xcc] ss:$16 sps:$4 sm:$0xff]  }
 0xc81   : > { %4746 = vmatpush1.bf16.msra.mxu1 %v18520_v49  ;;  %v18601_v49 = vld [vmem:[#allocation37 + $0xc0] ss:$16 sps:$4 sm:$0xff]  }
 0xc82   : > { %4747 = vmatprep.subr.bf16.mxu1 %v18528_v50  ;;  %v18604_v50 = vld [vmem:[#allocation37 + $0xc8] ss:$16 sps:$4 sm:$0xff]  }
 0xc85   : > { %4748 = vmatpush1.bf16.msra.mxu1 %v18526_v51  ;;  %v18609_v51 = vld [vmem:[#allocation37 + $0xe4] ss:$16 sps:$4 sm:$0xff]  }
 0xc86   : > { %4749 = vmatprep.subr.bf16.mxu1 %v18534_v52  ;;  %v18612_v52 = vld [vmem:[#allocation37 + $0xec] ss:$16 sps:$4 sm:$0xff]  }
 0xc89   : > { %4750 = vmatpush1.bf16.msra.mxu1 %v18532_v53  ;;  %v18607_v53 = vld [vmem:[#allocation37 + $0xe0] ss:$16 sps:$4 sm:$0xff]  }
 0xc8a   : > { %4751 = vmatprep.subr.bf16.mxu1 %v18540_v54  ;;  %v18610_v54 = vld [vmem:[#allocation37 + $0xe8] ss:$16 sps:$4 sm:$0xff]  }
 0xc8d   : > { %4752 = vmatpush1.bf16.msra.mxu1 %v18538_v55  ;;  %v18615_v55 = vld [vmem:[#allocation37 + $0x104] ss:$16 sps:$4 sm:$0xff]  }
 0xc8e   : > { %4753 = vmatprep.subr.bf16.mxu1 %v18546_v56  ;;  %v18618_v56 = vld [vmem:[#allocation37 + $0x10c] ss:$16 sps:$4 sm:$0xff]  }
 0xc91   : > { %4754 = vmatpush1.bf16.msra.mxu1 %v18544_v57  ;;  %v18613_v57 = vld [vmem:[#allocation37 + $0x100] ss:$16 sps:$4 sm:$0xff]  }
 0xc92   : > { %4755 = vmatprep.subr.bf16.mxu1 %v18552_v59  ;;  %v18621_v59 = vld [vmem:[#allocation37 + $0x124] ss:$16 sps:$4 sm:$0xff]  }
 0xc95   : > { %4756 = vmatpush1.bf16.msra.mxu1 %v18550_v61  ;;  %v18619_v61 = vld [vmem:[#allocation37 + $0x120] ss:$16 sps:$4 sm:$0xff]  }
 0xc96   : > { %4757 = vmatprep.subr.bf16.mxu1 %v18558_v63  ;;  %v18627_v63 = vld [vmem:[#allocation37 + $0x144] ss:$16 sps:$4 sm:$0xff]  }
 0xc99   : > { %4758 = vmatpush1.bf16.msra.mxu1 %v18556_v1  ;;  %v18625_v1 = vld [vmem:[#allocation37 + $0x140] ss:$16 sps:$4 sm:$0xff]  }
 0xc9a   : > { %4759 = vmatprep.subr.bf16.mxu1 %v18564_v3  ;;  %v18633_v3 = vld [vmem:[#allocation37 + $0x164] ss:$16 sps:$4 sm:$0xff]  }
 0xc9d   : > { %4760 = vmatpush1.bf16.msra.mxu1 %v18562_v6  ;;  %v18631_v6 = vld [vmem:[#allocation37 + $0x160] ss:$16 sps:$4 sm:$0xff]  }
 0xc9e   : > { %5131 = vmatprep.subr.bf16.mxu1 %v18570_v9  ;;  %v18639_v9 = vld [vmem:[#allocation37 + $0x184] ss:$16 sps:$4 sm:$0xff]  }
 0xd2b   : > { %v22682_v11 = vpop.f32.mrb[32].mxu1 }
 0xd2c   : > { %v4186_v12 = vpop.f32.mrb[33].mxu1 }
 0xd2d   : > { %v4188_v13 = vpop.f32.mrb[34].mxu1  ;;  %v4192_v25 = vpack.c.bf16 %v4186_v12, %v4186_v12  ;;  %v18642_v12 = vld [vmem:[#allocation37 + $0x18c] ss:$16 sps:$4 sm:$0xff]  }
 0xd2e   : > { %v4189_v14 = vpop.f32.mrb[35].mxu1  ;;  %v18637_v13 = vld [vmem:[#allocation37 + $0x180] ss:$16 sps:$4 sm:$0xff]  }
 0xd2f   : > { %v18640_v14 = vld [vmem:[#allocation37 + $0x188] ss:$16 sps:$4 sm:$0xff]  }
 0xd33   : > { %v4295_v15 = vpop.f32.mrb[36].mxu1 }
 0xd34   : > { %v4297_v16 = vpop.f32.mrb[37].mxu1  ;;  %v4302_v21 = vpack.c.bf16 %v4295_v15, %v4295_v15  ;;  %v18645_v15 = vld [vmem:[#allocation37 + $0x1a4] ss:$16 sps:$4 sm:$0xff]  }
 0xd35   : > { %v4303_v17 = vpack.c.bf16 %v4297_v16, %v4297_v16  ;;  %v4299_v18 = vpop.f32.mrb[38].mxu1  ;;  %v18648_v16 = vld [vmem:[#allocation37 + $0x1ac] ss:$16 sps:$4 sm:$0xff]  }
 0xd36   : > { %v4300_v22 = vpop.f32.mrb[39].mxu1  ;;  %v18646_v18 = vld [vmem:[#allocation37 + $0x1a8] ss:$16 sps:$4 sm:$0xff]  }
 0xd37   : > { %4720 = vmatprep.mubr.bf16.mxu0 %v4303_v17  ;;  %4761 = vmatprep.mubr.bf16.mxu1 %v4303_v17  ;;  %v18643_v17 = vld [vmem:[#allocation37 + $0x1a0] ss:$16 sps:$4 sm:$0xff]   ;;  %v18652_v22 = vld [vmem:[#allocation37 + $0x1c8] ss:$16 sps:$4 sm:$0xff]  }
 0xd38   : > { %4721 = vmatmul.mubr.bf16.vlgmr.msra.gmra.mrb[44].mxu0 %v4302_v21  ;;  %4762 = vmatmul.mubr.bf16.vlgmr.msra.gmra.mrb[40].mxu1 %v4302_v21  ;;  %v18649_v21 = vld [vmem:[#allocation37 + $0x1c0] ss:$16 sps:$4 sm:$0xff]  }
 0xd39   : > { %5091 = vmatpush1.bf16.msra.mxu0 %v18565_v19  ;;  %5132 = vmatpush1.bf16.msra.mxu1 %v18568_v20  ;;  %v18651_v19 = vld [vmem:[#allocation37 + $0x1c4] ss:$16 sps:$4 sm:$0xff]   ;;  %v18654_v20 = vld [vmem:[#allocation37 + $0x1cc] ss:$16 sps:$4 sm:$0xff]  }
 0xd3a   : > { %5122 = vmatprep.mubr.bf16.mxu0 %v4192_v25  ;;  %5163 = vmatprep.mubr.bf16.mxu1 %v4192_v25  ;;  %v18655_v25 = vld [vmem:[#allocation37 + $0x1e0] ss:$16 sps:$4 sm:$0xff]  }
 0xd3b   : > { %5092 = vmatprep.subr.bf16.mxu0 %v18573_v23  ;;  %5133 = vmatprep.subr.bf16.mxu1 %v18576_v24  ;;  %v18657_v23 = vld [vmem:[#allocation37 + $0x1e4] ss:$16 sps:$4 sm:$0xff]   ;;  %v18660_v24 = vld [vmem:[#allocation37 + $0x1ec] ss:$16 sps:$4 sm:$0xff]  }
 0xd3d   : > { %5093 = vmatpush1.bf16.msra.mxu0 %v18571_v26  ;;  %5134 = vmatpush1.bf16.msra.mxu1 %v18574_v29  ;;  %v18658_v26 = vld [vmem:[#allocation37 + $0x1e8] ss:$16 sps:$4 sm:$0xff]   ;;  %v4191_v29 = vpack.c.bf16 %v22682_v11, %v22682_v11  ;;  %v18667_v11 = vld [vmem:[#allocation40 + $0x20] ss:$16 sps:$4 sm:$0xff]  }
 0xd3e   : > { %5094 = vmatprep.subr.bf16.mxu0 %v18579_v5  ;;  %5135 = vmatprep.subr.bf16.mxu1 %v18582_v30  ;;  %v5172_v5 = vld [vmem:[%s23241_s3] sm:$0x3]  ;;  %s23250_s3 = sld [smem:[#allocation114_spill]] }
 0xd3f   : > { %v18661_v30 = vld [vmem:[#allocation40] ss:$16 sps:$4 sm:$0xff]  }
 0xd41   : > { %5095 = vmatpush1.bf16.msra.mxu0 %v18577_v31  ;;  %5136 = vmatpush1.bf16.msra.mxu1 %v18580_v32  ;;  %v18663_v31 = vld [vmem:[#allocation40 + $0x4] ss:$16 sps:$4 sm:$0xff]   ;;  %v18664_v32 = vld [vmem:[#allocation40 + $0x8] ss:$16 sps:$4 sm:$0xff]  }
 0xd42   : > { %5096 = vmatprep.subr.bf16.mxu0 %v18585_v33  ;;  %5137 = vmatprep.subr.bf16.mxu1 %v18588_v34  ;;  %v18666_v33 = vld [vmem:[#allocation40 + $0xc] ss:$16 sps:$4 sm:$0xff]   ;;  %v18669_v34 = vld [vmem:[#allocation40 + $0x24] ss:$16 sps:$4 sm:$0xff]  }
 0xd45   : > { %5097 = vmatpush1.bf16.msra.mxu0 %v18583_v35  ;;  %5138 = vmatpush1.bf16.msra.mxu1 %v18586_v36  ;;  %v18672_v35 = vld [vmem:[#allocation40 + $0x2c] ss:$16 sps:$4 sm:$0xff]   ;;  %v18675_v36 = vld [vmem:[#allocation40 + $0x44] ss:$16 sps:$4 sm:$0xff]  }
 0xd46   : > { %5098 = vmatprep.subr.bf16.mxu0 %v18591_v8  ;;  %5139 = vmatprep.subr.bf16.mxu1 %v18594_v37  ;;  %v18673_v8 = vld [vmem:[#allocation40 + $0x40] ss:$16 sps:$4 sm:$0xff]   ;;  %v18676_v37 = vld [vmem:[#allocation40 + $0x48] ss:$16 sps:$4 sm:$0xff]  }
 0xd49   : > { %5099 = vmatpush1.bf16.msra.mxu0 %v18589_v38  ;;  %5140 = vmatpush1.bf16.msra.mxu1 %v18592_v39  ;;  %v18681_v38 = vld [vmem:[#allocation40 + $0x64] ss:$16 sps:$4 sm:$0xff]   ;;  %v18684_v39 = vld [vmem:[#allocation40 + $0x6c] ss:$16 sps:$4 sm:$0xff]  }
 0xd4a   : > { %5100 = vmatprep.subr.bf16.mxu0 %v18597_v42  ;;  %5141 = vmatprep.subr.bf16.mxu1 %v18600_v44  ;;  %v18679_v42 = vld [vmem:[#allocation40 + $0x60] ss:$16 sps:$4 sm:$0xff]   ;;  %v18682_v44 = vld [vmem:[#allocation40 + $0x68] ss:$16 sps:$4 sm:$0xff]  }
 0xd4d   : > { %5101 = vmatpush1.bf16.msra.mxu0 %v18595_v45  ;;  %5142 = vmatpush1.bf16.msra.mxu1 %v18598_v46  ;;  %v18687_v45 = vld [vmem:[#allocation40 + $0x84] ss:$16 sps:$4 sm:$0xff]   ;;  %v18690_v46 = vld [vmem:[#allocation40 + $0x8c] ss:$16 sps:$4 sm:$0xff]  }
 0xd4e   : > { %5102 = vmatprep.subr.bf16.mxu0 %v18603_v47  ;;  %5143 = vmatprep.subr.bf16.mxu1 %v18606_v48  ;;  %v18685_v47 = vld [vmem:[#allocation40 + $0x80] ss:$16 sps:$4 sm:$0xff]   ;;  %v18688_v48 = vld [vmem:[#allocation40 + $0x88] ss:$16 sps:$4 sm:$0xff]  }
 0xd51   : > { %5103 = vmatpush1.bf16.msra.mxu0 %v18601_v49  ;;  %5144 = vmatpush1.bf16.msra.mxu1 %v18604_v50  ;;  %v18693_v49 = vld [vmem:[#allocation40 + $0xa4] ss:$16 sps:$4 sm:$0xff]   ;;  %v18696_v50 = vld [vmem:[#allocation40 + $0xac] ss:$16 sps:$4 sm:$0xff]  }
 0xd52   : > { %5104 = vmatprep.subr.bf16.mxu0 %v18609_v51  ;;  %5145 = vmatprep.subr.bf16.mxu1 %v18612_v52  ;;  %v18691_v51 = vld [vmem:[#allocation40 + $0xa0] ss:$16 sps:$4 sm:$0xff]   ;;  %v18694_v52 = vld [vmem:[#allocation40 + $0xa8] ss:$16 sps:$4 sm:$0xff]  }
 0xd55   : > { %5105 = vmatpush1.bf16.msra.mxu0 %v18607_v53  ;;  %5146 = vmatpush1.bf16.msra.mxu1 %v18610_v54  ;;  %v18699_v53 = vld [vmem:[#allocation40 + $0xc4] ss:$16 sps:$4 sm:$0xff]   ;;  %v18702_v54 = vld [vmem:[#allocation40 + $0xcc] ss:$16 sps:$4 sm:$0xff]  }
 0xd56   : > { %5106 = vmatprep.subr.bf16.mxu0 %v18615_v55  ;;  %5147 = vmatprep.subr.bf16.mxu1 %v18618_v56  ;;  %v18697_v55 = vld [vmem:[#allocation40 + $0xc0] ss:$16 sps:$4 sm:$0xff]   ;;  %v18700_v56 = vld [vmem:[#allocation40 + $0xc8] ss:$16 sps:$4 sm:$0xff]  }
 0xd59   : > { %5107 = vmatpush1.bf16.msra.mxu0 %v18613_v57  ;;  %5148 = vmatpush1.bf16.msra.mxu1 %v18616_v58  ;;  %v18705_v57 = vld [vmem:[#allocation40 + $0xe4] ss:$16 sps:$4 sm:$0xff]   ;;  %v18708_v58 = vld [vmem:[#allocation40 + $0xec] ss:$16 sps:$4 sm:$0xff]  }
 0xd5a   : > { %5108 = vmatprep.subr.bf16.mxu0 %v18621_v59  ;;  %5149 = vmatprep.subr.bf16.mxu1 %v18624_v60  ;;  %v18703_v59 = vld [vmem:[#allocation40 + $0xe0] ss:$16 sps:$4 sm:$0xff]   ;;  %v18706_v60 = vld [vmem:[#allocation40 + $0xe8] ss:$16 sps:$4 sm:$0xff]  }
 0xd5d   : > { %5109 = vmatpush1.bf16.msra.mxu0 %v18619_v61  ;;  %5150 = vmatpush1.bf16.msra.mxu1 %v18622_v62  ;;  %v18711_v61 = vld [vmem:[#allocation40 + $0x104] ss:$16 sps:$4 sm:$0xff]   ;;  %v18714_v62 = vld [vmem:[#allocation40 + $0x10c] ss:$16 sps:$4 sm:$0xff]  }
 0xd5e   : > { %5110 = vmatprep.subr.bf16.mxu0 %v18627_v63  ;;  %5151 = vmatprep.subr.bf16.mxu1 %v18630_v0  ;;  %v18709_v63 = vld [vmem:[#allocation40 + $0x100] ss:$16 sps:$4 sm:$0xff]   ;;  %v18712_v0 = vld [vmem:[#allocation40 + $0x108] ss:$16 sps:$4 sm:$0xff]  }
 0xd61   : > { %5111 = vmatpush1.bf16.msra.mxu0 %v18625_v1  ;;  %5152 = vmatpush1.bf16.msra.mxu1 %v18628_v2  ;;  %v18717_v1 = vld [vmem:[#allocation40 + $0x124] ss:$16 sps:$4 sm:$0xff]   ;;  %v18720_v2 = vld [vmem:[#allocation40 + $0x12c] ss:$16 sps:$4 sm:$0xff]  }
 0xd62   : > { %5112 = vmatprep.subr.bf16.mxu0 %v18633_v3  ;;  %5153 = vmatprep.subr.bf16.mxu1 %v18636_v4  ;;  %v18715_v3 = vld [vmem:[#allocation40 + $0x120] ss:$16 sps:$4 sm:$0xff]   ;;  %v18718_v4 = vld [vmem:[#allocation40 + $0x128] ss:$16 sps:$4 sm:$0xff]  }
 0xd65   : > { %5113 = vmatpush1.bf16.msra.mxu0 %v18631_v6  ;;  %5154 = vmatpush1.bf16.msra.mxu1 %v18634_v7  ;;  %v18723_v6 = vld [vmem:[#allocation40 + $0x144] ss:$16 sps:$4 sm:$0xff]   ;;  %v18726_v7 = vld [vmem:[#allocation40 + $0x14c] ss:$16 sps:$4 sm:$0xff]  }
 0xd66   : > { %5114 = vmatprep.subr.bf16.mxu0 %v18639_v9  ;;  %5155 = vmatprep.subr.bf16.mxu1 %v18642_v12  ;;  %v18721_v9 = vld [vmem:[#allocation40 + $0x140] ss:$16 sps:$4 sm:$0xff]   ;;  %v18724_v12 = vld [vmem:[#allocation40 + $0x148] ss:$16 sps:$4 sm:$0xff]  }
 0xd69   : > { %5115 = vmatpush1.bf16.msra.mxu0 %v18637_v13  ;;  %5156 = vmatpush1.bf16.msra.mxu1 %v18640_v14  ;;  %v18729_v13 = vld [vmem:[#allocation40 + $0x164] ss:$16 sps:$4 sm:$0xff]   ;;  %v18732_v14 = vld [vmem:[#allocation40 + $0x16c] ss:$16 sps:$4 sm:$0xff]  }
 0xd6a   : > { %5116 = vmatprep.subr.bf16.mxu0 %v18645_v15  ;;  %5157 = vmatprep.subr.bf16.mxu1 %v18648_v16  ;;  %v18727_v15 = vld [vmem:[#allocation40 + $0x160] ss:$16 sps:$4 sm:$0xff]   ;;  %v18730_v16 = vld [vmem:[#allocation40 + $0x168] ss:$16 sps:$4 sm:$0xff]  }
 0xd6d   : > { %5117 = vmatpush1.bf16.msra.mxu0 %v18643_v17  ;;  %5158 = vmatpush1.bf16.msra.mxu1 %v18646_v18  ;;  %v18735_v17 = vld [vmem:[#allocation40 + $0x184] ss:$16 sps:$4 sm:$0xff]   ;;  %v18738_v18 = vld [vmem:[#allocation40 + $0x18c] ss:$16 sps:$4 sm:$0xff]  }
 0xd6e   : > { %5118 = vmatprep.subr.bf16.mxu0 %v18651_v19  ;;  %5159 = vmatprep.subr.bf16.mxu1 %v18654_v20  ;;  %v18733_v19 = vld [vmem:[#allocation40 + $0x180] ss:$16 sps:$4 sm:$0xff]   ;;  %v18736_v20 = vld [vmem:[#allocation40 + $0x188] ss:$16 sps:$4 sm:$0xff]  }
 0xd71   : > { %5119 = vmatpush1.bf16.msra.mxu0 %v18649_v21  ;;  %5160 = vmatpush1.bf16.msra.mxu1 %v18652_v22  ;;  %v18741_v21 = vld [vmem:[#allocation40 + $0x1a4] ss:$16 sps:$4 sm:$0xff]   ;;  %v18744_v22 = vld [vmem:[#allocation40 + $0x1ac] ss:$16 sps:$4 sm:$0xff]  }
 0xd72   : > { %5120 = vmatprep.subr.bf16.mxu0 %v18657_v23  ;;  %5161 = vmatprep.subr.bf16.mxu1 %v18660_v24  ;;  %v18739_v23 = vld [vmem:[#allocation40 + $0x1a0] ss:$16 sps:$4 sm:$0xff]   ;;  %v18742_v24 = vld [vmem:[#allocation40 + $0x1a8] ss:$16 sps:$4 sm:$0xff]  }
 0xd75   : > { %5121 = vmatpush1.bf16.msra.mxu0 %v18655_v25  ;;  %5162 = vmatpush1.bf16.msra.mxu1 %v18658_v26  ;;  %v18745_v25 = vld [vmem:[#allocation40 + $0x1c0] ss:$16 sps:$4 sm:$0xff]   ;;  %v18747_v26 = vld [vmem:[#allocation40 + $0x1c4] ss:$16 sps:$4 sm:$0xff]  }
 0xd76   : > { %16392 = vmatprep.subr.msk.bf16.mxu0 %vm4143_vm13, %v22666_v27  ;;  %5603 = vmatprep.subr.bf16.mxu1 %v18663_v31  ;;  %v18670_v27 = vld [vmem:[#allocation40 + $0x28] ss:$16 sps:$4 sm:$0xff]   ;;  %v18756_v31 = vld [vmem:[#allocation40 + $0x1ec] ss:$16 sps:$4 sm:$0xff]  }
 0xd78   : > { %5123 = vmatmul.mubr.bf16.vlgmr.msra.gmra.mrb[48].mxu0 %v4191_v29  ;;  %5164 = vmatmul.mubr.bf16.vlgmr.msra.gmra.mrb[44].mxu1 %v4191_v29  ;;  %v18748_v29 = vld [vmem:[#allocation40 + $0x1c8] ss:$16 sps:$4 sm:$0xff]  }
 0xd79   : > { %5177 = vmatpush1.bf16.msra.mxu0 %v22669_v28  ;;  %5208 = vmatprep.mubr.bf16.mxu0 %v21659_v10  ;;  %v18678_v28 = vld [vmem:[#allocation40 + $0x4c] ss:$16 sps:$4 sm:$0xff]  }
 0xd7a   : > { %5644 = vmatprep.subr.bf16.mxu0 %v18666_v33  ;;  %5604 = vmatpush1.bf16.msra.mxu1 %v18661_v30  ;;  %v18753_v30 = vld [vmem:[#allocation40 + $0x1e4] ss:$16 sps:$4 sm:$0xff]   ;;  %v18754_v33 = vld [vmem:[#allocation40 + $0x1e8] ss:$16 sps:$4 sm:$0xff]  }
 0xd7b   : > { %5605 = vmatprep.subr.bf16.mxu1 %v18669_v34 }
 0xd7e   : > { %5606 = vmatpush1.bf16.msra.mxu1 %v18667_v11 }
 0xd7f   : > { %5607 = vmatprep.subr.bf16.mxu1 %v18675_v36 }
 0xd80   : > { %16393 = vmatmul.mubr.msk.bf16.vlgmr.msra.gmra.mrb[52].mxu0 %vm4139_vm14, %v5172_v5  ;;  %v18750_v5 = vld [vmem:[#allocation40 + $0x1cc] ss:$16 sps:$4 sm:$0xff]  }
 0xd81   : > { %5645 = vmatpush1.bf16.msra.mxu0 %v18664_v32  ;;  %v18751_v32 = vld [vmem:[#allocation40 + $0x1e0] ss:$16 sps:$4 sm:$0xff]  }
 0xd82   : > { %5646 = vmatprep.subr.bf16.mxu0 %v18672_v35  ;;  %5608 = vmatpush1.bf16.msra.mxu1 %v18673_v8 }
 0xd83   : > { %5609 = vmatprep.subr.bf16.mxu1 %v18681_v38 }
 0xd85   : > { %5647 = vmatpush1.bf16.msra.mxu0 %v18670_v27 }
 0xd86   : > { %5648 = vmatprep.subr.bf16.mxu0 %v18678_v28  ;;  %5610 = vmatpush1.bf16.msra.mxu1 %v18679_v42 }
 0xd87   : > { %5611 = vmatprep.subr.bf16.mxu1 %v18687_v45 }
 0xd89   : > { %5649 = vmatpush1.bf16.msra.mxu0 %v18676_v37 }
 0xd8a   : > { %5650 = vmatprep.subr.bf16.mxu0 %v18684_v39  ;;  %5612 = vmatpush1.bf16.msra.mxu1 %v18685_v47 }
 0xd8b   : > { %5613 = vmatprep.subr.bf16.mxu1 %v18693_v49 }
 0xd8d   : > { %5651 = vmatpush1.bf16.msra.mxu0 %v18682_v44 }
 0xd8e   : > { %5652 = vmatprep.subr.bf16.mxu0 %v18690_v46  ;;  %5614 = vmatpush1.bf16.msra.mxu1 %v18691_v51 }
 0xd8f   : > { %5615 = vmatprep.subr.bf16.mxu1 %v18699_v53 }
 0xd91   : > { %5653 = vmatpush1.bf16.msra.mxu0 %v18688_v48 }
 0xd92   : > { %5654 = vmatprep.subr.bf16.mxu0 %v18696_v50  ;;  %5616 = vmatpush1.bf16.msra.mxu1 %v18697_v55 }
 0xd93   : > { %5617 = vmatprep.subr.bf16.mxu1 %v18705_v57 }
 0xd95   : > { %5655 = vmatpush1.bf16.msra.mxu0 %v18694_v52 }
 0xd96   : > { %5656 = vmatprep.subr.bf16.mxu0 %v18702_v54  ;;  %5618 = vmatpush1.bf16.msra.mxu1 %v18703_v59  ;;  %v22695_v59 = vsub.s32 2, %v22574_v40 }
 0xd97   : > { %5619 = vmatprep.subr.bf16.mxu1 %v18711_v61  ;;  %v22699_v61 = vsub.s32 3, %v22574_v40 }
 0xd99   : > { %5657 = vmatpush1.bf16.msra.mxu0 %v18700_v56 }
 0xd9a   : > { %5658 = vmatprep.subr.bf16.mxu0 %v18708_v58  ;;  %5620 = vmatpush1.bf16.msra.mxu1 %v18709_v63 }
 0xd9b   : > { %5621 = vmatprep.subr.bf16.mxu1 %v18717_v1 }
 0xd9d   : > { %5659 = vmatpush1.bf16.msra.mxu0 %v18706_v60  ;;  %v5689_v60 = vld [vmem:[%s23242_s12] sm:$0xf]  ;;  %s23251_s12 = sld [smem:[#allocation115_spill]] }
 0xd9e   : > { %5660 = vmatprep.subr.bf16.mxu0 %v18714_v62  ;;  %5622 = vmatpush1.bf16.msra.mxu1 %v18715_v3  ;;  %v5694_v62 = vrot.slane %v5689_v60, %v22577_v41  ;;  %v5702_v63 = vrot.slane %v5689_v60, %v22695_v59  ;;  %v5706_v3 = vrot.slane %v5689_v60, %v22699_v61 }
 0xd9f   : > { %5623 = vmatprep.subr.bf16.mxu1 %v18723_v6 }
 0xda1   : > { %5661 = vmatpush1.bf16.msra.mxu0 %v18712_v0 }
 0xda2   : > { %5662 = vmatprep.subr.bf16.mxu0 %v18720_v2  ;;  %5624 = vmatpush1.bf16.msra.mxu1 %v18721_v9  ;;  %v5698_v2 = vrot.slane %v5689_v60, %v22580_v43  ;;  %v18793_v60 = vld [vmem:[#allocation43 + $0xc0] ss:$16 sps:$4 sm:$0xff]  }
 0xda3   : > { %5625 = vmatprep.subr.bf16.mxu1 %v18729_v13 }
 0xda5   : > { %5663 = vmatpush1.bf16.msra.mxu0 %v18718_v4 }
 0xda6   : > { %5664 = vmatprep.subr.bf16.mxu0 %v18726_v7  ;;  %5626 = vmatpush1.bf16.msra.mxu1 %v18727_v15 }
 0xda7   : > { %5627 = vmatprep.subr.bf16.mxu1 %v18735_v17 }
 0xda9   : > { %5665 = vmatpush1.bf16.msra.mxu0 %v18724_v12 }
 0xdaa   : > { %5666 = vmatprep.subr.bf16.mxu0 %v18732_v14  ;;  %5628 = vmatpush1.bf16.msra.mxu1 %v18733_v19 }
 0xdab   : > { %5629 = vmatprep.subr.bf16.mxu1 %v18741_v21 }
 0xdad   : > { %5667 = vmatpush1.bf16.msra.mxu0 %v18730_v16 }
 0xdae   : > { %5668 = vmatprep.subr.bf16.mxu0 %v18738_v18  ;;  %5630 = vmatpush1.bf16.msra.mxu1 %v18739_v23 }
 0xdaf   : > { %5631 = vmatprep.subr.bf16.mxu1 %v18747_v26 }
 0xdb1   : > { %5669 = vmatpush1.bf16.msra.mxu0 %v18736_v20 }
 0xdb2   : > { %5670 = vmatprep.subr.bf16.mxu0 %v18744_v22  ;;  %5632 = vmatpush1.bf16.msra.mxu1 %v18745_v25 }
 0xdb3   : > { %5633 = vmatprep.subr.bf16.mxu1 %v18753_v30 }
 0xdb5   : > { %5671 = vmatpush1.bf16.msra.mxu0 %v18742_v24 }
 0xdb6   : > { %5672 = vmatprep.subr.bf16.mxu0 %v18750_v5  ;;  %5634 = vmatpush1.bf16.msra.mxu1 %v18751_v32  ;;  %v5723_v32 = vld [vmem:[%s23243_s5] sm:$0xf]  ;;  %s23252_s5 = sld [smem:[#allocation117_spill]] }
 0xdb9   : > { %5673 = vmatpush1.bf16.msra.mxu0 %v18748_v29 }
 0xdba   : > { %5674 = vmatprep.subr.bf16.mxu0 %v18756_v31 }
 0xdbd   : > { %5675 = vmatpush1.bf16.msra.mxu0 %v18754_v33  ;;  %v18759_v33 = vld [vmem:[#allocation43 + $0x4] ss:$16 sps:$4 sm:$0xff]  }
 0xe0b   : > { %v4722_v34 = vpop.f32.mrb[44].mxu0  ;;  %v4763_v35 = vpop.f32.mrb[40].mxu1 }
 0xe0c   : > { %v4724_v11 = vpop.f32.mrb[45].mxu0  ;;  %v4765_v27 = vpop.f32.mrb[41].mxu1 }
 0xe0d   : > { %v4726_v36 = vpop.f32.mrb[46].mxu0  ;;  %v4767_v28 = vpop.f32.mrb[42].mxu1 }
 0xe0e   : > { %v4727_v8 = vpop.f32.mrb[47].mxu0  ;;  %v4768_v37 = vpop.f32.mrb[43].mxu1  ;;  %v18765_v36 = vld [vmem:[#allocation43 + $0x24] ss:$16 sps:$4 sm:$0xff]  }
 0xe0f   : > { %v18768_v28 = vld [vmem:[#allocation43 + $0x224] ss:$16 sps:$4 sm:$0xff]   ;;  %v18763_v8 = vld [vmem:[#allocation43 + $0x20] ss:$16 sps:$4 sm:$0xff]  }
 0xe10   : > { %v18766_v37 = vld [vmem:[#allocation43 + $0x220] ss:$16 sps:$4 sm:$0xff]  }
 0xe4b   : > { %v5124_v38 = vpop.f32.mrb[48].mxu0  ;;  %v5165_v39 = vpop.f32.mrb[44].mxu1 }
 0xe4c   : > { %v5125_v42 = vadd.f32 %v5124_v38, %v4722_v34  ;;  %v5166_v44 = vadd.f32 %v5165_v39, %v4763_v35  ;;  %v5126_v45 = vpop.f32.mrb[49].mxu0  ;;  %v5167_v46 = vpop.f32.mrb[45].mxu1  ;;  %v18762_v34 = vld [vmem:[#allocation43 + $0x204] ss:$16 sps:$4 sm:$0xff]   ;;  %v5953_v35 = vld [vmem:[%s23244_s11] sm:$0xf] }
 0xe4d   : > { %v5127_v47 = vadd.f32 %v5126_v45, %v4724_v11  ;;  %v5168_v48 = vadd.f32 %v5167_v46, %v4765_v27  ;;  %v5128_v49 = vpop.f32.mrb[50].mxu0  ;;  %v5169_v50 = vpop.f32.mrb[46].mxu1  ;;  %v18757_v11 = vld [vmem:[#allocation43] ss:$16 sps:$4 sm:$0xff]   ;;  %v18771_v38 = vld [vmem:[#allocation43 + $0x44] ss:$16 sps:$4 sm:$0xff]  }
 0xe4e   : > { %v5129_v51 = vpop.f32.mrb[51].mxu0  ;;  %v5170_v52 = vpop.f32.mrb[47].mxu1  ;;  %v18760_v27 = vld [vmem:[#allocation43 + $0x200] ss:$16 sps:$4 sm:$0xff]   ;;  %v18774_v39 = vld [vmem:[#allocation43 + $0x244] ss:$16 sps:$4 sm:$0xff]  }
 0xe4f   : > { %v18777_v45 = vld [vmem:[#allocation43 + $0x64] ss:$16 sps:$4 sm:$0xff]   ;;  %v18781_v51 = vld [vmem:[#allocation43 + $0x80] ss:$16 sps:$4 sm:$0xff]   ;;  %s23253_s11 = sld [smem:[#allocation119_spill]] }
 0xe50   : > { %v18780_v46 = vld [vmem:[#allocation43 + $0x264] ss:$16 sps:$4 sm:$0xff]   ;;  %v18784_v52 = vld [vmem:[#allocation43 + $0x280] ss:$16 sps:$4 sm:$0xff]  }
 0xe51   : > { %v18783_v49 = vld [vmem:[#allocation43 + $0x84] ss:$16 sps:$4 sm:$0xff]  }
 0xe52   : > { %v18786_v50 = vld [vmem:[#allocation43 + $0x284] ss:$16 sps:$4 sm:$0xff]  }
 0xe53   : > { %v5210_v53 = vpop.f32.mrb[52].mxu0 }
 0xe54   : > { %v5212_v54 = vpop.f32.mrb[53].mxu0  ;;  %v5217_v57 = vpack.c.bf16 %v5210_v53, %v5210_v53  ;;  %v18789_v53 = vld [vmem:[#allocation43 + $0xa4] ss:$16 sps:$4 sm:$0xff]  }
 0xe55   : > { %v5218_v55 = vpack.c.bf16 %v5212_v54, %v5212_v54  ;;  %v5214_v56 = vpop.f32.mrb[54].mxu0  ;;  %v18792_v54 = vld [vmem:[#allocation43 + $0x2a4] ss:$16 sps:$4 sm:$0xff]  }
 0xe56   : > { %v5215_v58 = vpop.f32.mrb[55].mxu0  ;;  %v18790_v56 = vld [vmem:[#allocation43 + $0x2a0] ss:$16 sps:$4 sm:$0xff]  }
 0xe57   : > { %5635 = vmatprep.mubr.bf16.mxu1 %v5218_v55  ;;  %5676 = vmatprep.mubr.bf16.mxu0 %v5218_v55  ;;  %v18787_v55 = vld [vmem:[#allocation43 + $0xa0] ss:$16 sps:$4 sm:$0xff]   ;;  %v18798_v58 = vld [vmem:[#allocation43 + $0x2c4] ss:$16 sps:$4 sm:$0xff]  }
 0xe58   : > { %5636 = vmatmul.mubr.bf16.vlgmr.msra.gmra.mrb[48].mxu1 %v5217_v57  ;;  %5677 = vmatmul.mubr.bf16.vlgmr.msra.gmra.mrb[56].mxu0 %v5217_v57  ;;  %v18795_v57 = vld [vmem:[#allocation43 + $0xc4] ss:$16 sps:$4 sm:$0xff]  }
 0xe59   : > { %5771 = vmatprep.mubr.bf16.mxu1 %v21659_v10  ;;  %5812 = vmatprep.mubr.bf16.mxu0 %v21659_v10 }
 0xf2b   : > { %v5637_v0 = vpop.f32.mrb[48].mxu1  ;;  %v5678_v1 = vpop.f32.mrb[56].mxu0 }
 0xf2c   : > { %v5685_v4 = vadd.f32 %v5637_v0, %v5125_v42  ;;  %v5687_v6 = vadd.f32 %v5678_v1, %v5166_v44  ;;  %v5639_v7 = vpop.f32.mrb[49].mxu1  ;;  %v5680_v9 = vpop.f32.mrb[57].mxu0  ;;  %v18769_v42 = vld [vmem:[#allocation43 + $0x40] ss:$16 sps:$4 sm:$0xff]   ;;  %v18804_v0 = vld [vmem:[#allocation43 + $0x2e4] ss:$16 sps:$4 sm:$0xff]  }
 0xf2d   : > { %v5686_v12 = vadd.f32 %v5639_v7, %v5127_v47  ;;  %v5688_v13 = vadd.f32 %v5680_v9, %v5168_v48  ;;  %v5641_v14 = vpop.f32.mrb[50].mxu1  ;;  %v5682_v15 = vpop.f32.mrb[58].mxu0  ;;  %v18772_v44 = vld [vmem:[#allocation43 + $0x240] ss:$16 sps:$4 sm:$0xff]   ;;  %v18813_v9 = vld [vmem:[#allocation43 + $0x124] ss:$16 sps:$4 sm:$0xff]  }
 0xf2e   : > { %v5711_v40 = vadd.f32 %v5694_v62, %v5685_v4  ;;  %v5713_v16 = vadd.f32 %v5702_v63, %v5687_v6  ;;  %v5642_v17 = vpop.f32.mrb[51].mxu1  ;;  %v5683_v18 = vpop.f32.mrb[59].mxu0  ;;  %v18775_v47 = vld [vmem:[#allocation43 + $0x60] ss:$16 sps:$4 sm:$0xff]   ;;  %v18801_v63 = vld [vmem:[#allocation43 + $0xe4] ss:$16 sps:$4 sm:$0xff]  }
 0xf2f   : > { %v5712_v19 = vadd.f32 %v5698_v2, %v5686_v12  ;;  %v5714_v20 = vadd.f32 %v5706_v3, %v5688_v13  ;;  %v18778_v48 = vld [vmem:[#allocation43 + $0x260] ss:$16 sps:$4 sm:$0xff]   ;;  %v18807_v3 = vld [vmem:[#allocation43 + $0x104] ss:$16 sps:$4 sm:$0xff]  }
 0xf30   : > { %v5715_v21 = vmax.f32 %v5711_v40, 0.0  ;;  %v5717_v22 = vmax.f32 %v5713_v16, 0.0  ;;  %v18796_v62 = vld [vmem:[#allocation43 + $0x2c0] ss:$16 sps:$4 sm:$0xff]   ;;  %v18810_v4 = vld [vmem:[#allocation43 + $0x304] ss:$16 sps:$4 sm:$0xff]  }
 0xf31   : > { %v5716_v23 = vmax.f32 %v5712_v19, 0.0  ;;  %v5718_v24 = vmax.f32 %v5714_v20, 0.0  ;;  %v18799_v1 = vld [vmem:[#allocation43 + $0xe0] ss:$16 sps:$4 sm:$0xff]   ;;  %v18816_v12 = vld [vmem:[#allocation43 + $0x324] ss:$16 sps:$4 sm:$0xff]  }
 0xf32   : > { %v5719_v25 = vpack.c.bf16 %v5715_v21, %v5715_v21  ;;  %v5721_v26 = vpack.c.bf16 %v5717_v22, %v5717_v22  ;;  %v18802_v2 = vld [vmem:[#allocation43 + $0x2e0] ss:$16 sps:$4 sm:$0xff]   ;;  %v18819_v15 = vld [vmem:[#allocation43 + $0x144] ss:$16 sps:$4 sm:$0xff]  }
 0xf33   : > { %v22705_v29 = vpack.c.bf16 %v5716_v23, %v5716_v23  ;;  %v22707_v5 = vpack.c.bf16 %v5718_v24, %v5718_v24  ;;  %v18805_v6 = vld [vmem:[#allocation43 + $0x100] ss:$16 sps:$4 sm:$0xff]   ;;  %v18822_v40 = vld [vmem:[#allocation43 + $0x344] ss:$16 sps:$4 sm:$0xff]  }
 0xf34   : > { %v22710_v30 = vsel %vm3305_vm8, %v5719_v25, 0  ;;  %v22713_v31 = vsel %vm3305_vm8, %v5721_v26, 0  ;;  %v18808_v7 = vld [vmem:[#allocation43 + $0x300] ss:$16 sps:$4 sm:$0xff]   ;;  %v18825_v18 = vld [vmem:[#allocation43 + $0x164] ss:$16 sps:$4 sm:$0xff]  }
 0xf35   : > { %16458 = vmatprep.subr.msk.bf16.mxu1 %vm3305_vm8, %v22705_v29  ;;  %16460 = vmatprep.subr.msk.bf16.mxu0 %vm3305_vm8, %v22707_v5  ;;  %v18811_v13 = vld [vmem:[#allocation43 + $0x120] ss:$16 sps:$4 sm:$0xff]   ;;  %v18828_v19 = vld [vmem:[#allocation43 + $0x364] ss:$16 sps:$4 sm:$0xff]  }
 0xf36   : > { %5740 = vmatpush1.bf16.msra.mxu1 %v22710_v30  ;;  %5781 = vmatpush1.bf16.msra.mxu0 %v22713_v31  ;;  %v18814_v14 = vld [vmem:[#allocation43 + $0x320] ss:$16 sps:$4 sm:$0xff]   ;;  %v18831_v22 = vld [vmem:[#allocation43 + $0x184] ss:$16 sps:$4 sm:$0xff]  }
 0xf37   : > { %16462 = vmatprep.subr.msk.bf16.mxu1 %vm3305_vm8, %v22705_v29  ;;  %16464 = vmatprep.subr.msk.bf16.mxu0 %vm3305_vm8, %v22707_v5  ;;  %v18817_v16 = vld [vmem:[#allocation43 + $0x140] ss:$16 sps:$4 sm:$0xff]   ;;  %v18834_v23 = vld [vmem:[#allocation43 + $0x384] ss:$16 sps:$4 sm:$0xff]  }
 0xf38   : > { %v18820_v17 = vld [vmem:[#allocation43 + $0x340] ss:$16 sps:$4 sm:$0xff]   ;;  %v18837_v26 = vld [vmem:[#allocation43 + $0x1a4] ss:$16 sps:$4 sm:$0xff]  }
 0xf39   : > { %16459 = vmatmul.mubr.msk.bf16.vlgmr.msra.gmra.mrb[52].mxu1 %vm3301_vm9, %v5723_v32  ;;  %16461 = vmatmul.mubr.msk.bf16.vlgmr.msra.gmra.mrb[60].mxu0 %vm3301_vm9, %v5723_v32  ;;  %v18823_v20 = vld [vmem:[#allocation43 + $0x160] ss:$16 sps:$4 sm:$0xff]   ;;  %v18840_v32 = vld [vmem:[#allocation43 + $0x3a4] ss:$16 sps:$4 sm:$0xff]  }
 0xf3a   : > { %5958 = vmatpush1.bf16.msra.mxu1 %v22710_v30  ;;  %5999 = vmatpush1.bf16.msra.mxu0 %v22713_v31  ;;  %v18826_v21 = vld [vmem:[#allocation43 + $0x360] ss:$16 sps:$4 sm:$0xff]  }
 0xf3b   : > { %5989 = vmatprep.mubr.bf16.mxu1 %v21659_v10  ;;  %6030 = vmatprep.mubr.bf16.mxu0 %v21659_v10  ;;  %v18829_v24 = vld [vmem:[#allocation43 + $0x180] ss:$16 sps:$4 sm:$0xff]  }
 0xf3c   : > { %6811 = vmatprep.subr.bf16.mxu1 %v18759_v33  ;;  %6852 = vmatprep.subr.bf16.mxu0 %v18762_v34  ;;  %v18832_v25 = vld [vmem:[#allocation43 + $0x380] ss:$16 sps:$4 sm:$0xff]  }
 0xf3d   : > { %v18835_v33 = vld [vmem:[#allocation43 + $0x1a0] ss:$16 sps:$4 sm:$0xff]  }
 0xf3e   : > { %v18838_v34 = vld [vmem:[#allocation43 + $0x3a0] ss:$16 sps:$4 sm:$0xff]  }
 0xf41   : > { %16463 = vmatmul.mubr.msk.bf16.vlgmr.msra.gmra.mrb[56].mxu1 %vm3301_vm9, %v5953_v35  ;;  %16465 = vmatmul.mubr.msk.bf16.vlgmr.msra.gmra.mrb[64].mxu0 %vm3301_vm9, %v5953_v35  ;;  %v18843_v35 = vld [vmem:[#allocation43 + $0x1c4] ss:$16 sps:$4 sm:$0xff]  }
 0xf42   : > { %6812 = vmatpush1.bf16.msra.mxu1 %v18757_v11  ;;  %6853 = vmatpush1.bf16.msra.mxu0 %v18760_v27  ;;  %v18846_v11 = vld [vmem:[#allocation43 + $0x3c4] ss:$16 sps:$4 sm:$0xff]   ;;  %v18841_v27 = vld [vmem:[#allocation43 + $0x1c0] ss:$16 sps:$4 sm:$0xff]  }
 0xf43   : > { %6813 = vmatprep.subr.bf16.mxu1 %v18765_v36  ;;  %6854 = vmatprep.subr.bf16.mxu0 %v18768_v28  ;;  %v18844_v36 = vld [vmem:[#allocation43 + $0x3c0] ss:$16 sps:$4 sm:$0xff]   ;;  %v18849_v28 = vld [vmem:[#allocation43 + $0x1e4] ss:$16 sps:$4 sm:$0xff]  }
 0xf46   : > { %6814 = vmatpush1.bf16.msra.mxu1 %v18763_v8  ;;  %6855 = vmatpush1.bf16.msra.mxu0 %v18766_v37  ;;  %v18852_v8 = vld [vmem:[#allocation43 + $0x3e4] ss:$16 sps:$4 sm:$0xff]   ;;  %v18847_v37 = vld [vmem:[#allocation43 + $0x1e0] ss:$16 sps:$4 sm:$0xff]  }
 0xf47   : > { %6815 = vmatprep.subr.bf16.mxu1 %v18771_v38  ;;  %6856 = vmatprep.subr.bf16.mxu0 %v18774_v39  ;;  %v18850_v38 = vld [vmem:[#allocation43 + $0x3e0] ss:$16 sps:$4 sm:$0xff]   ;;  %v18855_v39 = vld [vmem:[#allocation43 + $0xc] ss:$16 sps:$4 sm:$0xff]  }
 0xf4a   : > { %6816 = vmatpush1.bf16.msra.mxu1 %v18769_v42  ;;  %6857 = vmatpush1.bf16.msra.mxu0 %v18772_v44  ;;  %v18858_v42 = vld [vmem:[#allocation43 + $0x20c] ss:$16 sps:$4 sm:$0xff]  }
 0xf4b   : > { %6817 = vmatprep.subr.bf16.mxu1 %v18777_v45  ;;  %6858 = vmatprep.subr.bf16.mxu0 %v18780_v46 }
 0xf4e   : > { %6818 = vmatpush1.bf16.msra.mxu1 %v18775_v47  ;;  %6859 = vmatpush1.bf16.msra.mxu0 %v18778_v48 }
 0xf4f   : > { %6819 = vmatprep.subr.bf16.mxu1 %v18783_v49  ;;  %6860 = vmatprep.subr.bf16.mxu0 %v18786_v50 }
 0xf52   : > { %6820 = vmatpush1.bf16.msra.mxu1 %v18781_v51  ;;  %6861 = vmatpush1.bf16.msra.mxu0 %v18784_v52 }
 0xf53   : > { %6821 = vmatprep.subr.bf16.mxu1 %v18789_v53  ;;  %6862 = vmatprep.subr.bf16.mxu0 %v18792_v54 }
 0xf56   : > { %6822 = vmatpush1.bf16.msra.mxu1 %v18787_v55  ;;  %6863 = vmatpush1.bf16.msra.mxu0 %v18790_v56 }
 0xf57   : > { %6823 = vmatprep.subr.bf16.mxu1 %v18795_v57  ;;  %6864 = vmatprep.subr.bf16.mxu0 %v18798_v58 }
 0xf5a   : > { %6824 = vmatpush1.bf16.msra.mxu1 %v18793_v60  ;;  %6865 = vmatpush1.bf16.msra.mxu0 %v18796_v62  ;;  %v18853_v62 = vld [vmem:[#allocation43 + $0x8] ss:$16 sps:$4 sm:$0xff]  }
 0xf5b   : > { %6825 = vmatprep.subr.bf16.mxu1 %v18801_v63  ;;  %6866 = vmatprep.subr.bf16.mxu0 %v18804_v0  ;;  %v18856_v63 = vld [vmem:[#allocation43 + $0x208] ss:$16 sps:$4 sm:$0xff]  }
 0xf5e   : > { %6826 = vmatpush1.bf16.msra.mxu1 %v18799_v1  ;;  %6867 = vmatpush1.bf16.msra.mxu0 %v18802_v2 }
 0xf5f   : > { %6827 = vmatprep.subr.bf16.mxu1 %v18807_v3  ;;  %6868 = vmatprep.subr.bf16.mxu0 %v18810_v4  ;;  %v18861_v4 = vld [vmem:[#allocation43 + $0x2c] ss:$16 sps:$4 sm:$0xff]  }
 0xf62   : > { %6828 = vmatpush1.bf16.msra.mxu1 %v18805_v6  ;;  %6869 = vmatpush1.bf16.msra.mxu0 %v18808_v7  ;;  %v18864_v6 = vld [vmem:[#allocation43 + $0x22c] ss:$16 sps:$4 sm:$0xff]   ;;  %v18859_v7 = vld [vmem:[#allocation43 + $0x28] ss:$16 sps:$4 sm:$0xff]  }
 0xf63   : > { %6829 = vmatprep.subr.bf16.mxu1 %v18813_v9  ;;  %6870 = vmatprep.subr.bf16.mxu0 %v18816_v12  ;;  %v18862_v9 = vld [vmem:[#allocation43 + $0x228] ss:$16 sps:$4 sm:$0xff]   ;;  %v18867_v12 = vld [vmem:[#allocation43 + $0x4c] ss:$16 sps:$4 sm:$0xff]  }
 0xf66   : > { %6830 = vmatpush1.bf16.msra.mxu1 %v18811_v13  ;;  %6871 = vmatpush1.bf16.msra.mxu0 %v18814_v14  ;;  %v18870_v13 = vld [vmem:[#allocation43 + $0x24c] ss:$16 sps:$4 sm:$0xff]   ;;  %v18865_v14 = vld [vmem:[#allocation43 + $0x48] ss:$16 sps:$4 sm:$0xff]  }
 0xf67   : > { %6831 = vmatprep.subr.bf16.mxu1 %v18819_v15  ;;  %6872 = vmatprep.subr.bf16.mxu0 %v18822_v40  ;;  %v18868_v15 = vld [vmem:[#allocation43 + $0x248] ss:$16 sps:$4 sm:$0xff]   ;;  %v18873_v40 = vld [vmem:[#allocation43 + $0x6c] ss:$16 sps:$4 sm:$0xff]  }
 0xf6a   : > { %6832 = vmatpush1.bf16.msra.mxu1 %v18817_v16  ;;  %6873 = vmatpush1.bf16.msra.mxu0 %v18820_v17  ;;  %v18876_v16 = vld [vmem:[#allocation43 + $0x26c] ss:$16 sps:$4 sm:$0xff]   ;;  %v18871_v17 = vld [vmem:[#allocation43 + $0x68] ss:$16 sps:$4 sm:$0xff]  }
 0xf6b   : > { %6833 = vmatprep.subr.bf16.mxu1 %v18825_v18  ;;  %6874 = vmatprep.subr.bf16.mxu0 %v18828_v19  ;;  %v18874_v18 = vld [vmem:[#allocation43 + $0x268] ss:$16 sps:$4 sm:$0xff]   ;;  %v18879_v19 = vld [vmem:[#allocation43 + $0x8c] ss:$16 sps:$4 sm:$0xff]  }
 0xf6e   : > { %6834 = vmatpush1.bf16.msra.mxu1 %v18823_v20  ;;  %6875 = vmatpush1.bf16.msra.mxu0 %v18826_v21  ;;  %v18882_v20 = vld [vmem:[#allocation43 + $0x28c] ss:$16 sps:$4 sm:$0xff]   ;;  %v18877_v21 = vld [vmem:[#allocation43 + $0x88] ss:$16 sps:$4 sm:$0xff]  }
 0xf6f   : > { %6835 = vmatprep.subr.bf16.mxu1 %v18831_v22  ;;  %6876 = vmatprep.subr.bf16.mxu0 %v18834_v23  ;;  %v18880_v22 = vld [vmem:[#allocation43 + $0x288] ss:$16 sps:$4 sm:$0xff]   ;;  %v18885_v23 = vld [vmem:[#allocation43 + $0xac] ss:$16 sps:$4 sm:$0xff]  }
 0xf72   : > { %6836 = vmatpush1.bf16.msra.mxu1 %v18829_v24  ;;  %6877 = vmatpush1.bf16.msra.mxu0 %v18832_v25  ;;  %v18888_v24 = vld [vmem:[#allocation43 + $0x2ac] ss:$16 sps:$4 sm:$0xff]   ;;  %v18883_v25 = vld [vmem:[#allocation43 + $0xa8] ss:$16 sps:$4 sm:$0xff]  }
 0xf73   : > { %6837 = vmatprep.subr.bf16.mxu1 %v18837_v26  ;;  %6878 = vmatprep.subr.bf16.mxu0 %v18840_v32  ;;  %v18886_v26 = vld [vmem:[#allocation43 + $0x2a8] ss:$16 sps:$4 sm:$0xff]   ;;  %v18891_v32 = vld [vmem:[#allocation43 + $0xcc] ss:$16 sps:$4 sm:$0xff]  }
 0xf76   : > { %6838 = vmatpush1.bf16.msra.mxu1 %v18835_v33  ;;  %6879 = vmatpush1.bf16.msra.mxu0 %v18838_v34  ;;  %v18894_v33 = vld [vmem:[#allocation43 + $0x2cc] ss:$16 sps:$4 sm:$0xff]   ;;  %v18889_v34 = vld [vmem:[#allocation43 + $0xc8] ss:$16 sps:$4 sm:$0xff]  }
 0xf77   : > { %6839 = vmatprep.subr.bf16.mxu1 %v18843_v35  ;;  %6880 = vmatprep.subr.bf16.mxu0 %v18846_v11  ;;  %v18892_v35 = vld [vmem:[#allocation43 + $0x2c8] ss:$16 sps:$4 sm:$0xff]   ;;  %v18897_v11 = vld [vmem:[#allocation43 + $0xec] ss:$16 sps:$4 sm:$0xff]  }
 0xf7a   : > { %6840 = vmatpush1.bf16.msra.mxu1 %v18841_v27  ;;  %6881 = vmatpush1.bf16.msra.mxu0 %v18844_v36  ;;  %v18900_v27 = vld [vmem:[#allocation43 + $0x2ec] ss:$16 sps:$4 sm:$0xff]   ;;  %v18895_v36 = vld [vmem:[#allocation43 + $0xe8] ss:$16 sps:$4 sm:$0xff]  }
 0xf7b   : > { %6841 = vmatprep.subr.bf16.mxu1 %v18849_v28  ;;  %6882 = vmatprep.subr.bf16.mxu0 %v18852_v8  ;;  %v18898_v28 = vld [vmem:[#allocation43 + $0x2e8] ss:$16 sps:$4 sm:$0xff]   ;;  %v18903_v8 = vld [vmem:[#allocation43 + $0x10c] ss:$16 sps:$4 sm:$0xff]  }
 0xf7e   : > { %6842 = vmatpush1.bf16.msra.mxu1 %v18847_v37  ;;  %6883 = vmatpush1.bf16.msra.mxu0 %v18850_v38  ;;  %v18906_v37 = vld [vmem:[#allocation43 + $0x30c] ss:$16 sps:$4 sm:$0xff]   ;;  %v18901_v38 = vld [vmem:[#allocation43 + $0x108] ss:$16 sps:$4 sm:$0xff]  }
 0xf7f   : > { %6893 = vmatprep.subr.bf16.mxu1 %v18855_v39  ;;  %6934 = vmatprep.subr.bf16.mxu0 %v18858_v42  ;;  %v18904_v39 = vld [vmem:[#allocation43 + $0x308] ss:$16 sps:$4 sm:$0xff]   ;;  %v18909_v42 = vld [vmem:[#allocation43 + $0x12c] ss:$16 sps:$4 sm:$0xff]  }
0x100c   : > { %v22735_v44 = vpop.f32.mrb[52].mxu1  ;;  %v22737_v45 = vpop.f32.mrb[60].mxu0 }
0x100d   : > { %v22739_v46 = vpop.f32.mrb[53].mxu1  ;;  %v22741_v47 = vpop.f32.mrb[61].mxu0 }
0x100e   : > { %v5777_v48 = vpop.f32.mrb[54].mxu1  ;;  %v5818_v49 = vpop.f32.mrb[62].mxu0 }
0x100f   : > { %v5778_v50 = vpop.f32.mrb[55].mxu1  ;;  %v5819_v51 = vpop.f32.mrb[63].mxu0  ;;  %v18912_v48 = vld [vmem:[#allocation43 + $0x32c] ss:$16 sps:$4 sm:$0xff]   ;;  %v18907_v49 = vld [vmem:[#allocation43 + $0x128] ss:$16 sps:$4 sm:$0xff]  }
0x1010   : > { %v18910_v50 = vld [vmem:[#allocation43 + $0x328] ss:$16 sps:$4 sm:$0xff]   ;;  %v18915_v51 = vld [vmem:[#allocation43 + $0x14c] ss:$16 sps:$4 sm:$0xff]  }
0x1014   : > { %v5991_v52 = vpop.f32.mrb[56].mxu1  ;;  %v6032_v53 = vpop.f32.mrb[64].mxu0 }
0x1015   : > { %v5993_v54 = vpop.f32.mrb[57].mxu1  ;;  %v6034_v55 = vpop.f32.mrb[65].mxu0  ;;  %v22743_v0 = vpack.c.bf16 %v5991_v52, %v5991_v52  ;;  %v22745_v1 = vpack.c.bf16 %v6032_v53, %v6032_v53  ;;  %v18918_v52 = vld [vmem:[#allocation43 + $0x34c] ss:$16 sps:$4 sm:$0xff]   ;;  %v18913_v53 = vld [vmem:[#allocation43 + $0x148] ss:$16 sps:$4 sm:$0xff]  }
0x1016   : > { %v6040_v56 = vpack.c.bf16 %v5993_v54, %v5993_v54  ;;  %v6042_v57 = vpack.c.bf16 %v6034_v55, %v6034_v55  ;;  %v5995_v58 = vpop.f32.mrb[58].mxu1  ;;  %v6036_v60 = vpop.f32.mrb[66].mxu0  ;;  %v18916_v54 = vld [vmem:[#allocation43 + $0x348] ss:$16 sps:$4 sm:$0xff]   ;;  %v18921_v55 = vld [vmem:[#allocation43 + $0x16c] ss:$16 sps:$4 sm:$0xff]  }
0x1017   : > { %v5996_v2 = vpop.f32.mrb[59].mxu1  ;;  %v6037_v3 = vpop.f32.mrb[67].mxu0  ;;  %v18922_v58 = vld [vmem:[#allocation43 + $0x368] ss:$16 sps:$4 sm:$0xff]   ;;  %v18927_v60 = vld [vmem:[#allocation43 + $0x18c] ss:$16 sps:$4 sm:$0xff]  }
0x1018   : > { %6843 = vmatprep.mubr.bf16.mxu1 %v6040_v56  ;;  %6884 = vmatprep.mubr.bf16.mxu0 %v6042_v57  ;;  %v18928_v2 = vld [vmem:[#allocation43 + $0x388] ss:$16 sps:$4 sm:$0xff]   ;;  %v18933_v3 = vld [vmem:[#allocation43 + $0x1ac] ss:$16 sps:$4 sm:$0xff]  }
0x1019   : > { %6844 = vmatmul.mubr.bf16.vlgmr.msra.gmra.mrb[60].mxu1 %v22743_v0  ;;  %6885 = vmatmul.mubr.bf16.vlgmr.msra.gmra.mrb[68].mxu0 %v22745_v1 }
0x101a   : > { %6894 = vmatpush1.bf16.msra.mxu1 %v18853_v62  ;;  %6935 = vmatpush1.bf16.msra.mxu0 %v18856_v63  ;;  %v18930_v62 = vld [vmem:[#allocation43 + $0x38c] ss:$16 sps:$4 sm:$0xff]   ;;  %v18925_v63 = vld [vmem:[#allocation43 + $0x188] ss:$16 sps:$4 sm:$0xff]  }
0x101b   : > { %6925 = vmatprep.mubr.bf16.mxu1 %v6040_v56  ;;  %6966 = vmatprep.mubr.bf16.mxu0 %v6042_v57  ;;  %v18924_v56 = vld [vmem:[#allocation43 + $0x36c] ss:$16 sps:$4 sm:$0xff]   ;;  %v18919_v57 = vld [vmem:[#allocation43 + $0x168] ss:$16 sps:$4 sm:$0xff]  }
0x101c   : > { %6895 = vmatprep.subr.bf16.mxu1 %v18861_v4  ;;  %6936 = vmatprep.subr.bf16.mxu0 %v18864_v6  ;;  %v18936_v4 = vld [vmem:[#allocation43 + $0x3ac] ss:$16 sps:$4 sm:$0xff]   ;;  %v18931_v6 = vld [vmem:[#allocation43 + $0x1a8] ss:$16 sps:$4 sm:$0xff]  }
0x101e   : > { %6896 = vmatpush1.bf16.msra.mxu1 %v18859_v7  ;;  %6937 = vmatpush1.bf16.msra.mxu0 %v18862_v9  ;;  %v18934_v7 = vld [vmem:[#allocation43 + $0x3a8] ss:$16 sps:$4 sm:$0xff]   ;;  %v18939_v9 = vld [vmem:[#allocation43 + $0x1cc] ss:$16 sps:$4 sm:$0xff]  }
0x101f   : > { %6897 = vmatprep.subr.bf16.mxu1 %v18867_v12  ;;  %6938 = vmatprep.subr.bf16.mxu0 %v18870_v13  ;;  %v18942_v12 = vld [vmem:[#allocation43 + $0x3cc] ss:$16 sps:$4 sm:$0xff]   ;;  %v18937_v13 = vld [vmem:[#allocation43 + $0x1c8] ss:$16 sps:$4 sm:$0xff]  }
0x1022   : > { %6898 = vmatpush1.bf16.msra.mxu1 %v18865_v14  ;;  %6939 = vmatpush1.bf16.msra.mxu0 %v18868_v15  ;;  %v18940_v14 = vld [vmem:[#allocation43 + $0x3c8] ss:$16 sps:$4 sm:$0xff]   ;;  %v18945_v15 = vld [vmem:[#allocation43 + $0x1ec] ss:$16 sps:$4 sm:$0xff]  }
0x1023   : > { %6899 = vmatprep.subr.bf16.mxu1 %v18873_v40  ;;  %6940 = vmatprep.subr.bf16.mxu0 %v18876_v16  ;;  %v18948_v40 = vld [vmem:[#allocation43 + $0x3ec] ss:$16 sps:$4 sm:$0xff]   ;;  %v18943_v16 = vld [vmem:[#allocation43 + $0x1e8] ss:$16 sps:$4 sm:$0xff]  }
0x1026   : > { %6900 = vmatpush1.bf16.msra.mxu1 %v18871_v17  ;;  %6941 = vmatpush1.bf16.msra.mxu0 %v18874_v18  ;;  %v18946_v17 = vld [vmem:[#allocation43 + $0x3e8] ss:$16 sps:$4 sm:$0xff]   ;;  %v18951_v18 = vld [vmem:[#allocation41 + $0x4] ss:$16 sps:$4 sm:$0xff]  }
0x1027   : > { %6901 = vmatprep.subr.bf16.mxu1 %v18879_v19  ;;  %6942 = vmatprep.subr.bf16.mxu0 %v18882_v20  ;;  %v18954_v19 = vld [vmem:[#allocation41 + $0x204] ss:$16 sps:$4 sm:$0xff]   ;;  %v18949_v20 = vld [vmem:[#allocation41] ss:$16 sps:$4 sm:$0xff]  }
0x102a   : > { %6902 = vmatpush1.bf16.msra.mxu1 %v18877_v21  ;;  %6943 = vmatpush1.bf16.msra.mxu0 %v18880_v22  ;;  %v18952_v21 = vld [vmem:[#allocation41 + $0x200] ss:$16 sps:$4 sm:$0xff]   ;;  %v22751_v22 = vpack.c.bf16 %v22739_v46, %v22739_v46  ;;  %v18963_v46 = vld [vmem:[#allocation41 + $0x44] ss:$16 sps:$4 sm:$0xff]  }
0x102b   : > { %6903 = vmatprep.subr.bf16.mxu1 %v18885_v23  ;;  %6944 = vmatprep.subr.bf16.mxu0 %v18888_v24  ;;  %v18957_v23 = vld [vmem:[#allocation41 + $0x24] ss:$16 sps:$4 sm:$0xff]  }
0x102c   : > { %v18960_v24 = vld [vmem:[#allocation41 + $0x224] ss:$16 sps:$4 sm:$0xff]  }
0x102e   : > { %6904 = vmatpush1.bf16.msra.mxu1 %v18883_v25  ;;  %6945 = vmatpush1.bf16.msra.mxu0 %v18886_v26  ;;  %v22755_v25 = vpack.c.bf16 %v22741_v47, %v22741_v47  ;;  %v18955_v26 = vld [vmem:[#allocation41 + $0x20] ss:$16 sps:$4 sm:$0xff]  }
0x102f   : > { %6905 = vmatprep.subr.bf16.mxu1 %v18891_v32  ;;  %6946 = vmatprep.subr.bf16.mxu0 %v18894_v33  ;;  %v18958_v32 = vld [vmem:[#allocation41 + $0x220] ss:$16 sps:$4 sm:$0xff]   ;;  %v18966_v33 = vld [vmem:[#allocation41 + $0x244] ss:$16 sps:$4 sm:$0xff]  }
0x1030   : > { %v18964_v47 = vld [vmem:[#allocation41 + $0x240] ss:$16 sps:$4 sm:$0xff]  }
0x1032   : > { %6906 = vmatpush1.bf16.msra.mxu1 %v18889_v34  ;;  %6947 = vmatpush1.bf16.msra.mxu0 %v18892_v35  ;;  %v18961_v34 = vld [vmem:[#allocation41 + $0x40] ss:$16 sps:$4 sm:$0xff]  }
0x1033   : > { %6907 = vmatprep.subr.bf16.mxu1 %v18897_v11  ;;  %6948 = vmatprep.subr.bf16.mxu0 %v18900_v27  ;;  %v18967_v35 = vld [vmem:[#allocation41 + $0x60] ss:$16 sps:$4 sm:$0xff]   ;;  %v18975_v27 = vld [vmem:[#allocation41 + $0x84] ss:$16 sps:$4 sm:$0xff]  }
0x1034   : > { %v18970_v11 = vld [vmem:[#allocation41 + $0x260] ss:$16 sps:$4 sm:$0xff]  }
0x1036   : > { %6908 = vmatpush1.bf16.msra.mxu1 %v18895_v36  ;;  %6949 = vmatpush1.bf16.msra.mxu0 %v18898_v28  ;;  %v18978_v36 = vld [vmem:[#allocation41 + $0x284] ss:$16 sps:$4 sm:$0xff]   ;;  %v18973_v28 = vld [vmem:[#allocation41 + $0x80] ss:$16 sps:$4 sm:$0xff]  }
0x1037   : > { %6909 = vmatprep.subr.bf16.mxu1 %v18903_v8  ;;  %6950 = vmatprep.subr.bf16.mxu0 %v18906_v37  ;;  %v18976_v8 = vld [vmem:[#allocation41 + $0x280] ss:$16 sps:$4 sm:$0xff]   ;;  %v18981_v37 = vld [vmem:[#allocation41 + $0xa4] ss:$16 sps:$4 sm:$0xff]  }
0x103a   : > { %6910 = vmatpush1.bf16.msra.mxu1 %v18901_v38  ;;  %6951 = vmatpush1.bf16.msra.mxu0 %v18904_v39  ;;  %v18984_v38 = vld [vmem:[#allocation41 + $0x2a4] ss:$16 sps:$4 sm:$0xff]   ;;  %v18979_v39 = vld [vmem:[#allocation41 + $0xa0] ss:$16 sps:$4 sm:$0xff]  }
0x103b   : > { %6911 = vmatprep.subr.bf16.mxu1 %v18909_v42  ;;  %6952 = vmatprep.subr.bf16.mxu0 %v18912_v48  ;;  %v18982_v42 = vld [vmem:[#allocation41 + $0x2a0] ss:$16 sps:$4 sm:$0xff]   ;;  %v18987_v48 = vld [vmem:[#allocation41 + $0xc4] ss:$16 sps:$4 sm:$0xff]  }
0x103e   : > { %6912 = vmatpush1.bf16.msra.mxu1 %v18907_v49  ;;  %6953 = vmatpush1.bf16.msra.mxu0 %v18910_v50  ;;  %v18990_v49 = vld [vmem:[#allocation41 + $0x2c4] ss:$16 sps:$4 sm:$0xff]   ;;  %v18985_v50 = vld [vmem:[#allocation41 + $0xc0] ss:$16 sps:$4 sm:$0xff]  }
0x103f   : > { %6913 = vmatprep.subr.bf16.mxu1 %v18915_v51  ;;  %6954 = vmatprep.subr.bf16.mxu0 %v18918_v52  ;;  %v18988_v51 = vld [vmem:[#allocation41 + $0x2c0] ss:$16 sps:$4 sm:$0xff]   ;;  %v18993_v52 = vld [vmem:[#allocation41 + $0xe4] ss:$16 sps:$4 sm:$0xff]  }
0x1042   : > { %6914 = vmatpush1.bf16.msra.mxu1 %v18913_v53  ;;  %6955 = vmatpush1.bf16.msra.mxu0 %v18916_v54  ;;  %v18996_v53 = vld [vmem:[#allocation41 + $0x2e4] ss:$16 sps:$4 sm:$0xff]   ;;  %v18991_v54 = vld [vmem:[#allocation41 + $0xe0] ss:$16 sps:$4 sm:$0xff]  }
0x1043   : > { %6915 = vmatprep.subr.bf16.mxu1 %v18921_v55  ;;  %6956 = vmatprep.subr.bf16.mxu0 %v18924_v56  ;;  %v18994_v55 = vld [vmem:[#allocation41 + $0x2e0] ss:$16 sps:$4 sm:$0xff]   ;;  %v18999_v56 = vld [vmem:[#allocation41 + $0x104] ss:$16 sps:$4 sm:$0xff]  }
0x1046   : > { %6916 = vmatpush1.bf16.msra.mxu1 %v18919_v57  ;;  %6957 = vmatpush1.bf16.msra.mxu0 %v18922_v58  ;;  %v19002_v57 = vld [vmem:[#allocation41 + $0x304] ss:$16 sps:$4 sm:$0xff]   ;;  %v18997_v58 = vld [vmem:[#allocation41 + $0x100] ss:$16 sps:$4 sm:$0xff]  }
0x1047   : > { %6917 = vmatprep.subr.bf16.mxu1 %v18927_v60  ;;  %6958 = vmatprep.subr.bf16.mxu0 %v18930_v62  ;;  %v19000_v60 = vld [vmem:[#allocation41 + $0x300] ss:$16 sps:$4 sm:$0xff]   ;;  %v19005_v62 = vld [vmem:[#allocation41 + $0x124] ss:$16 sps:$4 sm:$0xff]  }
0x104a   : > { %6918 = vmatpush1.bf16.msra.mxu1 %v18925_v63  ;;  %6959 = vmatpush1.bf16.msra.mxu0 %v18928_v2  ;;  %v19008_v63 = vld [vmem:[#allocation41 + $0x324] ss:$16 sps:$4 sm:$0xff]   ;;  %v19003_v2 = vld [vmem:[#allocation41 + $0x120] ss:$16 sps:$4 sm:$0xff]  }
0x104b   : > { %6919 = vmatprep.subr.bf16.mxu1 %v18933_v3  ;;  %6960 = vmatprep.subr.bf16.mxu0 %v18936_v4  ;;  %v19006_v3 = vld [vmem:[#allocation41 + $0x320] ss:$16 sps:$4 sm:$0xff]   ;;  %v19011_v4 = vld [vmem:[#allocation41 + $0x144] ss:$16 sps:$4 sm:$0xff]  }
0x104e   : > { %6920 = vmatpush1.bf16.msra.mxu1 %v18931_v6  ;;  %6961 = vmatpush1.bf16.msra.mxu0 %v18934_v7  ;;  %v19014_v6 = vld [vmem:[#allocation41 + $0x344] ss:$16 sps:$4 sm:$0xff]   ;;  %v19009_v7 = vld [vmem:[#allocation41 + $0x140] ss:$16 sps:$4 sm:$0xff]  }
0x104f   : > { %6921 = vmatprep.subr.bf16.mxu1 %v18939_v9  ;;  %6962 = vmatprep.subr.bf16.mxu0 %v18942_v12  ;;  %v19012_v9 = vld [vmem:[#allocation41 + $0x340] ss:$16 sps:$4 sm:$0xff]   ;;  %v19017_v12 = vld [vmem:[#allocation41 + $0x164] ss:$16 sps:$4 sm:$0xff]  }
0x1052   : > { %6922 = vmatpush1.bf16.msra.mxu1 %v18937_v13  ;;  %6963 = vmatpush1.bf16.msra.mxu0 %v18940_v14  ;;  %v19020_v13 = vld [vmem:[#allocation41 + $0x364] ss:$16 sps:$4 sm:$0xff]   ;;  %v19015_v14 = vld [vmem:[#allocation41 + $0x160] ss:$16 sps:$4 sm:$0xff]  }
0x1053   : > { %6923 = vmatprep.subr.bf16.mxu1 %v18945_v15  ;;  %6964 = vmatprep.subr.bf16.mxu0 %v18948_v40  ;;  %v19018_v15 = vld [vmem:[#allocation41 + $0x360] ss:$16 sps:$4 sm:$0xff]   ;;  %v19023_v40 = vld [vmem:[#allocation41 + $0x184] ss:$16 sps:$4 sm:$0xff]  }
0x1056   : > { %6924 = vmatpush1.bf16.msra.mxu1 %v18943_v16  ;;  %6965 = vmatpush1.bf16.msra.mxu0 %v18946_v17  ;;  %v19026_v16 = vld [vmem:[#allocation41 + $0x384] ss:$16 sps:$4 sm:$0xff]   ;;  %v19021_v17 = vld [vmem:[#allocation41 + $0x180] ss:$16 sps:$4 sm:$0xff]  }
0x1057   : > { %7615 = vmatprep.subr.bf16.mxu1 %v18951_v18  ;;  %7656 = vmatprep.subr.bf16.mxu0 %v18954_v19  ;;  %v19024_v18 = vld [vmem:[#allocation41 + $0x380] ss:$16 sps:$4 sm:$0xff]   ;;  %v19029_v19 = vld [vmem:[#allocation41 + $0x1a4] ss:$16 sps:$4 sm:$0xff]  }
0x1059   : > { %6926 = vmatmul.mubr.bf16.vlgmr.msra.gmra.mrb[64].mxu1 %v22743_v0  ;;  %6967 = vmatmul.mubr.bf16.vlgmr.msra.gmra.mrb[72].mxu0 %v22745_v1  ;;  %v18969_v0 = vld [vmem:[#allocation41 + $0x64] ss:$16 sps:$4 sm:$0xff]  }
0x105a   : > { %7616 = vmatpush1.bf16.msra.mxu1 %v18949_v20  ;;  %7647 = vmatprep.mubr.bf16.mxu1 %v22751_v22  ;;  %v18972_v1 = vld [vmem:[#allocation41 + $0x264] ss:$16 sps:$4 sm:$0xff]  }
0x105b   : > { %7657 = vmatpush1.bf16.msra.mxu0 %v18952_v21  ;;  %7688 = vmatprep.mubr.bf16.mxu0 %v22755_v25  ;;  %v19032_v20 = vld [vmem:[#allocation41 + $0x3a4] ss:$16 sps:$4 sm:$0xff]   ;;  %v19027_v21 = vld [vmem:[#allocation41 + $0x1a0] ss:$16 sps:$4 sm:$0xff]  }
0x105c   : > { %7617 = vmatprep.subr.bf16.mxu1 %v18957_v23  ;;  %7658 = vmatprep.subr.bf16.mxu0 %v18960_v24  ;;  %v19030_v23 = vld [vmem:[#allocation41 + $0x3a0] ss:$16 sps:$4 sm:$0xff]   ;;  %v19035_v24 = vld [vmem:[#allocation41 + $0x1c4] ss:$16 sps:$4 sm:$0xff]  }
0x105e   : > { %7618 = vmatpush1.bf16.msra.mxu1 %v18955_v26  ;;  %v19038_v26 = vld [vmem:[#allocation41 + $0x3c4] ss:$16 sps:$4 sm:$0xff]  }
0x105f   : > { %7659 = vmatpush1.bf16.msra.mxu0 %v18958_v32  ;;  %7619 = vmatprep.subr.bf16.mxu1 %v18963_v46  ;;  %v19033_v32 = vld [vmem:[#allocation41 + $0x1c0] ss:$16 sps:$4 sm:$0xff]  }
0x1060   : > { %7660 = vmatprep.subr.bf16.mxu0 %v18966_v33  ;;  %v19036_v46 = vld [vmem:[#allocation41 + $0x3c0] ss:$16 sps:$4 sm:$0xff]   ;;  %v19041_v33 = vld [vmem:[#allocation41 + $0x1e4] ss:$16 sps:$4 sm:$0xff]  }
0x1062   : > { %7620 = vmatpush1.bf16.msra.mxu1 %v18961_v34  ;;  %v19044_v34 = vld [vmem:[#allocation41 + $0x3e4] ss:$16 sps:$4 sm:$0xff]  }
0x1063   : > { %7661 = vmatpush1.bf16.msra.mxu0 %v18964_v47  ;;  %7621 = vmatprep.subr.bf16.mxu1 %v18969_v0  ;;  %v19039_v47 = vld [vmem:[#allocation41 + $0x1e0] ss:$16 sps:$4 sm:$0xff]  }
0x1064   : > { %7662 = vmatprep.subr.bf16.mxu0 %v18972_v1  ;;  %v19042_v0 = vld [vmem:[#allocation41 + $0x3e0] ss:$16 sps:$4 sm:$0xff]   ;;  %v19047_v1 = vld [vmem:[#allocation41 + $0xc] ss:$16 sps:$4 sm:$0xff]  }
0x1066   : > { %7622 = vmatpush1.bf16.msra.mxu1 %v18967_v35  ;;  %v19050_v35 = vld [vmem:[#allocation41 + $0x20c] ss:$16 sps:$4 sm:$0xff]  }
0x1067   : > { %7663 = vmatpush1.bf16.msra.mxu0 %v18970_v11  ;;  %7623 = vmatprep.subr.bf16.mxu1 %v18975_v27  ;;  %v19045_v11 = vld [vmem:[#allocation41 + $0x8] ss:$16 sps:$4 sm:$0xff]   ;;  %v22763_v27 = vpack.c.bf16 %v22735_v44, %v22735_v44 }
0x1068   : > { %7664 = vmatprep.subr.bf16.mxu0 %v18978_v36  ;;  %v19048_v36 = vld [vmem:[#allocation41 + $0x208] ss:$16 sps:$4 sm:$0xff]  }
0x1069   : > { %v19054_v44 = vld [vmem:[#allocation41 + $0x228] ss:$16 sps:$4 sm:$0xff]  }
0x106a   : > { %7624 = vmatpush1.bf16.msra.mxu1 %v18973_v28  ;;  %v22767_v28 = vpack.c.bf16 %v22737_v45, %v22737_v45  ;;  %v19057_v45 = vld [vmem:[#allocation41 + $0x48] ss:$16 sps:$4 sm:$0xff]  }
0x106b   : > { %7665 = vmatpush1.bf16.msra.mxu0 %v18976_v8  ;;  %7625 = vmatprep.subr.bf16.mxu1 %v18981_v37  ;;  %v19053_v8 = vld [vmem:[#allocation41 + $0x2c] ss:$16 sps:$4 sm:$0xff]  }
0x106c   : > { %7666 = vmatprep.subr.bf16.mxu0 %v18984_v38  ;;  %v19056_v37 = vld [vmem:[#allocation41 + $0x22c] ss:$16 sps:$4 sm:$0xff]   ;;  %v19051_v38 = vld [vmem:[#allocation41 + $0x28] ss:$16 sps:$4 sm:$0xff]  }
0x106e   : > { %7626 = vmatpush1.bf16.msra.mxu1 %v18979_v39  ;;  %v19059_v39 = vld [vmem:[#allocation41 + $0x4c] ss:$16 sps:$4 sm:$0xff]  }
0x106f   : > { %7667 = vmatpush1.bf16.msra.mxu0 %v18982_v42  ;;  %7627 = vmatprep.subr.bf16.mxu1 %v18987_v48  ;;  %v19062_v42 = vld [vmem:[#allocation41 + $0x24c] ss:$16 sps:$4 sm:$0xff]   ;;  %v19060_v48 = vld [vmem:[#allocation41 + $0x248] ss:$16 sps:$4 sm:$0xff]  }
0x1070   : > { %7668 = vmatprep.subr.bf16.mxu0 %v18990_v49  ;;  %v19065_v49 = vld [vmem:[#allocation41 + $0x6c] ss:$16 sps:$4 sm:$0xff]  }
0x1072   : > { %7628 = vmatpush1.bf16.msra.mxu1 %v18985_v50  ;;  %v19068_v50 = vld [vmem:[#allocation41 + $0x26c] ss:$16 sps:$4 sm:$0xff]  }
0x1073   : > { %7669 = vmatpush1.bf16.msra.mxu0 %v18988_v51  ;;  %7629 = vmatprep.subr.bf16.mxu1 %v18993_v52  ;;  %v19063_v51 = vld [vmem:[#allocation41 + $0x68] ss:$16 sps:$4 sm:$0xff]   ;;  %v19071_v52 = vld [vmem:[#allocation41 + $0x8c] ss:$16 sps:$4 sm:$0xff]  }
0x1074   : > { %7670 = vmatprep.subr.bf16.mxu0 %v18996_v53  ;;  %v19074_v53 = vld [vmem:[#allocation41 + $0x28c] ss:$16 sps:$4 sm:$0xff]  }
0x1076   : > { %7630 = vmatpush1.bf16.msra.mxu1 %v18991_v54  ;;  %v19072_v54 = vld [vmem:[#allocation41 + $0x288] ss:$16 sps:$4 sm:$0xff]  }
0x1077   : > { %7671 = vmatpush1.bf16.msra.mxu0 %v18994_v55  ;;  %7631 = vmatprep.subr.bf16.mxu1 %v18999_v56  ;;  %v19077_v55 = vld [vmem:[#allocation41 + $0xac] ss:$16 sps:$4 sm:$0xff]  }
0x1078   : > { %7672 = vmatprep.subr.bf16.mxu0 %v19002_v57  ;;  %v19080_v56 = vld [vmem:[#allocation41 + $0x2ac] ss:$16 sps:$4 sm:$0xff]   ;;  %v19075_v57 = vld [vmem:[#allocation41 + $0xa8] ss:$16 sps:$4 sm:$0xff]  }
0x107a   : > { %7632 = vmatpush1.bf16.msra.mxu1 %v18997_v58  ;;  %v19078_v58 = vld [vmem:[#allocation41 + $0x2a8] ss:$16 sps:$4 sm:$0xff]  }
0x107b   : > { %7673 = vmatpush1.bf16.msra.mxu0 %v19000_v60  ;;  %7633 = vmatprep.subr.bf16.mxu1 %v19005_v62  ;;  %v19083_v60 = vld [vmem:[#allocation41 + $0xcc] ss:$16 sps:$4 sm:$0xff]  }
0x107c   : > { %7674 = vmatprep.subr.bf16.mxu0 %v19008_v63  ;;  %v19086_v62 = vld [vmem:[#allocation41 + $0x2cc] ss:$16 sps:$4 sm:$0xff]   ;;  %v19081_v63 = vld [vmem:[#allocation41 + $0xc8] ss:$16 sps:$4 sm:$0xff]  }
0x107e   : > { %7634 = vmatpush1.bf16.msra.mxu1 %v19003_v2  ;;  %v19084_v2 = vld [vmem:[#allocation41 + $0x2c8] ss:$16 sps:$4 sm:$0xff]  }
0x107f   : > { %7675 = vmatpush1.bf16.msra.mxu0 %v19006_v3  ;;  %7635 = vmatprep.subr.bf16.mxu1 %v19011_v4  ;;  %v19089_v3 = vld [vmem:[#allocation41 + $0xec] ss:$16 sps:$4 sm:$0xff]  }
0x1080   : > { %7676 = vmatprep.subr.bf16.mxu0 %v19014_v6  ;;  %v19092_v4 = vld [vmem:[#allocation41 + $0x2ec] ss:$16 sps:$4 sm:$0xff]   ;;  %v19087_v6 = vld [vmem:[#allocation41 + $0xe8] ss:$16 sps:$4 sm:$0xff]  }
0x1082   : > { %7636 = vmatpush1.bf16.msra.mxu1 %v19009_v7  ;;  %v19090_v7 = vld [vmem:[#allocation41 + $0x2e8] ss:$16 sps:$4 sm:$0xff]  }
0x1083   : > { %7677 = vmatpush1.bf16.msra.mxu0 %v19012_v9  ;;  %7637 = vmatprep.subr.bf16.mxu1 %v19017_v12  ;;  %v19095_v9 = vld [vmem:[#allocation41 + $0x10c] ss:$16 sps:$4 sm:$0xff]  }
0x1084   : > { %7678 = vmatprep.subr.bf16.mxu0 %v19020_v13  ;;  %v19098_v12 = vld [vmem:[#allocation41 + $0x30c] ss:$16 sps:$4 sm:$0xff]   ;;  %v19093_v13 = vld [vmem:[#allocation41 + $0x108] ss:$16 sps:$4 sm:$0xff]  }
0x1086   : > { %7638 = vmatpush1.bf16.msra.mxu1 %v19015_v14  ;;  %v19096_v14 = vld [vmem:[#allocation41 + $0x308] ss:$16 sps:$4 sm:$0xff]  }
0x1087   : > { %7679 = vmatpush1.bf16.msra.mxu0 %v19018_v15  ;;  %7639 = vmatprep.subr.bf16.mxu1 %v19023_v40  ;;  %v19101_v15 = vld [vmem:[#allocation41 + $0x12c] ss:$16 sps:$4 sm:$0xff]  }
0x1088   : > { %7680 = vmatprep.subr.bf16.mxu0 %v19026_v16  ;;  %v19104_v40 = vld [vmem:[#allocation41 + $0x32c] ss:$16 sps:$4 sm:$0xff]   ;;  %v19099_v16 = vld [vmem:[#allocation41 + $0x128] ss:$16 sps:$4 sm:$0xff]  }
0x108a   : > { %7640 = vmatpush1.bf16.msra.mxu1 %v19021_v17  ;;  %v19102_v17 = vld [vmem:[#allocation41 + $0x328] ss:$16 sps:$4 sm:$0xff]  }
0x108b   : > { %7681 = vmatpush1.bf16.msra.mxu0 %v19024_v18  ;;  %7641 = vmatprep.subr.bf16.mxu1 %v19029_v19  ;;  %v19107_v18 = vld [vmem:[#allocation41 + $0x14c] ss:$16 sps:$4 sm:$0xff]  }
0x108c   : > { %7682 = vmatprep.subr.bf16.mxu0 %v19032_v20  ;;  %v19110_v19 = vld [vmem:[#allocation41 + $0x34c] ss:$16 sps:$4 sm:$0xff]   ;;  %v19105_v20 = vld [vmem:[#allocation41 + $0x148] ss:$16 sps:$4 sm:$0xff]  }
0x108e   : > { %7642 = vmatpush1.bf16.msra.mxu1 %v19027_v21  ;;  %v19108_v21 = vld [vmem:[#allocation41 + $0x348] ss:$16 sps:$4 sm:$0xff]  }
0x108f   : > { %7683 = vmatpush1.bf16.msra.mxu0 %v19030_v23  ;;  %7643 = vmatprep.subr.bf16.mxu1 %v19035_v24  ;;  %v19113_v23 = vld [vmem:[#allocation41 + $0x16c] ss:$16 sps:$4 sm:$0xff]  }
0x1090   : > { %7684 = vmatprep.subr.bf16.mxu0 %v19038_v26  ;;  %v19116_v24 = vld [vmem:[#allocation41 + $0x36c] ss:$16 sps:$4 sm:$0xff]   ;;  %v19111_v26 = vld [vmem:[#allocation41 + $0x168] ss:$16 sps:$4 sm:$0xff]  }
0x1092   : > { %7644 = vmatpush1.bf16.msra.mxu1 %v19033_v32  ;;  %v19114_v32 = vld [vmem:[#allocation41 + $0x368] ss:$16 sps:$4 sm:$0xff]  }
0x1093   : > { %7685 = vmatpush1.bf16.msra.mxu0 %v19036_v46  ;;  %7645 = vmatprep.subr.bf16.mxu1 %v19041_v33  ;;  %v19119_v46 = vld [vmem:[#allocation41 + $0x18c] ss:$16 sps:$4 sm:$0xff]  }
0x1094   : > { %7686 = vmatprep.subr.bf16.mxu0 %v19044_v34  ;;  %v19122_v33 = vld [vmem:[#allocation41 + $0x38c] ss:$16 sps:$4 sm:$0xff]   ;;  %v19117_v34 = vld [vmem:[#allocation41 + $0x188] ss:$16 sps:$4 sm:$0xff]  }
0x1096   : > { %7646 = vmatpush1.bf16.msra.mxu1 %v19039_v47  ;;  %v19120_v47 = vld [vmem:[#allocation41 + $0x388] ss:$16 sps:$4 sm:$0xff]  }
0x1097   : > { %7687 = vmatpush1.bf16.msra.mxu0 %v19042_v0  ;;  %7697 = vmatprep.subr.bf16.mxu1 %v19047_v1  ;;  %v19125_v0 = vld [vmem:[#allocation41 + $0x1ac] ss:$16 sps:$4 sm:$0xff]  }
0x1098   : > { %7738 = vmatprep.subr.bf16.mxu0 %v19050_v35  ;;  %v19128_v1 = vld [vmem:[#allocation41 + $0x3ac] ss:$16 sps:$4 sm:$0xff]   ;;  %v19123_v35 = vld [vmem:[#allocation41 + $0x1a8] ss:$16 sps:$4 sm:$0xff]  }
0x1099   : > { %7648 = vmatmul.mubr.bf16.vlgmr.msra.gmra.mrb[68].mxu1 %v22763_v27 }
0x109a   : > { %7689 = vmatmul.mubr.bf16.vlgmr.msra.gmra.mrb[76].mxu0 %v22767_v28  ;;  %7698 = vmatpush1.bf16.msra.mxu1 %v19045_v11  ;;  %v19126_v11 = vld [vmem:[#allocation41 + $0x3a8] ss:$16 sps:$4 sm:$0xff]  }
0x109b   : > { %7729 = vmatprep.mubr.bf16.mxu1 %v22751_v22  ;;  %7739 = vmatpush1.bf16.msra.mxu0 %v19048_v36  ;;  %v19066_v22 = vld [vmem:[#allocation41 + $0x268] ss:$16 sps:$4 sm:$0xff]   ;;  %v19131_v36 = vld [vmem:[#allocation41 + $0x1cc] ss:$16 sps:$4 sm:$0xff]  }
0x109c   : > { %7770 = vmatprep.mubr.bf16.mxu0 %v22755_v25  ;;  %7699 = vmatprep.subr.bf16.mxu1 %v19053_v8  ;;  %v19069_v25 = vld [vmem:[#allocation41 + $0x88] ss:$16 sps:$4 sm:$0xff]   ;;  %v19134_v8 = vld [vmem:[#allocation41 + $0x3cc] ss:$16 sps:$4 sm:$0xff]  }
0x109d   : > { %7740 = vmatprep.subr.bf16.mxu0 %v19056_v37  ;;  %v19129_v37 = vld [vmem:[#allocation41 + $0x1c8] ss:$16 sps:$4 sm:$0xff]  }
0x109e   : > { %7700 = vmatpush1.bf16.msra.mxu1 %v19051_v38  ;;  %v19132_v38 = vld [vmem:[#allocation41 + $0x3c8] ss:$16 sps:$4 sm:$0xff]  }
0x109f   : > { %7741 = vmatpush1.bf16.msra.mxu0 %v19054_v44  ;;  %7701 = vmatprep.subr.bf16.mxu1 %v19059_v39  ;;  %v19137_v44 = vld [vmem:[#allocation41 + $0x1ec] ss:$16 sps:$4 sm:$0xff]  }
0x10a0   : > { %7742 = vmatprep.subr.bf16.mxu0 %v19062_v42  ;;  %v19140_v39 = vld [vmem:[#allocation41 + $0x3ec] ss:$16 sps:$4 sm:$0xff]   ;;  %v19135_v42 = vld [vmem:[#allocation41 + $0x1e8] ss:$16 sps:$4 sm:$0xff]  }
0x10a2   : > { %7702 = vmatpush1.bf16.msra.mxu1 %v19057_v45  ;;  %v19138_v45 = vld [vmem:[#allocation41 + $0x3e8] ss:$16 sps:$4 sm:$0xff]  }
0x10a3   : > { %7743 = vmatpush1.bf16.msra.mxu0 %v19060_v48  ;;  %7703 = vmatprep.subr.bf16.mxu1 %v19065_v49  ;;  %v7779_v48 = vld [vmem:[%s23245_s6] sm:$0xf]  ;;  %s23254_s6 = sld [smem:[#allocation124_spill]] }
0x10a4   : > { %7744 = vmatprep.subr.bf16.mxu0 %v19068_v50 }
0x10a6   : > { %7704 = vmatpush1.bf16.msra.mxu1 %v19063_v51 }
0x10a7   : > { %7745 = vmatpush1.bf16.msra.mxu0 %v19066_v22  ;;  %7705 = vmatprep.subr.bf16.mxu1 %v19071_v52  ;;  %v19141_v52 = vld [vmem:[#allocation44] ss:$16 sps:$4 sm:$0xff]  }
0x10a8   : > { %7746 = vmatprep.subr.bf16.mxu0 %v19074_v53  ;;  %v19143_v53 = vld [vmem:[#allocation44 + $0x4] ss:$16 sps:$4 sm:$0xff]  }
0x10a9   : > { %p23255_p1 = scmp.ne.s32.totalorder %s23254_s6, 0 }
0x10aa   : > { %7706 = vmatpush1.bf16.msra.mxu1 %v19069_v25  ;;  %v19144_v25 = vld [vmem:[#allocation44 + $0x200] ss:$16 sps:$4 sm:$0xff]  }
0x10ab   : > { %7747 = vmatpush1.bf16.msra.mxu0 %v19072_v54  ;;  %7707 = vmatprep.subr.bf16.mxu1 %v19077_v55  ;;  %v19146_v54 = vld [vmem:[#allocation44 + $0x204] ss:$16 sps:$4 sm:$0xff]  }
0x10ac   : > { %7748 = vmatprep.subr.bf16.mxu0 %v19080_v56  ;;  %v19149_v55 = vld [vmem:[#allocation44 + $0x24] ss:$16 sps:$4 sm:$0xff]  }
0x10ad   : > { %v19152_v56 = vld [vmem:[#allocation44 + $0x224] ss:$16 sps:$4 sm:$0xff]  }
0x10ae   : > { %7708 = vmatpush1.bf16.msra.mxu1 %v19075_v57  ;;  %v19147_v57 = vld [vmem:[#allocation44 + $0x20] ss:$16 sps:$4 sm:$0xff]  }
0x10af   : > { %7749 = vmatpush1.bf16.msra.mxu0 %v19078_v58  ;;  %7709 = vmatprep.subr.bf16.mxu1 %v19083_v60  ;;  %v19150_v58 = vld [vmem:[#allocation44 + $0x220] ss:$16 sps:$4 sm:$0xff]   ;;  %v19155_v60 = vld [vmem:[#allocation44 + $0x44] ss:$16 sps:$4 sm:$0xff]  }
0x10b0   : > { %7750 = vmatprep.subr.bf16.mxu0 %v19086_v62  ;;  %v19158_v62 = vld [vmem:[#allocation44 + $0x244] ss:$16 sps:$4 sm:$0xff]  }
0x10b2   : > { %7710 = vmatpush1.bf16.msra.mxu1 %v19081_v63  ;;  %v19153_v63 = vld [vmem:[#allocation44 + $0x40] ss:$16 sps:$4 sm:$0xff]  }
0x10b3   : > { %7751 = vmatpush1.bf16.msra.mxu0 %v19084_v2  ;;  %7711 = vmatprep.subr.bf16.mxu1 %v19089_v3  ;;  %v19156_v2 = vld [vmem:[#allocation44 + $0x240] ss:$16 sps:$4 sm:$0xff]   ;;  %v19161_v3 = vld [vmem:[#allocation44 + $0x64] ss:$16 sps:$4 sm:$0xff]  }
0x10b4   : > { %7752 = vmatprep.subr.bf16.mxu0 %v19092_v4  ;;  %v19164_v4 = vld [vmem:[#allocation44 + $0x264] ss:$16 sps:$4 sm:$0xff]  }
0x10b6   : > { %7712 = vmatpush1.bf16.msra.mxu1 %v19087_v6  ;;  %v19159_v6 = vld [vmem:[#allocation44 + $0x60] ss:$16 sps:$4 sm:$0xff]  }
0x10b7   : > { %7753 = vmatpush1.bf16.msra.mxu0 %v19090_v7  ;;  %7713 = vmatprep.subr.bf16.mxu1 %v19095_v9  ;;  %v19162_v7 = vld [vmem:[#allocation44 + $0x260] ss:$16 sps:$4 sm:$0xff]   ;;  %v19167_v9 = vld [vmem:[#allocation44 + $0x84] ss:$16 sps:$4 sm:$0xff]  }
0x10b8   : > { %7754 = vmatprep.subr.bf16.mxu0 %v19098_v12  ;;  %v19170_v12 = vld [vmem:[#allocation44 + $0x284] ss:$16 sps:$4 sm:$0xff]  }
0x10ba   : > { %7714 = vmatpush1.bf16.msra.mxu1 %v19093_v13  ;;  %v19165_v13 = vld [vmem:[#allocation44 + $0x80] ss:$16 sps:$4 sm:$0xff]  }
0x10bb   : > { %7755 = vmatpush1.bf16.msra.mxu0 %v19096_v14  ;;  %7715 = vmatprep.subr.bf16.mxu1 %v19101_v15  ;;  %v19168_v14 = vld [vmem:[#allocation44 + $0x280] ss:$16 sps:$4 sm:$0xff]   ;;  %v19173_v15 = vld [vmem:[#allocation44 + $0xa4] ss:$16 sps:$4 sm:$0xff]  }
0x10bc   : > { %7756 = vmatprep.subr.bf16.mxu0 %v19104_v40  ;;  %v19176_v40 = vld [vmem:[#allocation44 + $0x2a4] ss:$16 sps:$4 sm:$0xff]  }
0x10be   : > { %7716 = vmatpush1.bf16.msra.mxu1 %v19099_v16  ;;  %v19171_v16 = vld [vmem:[#allocation44 + $0xa0] ss:$16 sps:$4 sm:$0xff]  }
0x10bf   : > { %7757 = vmatpush1.bf16.msra.mxu0 %v19102_v17  ;;  %7717 = vmatprep.subr.bf16.mxu1 %v19107_v18  ;;  %v19174_v17 = vld [vmem:[#allocation44 + $0x2a0] ss:$16 sps:$4 sm:$0xff]   ;;  %v19179_v18 = vld [vmem:[#allocation44 + $0xc4] ss:$16 sps:$4 sm:$0xff]  }
0x10c0   : > { %7758 = vmatprep.subr.bf16.mxu0 %v19110_v19  ;;  %v19182_v19 = vld [vmem:[#allocation44 + $0x2c4] ss:$16 sps:$4 sm:$0xff]  }
0x10c2   : > { %7718 = vmatpush1.bf16.msra.mxu1 %v19105_v20  ;;  %v19177_v20 = vld [vmem:[#allocation44 + $0xc0] ss:$16 sps:$4 sm:$0xff]  }
0x10c3   : > { %7759 = vmatpush1.bf16.msra.mxu0 %v19108_v21  ;;  %7719 = vmatprep.subr.bf16.mxu1 %v19113_v23  ;;  %v19180_v21 = vld [vmem:[#allocation44 + $0x2c0] ss:$16 sps:$4 sm:$0xff]   ;;  %v19185_v23 = vld [vmem:[#allocation44 + $0xe4] ss:$16 sps:$4 sm:$0xff]  }
0x10c4   : > { %7760 = vmatprep.subr.bf16.mxu0 %v19116_v24  ;;  %v19188_v24 = vld [vmem:[#allocation44 + $0x2e4] ss:$16 sps:$4 sm:$0xff]  }
0x10c6   : > { %7720 = vmatpush1.bf16.msra.mxu1 %v19111_v26  ;;  %v19183_v26 = vld [vmem:[#allocation44 + $0xe0] ss:$16 sps:$4 sm:$0xff]  }
0x10c7   : > { %7761 = vmatpush1.bf16.msra.mxu0 %v19114_v32  ;;  %7721 = vmatprep.subr.bf16.mxu1 %v19119_v46  ;;  %v19186_v32 = vld [vmem:[#allocation44 + $0x2e0] ss:$16 sps:$4 sm:$0xff]   ;;  %v19191_v46 = vld [vmem:[#allocation44 + $0x104] ss:$16 sps:$4 sm:$0xff]  }
0x10c8   : > { %7762 = vmatprep.subr.bf16.mxu0 %v19122_v33  ;;  %v19194_v33 = vld [vmem:[#allocation44 + $0x304] ss:$16 sps:$4 sm:$0xff]  }
0x10ca   : > { %7722 = vmatpush1.bf16.msra.mxu1 %v19117_v34  ;;  %v19189_v34 = vld [vmem:[#allocation44 + $0x100] ss:$16 sps:$4 sm:$0xff]  }
0x10cb   : > { %7763 = vmatpush1.bf16.msra.mxu0 %v19120_v47  ;;  %7723 = vmatprep.subr.bf16.mxu1 %v19125_v0  ;;  %v19192_v47 = vld [vmem:[#allocation44 + $0x300] ss:$16 sps:$4 sm:$0xff]   ;;  %v19197_v0 = vld [vmem:[#allocation44 + $0x124] ss:$16 sps:$4 sm:$0xff]  }
0x10cc   : > { %7764 = vmatprep.subr.bf16.mxu0 %v19128_v1  ;;  %v19200_v1 = vld [vmem:[#allocation44 + $0x324] ss:$16 sps:$4 sm:$0xff]  }
0x10ce   : > { %7724 = vmatpush1.bf16.msra.mxu1 %v19123_v35  ;;  %v19195_v35 = vld [vmem:[#allocation44 + $0x120] ss:$16 sps:$4 sm:$0xff]  }
0x10cf   : > { %7765 = vmatpush1.bf16.msra.mxu0 %v19126_v11  ;;  %7725 = vmatprep.subr.bf16.mxu1 %v19131_v36  ;;  %v19198_v11 = vld [vmem:[#allocation44 + $0x320] ss:$16 sps:$4 sm:$0xff]   ;;  %v19203_v36 = vld [vmem:[#allocation44 + $0x144] ss:$16 sps:$4 sm:$0xff]  }
0x10d0   : > { %7766 = vmatprep.subr.bf16.mxu0 %v19134_v8  ;;  %v19206_v8 = vld [vmem:[#allocation44 + $0x344] ss:$16 sps:$4 sm:$0xff]  }
0x10d2   : > { %7726 = vmatpush1.bf16.msra.mxu1 %v19129_v37  ;;  %v19201_v37 = vld [vmem:[#allocation44 + $0x140] ss:$16 sps:$4 sm:$0xff]  }
0x10d3   : > { %7767 = vmatpush1.bf16.msra.mxu0 %v19132_v38  ;;  %7727 = vmatprep.subr.bf16.mxu1 %v19137_v44  ;;  %v19204_v38 = vld [vmem:[#allocation44 + $0x340] ss:$16 sps:$4 sm:$0xff]   ;;  %v19209_v44 = vld [vmem:[#allocation44 + $0x164] ss:$16 sps:$4 sm:$0xff]  }
0x10d4   : > { %7768 = vmatprep.subr.bf16.mxu0 %v19140_v39  ;;  %v19212_v39 = vld [vmem:[#allocation44 + $0x364] ss:$16 sps:$4 sm:$0xff]  }
0x10d6   : > { %7728 = vmatpush1.bf16.msra.mxu1 %v19135_v42  ;;  %v19207_v42 = vld [vmem:[#allocation44 + $0x160] ss:$16 sps:$4 sm:$0xff]  }
0x10d7   : > { %7769 = vmatpush1.bf16.msra.mxu0 %v19138_v45  ;;  %16722 = vmatprep.subr.msk.bf16.mxu1 %vm3305_vm8, %v22705_v29  ;;  %v19210_v45 = vld [vmem:[#allocation44 + $0x360] ss:$16 sps:$4 sm:$0xff]  }
0x10d8   : > { %16724 = vmatprep.subr.msk.bf16.mxu0 %vm3305_vm8, %v22707_v5 }
0x10d9   : > { %7730 = vmatmul.mubr.bf16.vlgmr.msra.gmra.mrb[72].mxu1 %v22763_v27 }
0x10da   : > { %7771 = vmatmul.mubr.bf16.vlgmr.msra.gmra.mrb[80].mxu0 %v22767_v28  ;;  %7784 = vmatpush1.bf16.msra.mxu1 %v22710_v30 }
0x10db   : > { %7825 = vmatpush1.bf16.msra.mxu0 %v22713_v31  ;;  %7815 = vmatprep.mubr.bf16.mxu1 %v21659_v10 }
0x10dc   : > { %7856 = vmatprep.mubr.bf16.mxu0 %v21659_v10  ;;  %8637 = vmatprep.subr.bf16.mxu1 %v19143_v53 }
0x10dd   : > { %8678 = vmatprep.subr.bf16.mxu0 %v19146_v54  ;;  %v19222_v54 = vld [vmem:[#allocation44 + $0x3a0] ss:$16 sps:$4 sm:$0xff]  }
0x10e1   : > { %16723 = vmatmul.mubr.msk.bf16.vlgmr.msra.gmra.mrb[76].mxu1 %vm3301_vm9, %v7779_v48 }
0x10e2   : > { %16725 = vmatmul.mubr.msk.bf16.vlgmr.msra.gmra.mrb[84].mxu0 %vm3301_vm9, %v7779_v48  ;;  %8638 = vmatpush1.bf16.msra.mxu1 %v19141_v52  ;;  %v19215_v48 = vld [vmem:[#allocation44 + $0x184] ss:$16 sps:$4 sm:$0xff]  }
0x10e3   : > { %8679 = vmatpush1.bf16.msra.mxu0 %v19144_v25  ;;  %8639 = vmatprep.subr.bf16.mxu1 %v19149_v55  ;;  %v19219_v25 = vld [vmem:[#allocation44 + $0x1a0] ss:$16 sps:$4 sm:$0xff]  }
0x10e4   : > { %8680 = vmatprep.subr.bf16.mxu0 %v19152_v56 }
0x10e6   : > { %8640 = vmatpush1.bf16.msra.mxu1 %v19147_v57 }
0x10e7   : > { %8681 = vmatpush1.bf16.msra.mxu0 %v19150_v58  ;;  %8641 = vmatprep.subr.bf16.mxu1 %v19155_v60 }
0x10e8   : > { %8682 = vmatprep.subr.bf16.mxu0 %v19158_v62  ;;  %v19225_v62 = vld [vmem:[#allocation44 + $0x1c0] ss:$16 sps:$4 sm:$0xff]  }
0x10ea   : > { %8642 = vmatpush1.bf16.msra.mxu1 %v19153_v63  ;;  %v19227_v63 = vld [vmem:[#allocation44 + $0x1c4] ss:$16 sps:$4 sm:$0xff]  }
0x10eb   : > { %8683 = vmatpush1.bf16.msra.mxu0 %v19156_v2  ;;  %8643 = vmatprep.subr.bf16.mxu1 %v19161_v3  ;;  %v19228_v2 = vld [vmem:[#allocation44 + $0x3c0] ss:$16 sps:$4 sm:$0xff]   ;;  %v19230_v3 = vld [vmem:[#allocation44 + $0x3c4] ss:$16 sps:$4 sm:$0xff]  }
0x10ec   : > { %v6845_v29 = vpop.f32.mrb[60].mxu1  ;;  %v6886_v49 = vpop.f32.mrb[68].mxu0  ;;  %8684 = vmatprep.subr.bf16.mxu0 %v19164_v4  ;;  %v19233_v4 = vld [vmem:[#allocation44 + $0x1e4] ss:$16 sps:$4 sm:$0xff]  }
0x10ed   : > { %v22786_v5 = vadd.f32 %v6886_v49, %v6845_v29  ;;  %v6847_v27 = vpop.f32.mrb[61].mxu1  ;;  %v6888_v50 = vpop.f32.mrb[69].mxu0  ;;  %v19218_v29 = vld [vmem:[#allocation44 + $0x384] ss:$16 sps:$4 sm:$0xff]   ;;  %v19213_v49 = vld [vmem:[#allocation44 + $0x180] ss:$16 sps:$4 sm:$0xff]  }
0x10ee   : > { %v22788_v28 = vadd.f32 %v6888_v50, %v6847_v27  ;;  %v6849_v30 = vpop.f32.mrb[62].mxu1  ;;  %v6890_v51 = vpop.f32.mrb[70].mxu0  ;;  %8644 = vmatpush1.bf16.msra.mxu1 %v19159_v6  ;;  %v19216_v27 = vld [vmem:[#allocation44 + $0x380] ss:$16 sps:$4 sm:$0xff]   ;;  %v19236_v6 = vld [vmem:[#allocation44 + $0x3e4] ss:$16 sps:$4 sm:$0xff]  }
0x10ef   : > { %v6850_v31 = vpop.f32.mrb[63].mxu1  ;;  %v6891_v22 = vpop.f32.mrb[71].mxu0  ;;  %8685 = vmatpush1.bf16.msra.mxu0 %v19162_v7  ;;  %8645 = vmatprep.subr.bf16.mxu1 %v19167_v9  ;;  %v19221_v51 = vld [vmem:[#allocation44 + $0x1a4] ss:$16 sps:$4 sm:$0xff]   ;;  %v19231_v7 = vld [vmem:[#allocation44 + $0x1e0] ss:$16 sps:$4 sm:$0xff]  }
0x10f0   : > { %8686 = vmatprep.subr.bf16.mxu0 %v19170_v12  ;;  %v19224_v31 = vld [vmem:[#allocation44 + $0x3a4] ss:$16 sps:$4 sm:$0xff]   ;;  %v19234_v9 = vld [vmem:[#allocation44 + $0x3e0] ss:$16 sps:$4 sm:$0xff]   ;;  %v19239_v12 = vld [vmem:[#allocation44 + $0xc] ss:$16 sps:$4 sm:$0xff]  }
0x10f2   : > { %8646 = vmatpush1.bf16.msra.mxu1 %v19165_v13  ;;  %v19242_v13 = vld [vmem:[#allocation44 + $0x20c] ss:$16 sps:$4 sm:$0xff]  }
0x10f3   : > { %8687 = vmatpush1.bf16.msra.mxu0 %v19168_v14  ;;  %8647 = vmatprep.subr.bf16.mxu1 %v19173_v15 }
0x10f4   : > { %8688 = vmatprep.subr.bf16.mxu0 %v19176_v40 }
0x10f6   : > { %8648 = vmatpush1.bf16.msra.mxu1 %v19171_v16 }
0x10f7   : > { %8689 = vmatpush1.bf16.msra.mxu0 %v19174_v17  ;;  %8649 = vmatprep.subr.bf16.mxu1 %v19179_v18 }
0x10f8   : > { %8690 = vmatprep.subr.bf16.mxu0 %v19182_v19 }
0x10fa   : > { %8650 = vmatpush1.bf16.msra.mxu1 %v19177_v20 }
0x10fb   : > { %8691 = vmatpush1.bf16.msra.mxu0 %v19180_v21  ;;  %8651 = vmatprep.subr.bf16.mxu1 %v19185_v23 }
0x10fc   : > { %8692 = vmatprep.subr.bf16.mxu0 %v19188_v24 }
0x10fe   : > { %8652 = vmatpush1.bf16.msra.mxu1 %v19183_v26 }
0x10ff   : > { %8693 = vmatpush1.bf16.msra.mxu0 %v19186_v32  ;;  %8653 = vmatprep.subr.bf16.mxu1 %v19191_v46 }
0x1100   : > { %8694 = vmatprep.subr.bf16.mxu0 %v19194_v33 }
0x1102   : > { %8654 = vmatpush1.bf16.msra.mxu1 %v19189_v34 }
0x1103   : > { %8695 = vmatpush1.bf16.msra.mxu0 %v19192_v47  ;;  %8655 = vmatprep.subr.bf16.mxu1 %v19197_v0 }
0x1104   : > { %8696 = vmatprep.subr.bf16.mxu0 %v19200_v1 }
0x1106   : > { %8656 = vmatpush1.bf16.msra.mxu1 %v19195_v35 }
0x1107   : > { %8697 = vmatpush1.bf16.msra.mxu0 %v19198_v11  ;;  %8657 = vmatprep.subr.bf16.mxu1 %v19203_v36 }
0x1108   : > { %8698 = vmatprep.subr.bf16.mxu0 %v19206_v8 }
0x110a   : > { %8658 = vmatpush1.bf16.msra.mxu1 %v19201_v37 }
0x110b   : > { %8699 = vmatpush1.bf16.msra.mxu0 %v19204_v38  ;;  %8659 = vmatprep.subr.bf16.mxu1 %v19209_v44 }
0x110c   : > { %8700 = vmatprep.subr.bf16.mxu0 %v19212_v39 }
0x110e   : > { %8660 = vmatpush1.bf16.msra.mxu1 %v19207_v42 }
0x110f   : > { %8701 = vmatpush1.bf16.msra.mxu0 %v19210_v45  ;;  %8661 = vmatprep.subr.bf16.mxu1 %v19215_v48  ;;  %v19237_v45 = vld [vmem:[#allocation44 + $0x8] ss:$16 sps:$4 sm:$0xff]  }
0x1110   : > { %8702 = vmatprep.subr.bf16.mxu0 %v19218_v29 }
0x1112   : > { %8662 = vmatpush1.bf16.msra.mxu1 %v19213_v49 }
0x1113   : > { %8703 = vmatpush1.bf16.msra.mxu0 %v19216_v27  ;;  %8663 = vmatprep.subr.bf16.mxu1 %v19221_v51 }
0x1114   : > { %8704 = vmatprep.subr.bf16.mxu0 %v19224_v31  ;;  %v19245_v31 = vld [vmem:[#allocation44 + $0x2c] ss:$16 sps:$4 sm:$0xff]  }
0x1116   : > { %8664 = vmatpush1.bf16.msra.mxu1 %v19219_v25  ;;  %v19251_v25 = vld [vmem:[#allocation44 + $0x4c] ss:$16 sps:$4 sm:$0xff]  }
0x1117   : > { %8705 = vmatpush1.bf16.msra.mxu0 %v19222_v54  ;;  %8665 = vmatprep.subr.bf16.mxu1 %v19227_v63  ;;  %v19254_v54 = vld [vmem:[#allocation44 + $0x24c] ss:$16 sps:$4 sm:$0xff]  }
0x1118   : > { %8706 = vmatprep.subr.bf16.mxu0 %v19230_v3  ;;  %v19263_v63 = vld [vmem:[#allocation44 + $0x8c] ss:$16 sps:$4 sm:$0xff]   ;;  %v19261_v3 = vld [vmem:[#allocation44 + $0x88] ss:$16 sps:$4 sm:$0xff]  }
0x111a   : > { %8666 = vmatpush1.bf16.msra.mxu1 %v19225_v62  ;;  %v19258_v62 = vld [vmem:[#allocation44 + $0x268] ss:$16 sps:$4 sm:$0xff]  }
0x111b   : > { %8707 = vmatpush1.bf16.msra.mxu0 %v19228_v2  ;;  %8667 = vmatprep.subr.bf16.mxu1 %v19233_v4  ;;  %v19266_v2 = vld [vmem:[#allocation44 + $0x28c] ss:$16 sps:$4 sm:$0xff]   ;;  %v19264_v4 = vld [vmem:[#allocation44 + $0x288] ss:$16 sps:$4 sm:$0xff]  }
0x111c   : > { %8708 = vmatprep.subr.bf16.mxu0 %v19236_v6  ;;  %v19269_v6 = vld [vmem:[#allocation44 + $0xac] ss:$16 sps:$4 sm:$0xff]  }
0x111e   : > { %8668 = vmatpush1.bf16.msra.mxu1 %v19231_v7  ;;  %v19272_v7 = vld [vmem:[#allocation44 + $0x2ac] ss:$16 sps:$4 sm:$0xff]  }
0x111f   : > { %8709 = vmatpush1.bf16.msra.mxu0 %v19234_v9  ;;  %8719 = vmatprep.subr.bf16.mxu1 %v19239_v12  ;;  %v19267_v9 = vld [vmem:[#allocation44 + $0xa8] ss:$16 sps:$4 sm:$0xff]  }
0x1120   : > { %8760 = vmatprep.subr.bf16.mxu0 %v19242_v13  ;;  %v19270_v12 = vld [vmem:[#allocation44 + $0x2a8] ss:$16 sps:$4 sm:$0xff]   ;;  %v19275_v13 = vld [vmem:[#allocation44 + $0xcc] ss:$16 sps:$4 sm:$0xff]  }
0x112c   : > { %v6927_v50 = vpop.f32.mrb[64].mxu1  ;;  %v6968_v30 = vpop.f32.mrb[72].mxu0 }
0x112d   : > { %v6969_v22 = vadd.f32 %v6968_v30, %v6927_v50  ;;  %v6929_v52 = vpop.f32.mrb[65].mxu1  ;;  %v6970_v53 = vpop.f32.mrb[73].mxu0  ;;  %v19240_v50 = vld [vmem:[#allocation44 + $0x208] ss:$16 sps:$4 sm:$0xff]  }
0x112e   : > { %v6971_v55 = vadd.f32 %v6970_v53, %v6929_v52  ;;  %v6931_v56 = vpop.f32.mrb[66].mxu1  ;;  %v6972_v57 = vpop.f32.mrb[74].mxu0  ;;  %v19243_v52 = vld [vmem:[#allocation44 + $0x28] ss:$16 sps:$4 sm:$0xff]  }
0x112f   : > { %v6932_v58 = vpop.f32.mrb[67].mxu1  ;;  %v6973_v60 = vpop.f32.mrb[75].mxu0  ;;  %v19246_v53 = vld [vmem:[#allocation44 + $0x228] ss:$16 sps:$4 sm:$0xff]   ;;  %v19257_v57 = vld [vmem:[#allocation44 + $0x6c] ss:$16 sps:$4 sm:$0xff]  }
0x1130   : > { %v19252_v56 = vld [vmem:[#allocation44 + $0x248] ss:$16 sps:$4 sm:$0xff]   ;;  %v19260_v58 = vld [vmem:[#allocation44 + $0x26c] ss:$16 sps:$4 sm:$0xff]  }
0x1131   : > { %v19255_v60 = vld [vmem:[#allocation44 + $0x68] ss:$16 sps:$4 sm:$0xff]  }
0x116c   : > { %v7649_v14 = vpop.f32.mrb[68].mxu1 }
0x116d   : > { %v7650_v15 = vadd.f32 %v7649_v14, %v22786_v5  ;;  %v7690_v40 = vpop.f32.mrb[76].mxu0  ;;  %v7651_v16 = vpop.f32.mrb[69].mxu1  ;;  %v19278_v14 = vld [vmem:[#allocation44 + $0x2cc] ss:$16 sps:$4 sm:$0xff]  }
0x116e   : > { %v7652_v17 = vadd.f32 %v7651_v16, %v22788_v28  ;;  %v7692_v18 = vpop.f32.mrb[77].mxu0  ;;  %v7653_v19 = vpop.f32.mrb[70].mxu1  ;;  %v19281_v16 = vld [vmem:[#allocation44 + $0xec] ss:$16 sps:$4 sm:$0xff]  }
0x116f   : > { %v22792_v20 = vadd.f32 %v7690_v40, %v7650_v15  ;;  %v7694_v21 = vpop.f32.mrb[78].mxu0  ;;  %v7654_v23 = vpop.f32.mrb[71].mxu1  ;;  %v19273_v15 = vld [vmem:[#allocation44 + $0xc8] ss:$16 sps:$4 sm:$0xff]  }
0x1170   : > { %v22794_v24 = vadd.f32 %v7692_v18, %v7652_v17  ;;  %v7695_v26 = vpop.f32.mrb[79].mxu0  ;;  %v19276_v40 = vld [vmem:[#allocation44 + $0x2c8] ss:$16 sps:$4 sm:$0xff]   ;;  %v19284_v17 = vld [vmem:[#allocation44 + $0x2ec] ss:$16 sps:$4 sm:$0xff]  }
0x1171   : > { %v19279_v18 = vld [vmem:[#allocation44 + $0xe8] ss:$16 sps:$4 sm:$0xff]   ;;  %v19287_v21 = vld [vmem:[#allocation44 + $0x10c] ss:$16 sps:$4 sm:$0xff]  }
0x1172   : > { %v19282_v19 = vld [vmem:[#allocation44 + $0x2e8] ss:$16 sps:$4 sm:$0xff]   ;;  %v19290_v23 = vld [vmem:[#allocation44 + $0x30c] ss:$16 sps:$4 sm:$0xff]  }
0x1173   : > { %v19285_v26 = vld [vmem:[#allocation44 + $0x108] ss:$16 sps:$4 sm:$0xff]  }
0x11ac   : > { %v7731_v32 = vpop.f32.mrb[72].mxu1 }
0x11ad   : > { %v7732_v46 = vadd.f32 %v7731_v32, %v6969_v22  ;;  %v7772_v33 = vpop.f32.mrb[80].mxu0  ;;  %v7733_v34 = vpop.f32.mrb[73].mxu1  ;;  %v19248_v22 = vld [vmem:[#allocation44 + $0x22c] ss:$16 sps:$4 sm:$0xff]   ;;  %v19288_v32 = vld [vmem:[#allocation44 + $0x308] ss:$16 sps:$4 sm:$0xff]  }
0x11ae   : > { %v7734_v47 = vadd.f32 %v7733_v34, %v6971_v55  ;;  %v7774_v0 = vpop.f32.mrb[81].mxu0  ;;  %v7735_v5 = vpop.f32.mrb[74].mxu1  ;;  %v19249_v55 = vld [vmem:[#allocation44 + $0x48] ss:$16 sps:$4 sm:$0xff]  }
0x11af   : > { %v22796_v1 = vadd.f32 %v7772_v33, %v7732_v46  ;;  %v7776_v35 = vpop.f32.mrb[82].mxu0  ;;  %v7736_v28 = vpop.f32.mrb[75].mxu1  ;;  %v19293_v46 = vld [vmem:[#allocation44 + $0x12c] ss:$16 sps:$4 sm:$0xff]   ;;  %v19291_v34 = vld [vmem:[#allocation44 + $0x128] ss:$16 sps:$4 sm:$0xff]  }
0x11b0   : > { %v22798_v11 = vadd.f32 %v7774_v0, %v7734_v47  ;;  %v7777_v36 = vpop.f32.mrb[83].mxu0  ;;  %v19296_v33 = vld [vmem:[#allocation44 + $0x32c] ss:$16 sps:$4 sm:$0xff]   ;;  %v19294_v47 = vld [vmem:[#allocation44 + $0x328] ss:$16 sps:$4 sm:$0xff]  }
0x11b1   : > { %v19299_v0 = vld [vmem:[#allocation44 + $0x14c] ss:$16 sps:$4 sm:$0xff]   ;;  %v19297_v35 = vld [vmem:[#allocation44 + $0x148] ss:$16 sps:$4 sm:$0xff]  }
0x11b2   : > { %v19302_v5 = vld [vmem:[#allocation44 + $0x34c] ss:$16 sps:$4 sm:$0xff]   ;;  %v19300_v28 = vld [vmem:[#allocation44 + $0x348] ss:$16 sps:$4 sm:$0xff]  }
0x11b3   : > { %v19305_v36 = vld [vmem:[#allocation44 + $0x16c] ss:$16 sps:$4 sm:$0xff]  }
0x11b4   : > { %v7817_v8 = vpop.f32.mrb[76].mxu1 }
0x11b5   : > { %v7858_v37 = vpop.f32.mrb[84].mxu0  ;;  %v7819_v38 = vpop.f32.mrb[77].mxu1  ;;  %v22800_v48 = vpack.c.bf16 %v7817_v8, %v7817_v8  ;;  %v19308_v8 = vld [vmem:[#allocation44 + $0x36c] ss:$16 sps:$4 sm:$0xff]  }
0x11b6   : > { %v7866_v44 = vpack.c.bf16 %v7819_v38, %v7819_v38  ;;  %v7860_v39 = vpop.f32.mrb[85].mxu0  ;;  %v7821_v42 = vpop.f32.mrb[78].mxu1  ;;  %v22802_v30 = vpack.c.bf16 %v7858_v37, %v7858_v37  ;;  %v19303_v37 = vld [vmem:[#allocation44 + $0x168] ss:$16 sps:$4 sm:$0xff]  }
0x11b7   : > { %v7868_v29 = vpack.c.bf16 %v7860_v39, %v7860_v39  ;;  %v7862_v49 = vpop.f32.mrb[86].mxu0  ;;  %v7822_v27 = vpop.f32.mrb[79].mxu1  ;;  %v19306_v38 = vld [vmem:[#allocation44 + $0x368] ss:$16 sps:$4 sm:$0xff]   ;;  %v19314_v39 = vld [vmem:[#allocation44 + $0x38c] ss:$16 sps:$4 sm:$0xff]  }
0x11b8   : > { %v7863_v51 = vpop.f32.mrb[87].mxu0  ;;  %8669 = vmatprep.mubr.bf16.mxu1 %v7866_v44  ;;  %v19309_v42 = vld [vmem:[#allocation44 + $0x188] ss:$16 sps:$4 sm:$0xff]   ;;  %v19320_v49 = vld [vmem:[#allocation44 + $0x3ac] ss:$16 sps:$4 sm:$0xff]  }
0x11b9   : > { %8710 = vmatprep.mubr.bf16.mxu0 %v7868_v29  ;;  %8670 = vmatmul.mubr.bf16.vlgmr.msra.gmra.mrb[80].mxu1 %v22800_v48  ;;  %v19315_v27 = vld [vmem:[#allocation44 + $0x1a8] ss:$16 sps:$4 sm:$0xff]   ;;  %v19323_v51 = vld [vmem:[#allocation44 + $0x1cc] ss:$16 sps:$4 sm:$0xff]  }
0x11ba   : > { %8711 = vmatmul.mubr.bf16.vlgmr.msra.gmra.mrb[88].mxu0 %v22802_v30  ;;  %8720 = vmatpush1.bf16.msra.mxu1 %v19237_v45  ;;  %v19312_v45 = vld [vmem:[#allocation44 + $0x388] ss:$16 sps:$4 sm:$0xff]  }
0x11bb   : > { %8761 = vmatpush1.bf16.msra.mxu0 %v19240_v50  ;;  %8751 = vmatprep.mubr.bf16.mxu1 %v7866_v44  ;;  %v19311_v44 = vld [vmem:[#allocation44 + $0x18c] ss:$16 sps:$4 sm:$0xff]   ;;  %v19318_v50 = vld [vmem:[#allocation44 + $0x3a8] ss:$16 sps:$4 sm:$0xff]  }
0x11bc   : > { %8792 = vmatprep.mubr.bf16.mxu0 %v7868_v29  ;;  %8721 = vmatprep.subr.bf16.mxu1 %v19245_v31  ;;  %v19317_v29 = vld [vmem:[#allocation44 + $0x1ac] ss:$16 sps:$4 sm:$0xff]  }
0x11bd   : > { %8762 = vmatprep.subr.bf16.mxu0 %v19248_v22  ;;  %v19326_v31 = vld [vmem:[#allocation44 + $0x3cc] ss:$16 sps:$4 sm:$0xff]   ;;  %v19321_v22 = vld [vmem:[#allocation44 + $0x1c8] ss:$16 sps:$4 sm:$0xff]  }
0x11be   : > { %8722 = vmatpush1.bf16.msra.mxu1 %v19243_v52  ;;  %v19324_v52 = vld [vmem:[#allocation44 + $0x3c8] ss:$16 sps:$4 sm:$0xff]  }
0x11bf   : > { %8763 = vmatpush1.bf16.msra.mxu0 %v19246_v53  ;;  %8723 = vmatprep.subr.bf16.mxu1 %v19251_v25  ;;  %v19329_v53 = vld [vmem:[#allocation44 + $0x1ec] ss:$16 sps:$4 sm:$0xff]  }
0x11c0   : > { %8764 = vmatprep.subr.bf16.mxu0 %v19254_v54  ;;  %v19332_v25 = vld [vmem:[#allocation44 + $0x3ec] ss:$16 sps:$4 sm:$0xff]   ;;  %v19327_v54 = vld [vmem:[#allocation44 + $0x1e8] ss:$16 sps:$4 sm:$0xff]  }
0x11c2   : > { %8724 = vmatpush1.bf16.msra.mxu1 %v19249_v55  ;;  %v19330_v55 = vld [vmem:[#allocation44 + $0x3e8] ss:$16 sps:$4 sm:$0xff]  }
0x11c3   : > { %8765 = vmatpush1.bf16.msra.mxu0 %v19252_v56  ;;  %8725 = vmatprep.subr.bf16.mxu1 %v19257_v57  ;;  %v22811_v56 = vld [vmem:[%s23246_s0] sm:$0xf]  ;;  %s17685_s0 = sshll.u32 %s21964_s22, 8  ;;  %s21660_s22 = smov [#allocation55]  }
0x11c4   : > { %8766 = vmatprep.subr.bf16.mxu0 %v19260_v58 }
0x11c6   : > { %8726 = vmatpush1.bf16.msra.mxu1 %v19255_v60 }
0x11c7   : > { %8767 = vmatpush1.bf16.msra.mxu0 %v19258_v62  ;;  %8727 = vmatprep.subr.bf16.mxu1 %v19263_v63  ;;  %v8810_v63 = vrot.slane %v22811_v56, %v22577_v41 }
0x11c8   : > { %8768 = vmatprep.subr.bf16.mxu0 %v19266_v2 }
0x11ca   : > { %8728 = vmatpush1.bf16.msra.mxu1 %v19261_v3 }
0x11cb   : > { %8769 = vmatpush1.bf16.msra.mxu0 %v19264_v4  ;;  %8729 = vmatprep.subr.bf16.mxu1 %v19269_v6 }
0x11cc   : > { %8770 = vmatprep.subr.bf16.mxu0 %v19272_v7 }
0x11ce   : > { %8730 = vmatpush1.bf16.msra.mxu1 %v19267_v9 }
0x11cf   : > { %8771 = vmatpush1.bf16.msra.mxu0 %v19270_v12  ;;  %8731 = vmatprep.subr.bf16.mxu1 %v19275_v13 }
0x11d0   : > { %8772 = vmatprep.subr.bf16.mxu0 %v19278_v14 }
0x11d2   : > { %8732 = vmatpush1.bf16.msra.mxu1 %v19273_v15 }
0x11d3   : > { %8773 = vmatpush1.bf16.msra.mxu0 %v19276_v40  ;;  %8733 = vmatprep.subr.bf16.mxu1 %v19281_v16 }
0x11d4   : > { %8774 = vmatprep.subr.bf16.mxu0 %v19284_v17 }
0x11d6   : > { %8734 = vmatpush1.bf16.msra.mxu1 %v19279_v18 }
0x11d7   : > { %8775 = vmatpush1.bf16.msra.mxu0 %v19282_v19  ;;  %8735 = vmatprep.subr.bf16.mxu1 %v19287_v21  ;;  %v22827_v19 = vld [vmem:[%s23247_s2] sm:$0xff]   ;;  %s2073_s2 = scalar_lea.vmem [#allocation55], %s16033_s7  ;;  %s21429_s7 = sshll.u32 %s21660_s22, 4  ;;  %s21430_s7 = int_to_ptr.vmem [resolvable:$false] %s21429_s7 }
0x11d8   : > { %8776 = vmatprep.subr.bf16.mxu0 %v19290_v23  ;;  %v19335_v21 = vld [vmem:[#allocation47] ss:$16 sps:$4 sm:$0xff]   ;;  %v19343_v23 = vld [vmem:[#allocation47 + $0x24] ss:$16 sps:$4 sm:$0xff]  }
0x11da   : > { %8736 = vmatpush1.bf16.msra.mxu1 %v19285_v26  ;;  %v19341_v26 = vld [vmem:[#allocation47 + $0x20] ss:$16 sps:$4 sm:$0xff]  }
0x11db   : > { %8777 = vmatpush1.bf16.msra.mxu0 %v19288_v32  ;;  %8737 = vmatprep.subr.bf16.mxu1 %v19293_v46  ;;  %v19349_v32 = vld [vmem:[#allocation47 + $0x44] ss:$16 sps:$4 sm:$0xff]   ;;  %v19347_v46 = vld [vmem:[#allocation47 + $0x40] ss:$16 sps:$4 sm:$0xff]  }
0x11dc   : > { %8778 = vmatprep.subr.bf16.mxu0 %v19296_v33  ;;  %v19355_v33 = vld [vmem:[#allocation47 + $0x64] ss:$16 sps:$4 sm:$0xff]  }
0x11de   : > { %8738 = vmatpush1.bf16.msra.mxu1 %v19291_v34  ;;  %v19353_v34 = vld [vmem:[#allocation47 + $0x60] ss:$16 sps:$4 sm:$0xff]  }
0x11df   : > { %8779 = vmatpush1.bf16.msra.mxu0 %v19294_v47  ;;  %8739 = vmatprep.subr.bf16.mxu1 %v19299_v0  ;;  %v19361_v47 = vld [vmem:[#allocation47 + $0x84] ss:$16 sps:$4 sm:$0xff]   ;;  %v19359_v0 = vld [vmem:[#allocation47 + $0x80] ss:$16 sps:$4 sm:$0xff]  }
0x11e0   : > { %8780 = vmatprep.subr.bf16.mxu0 %v19302_v5  ;;  %v19367_v5 = vld [vmem:[#allocation47 + $0xa4] ss:$16 sps:$4 sm:$0xff]  }
0x11e2   : > { %8740 = vmatpush1.bf16.msra.mxu1 %v19297_v35  ;;  %v19365_v35 = vld [vmem:[#allocation47 + $0xa0] ss:$16 sps:$4 sm:$0xff]  }
0x11e3   : > { %8781 = vmatpush1.bf16.msra.mxu0 %v19300_v28  ;;  %8741 = vmatprep.subr.bf16.mxu1 %v19305_v36  ;;  %v19373_v28 = vld [vmem:[#allocation47 + $0xc4] ss:$16 sps:$4 sm:$0xff]   ;;  %v19371_v36 = vld [vmem:[#allocation47 + $0xc0] ss:$16 sps:$4 sm:$0xff]  }
0x11e4   : > { %8782 = vmatprep.subr.bf16.mxu0 %v19308_v8  ;;  %v19379_v8 = vld [vmem:[#allocation47 + $0xe4] ss:$16 sps:$4 sm:$0xff]  }
0x11e6   : > { %8742 = vmatpush1.bf16.msra.mxu1 %v19303_v37  ;;  %v19377_v37 = vld [vmem:[#allocation47 + $0xe0] ss:$16 sps:$4 sm:$0xff]  }
0x11e7   : > { %8783 = vmatpush1.bf16.msra.mxu0 %v19306_v38  ;;  %8743 = vmatprep.subr.bf16.mxu1 %v19311_v44  ;;  %v19385_v38 = vld [vmem:[#allocation47 + $0x104] ss:$16 sps:$4 sm:$0xff]   ;;  %v19383_v44 = vld [vmem:[#allocation47 + $0x100] ss:$16 sps:$4 sm:$0xff]  }
0x11e8   : > { %8784 = vmatprep.subr.bf16.mxu0 %v19314_v39  ;;  %v19391_v39 = vld [vmem:[#allocation47 + $0x124] ss:$16 sps:$4 sm:$0xff]  }
0x11ea   : > { %8744 = vmatpush1.bf16.msra.mxu1 %v19309_v42  ;;  %v19389_v42 = vld [vmem:[#allocation47 + $0x120] ss:$16 sps:$4 sm:$0xff]  }
0x11eb   : > { %8785 = vmatpush1.bf16.msra.mxu0 %v19312_v45  ;;  %8745 = vmatprep.subr.bf16.mxu1 %v19317_v29  ;;  %v19397_v45 = vld [vmem:[#allocation47 + $0x144] ss:$16 sps:$4 sm:$0xff]   ;;  %v19395_v29 = vld [vmem:[#allocation47 + $0x140] ss:$16 sps:$4 sm:$0xff]  }
0x11ec   : > { %8786 = vmatprep.subr.bf16.mxu0 %v19320_v49  ;;  %v19403_v49 = vld [vmem:[#allocation47 + $0x164] ss:$16 sps:$4 sm:$0xff]  }
0x11ee   : > { %8746 = vmatpush1.bf16.msra.mxu1 %v19315_v27 }
0x11ef   : > { %8787 = vmatpush1.bf16.msra.mxu0 %v19318_v50  ;;  %8747 = vmatprep.subr.bf16.mxu1 %v19323_v51 }
0x11f0   : > { %8788 = vmatprep.subr.bf16.mxu0 %v19326_v31 }
0x11f2   : > { %8748 = vmatpush1.bf16.msra.mxu1 %v19321_v22  ;;  %v8818_v22 = vrot.slane %v22811_v56, %v22695_v59 }
0x11f3   : > { %8789 = vmatpush1.bf16.msra.mxu0 %v19324_v52  ;;  %8749 = vmatprep.subr.bf16.mxu1 %v19329_v53 }
0x11f4   : > { %8790 = vmatprep.subr.bf16.mxu0 %v19332_v25  ;;  %v19401_v25 = vld [vmem:[#allocation47 + $0x160] ss:$16 sps:$4 sm:$0xff]  }
0x11f6   : > { %8750 = vmatpush1.bf16.msra.mxu1 %v19327_v54 }
0x11f7   : > { %8791 = vmatpush1.bf16.msra.mxu0 %v19330_v55  ;;  %v8822_v55 = vrot.slane %v22811_v56, %v22699_v61 }
0x11f9   : > { %8752 = vmatmul.mubr.bf16.vlgmr.msra.gmra.mrb[84].mxu1 %v22800_v48  ;;  %v8814_v48 = vrot.slane %v22811_v56, %v22580_v43 }
0x11fa   : > { %8793 = vmatmul.mubr.bf16.vlgmr.msra.gmra.mrb[92].mxu0 %v22802_v30  ;;  %8893 = vmatprep.mubr.bf16.mxu1 %v21659_v10 }
0x11fb   : > { %8936 = vmatprep.mubr.bf16.mxu0 %v21659_v10 }
0x128c   : > { %v8671_v57 = vpop.f32.mrb[80].mxu1 }
0x128d   : > { %v8712_v58 = vpop.f32.mrb[88].mxu0  ;;  %v8673_v60 = vpop.f32.mrb[81].mxu1 }
0x128e   : > { %v8713_v62 = vadd.f32 %v8712_v58, %v8671_v57  ;;  %v8714_v2 = vpop.f32.mrb[89].mxu0  ;;  %v8675_v3 = vpop.f32.mrb[82].mxu1 }
0x128f   : > { %v8715_v4 = vadd.f32 %v8714_v2, %v8673_v60  ;;  %v8716_v30 = vpop.f32.mrb[90].mxu0  ;;  %v8676_v6 = vpop.f32.mrb[83].mxu1  ;;  %v19409_v60 = vld [vmem:[#allocation47 + $0x184] ss:$16 sps:$4 sm:$0xff]  }
0x1290   : > { %v8801_v7 = vadd.f32 %v8713_v62, %v22792_v20  ;;  %v8717_v9 = vpop.f32.mrb[91].mxu0  ;;  %v19337_v20 = vld [vmem:[#allocation47 + $0x4] ss:$16 sps:$4 sm:$0xff]  }
0x1291   : > { %v8802_v12 = vadd.f32 %v8715_v4, %v22794_v24  ;;  %v22837_v24 = vld [vmem:[%s23248_s9] sm:$0xff]   ;;  %s15552_s9 = sshll.u32 %s2073_s2, 4  ;;  %s23002_s9 = int_to_ptr.vmem [resolvable:$true] %s15552_s9 }
0x1292   : > { %v8827_v13 = vadd.f32 %v8810_v63, %v8801_v7  ;;  %v19407_v4 = vld [vmem:[#allocation47 + $0x180] ss:$16 sps:$4 sm:$0xff]   ;;  %p21432_p12 = scmp.lt.s32.totalorder %s23002_s9, %s21430_s7 }
0x1293   : > { %v8828_v14 = vadd.f32 %v8814_v48, %v8802_v12  ;;  %v19346_v12 = vld [vmem:[#allocation47 + $0x2c] ss:$16 sps:$4 sm:$0xff]  }
0x1294   : > { %v8831_v15 = vmax.f32 %v8827_v13, 0.0  ;;  %v19344_v13 = vld [vmem:[#allocation47 + $0x28] ss:$16 sps:$4 sm:$0xff]  }
0x1295   : > { %v8832_v40 = vmax.f32 %v8828_v14, 0.0  ;;  %v19352_v14 = vld [vmem:[#allocation47 + $0x4c] ss:$16 sps:$4 sm:$0xff]  }
0x1296   : > { %v8835_v16 = vpack.c.bf16 %v8831_v15, %v8831_v15  ;;  %v19350_v15 = vld [vmem:[#allocation47 + $0x48] ss:$16 sps:$4 sm:$0xff]  }
0x1297   : > { %v22819_v17 = vpack.c.bf16 %v8832_v40, %v8832_v40  ;;  %v19358_v40 = vld [vmem:[#allocation47 + $0x6c] ss:$16 sps:$4 sm:$0xff]  }
0x1298   : > { %v22822_v18 = vsel %vm2423_vm4, %v8835_v16, 0  ;;  %v19356_v16 = vld [vmem:[#allocation47 + $0x68] ss:$16 sps:$4 sm:$0xff]  }
0x1299   : > { %16855 = vmatprep.subr.msk.bf16.mxu1 %vm2423_vm4, %v22819_v17 }
0x129a   : > { %8862 = vmatpush1.bf16.msra.mxu1 %v22822_v18 }
0x129b   : > { %16860 = vmatprep.subr.msk.bf16.mxu1 %vm2423_vm4, %v22819_v17 }
0x129d   : > { %16856 = vmatmul.mubr.msk.bf16.vlgmr.msra.gmra.mrb[88].mxu1 %vm2419_vm5, %v22827_v19 }
0x129e   : > { %9090 = vmatpush1.bf16.msra.mxu1 %v22822_v18  ;;  %9121 = vmatprep.mubr.bf16.mxu1 %v21659_v10 }
0x129f   : > { %9947 = vmatprep.subr.bf16.mxu1 %v19337_v20  ;;  %v19415_v20 = vld [vmem:[#allocation47 + $0x1a4] ss:$16 sps:$4 sm:$0xff]  }
0x12a5   : > { %16861 = vmatmul.mubr.msk.bf16.vlgmr.msra.gmra.mrb[92].mxu1 %vm2419_vm5, %v22837_v24 }
0x12a6   : > { %9948 = vmatpush1.bf16.msra.mxu1 %v19335_v21  ;;  %v19362_v21 = vld [vmem:[#allocation47 + $0x88] ss:$16 sps:$4 sm:$0xff]  }
0x12a7   : > { %9949 = vmatprep.subr.bf16.mxu1 %v19343_v23  ;;  %v19413_v23 = vld [vmem:[#allocation47 + $0x1a0] ss:$16 sps:$4 sm:$0xff]  }
0x12aa   : > { %9950 = vmatpush1.bf16.msra.mxu1 %v19341_v26  ;;  %v19370_v26 = vld [vmem:[#allocation47 + $0xac] ss:$16 sps:$4 sm:$0xff]  }
0x12ab   : > { %9951 = vmatprep.subr.bf16.mxu1 %v19349_v32  ;;  %v19421_v32 = vld [vmem:[#allocation47 + $0x1c4] ss:$16 sps:$4 sm:$0xff]  }
0x12ae   : > { %9952 = vmatpush1.bf16.msra.mxu1 %v19347_v46  ;;  %v19368_v46 = vld [vmem:[#allocation47 + $0xa8] ss:$16 sps:$4 sm:$0xff]  }
0x12af   : > { %9953 = vmatprep.subr.bf16.mxu1 %v19355_v33  ;;  %v19376_v33 = vld [vmem:[#allocation47 + $0xcc] ss:$16 sps:$4 sm:$0xff]  }
0x12b2   : > { %9954 = vmatpush1.bf16.msra.mxu1 %v19353_v34  ;;  %v19427_v34 = vld [vmem:[#allocation47 + $0x1e4] ss:$16 sps:$4 sm:$0xff]  }
0x12b3   : > { %9955 = vmatprep.subr.bf16.mxu1 %v19361_v47  ;;  %v19374_v47 = vld [vmem:[#allocation47 + $0xc8] ss:$16 sps:$4 sm:$0xff]  }
0x12b6   : > { %9956 = vmatpush1.bf16.msra.mxu1 %v19359_v0  ;;  %v19425_v0 = vld [vmem:[#allocation47 + $0x1e0] ss:$16 sps:$4 sm:$0xff]  }
0x12b7   : > { %9957 = vmatprep.subr.bf16.mxu1 %v19367_v5  ;;  %v19382_v5 = vld [vmem:[#allocation47 + $0xec] ss:$16 sps:$4 sm:$0xff]  }
0x12ba   : > { %9958 = vmatpush1.bf16.msra.mxu1 %v19365_v35  ;;  %v19433_v35 = vld [vmem:[#allocation47 + $0x204] ss:$16 sps:$4 sm:$0xff]  }
0x12bb   : > { %9959 = vmatprep.subr.bf16.mxu1 %v19373_v28  ;;  %v19380_v28 = vld [vmem:[#allocation47 + $0xe8] ss:$16 sps:$4 sm:$0xff]  }
0x12be   : > { %9960 = vmatpush1.bf16.msra.mxu1 %v19371_v36  ;;  %v19388_v36 = vld [vmem:[#allocation47 + $0x10c] ss:$16 sps:$4 sm:$0xff]  }
0x12bf   : > { %9961 = vmatprep.subr.bf16.mxu1 %v19379_v8  ;;  %v19386_v8 = vld [vmem:[#allocation47 + $0x108] ss:$16 sps:$4 sm:$0xff]  }
0x12c2   : > { %9962 = vmatpush1.bf16.msra.mxu1 %v19377_v37  ;;  %v19394_v37 = vld [vmem:[#allocation47 + $0x12c] ss:$16 sps:$4 sm:$0xff]  }
0x12c3   : > { %9963 = vmatprep.subr.bf16.mxu1 %v19385_v38  ;;  %v19392_v38 = vld [vmem:[#allocation47 + $0x128] ss:$16 sps:$4 sm:$0xff]  }
0x12c6   : > { %9964 = vmatpush1.bf16.msra.mxu1 %v19383_v44  ;;  %v19400_v44 = vld [vmem:[#allocation47 + $0x14c] ss:$16 sps:$4 sm:$0xff]  }
0x12c7   : > { %9965 = vmatprep.subr.bf16.mxu1 %v19391_v39  ;;  %v19398_v39 = vld [vmem:[#allocation47 + $0x148] ss:$16 sps:$4 sm:$0xff]  }
0x12ca   : > { %9966 = vmatpush1.bf16.msra.mxu1 %v19389_v42  ;;  %v19406_v42 = vld [vmem:[#allocation47 + $0x16c] ss:$16 sps:$4 sm:$0xff]  }
0x12cb   : > { %9967 = vmatprep.subr.bf16.mxu1 %v19397_v45  ;;  %v19404_v45 = vld [vmem:[#allocation47 + $0x168] ss:$16 sps:$4 sm:$0xff]  }
0x12cc   : > { %v8753_v27 = vpop.f32.mrb[84].mxu1 }
0x12cd   : > { %v8794_v50 = vpop.f32.mrb[92].mxu0  ;;  %v8755_v51 = vpop.f32.mrb[85].mxu1 }
0x12ce   : > { %v8795_v31 = vadd.f32 %v8794_v50, %v8753_v27  ;;  %v8796_v52 = vpop.f32.mrb[93].mxu0  ;;  %v8757_v53 = vpop.f32.mrb[86].mxu1  ;;  %9968 = vmatpush1.bf16.msra.mxu1 %v19395_v29  ;;  %v19412_v29 = vld [vmem:[#allocation47 + $0x18c] ss:$16 sps:$4 sm:$0xff]   ;;  %v19416_v50 = vld [vmem:[#allocation47 + $0x1a8] ss:$16 sps:$4 sm:$0xff]  }
0x12cf   : > { %v8797_v54 = vadd.f32 %v8796_v52, %v8755_v51  ;;  %v8798_v57 = vpop.f32.mrb[94].mxu0  ;;  %v8758_v58 = vpop.f32.mrb[87].mxu1  ;;  %9969 = vmatprep.subr.bf16.mxu1 %v19403_v49  ;;  %v19410_v49 = vld [vmem:[#allocation47 + $0x188] ss:$16 sps:$4 sm:$0xff]   ;;  %v19418_v27 = vld [vmem:[#allocation47 + $0x1ac] ss:$16 sps:$4 sm:$0xff]  }
0x12d0   : > { %v8803_v62 = vadd.f32 %v8795_v31, %v22796_v1  ;;  %v8799_v63 = vpop.f32.mrb[95].mxu0  ;;  %v19340_v1 = vld [vmem:[#allocation47 + $0xc] ss:$16 sps:$4 sm:$0xff]   ;;  %v19422_v31 = vld [vmem:[#allocation47 + $0x1c8] ss:$16 sps:$4 sm:$0xff]  }
0x12d1   : > { %v8804_v2 = vadd.f32 %v8797_v54, %v22798_v11  ;;  %v19338_v11 = vld [vmem:[#allocation47 + $0x8] ss:$16 sps:$4 sm:$0xff]   ;;  %v19424_v51 = vld [vmem:[#allocation47 + $0x1cc] ss:$16 sps:$4 sm:$0xff]  }
0x12d2   : > { %v8829_v3 = vadd.f32 %v8818_v22, %v8803_v62  ;;  %9970 = vmatpush1.bf16.msra.mxu1 %v19401_v25  ;;  %v19430_v22 = vld [vmem:[#allocation47 + $0x1ec] ss:$16 sps:$4 sm:$0xff]   ;;  %v19428_v52 = vld [vmem:[#allocation47 + $0x1e8] ss:$16 sps:$4 sm:$0xff]  }
0x12d3   : > { %v8830_v48 = vadd.f32 %v8822_v55, %v8804_v2  ;;  %9971 = vmatprep.subr.bf16.mxu1 %v19409_v60  ;;  %v19436_v53 = vld [vmem:[#allocation47 + $0x20c] ss:$16 sps:$4 sm:$0xff]  }
0x12d4   : > { %v8833_v30 = vmax.f32 %v8829_v3, 0.0 }
0x12d5   : > { %v8834_v6 = vmax.f32 %v8830_v48, 0.0 }
0x12d6   : > { %v8837_v7 = vpack.c.bf16 %v8833_v30, %v8833_v30  ;;  %9972 = vmatpush1.bf16.msra.mxu1 %v19407_v4  ;;  %v19431_v30 = vld [vmem:[#allocation47 + $0x200] ss:$16 sps:$4 sm:$0xff]  }
0x12d7   : > { %v22847_v9 = vpack.c.bf16 %v8834_v6, %v8834_v6  ;;  %9973 = vmatprep.subr.bf16.mxu1 %v19415_v20  ;;  %v19434_v6 = vld [vmem:[#allocation47 + $0x208] ss:$16 sps:$4 sm:$0xff]   ;;  %v19449_v20 = vld [vmem:[#allocation47 + $0x260] ss:$16 sps:$4 sm:$0xff]  }
0x12d8   : > { %v22850_v56 = vsel %vm2423_vm4, %v8837_v7, 0  ;;  %v19439_v7 = vld [vmem:[#allocation47 + $0x224] ss:$16 sps:$4 sm:$0xff]  }
0x12d9   : > { %16857 = vmatprep.subr.msk.bf16.mxu0 %vm2423_vm4, %v22847_v9 }
0x12da   : > { %8905 = vmatpush1.bf16.msra.mxu0 %v22850_v56  ;;  %9974 = vmatpush1.bf16.msra.mxu1 %v19413_v23  ;;  %v19457_v23 = vld [vmem:[#allocation47 + $0x284] ss:$16 sps:$4 sm:$0xff]  }
0x12db   : > { %16862 = vmatprep.subr.msk.bf16.mxu0 %vm2423_vm4, %v22847_v9  ;;  %9975 = vmatprep.subr.bf16.mxu1 %v19421_v32  ;;  %v19458_v32 = vld [vmem:[#allocation47 + $0x288] ss:$16 sps:$4 sm:$0xff]  }
0x12dd   : > { %16858 = vmatmul.mubr.msk.bf16.vlgmr.msra.gmra.mrb[96].mxu0 %vm2419_vm5, %v22827_v19  ;;  %v19364_v19 = vld [vmem:[#allocation47 + $0x8c] ss:$16 sps:$4 sm:$0xff]  }
0x12de   : > { %9133 = vmatpush1.bf16.msra.mxu0 %v22850_v56  ;;  %9164 = vmatprep.mubr.bf16.mxu0 %v21659_v10 }
0x12df   : > { %10033 = vmatprep.subr.bf16.mxu0 %v19340_v1  ;;  %v19442_v1 = vld [vmem:[#allocation47 + $0x22c] ss:$16 sps:$4 sm:$0xff]  }
0x12e5   : > { %16863 = vmatmul.mubr.msk.bf16.vlgmr.msra.gmra.mrb[100].mxu0 %vm2419_vm5, %v22837_v24  ;;  %v19419_v24 = vld [vmem:[#allocation47 + $0x1c0] ss:$16 sps:$4 sm:$0xff]  }
0x12e6   : > { %10034 = vmatpush1.bf16.msra.mxu0 %v19338_v11  ;;  %9976 = vmatpush1.bf16.msra.mxu1 %v19419_v24  ;;  %v19437_v11 = vld [vmem:[#allocation47 + $0x220] ss:$16 sps:$4 sm:$0xff]  }
0x12e7   : > { %10035 = vmatprep.subr.bf16.mxu0 %v19346_v12  ;;  %9977 = vmatprep.subr.bf16.mxu1 %v19427_v34  ;;  %v19440_v12 = vld [vmem:[#allocation47 + $0x228] ss:$16 sps:$4 sm:$0xff]   ;;  %v19455_v24 = vld [vmem:[#allocation47 + $0x280] ss:$16 sps:$4 sm:$0xff]  }
0x12e8   : > { %v19461_v34 = vld [vmem:[#allocation47 + $0x2a0] ss:$16 sps:$4 sm:$0xff]  }
0x12ea   : > { %10036 = vmatpush1.bf16.msra.mxu0 %v19344_v13  ;;  %9978 = vmatpush1.bf16.msra.mxu1 %v19425_v0  ;;  %v19445_v13 = vld [vmem:[#allocation47 + $0x244] ss:$16 sps:$4 sm:$0xff]  }
0x12eb   : > { %10037 = vmatprep.subr.bf16.mxu0 %v19352_v14  ;;  %9990 = vmatprep.subr.bf16.mxu1 %v19433_v35  ;;  %v19448_v14 = vld [vmem:[#allocation47 + $0x24c] ss:$16 sps:$4 sm:$0xff]   ;;  %v19469_v0 = vld [vmem:[#allocation47 + $0x2c4] ss:$16 sps:$4 sm:$0xff]   ;;  %v19467_v35 = vld [vmem:[#allocation47 + $0x2c0] ss:$16 sps:$4 sm:$0xff]  }
0x12ee   : > { %10038 = vmatpush1.bf16.msra.mxu0 %v19350_v15  ;;  %v19443_v15 = vld [vmem:[#allocation47 + $0x240] ss:$16 sps:$4 sm:$0xff]  }
0x12ef   : > { %10039 = vmatprep.subr.bf16.mxu0 %v19358_v40  ;;  %v19446_v40 = vld [vmem:[#allocation47 + $0x248] ss:$16 sps:$4 sm:$0xff]  }
0x12f2   : > { %10040 = vmatpush1.bf16.msra.mxu0 %v19356_v16  ;;  %v19451_v16 = vld [vmem:[#allocation47 + $0x264] ss:$16 sps:$4 sm:$0xff]  }
0x12f3   : > { %10041 = vmatprep.subr.bf16.mxu0 %v19364_v19  ;;  %v19454_v19 = vld [vmem:[#allocation47 + $0x26c] ss:$16 sps:$4 sm:$0xff]  }
0x12f6   : > { %10042 = vmatpush1.bf16.msra.mxu0 %v19362_v21  ;;  %v19452_v21 = vld [vmem:[#allocation47 + $0x268] ss:$16 sps:$4 sm:$0xff]  }
0x12f7   : > { %10043 = vmatprep.subr.bf16.mxu0 %v19370_v26  ;;  %v19460_v26 = vld [vmem:[#allocation47 + $0x28c] ss:$16 sps:$4 sm:$0xff]  }
0x12fa   : > { %10044 = vmatpush1.bf16.msra.mxu0 %v19368_v46  ;;  %v19463_v46 = vld [vmem:[#allocation47 + $0x2a4] ss:$16 sps:$4 sm:$0xff]  }
0x12fb   : > { %10045 = vmatprep.subr.bf16.mxu0 %v19376_v33  ;;  %v19466_v33 = vld [vmem:[#allocation47 + $0x2ac] ss:$16 sps:$4 sm:$0xff]  }
0x12fe   : > { %10046 = vmatpush1.bf16.msra.mxu0 %v19374_v47  ;;  %v19464_v47 = vld [vmem:[#allocation47 + $0x2a8] ss:$16 sps:$4 sm:$0xff]  }
0x12ff   : > { %10047 = vmatprep.subr.bf16.mxu0 %v19382_v5  ;;  %v19472_v5 = vld [vmem:[#allocation47 + $0x2cc] ss:$16 sps:$4 sm:$0xff]  }
0x1302   : > { %10048 = vmatpush1.bf16.msra.mxu0 %v19380_v28  ;;  %v19470_v28 = vld [vmem:[#allocation47 + $0x2c8] ss:$16 sps:$4 sm:$0xff]  }
0x1303   : > { %10049 = vmatprep.subr.bf16.mxu0 %v19388_v36  ;;  %v19475_v36 = vld [vmem:[#allocation47 + $0x2e4] ss:$16 sps:$4 sm:$0xff]  }
0x1306   : > { %10050 = vmatpush1.bf16.msra.mxu0 %v19386_v8  ;;  %v19478_v8 = vld [vmem:[#allocation47 + $0x2ec] ss:$16 sps:$4 sm:$0xff]  }
0x1307   : > { %10051 = vmatprep.subr.bf16.mxu0 %v19394_v37  ;;  %v19473_v37 = vld [vmem:[#allocation47 + $0x2e0] ss:$16 sps:$4 sm:$0xff]  }
0x130a   : > { %10052 = vmatpush1.bf16.msra.mxu0 %v19392_v38  ;;  %v19476_v38 = vld [vmem:[#allocation47 + $0x2e8] ss:$16 sps:$4 sm:$0xff]  }
0x130b   : > { %10053 = vmatprep.subr.bf16.mxu0 %v19400_v44  ;;  %v19481_v44 = vld [vmem:[#allocation47 + $0x304] ss:$16 sps:$4 sm:$0xff]  }
0x130e   : > { %10054 = vmatpush1.bf16.msra.mxu0 %v19398_v39  ;;  %v19484_v39 = vld [vmem:[#allocation47 + $0x30c] ss:$16 sps:$4 sm:$0xff]  }
0x130f   : > { %10055 = vmatprep.subr.bf16.mxu0 %v19406_v42  ;;  %v19479_v42 = vld [vmem:[#allocation47 + $0x300] ss:$16 sps:$4 sm:$0xff]  }
0x1312   : > { %10056 = vmatpush1.bf16.msra.mxu0 %v19404_v45  ;;  %v19482_v45 = vld [vmem:[#allocation47 + $0x308] ss:$16 sps:$4 sm:$0xff]  }
0x1313   : > { %10057 = vmatprep.subr.bf16.mxu0 %v19412_v29  ;;  %v19487_v29 = vld [vmem:[#allocation47 + $0x324] ss:$16 sps:$4 sm:$0xff]  }
0x1316   : > { %10058 = vmatpush1.bf16.msra.mxu0 %v19410_v49  ;;  %v19490_v49 = vld [vmem:[#allocation47 + $0x32c] ss:$16 sps:$4 sm:$0xff]  }
0x1317   : > { %10059 = vmatprep.subr.bf16.mxu0 %v19418_v27  ;;  %v19485_v27 = vld [vmem:[#allocation47 + $0x320] ss:$16 sps:$4 sm:$0xff]  }
0x131a   : > { %10060 = vmatpush1.bf16.msra.mxu0 %v19416_v50  ;;  %v19488_v50 = vld [vmem:[#allocation47 + $0x328] ss:$16 sps:$4 sm:$0xff]  }
0x131b   : > { %10061 = vmatprep.subr.bf16.mxu0 %v19424_v51  ;;  %v19493_v51 = vld [vmem:[#allocation47 + $0x344] ss:$16 sps:$4 sm:$0xff]  }
0x131e   : > { %10062 = vmatpush1.bf16.msra.mxu0 %v19422_v31  ;;  %v19496_v31 = vld [vmem:[#allocation47 + $0x34c] ss:$16 sps:$4 sm:$0xff]  }
0x131f   : > { %10063 = vmatprep.subr.bf16.mxu0 %v19430_v22  ;;  %v19491_v22 = vld [vmem:[#allocation47 + $0x340] ss:$16 sps:$4 sm:$0xff]  }
0x1322   : > { %10064 = vmatpush1.bf16.msra.mxu0 %v19428_v52  ;;  %v19494_v52 = vld [vmem:[#allocation47 + $0x348] ss:$16 sps:$4 sm:$0xff]  }
0x1323   : > { %10076 = vmatprep.subr.bf16.mxu0 %v19436_v53  ;;  %v19499_v53 = vld [vmem:[#allocation47 + $0x364] ss:$16 sps:$4 sm:$0xff]  }
0x1370   : > { %v8895_v25 = vpop.f32.mrb[88].mxu1 }
0x1371   : > { %v8897_v54 = vpop.f32.mrb[89].mxu1 }
0x1372   : > { %v8899_v55 = vpop.f32.mrb[90].mxu1 }
0x1373   : > { %v22863_v57 = vpack.c.bf16 %v8899_v55, %v8895_v25  ;;  %v8901_v58 = vpop.f32.mrb[91].mxu1  ;;  %v19502_v25 = vld [vmem:[#allocation47 + $0x36c] ss:$16 sps:$4 sm:$0xff]   ;;  %v19500_v55 = vld [vmem:[#allocation47 + $0x368] ss:$16 sps:$4 sm:$0xff]  }
0x1374   : > { %v22865_v60 = vpack.c.bf16 %v8901_v58, %v8897_v54  ;;  %v19497_v54 = vld [vmem:[#allocation47 + $0x360] ss:$16 sps:$4 sm:$0xff]   ;;  %v19505_v58 = vld [vmem:[#allocation47 + $0x384] ss:$16 sps:$4 sm:$0xff]  }
0x1378   : > { %v9123_v62 = vpop.f32.mrb[92].mxu1 }
0x1379   : > { %v9125_v63 = vpop.f32.mrb[93].mxu1 }
0x137a   : > { %v9127_v2 = vpop.f32.mrb[94].mxu1 }
0x137b   : > { %v9175_v3 = vpack.c.bf16 %v9127_v2, %v9123_v62  ;;  %v9129_v4 = vpop.f32.mrb[95].mxu1  ;;  %v19508_v62 = vld [vmem:[#allocation47 + $0x38c] ss:$16 sps:$4 sm:$0xff]   ;;  %v19506_v2 = vld [vmem:[#allocation47 + $0x388] ss:$16 sps:$4 sm:$0xff]  }
0x137c   : > { %v9176_v48 = vpack.c.bf16 %v9129_v4, %v9125_v63  ;;  %v19503_v63 = vld [vmem:[#allocation47 + $0x380] ss:$16 sps:$4 sm:$0xff]   ;;  %v19514_v4 = vld [vmem:[#allocation47 + $0x3ac] ss:$16 sps:$4 sm:$0xff]  }
0x137e   : > { %9979 = vmatprep.mubr.bf16.mxu1 %v9176_v48  ;;  %10065 = vmatprep.mubr.bf16.mxu0 %v9176_v48 }
0x137f   : > { %9980 = vmatmul.mubr.bf16.vlgmr.msra.gmra.mrb[96].mxu1 %v9175_v3  ;;  %10066 = vmatmul.mubr.bf16.vlgmr.msra.gmra.mrb[104].mxu0 %v9175_v3  ;;  %v19511_v3 = vld [vmem:[#allocation47 + $0x3a4] ss:$16 sps:$4 sm:$0xff]  }
0x1380   : > { %9991 = vmatpush1.bf16.msra.mxu1 %v19431_v30  ;;  %10077 = vmatpush1.bf16.msra.mxu0 %v19434_v6  ;;  %v19509_v30 = vld [vmem:[#allocation47 + $0x3a0] ss:$16 sps:$4 sm:$0xff]   ;;  %v19512_v6 = vld [vmem:[#allocation47 + $0x3a8] ss:$16 sps:$4 sm:$0xff]  }
0x1381   : > { %9992 = vmatprep.subr.bf16.mxu1 %v19439_v7  ;;  %10078 = vmatprep.subr.bf16.mxu0 %v19442_v1  ;;  %v19517_v1 = vld [vmem:[#allocation47 + $0x3c4] ss:$16 sps:$4 sm:$0xff]  }
0x1384   : > { %9993 = vmatpush1.bf16.msra.mxu1 %v19437_v11  ;;  %10079 = vmatpush1.bf16.msra.mxu0 %v19440_v12  ;;  %v19520_v11 = vld [vmem:[#allocation47 + $0x3cc] ss:$16 sps:$4 sm:$0xff]  }
0x1385   : > { %9994 = vmatprep.subr.bf16.mxu1 %v19445_v13  ;;  %10080 = vmatprep.subr.bf16.mxu0 %v19448_v14 }
0x1388   : > { %9995 = vmatpush1.bf16.msra.mxu1 %v19443_v15  ;;  %10081 = vmatpush1.bf16.msra.mxu0 %v19446_v40  ;;  %v19515_v40 = vld [vmem:[#allocation47 + $0x3c0] ss:$16 sps:$4 sm:$0xff]  }
0x1389   : > { %9996 = vmatprep.subr.bf16.mxu1 %v19451_v16  ;;  %10082 = vmatprep.subr.bf16.mxu0 %v19454_v19  ;;  %v19518_v16 = vld [vmem:[#allocation47 + $0x3c8] ss:$16 sps:$4 sm:$0xff]   ;;  %v19523_v19 = vld [vmem:[#allocation47 + $0x3e4] ss:$16 sps:$4 sm:$0xff]  }
0x138c   : > { %9997 = vmatpush1.bf16.msra.mxu1 %v19449_v20  ;;  %10083 = vmatpush1.bf16.msra.mxu0 %v19452_v21  ;;  %v19526_v20 = vld [vmem:[#allocation47 + $0x3ec] ss:$16 sps:$4 sm:$0xff]  }
0x138d   : > { %9998 = vmatprep.subr.bf16.mxu1 %v19457_v23  ;;  %10084 = vmatprep.subr.bf16.mxu0 %v19460_v26  ;;  %v19521_v23 = vld [vmem:[#allocation47 + $0x3e0] ss:$16 sps:$4 sm:$0xff]   ;;  %v19524_v26 = vld [vmem:[#allocation47 + $0x3e8] ss:$16 sps:$4 sm:$0xff]  }
0x1390   : > { %9999 = vmatpush1.bf16.msra.mxu1 %v19455_v24  ;;  %10085 = vmatpush1.bf16.msra.mxu0 %v19458_v32  ;;  %v19529_v32 = vld [vmem:[#allocation46 + $0x4] ss:$16 sps:$4 sm:$0xff]  }
0x1391   : > { %10000 = vmatprep.subr.bf16.mxu1 %v19463_v46  ;;  %10086 = vmatprep.subr.bf16.mxu0 %v19466_v33  ;;  %v19532_v46 = vld [vmem:[#allocation46 + $0xc] ss:$16 sps:$4 sm:$0xff]  }
0x1394   : > { %10001 = vmatpush1.bf16.msra.mxu1 %v19461_v34  ;;  %10087 = vmatpush1.bf16.msra.mxu0 %v19464_v47 }
0x1395   : > { %10002 = vmatprep.subr.bf16.mxu1 %v19469_v0  ;;  %10088 = vmatprep.subr.bf16.mxu0 %v19472_v5  ;;  %v19527_v5 = vld [vmem:[#allocation46] ss:$16 sps:$4 sm:$0xff]  }
0x1398   : > { %10003 = vmatpush1.bf16.msra.mxu1 %v19467_v35  ;;  %10089 = vmatpush1.bf16.msra.mxu0 %v19470_v28  ;;  %v19530_v35 = vld [vmem:[#allocation46 + $0x8] ss:$16 sps:$4 sm:$0xff]   ;;  %v19535_v28 = vld [vmem:[#allocation46 + $0x24] ss:$16 sps:$4 sm:$0xff]  }
0x1399   : > { %10004 = vmatprep.subr.bf16.mxu1 %v19475_v36  ;;  %10090 = vmatprep.subr.bf16.mxu0 %v19478_v8  ;;  %v19538_v36 = vld [vmem:[#allocation46 + $0x2c] ss:$16 sps:$4 sm:$0xff]   ;;  %v19533_v8 = vld [vmem:[#allocation46 + $0x20] ss:$16 sps:$4 sm:$0xff]  }
0x139c   : > { %10005 = vmatpush1.bf16.msra.mxu1 %v19473_v37  ;;  %10091 = vmatpush1.bf16.msra.mxu0 %v19476_v38  ;;  %v19536_v37 = vld [vmem:[#allocation46 + $0x28] ss:$16 sps:$4 sm:$0xff]   ;;  %v19541_v38 = vld [vmem:[#allocation46 + $0x44] ss:$16 sps:$4 sm:$0xff]  }
0x139d   : > { %10006 = vmatprep.subr.bf16.mxu1 %v19481_v44  ;;  %10092 = vmatprep.subr.bf16.mxu0 %v19484_v39  ;;  %v19544_v44 = vld [vmem:[#allocation46 + $0x4c] ss:$16 sps:$4 sm:$0xff]   ;;  %v19539_v39 = vld [vmem:[#allocation46 + $0x40] ss:$16 sps:$4 sm:$0xff]  }
0x13a0   : > { %10007 = vmatpush1.bf16.msra.mxu1 %v19479_v42  ;;  %10093 = vmatpush1.bf16.msra.mxu0 %v19482_v45  ;;  %v19542_v42 = vld [vmem:[#allocation46 + $0x48] ss:$16 sps:$4 sm:$0xff]   ;;  %v19547_v45 = vld [vmem:[#allocation46 + $0x64] ss:$16 sps:$4 sm:$0xff]  }
0x13a1   : > { %10008 = vmatprep.subr.bf16.mxu1 %v19487_v29  ;;  %10094 = vmatprep.subr.bf16.mxu0 %v19490_v49  ;;  %v19550_v29 = vld [vmem:[#allocation46 + $0x6c] ss:$16 sps:$4 sm:$0xff]   ;;  %v19545_v49 = vld [vmem:[#allocation46 + $0x60] ss:$16 sps:$4 sm:$0xff]  }
0x13a4   : > { %10009 = vmatpush1.bf16.msra.mxu1 %v19485_v27  ;;  %10095 = vmatpush1.bf16.msra.mxu0 %v19488_v50  ;;  %v19548_v27 = vld [vmem:[#allocation46 + $0x68] ss:$16 sps:$4 sm:$0xff]   ;;  %v19553_v50 = vld [vmem:[#allocation46 + $0x84] ss:$16 sps:$4 sm:$0xff]  }
0x13a5   : > { %10010 = vmatprep.subr.bf16.mxu1 %v19493_v51  ;;  %10096 = vmatprep.subr.bf16.mxu0 %v19496_v31  ;;  %v19551_v51 = vld [vmem:[#allocation46 + $0x80] ss:$16 sps:$4 sm:$0xff]   ;;  %v19554_v31 = vld [vmem:[#allocation46 + $0x88] ss:$16 sps:$4 sm:$0xff]  }
0x13a8   : > { %10011 = vmatpush1.bf16.msra.mxu1 %v19491_v22  ;;  %10097 = vmatpush1.bf16.msra.mxu0 %v19494_v52  ;;  %v19559_v22 = vld [vmem:[#allocation46 + $0xa4] ss:$16 sps:$4 sm:$0xff]   ;;  %v19562_v52 = vld [vmem:[#allocation46 + $0xac] ss:$16 sps:$4 sm:$0xff]  }
0x13a9   : > { %10012 = vmatprep.subr.bf16.mxu1 %v19499_v53  ;;  %10098 = vmatprep.subr.bf16.mxu0 %v19502_v25  ;;  %v19557_v53 = vld [vmem:[#allocation46 + $0xa0] ss:$16 sps:$4 sm:$0xff]   ;;  %v19560_v25 = vld [vmem:[#allocation46 + $0xa8] ss:$16 sps:$4 sm:$0xff]  }
0x13ac   : > { %10013 = vmatpush1.bf16.msra.mxu1 %v19497_v54  ;;  %10099 = vmatpush1.bf16.msra.mxu0 %v19500_v55  ;;  %v19565_v54 = vld [vmem:[#allocation46 + $0xc4] ss:$16 sps:$4 sm:$0xff]   ;;  %v19568_v55 = vld [vmem:[#allocation46 + $0xcc] ss:$16 sps:$4 sm:$0xff]  }
0x13ad   : > { %10014 = vmatprep.subr.bf16.mxu1 %v19505_v58  ;;  %10100 = vmatprep.subr.bf16.mxu0 %v19508_v62  ;;  %v19563_v58 = vld [vmem:[#allocation46 + $0xc0] ss:$16 sps:$4 sm:$0xff]   ;;  %v19566_v62 = vld [vmem:[#allocation46 + $0xc8] ss:$16 sps:$4 sm:$0xff]  }
0x13b0   : > { %v8938_v48 = vpop.f32.mrb[96].mxu0  ;;  %10015 = vmatpush1.bf16.msra.mxu1 %v19503_v63  ;;  %10101 = vmatpush1.bf16.msra.mxu0 %v19506_v2  ;;  %v19571_v63 = vld [vmem:[#allocation46 + $0xe4] ss:$16 sps:$4 sm:$0xff]   ;;  %v19574_v2 = vld [vmem:[#allocation46 + $0xec] ss:$16 sps:$4 sm:$0xff]  }
0x13b1   : > { %v8940_v7 = vpop.f32.mrb[97].mxu0  ;;  %10016 = vmatprep.subr.bf16.mxu1 %v19511_v3  ;;  %10102 = vmatprep.subr.bf16.mxu0 %v19514_v4  ;;  %v19569_v3 = vld [vmem:[#allocation46 + $0xe0] ss:$16 sps:$4 sm:$0xff]   ;;  %v19572_v4 = vld [vmem:[#allocation46 + $0xe8] ss:$16 sps:$4 sm:$0xff]  }
0x13b2   : > { %v8942_v12 = vpop.f32.mrb[98].mxu0 }
0x13b3   : > { %v22867_v13 = vpack.c.bf16 %v8942_v12, %v8938_v48  ;;  %v8944_v14 = vpop.f32.mrb[99].mxu0  ;;  %v19577_v48 = vld [vmem:[#allocation46 + $0x104] ss:$16 sps:$4 sm:$0xff]   ;;  %v19581_v12 = vld [vmem:[#allocation46 + $0x120] ss:$16 sps:$4 sm:$0xff]  }
0x13b4   : > { %v22869_v15 = vpack.c.bf16 %v8944_v14, %v8940_v7  ;;  %10017 = vmatpush1.bf16.msra.mxu1 %v19509_v30  ;;  %10103 = vmatpush1.bf16.msra.mxu0 %v19512_v6  ;;  %v19580_v30 = vld [vmem:[#allocation46 + $0x10c] ss:$16 sps:$4 sm:$0xff]   ;;  %v19575_v6 = vld [vmem:[#allocation46 + $0x100] ss:$16 sps:$4 sm:$0xff]   ;;  %v19578_v7 = vld [vmem:[#allocation46 + $0x108] ss:$16 sps:$4 sm:$0xff]  }
0x13b5   : > { %10018 = vmatprep.subr.bf16.mxu1 %v19517_v1  ;;  %10104 = vmatprep.subr.bf16.mxu0 %v19520_v11  ;;  %v19583_v1 = vld [vmem:[#allocation46 + $0x124] ss:$16 sps:$4 sm:$0xff]   ;;  %v19586_v11 = vld [vmem:[#allocation46 + $0x12c] ss:$16 sps:$4 sm:$0xff]   ;;  %v19584_v14 = vld [vmem:[#allocation46 + $0x128] ss:$16 sps:$4 sm:$0xff]  }
0x13b8   : > { %v9166_v21 = vpop.f32.mrb[100].mxu0  ;;  %10019 = vmatpush1.bf16.msra.mxu1 %v19515_v40  ;;  %10105 = vmatpush1.bf16.msra.mxu0 %v19518_v16  ;;  %v19589_v40 = vld [vmem:[#allocation46 + $0x144] ss:$16 sps:$4 sm:$0xff]   ;;  %v19592_v16 = vld [vmem:[#allocation46 + $0x14c] ss:$16 sps:$4 sm:$0xff]  }
0x13b9   : > { %v9168_v24 = vpop.f32.mrb[101].mxu0  ;;  %10020 = vmatprep.subr.bf16.mxu1 %v19523_v19  ;;  %10106 = vmatprep.subr.bf16.mxu0 %v19526_v20  ;;  %v19587_v19 = vld [vmem:[#allocation46 + $0x140] ss:$16 sps:$4 sm:$0xff]   ;;  %v19590_v20 = vld [vmem:[#allocation46 + $0x148] ss:$16 sps:$4 sm:$0xff]  }
0x13ba   : > { %v9170_v33 = vpop.f32.mrb[102].mxu0 }
0x13bb   : > { %v9177_v34 = vpack.c.bf16 %v9170_v33, %v9166_v21  ;;  %v9172_v47 = vpop.f32.mrb[103].mxu0  ;;  %v19595_v21 = vld [vmem:[#allocation46 + $0x164] ss:$16 sps:$4 sm:$0xff]   ;;  %v19599_v33 = vld [vmem:[#allocation46 + $0x180] ss:$16 sps:$4 sm:$0xff]  }
0x13bc   : > { %v9178_v0 = vpack.c.bf16 %v9172_v47, %v9168_v24  ;;  %10021 = vmatpush1.bf16.msra.mxu1 %v19521_v23  ;;  %10107 = vmatpush1.bf16.msra.mxu0 %v19524_v26  ;;  %v19598_v23 = vld [vmem:[#allocation46 + $0x16c] ss:$16 sps:$4 sm:$0xff]   ;;  %v19593_v26 = vld [vmem:[#allocation46 + $0x160] ss:$16 sps:$4 sm:$0xff]   ;;  %v19596_v24 = vld [vmem:[#allocation46 + $0x168] ss:$16 sps:$4 sm:$0xff]  }
0x13bd   : > { %10759 = vmatprep.subr.bf16.mxu1 %v19529_v32  ;;  %10845 = vmatprep.subr.bf16.mxu0 %v19532_v46  ;;  %v19601_v32 = vld [vmem:[#allocation46 + $0x184] ss:$16 sps:$4 sm:$0xff]   ;;  %v19604_v46 = vld [vmem:[#allocation46 + $0x18c] ss:$16 sps:$4 sm:$0xff]  }
0x13be   : > { %10022 = vmatprep.mubr.bf16.mxu1 %v9178_v0  ;;  %10108 = vmatprep.mubr.bf16.mxu0 %v9178_v0  ;;  %v19607_v47 = vld [vmem:[#allocation46 + $0x1a4] ss:$16 sps:$4 sm:$0xff]   ;;  %v19610_v0 = vld [vmem:[#allocation46 + $0x1ac] ss:$16 sps:$4 sm:$0xff]  }
0x13bf   : > { %10023 = vmatmul.mubr.bf16.vlgmr.msra.gmra.mrb[96].mxu1 %v9177_v34  ;;  %10109 = vmatmul.mubr.bf16.vlgmr.msra.gmra.mrb[104].mxu0 %v9177_v34  ;;  %v19602_v34 = vld [vmem:[#allocation46 + $0x188] ss:$16 sps:$4 sm:$0xff]  }
0x13c0   : > { %10760 = vmatpush1.bf16.msra.mxu1 %v19527_v5  ;;  %10791 = vmatprep.mubr.bf16.mxu1 %v22865_v60  ;;  %v19605_v5 = vld [vmem:[#allocation46 + $0x1a0] ss:$16 sps:$4 sm:$0xff]  }
0x13c1   : > { %10846 = vmatpush1.bf16.msra.mxu0 %v19530_v35  ;;  %10877 = vmatprep.mubr.bf16.mxu0 %v22865_v60  ;;  %v19556_v60 = vld [vmem:[#allocation46 + $0x8c] ss:$16 sps:$4 sm:$0xff]   ;;  %v19608_v35 = vld [vmem:[#allocation46 + $0x1a8] ss:$16 sps:$4 sm:$0xff]  }
0x13c2   : > { %10761 = vmatprep.subr.bf16.mxu1 %v19535_v28  ;;  %10847 = vmatprep.subr.bf16.mxu0 %v19538_v36  ;;  %v19613_v28 = vld [vmem:[#allocation46 + $0x1c4] ss:$16 sps:$4 sm:$0xff]   ;;  %v19616_v36 = vld [vmem:[#allocation46 + $0x1cc] ss:$16 sps:$4 sm:$0xff]  }
0x13c4   : > { %10762 = vmatpush1.bf16.msra.mxu1 %v19533_v8  ;;  %v19611_v8 = vld [vmem:[#allocation46 + $0x1c0] ss:$16 sps:$4 sm:$0xff]  }
0x13c5   : > { %10848 = vmatpush1.bf16.msra.mxu0 %v19536_v37  ;;  %10763 = vmatprep.subr.bf16.mxu1 %v19541_v38  ;;  %v19614_v37 = vld [vmem:[#allocation46 + $0x1c8] ss:$16 sps:$4 sm:$0xff]   ;;  %v19619_v38 = vld [vmem:[#allocation46 + $0x1e4] ss:$16 sps:$4 sm:$0xff]  }
0x13c6   : > { %10849 = vmatprep.subr.bf16.mxu0 %v19544_v44  ;;  %v19622_v44 = vld [vmem:[#allocation46 + $0x1ec] ss:$16 sps:$4 sm:$0xff]  }
0x13c8   : > { %10764 = vmatpush1.bf16.msra.mxu1 %v19539_v39  ;;  %v19617_v39 = vld [vmem:[#allocation46 + $0x1e0] ss:$16 sps:$4 sm:$0xff]  }
0x13c9   : > { %10850 = vmatpush1.bf16.msra.mxu0 %v19542_v42  ;;  %10765 = vmatprep.subr.bf16.mxu1 %v19547_v45  ;;  %v19620_v42 = vld [vmem:[#allocation46 + $0x1e8] ss:$16 sps:$4 sm:$0xff]   ;;  %v19625_v45 = vld [vmem:[#allocation46 + $0x204] ss:$16 sps:$4 sm:$0xff]  }
0x13ca   : > { %10851 = vmatprep.subr.bf16.mxu0 %v19550_v29  ;;  %v19628_v29 = vld [vmem:[#allocation46 + $0x20c] ss:$16 sps:$4 sm:$0xff]  }
0x13cc   : > { %10766 = vmatpush1.bf16.msra.mxu1 %v19545_v49  ;;  %v19623_v49 = vld [vmem:[#allocation46 + $0x200] ss:$16 sps:$4 sm:$0xff]  }
0x13cd   : > { %10852 = vmatpush1.bf16.msra.mxu0 %v19548_v27  ;;  %10767 = vmatprep.subr.bf16.mxu1 %v19553_v50  ;;  %v19626_v27 = vld [vmem:[#allocation46 + $0x208] ss:$16 sps:$4 sm:$0xff]   ;;  %v19631_v50 = vld [vmem:[#allocation46 + $0x224] ss:$16 sps:$4 sm:$0xff]  }
0x13ce   : > { %10853 = vmatprep.subr.bf16.mxu0 %v19556_v60  ;;  %v19634_v60 = vld [vmem:[#allocation46 + $0x22c] ss:$16 sps:$4 sm:$0xff]  }
0x13d0   : > { %10768 = vmatpush1.bf16.msra.mxu1 %v19551_v51  ;;  %v19629_v51 = vld [vmem:[#allocation46 + $0x220] ss:$16 sps:$4 sm:$0xff]  }
0x13d1   : > { %10854 = vmatpush1.bf16.msra.mxu0 %v19554_v31  ;;  %10769 = vmatprep.subr.bf16.mxu1 %v19559_v22  ;;  %v19632_v31 = vld [vmem:[#allocation46 + $0x228] ss:$16 sps:$4 sm:$0xff]   ;;  %v19637_v22 = vld [vmem:[#allocation46 + $0x244] ss:$16 sps:$4 sm:$0xff]  }
0x13d2   : > { %10855 = vmatprep.subr.bf16.mxu0 %v19562_v52  ;;  %v19640_v52 = vld [vmem:[#allocation46 + $0x24c] ss:$16 sps:$4 sm:$0xff]  }
0x13d4   : > { %10770 = vmatpush1.bf16.msra.mxu1 %v19557_v53  ;;  %v19635_v53 = vld [vmem:[#allocation46 + $0x240] ss:$16 sps:$4 sm:$0xff]  }
0x13d5   : > { %10856 = vmatpush1.bf16.msra.mxu0 %v19560_v25  ;;  %10771 = vmatprep.subr.bf16.mxu1 %v19565_v54  ;;  %v19638_v25 = vld [vmem:[#allocation46 + $0x248] ss:$16 sps:$4 sm:$0xff]   ;;  %v19643_v54 = vld [vmem:[#allocation46 + $0x264] ss:$16 sps:$4 sm:$0xff]  }
0x13d6   : > { %10857 = vmatprep.subr.bf16.mxu0 %v19568_v55  ;;  %v19641_v55 = vld [vmem:[#allocation46 + $0x260] ss:$16 sps:$4 sm:$0xff]  }
0x13d8   : > { %10772 = vmatpush1.bf16.msra.mxu1 %v19563_v58  ;;  %v19644_v58 = vld [vmem:[#allocation46 + $0x268] ss:$16 sps:$4 sm:$0xff]  }
0x13d9   : > { %10858 = vmatpush1.bf16.msra.mxu0 %v19566_v62  ;;  %10773 = vmatprep.subr.bf16.mxu1 %v19571_v63  ;;  %v19649_v62 = vld [vmem:[#allocation46 + $0x284] ss:$16 sps:$4 sm:$0xff]   ;;  %v19652_v63 = vld [vmem:[#allocation46 + $0x28c] ss:$16 sps:$4 sm:$0xff]  }
0x13da   : > { %10859 = vmatprep.subr.bf16.mxu0 %v19574_v2  ;;  %v19650_v2 = vld [vmem:[#allocation46 + $0x288] ss:$16 sps:$4 sm:$0xff]  }
0x13dc   : > { %10774 = vmatpush1.bf16.msra.mxu1 %v19569_v3  ;;  %v19655_v3 = vld [vmem:[#allocation46 + $0x2a4] ss:$16 sps:$4 sm:$0xff]  }
0x13dd   : > { %10860 = vmatpush1.bf16.msra.mxu0 %v19572_v4  ;;  %10775 = vmatprep.subr.bf16.mxu1 %v19577_v48  ;;  %v19658_v4 = vld [vmem:[#allocation46 + $0x2ac] ss:$16 sps:$4 sm:$0xff]   ;;  %v19653_v48 = vld [vmem:[#allocation46 + $0x2a0] ss:$16 sps:$4 sm:$0xff]  }
0x13de   : > { %10861 = vmatprep.subr.bf16.mxu0 %v19580_v30  ;;  %v19656_v30 = vld [vmem:[#allocation46 + $0x2a8] ss:$16 sps:$4 sm:$0xff]  }
0x13e0   : > { %10776 = vmatpush1.bf16.msra.mxu1 %v19575_v6  ;;  %v19661_v6 = vld [vmem:[#allocation46 + $0x2c4] ss:$16 sps:$4 sm:$0xff]  }
0x13e1   : > { %10862 = vmatpush1.bf16.msra.mxu0 %v19578_v7  ;;  %10777 = vmatprep.subr.bf16.mxu1 %v19583_v1  ;;  %v19664_v7 = vld [vmem:[#allocation46 + $0x2cc] ss:$16 sps:$4 sm:$0xff]   ;;  %v19659_v1 = vld [vmem:[#allocation46 + $0x2c0] ss:$16 sps:$4 sm:$0xff]  }
0x13e2   : > { %10863 = vmatprep.subr.bf16.mxu0 %v19586_v11  ;;  %v19662_v11 = vld [vmem:[#allocation46 + $0x2c8] ss:$16 sps:$4 sm:$0xff]  }
0x13e4   : > { %10778 = vmatpush1.bf16.msra.mxu1 %v19581_v12  ;;  %v19667_v12 = vld [vmem:[#allocation46 + $0x2e4] ss:$16 sps:$4 sm:$0xff]  }
0x13e5   : > { %10864 = vmatpush1.bf16.msra.mxu0 %v19584_v14  ;;  %10779 = vmatprep.subr.bf16.mxu1 %v19589_v40  ;;  %v19670_v14 = vld [vmem:[#allocation46 + $0x2ec] ss:$16 sps:$4 sm:$0xff]   ;;  %v19665_v40 = vld [vmem:[#allocation46 + $0x2e0] ss:$16 sps:$4 sm:$0xff]  }
0x13e6   : > { %10865 = vmatprep.subr.bf16.mxu0 %v19592_v16  ;;  %v19668_v16 = vld [vmem:[#allocation46 + $0x2e8] ss:$16 sps:$4 sm:$0xff]  }
0x13e8   : > { %10780 = vmatpush1.bf16.msra.mxu1 %v19587_v19  ;;  %v19673_v19 = vld [vmem:[#allocation46 + $0x304] ss:$16 sps:$4 sm:$0xff]  }
0x13e9   : > { %10866 = vmatpush1.bf16.msra.mxu0 %v19590_v20  ;;  %10781 = vmatprep.subr.bf16.mxu1 %v19595_v21  ;;  %v19676_v20 = vld [vmem:[#allocation46 + $0x30c] ss:$16 sps:$4 sm:$0xff]   ;;  %v19671_v21 = vld [vmem:[#allocation46 + $0x300] ss:$16 sps:$4 sm:$0xff]  }
0x13ea   : > { %10867 = vmatprep.subr.bf16.mxu0 %v19598_v23  ;;  %v19674_v23 = vld [vmem:[#allocation46 + $0x308] ss:$16 sps:$4 sm:$0xff]  }
0x13ec   : > { %10782 = vmatpush1.bf16.msra.mxu1 %v19593_v26  ;;  %v19679_v26 = vld [vmem:[#allocation46 + $0x324] ss:$16 sps:$4 sm:$0xff]  }
0x13ed   : > { %10868 = vmatpush1.bf16.msra.mxu0 %v19596_v24  ;;  %10783 = vmatprep.subr.bf16.mxu1 %v19601_v32  ;;  %v19682_v24 = vld [vmem:[#allocation46 + $0x32c] ss:$16 sps:$4 sm:$0xff]   ;;  %v19677_v32 = vld [vmem:[#allocation46 + $0x320] ss:$16 sps:$4 sm:$0xff]  }
0x13ee   : > { %10869 = vmatprep.subr.bf16.mxu0 %v19604_v46  ;;  %v19680_v46 = vld [vmem:[#allocation46 + $0x328] ss:$16 sps:$4 sm:$0xff]  }
0x13f0   : > { %10784 = vmatpush1.bf16.msra.mxu1 %v19599_v33  ;;  %v19685_v33 = vld [vmem:[#allocation46 + $0x344] ss:$16 sps:$4 sm:$0xff]  }
0x13f1   : > { %10870 = vmatpush1.bf16.msra.mxu0 %v19602_v34  ;;  %10785 = vmatprep.subr.bf16.mxu1 %v19607_v47  ;;  %v19688_v34 = vld [vmem:[#allocation46 + $0x34c] ss:$16 sps:$4 sm:$0xff]   ;;  %v19683_v47 = vld [vmem:[#allocation46 + $0x340] ss:$16 sps:$4 sm:$0xff]  }
0x13f2   : > { %10871 = vmatprep.subr.bf16.mxu0 %v19610_v0  ;;  %v19686_v0 = vld [vmem:[#allocation46 + $0x348] ss:$16 sps:$4 sm:$0xff]  }
0x13f4   : > { %10786 = vmatpush1.bf16.msra.mxu1 %v19605_v5  ;;  %v19691_v5 = vld [vmem:[#allocation46 + $0x364] ss:$16 sps:$4 sm:$0xff]  }
0x13f5   : > { %10872 = vmatpush1.bf16.msra.mxu0 %v19608_v35  ;;  %10787 = vmatprep.subr.bf16.mxu1 %v19613_v28  ;;  %v19694_v35 = vld [vmem:[#allocation46 + $0x36c] ss:$16 sps:$4 sm:$0xff]   ;;  %v19689_v28 = vld [vmem:[#allocation46 + $0x360] ss:$16 sps:$4 sm:$0xff]  }
0x13f6   : > { %10873 = vmatprep.subr.bf16.mxu0 %v19616_v36  ;;  %v19692_v36 = vld [vmem:[#allocation46 + $0x368] ss:$16 sps:$4 sm:$0xff]  }
0x13f8   : > { %10788 = vmatpush1.bf16.msra.mxu1 %v19611_v8  ;;  %v19697_v8 = vld [vmem:[#allocation46 + $0x384] ss:$16 sps:$4 sm:$0xff]  }
0x13f9   : > { %10874 = vmatpush1.bf16.msra.mxu0 %v19614_v37  ;;  %10789 = vmatprep.subr.bf16.mxu1 %v19619_v38  ;;  %v19700_v37 = vld [vmem:[#allocation46 + $0x38c] ss:$16 sps:$4 sm:$0xff]   ;;  %v19695_v38 = vld [vmem:[#allocation46 + $0x380] ss:$16 sps:$4 sm:$0xff]  }
0x13fa   : > { %10875 = vmatprep.subr.bf16.mxu0 %v19622_v44  ;;  %v19698_v44 = vld [vmem:[#allocation46 + $0x388] ss:$16 sps:$4 sm:$0xff]  }
0x13fc   : > { %10790 = vmatpush1.bf16.msra.mxu1 %v19617_v39  ;;  %v19703_v39 = vld [vmem:[#allocation46 + $0x3a4] ss:$16 sps:$4 sm:$0xff]  }
0x13fd   : > { %10876 = vmatpush1.bf16.msra.mxu0 %v19620_v42  ;;  %10802 = vmatprep.subr.bf16.mxu1 %v19625_v45  ;;  %v19706_v42 = vld [vmem:[#allocation46 + $0x3ac] ss:$16 sps:$4 sm:$0xff]   ;;  %v19701_v45 = vld [vmem:[#allocation46 + $0x3a0] ss:$16 sps:$4 sm:$0xff]  }
0x13fe   : > { %10888 = vmatprep.subr.bf16.mxu0 %v19628_v29  ;;  %v19704_v29 = vld [vmem:[#allocation46 + $0x3a8] ss:$16 sps:$4 sm:$0xff]  }
0x13ff   : > { %10792 = vmatmul.mubr.bf16.vlgmr.msra.gmra.mrb[96].mxu1 %v22863_v57 }
0x1400   : > { %10878 = vmatmul.mubr.bf16.vlgmr.msra.gmra.mrb[104].mxu0 %v22863_v57  ;;  %10803 = vmatpush1.bf16.msra.mxu1 %v19623_v49  ;;  %v19646_v57 = vld [vmem:[#allocation46 + $0x26c] ss:$16 sps:$4 sm:$0xff]   ;;  %v19709_v49 = vld [vmem:[#allocation46 + $0x3c4] ss:$16 sps:$4 sm:$0xff]  }
0x1401   : > { %10834 = vmatprep.mubr.bf16.mxu1 %v22869_v15  ;;  %10889 = vmatpush1.bf16.msra.mxu0 %v19626_v27  ;;  %v19712_v27 = vld [vmem:[#allocation46 + $0x3cc] ss:$16 sps:$4 sm:$0xff]  }
0x1402   : > { %10920 = vmatprep.mubr.bf16.mxu0 %v22869_v15  ;;  %10804 = vmatprep.subr.bf16.mxu1 %v19631_v50  ;;  %v19647_v15 = vld [vmem:[#allocation46 + $0x280] ss:$16 sps:$4 sm:$0xff]  }
0x1403   : > { %10890 = vmatprep.subr.bf16.mxu0 %v19634_v60  ;;  %v19707_v50 = vld [vmem:[#allocation46 + $0x3c0] ss:$16 sps:$4 sm:$0xff]   ;;  %v19710_v60 = vld [vmem:[#allocation46 + $0x3c8] ss:$16 sps:$4 sm:$0xff]  }
0x1404   : > { %10805 = vmatpush1.bf16.msra.mxu1 %v19629_v51  ;;  %v19715_v51 = vld [vmem:[#allocation46 + $0x3e4] ss:$16 sps:$4 sm:$0xff]  }
0x1405   : > { %10891 = vmatpush1.bf16.msra.mxu0 %v19632_v31  ;;  %10806 = vmatprep.subr.bf16.mxu1 %v19637_v22  ;;  %v19718_v31 = vld [vmem:[#allocation46 + $0x3ec] ss:$16 sps:$4 sm:$0xff]   ;;  %v19713_v22 = vld [vmem:[#allocation46 + $0x3e0] ss:$16 sps:$4 sm:$0xff]  }
0x1406   : > { %10892 = vmatprep.subr.bf16.mxu0 %v19640_v52  ;;  %v19716_v52 = vld [vmem:[#allocation46 + $0x3e8] ss:$16 sps:$4 sm:$0xff]  }
0x1408   : > { %10807 = vmatpush1.bf16.msra.mxu1 %v19635_v53  ;;  %v19722_v53 = vld [vmem:[#allocation49 + $0x4] ss:$16 sps:$4 sm:$0xff]  }
0x1409   : > { %10893 = vmatpush1.bf16.msra.mxu0 %v19638_v25  ;;  %10808 = vmatprep.subr.bf16.mxu1 %v19643_v54  ;;  %v19725_v25 = vld [vmem:[#allocation49 + $0xc] ss:$16 sps:$4 sm:$0xff]   ;;  %v19719_v54 = vld [vmem:[%s23249_s4] sm:$0xff]   ;;  %s23000_s4 = scalar_lea.hbm %s21941_s14, %s17685_s0 }
0x140a   : > { %10894 = vmatprep.subr.bf16.mxu0 %v19646_v57  ;;  %v19723_v57 = vld [vmem:[#allocation49 + $0x8] ss:$16 sps:$4 sm:$0xff]  }
0x140c   : > { %10809 = vmatpush1.bf16.msra.mxu1 %v19641_v55  ;;  %v19731_v55 = vld [vmem:[#allocation49 + $0x2c] ss:$16 sps:$4 sm:$0xff]  }
0x140d   : > { %10895 = vmatpush1.bf16.msra.mxu0 %v19644_v58  ;;  %10810 = vmatprep.subr.bf16.mxu1 %v19649_v62  ;;  %v19737_v58 = vld [vmem:[#allocation49 + $0x4c] ss:$16 sps:$4 sm:$0xff]   ;;  %v19732_v62 = vld [vmem:[#allocation49 + $0x40] ss:$16 sps:$4 sm:$0xff]  }
0x140e   : > { %10896 = vmatprep.subr.bf16.mxu0 %v19652_v63  ;;  %v19735_v63 = vld [vmem:[#allocation49 + $0x48] ss:$16 sps:$4 sm:$0xff]  }
0x1410   : > { %10811 = vmatpush1.bf16.msra.mxu1 %v19647_v15  ;;  %v19740_v15 = vld [vmem:[#allocation49 + $0x64] ss:$16 sps:$4 sm:$0xff]  }
0x1411   : > { %10897 = vmatpush1.bf16.msra.mxu0 %v19650_v2  ;;  %10812 = vmatprep.subr.bf16.mxu1 %v19655_v3  ;;  %v19743_v2 = vld [vmem:[#allocation49 + $0x6c] ss:$16 sps:$4 sm:$0xff]   ;;  %v19738_v3 = vld [vmem:[#allocation49 + $0x60] ss:$16 sps:$4 sm:$0xff]  }
0x1412   : > { %10898 = vmatprep.subr.bf16.mxu0 %v19658_v4  ;;  %v19741_v4 = vld [vmem:[#allocation49 + $0x68] ss:$16 sps:$4 sm:$0xff]  }
0x1414   : > { %10813 = vmatpush1.bf16.msra.mxu1 %v19653_v48  ;;  %v19746_v48 = vld [vmem:[#allocation49 + $0x84] ss:$16 sps:$4 sm:$0xff]  }
0x1415   : > { %10899 = vmatpush1.bf16.msra.mxu0 %v19656_v30  ;;  %10814 = vmatprep.subr.bf16.mxu1 %v19661_v6  ;;  %v19749_v30 = vld [vmem:[#allocation49 + $0x8c] ss:$16 sps:$4 sm:$0xff]   ;;  %v19744_v6 = vld [vmem:[#allocation49 + $0x80] ss:$16 sps:$4 sm:$0xff]  }
0x1416   : > { %10900 = vmatprep.subr.bf16.mxu0 %v19664_v7  ;;  %v19747_v7 = vld [vmem:[#allocation49 + $0x88] ss:$16 sps:$4 sm:$0xff]  }
0x1418   : > { %10815 = vmatpush1.bf16.msra.mxu1 %v19659_v1  ;;  %v19752_v1 = vld [vmem:[#allocation49 + $0xa4] ss:$16 sps:$4 sm:$0xff]  }
0x1419   : > { %10901 = vmatpush1.bf16.msra.mxu0 %v19662_v11  ;;  %10816 = vmatprep.subr.bf16.mxu1 %v19667_v12  ;;  %v19755_v11 = vld [vmem:[#allocation49 + $0xac] ss:$16 sps:$4 sm:$0xff]   ;;  %v19750_v12 = vld [vmem:[#allocation49 + $0xa0] ss:$16 sps:$4 sm:$0xff]  }
0x141a   : > { %10902 = vmatprep.subr.bf16.mxu0 %v19670_v14  ;;  %v19753_v14 = vld [vmem:[#allocation49 + $0xa8] ss:$16 sps:$4 sm:$0xff]  }
0x141c   : > { %10817 = vmatpush1.bf16.msra.mxu1 %v19665_v40  ;;  %v19758_v40 = vld [vmem:[#allocation49 + $0xc4] ss:$16 sps:$4 sm:$0xff]  }
0x141d   : > { %10903 = vmatpush1.bf16.msra.mxu0 %v19668_v16  ;;  %10818 = vmatprep.subr.bf16.mxu1 %v19673_v19  ;;  %v19761_v16 = vld [vmem:[#allocation49 + $0xcc] ss:$16 sps:$4 sm:$0xff]   ;;  %v19756_v19 = vld [vmem:[#allocation49 + $0xc0] ss:$16 sps:$4 sm:$0xff]  }
0x141e   : > { %10904 = vmatprep.subr.bf16.mxu0 %v19676_v20  ;;  %v19759_v20 = vld [vmem:[#allocation49 + $0xc8] ss:$16 sps:$4 sm:$0xff]  }
0x1420   : > { %10819 = vmatpush1.bf16.msra.mxu1 %v19671_v21  ;;  %v19764_v21 = vld [vmem:[#allocation49 + $0xe4] ss:$16 sps:$4 sm:$0xff]  }
0x1421   : > { %10905 = vmatpush1.bf16.msra.mxu0 %v19674_v23  ;;  %10820 = vmatprep.subr.bf16.mxu1 %v19679_v26  ;;  %v19767_v23 = vld [vmem:[#allocation49 + $0xec] ss:$16 sps:$4 sm:$0xff]   ;;  %v19762_v26 = vld [vmem:[#allocation49 + $0xe0] ss:$16 sps:$4 sm:$0xff]  }
0x1422   : > { %10906 = vmatprep.subr.bf16.mxu0 %v19682_v24  ;;  %v19765_v24 = vld [vmem:[#allocation49 + $0xe8] ss:$16 sps:$4 sm:$0xff]  }
0x1424   : > { %10821 = vmatpush1.bf16.msra.mxu1 %v19677_v32  ;;  %v19770_v32 = vld [vmem:[#allocation49 + $0x104] ss:$16 sps:$4 sm:$0xff]  }
0x1425   : > { %10907 = vmatpush1.bf16.msra.mxu0 %v19680_v46  ;;  %10822 = vmatprep.subr.bf16.mxu1 %v19685_v33  ;;  %v19773_v46 = vld [vmem:[#allocation49 + $0x10c] ss:$16 sps:$4 sm:$0xff]   ;;  %v19768_v33 = vld [vmem:[#allocation49 + $0x100] ss:$16 sps:$4 sm:$0xff]  }
0x1426   : > { %10908 = vmatprep.subr.bf16.mxu0 %v19688_v34  ;;  %v19771_v34 = vld [vmem:[#allocation49 + $0x108] ss:$16 sps:$4 sm:$0xff]  }
0x1428   : > { %10823 = vmatpush1.bf16.msra.mxu1 %v19683_v47  ;;  %v19776_v47 = vld [vmem:[#allocation49 + $0x124] ss:$16 sps:$4 sm:$0xff]  }
0x1429   : > { %10909 = vmatpush1.bf16.msra.mxu0 %v19686_v0  ;;  %10824 = vmatprep.subr.bf16.mxu1 %v19691_v5  ;;  %v19779_v0 = vld [vmem:[#allocation49 + $0x12c] ss:$16 sps:$4 sm:$0xff]   ;;  %v19774_v5 = vld [vmem:[#allocation49 + $0x120] ss:$16 sps:$4 sm:$0xff]  }
0x142a   : > { %10910 = vmatprep.subr.bf16.mxu0 %v19694_v35  ;;  %v19777_v35 = vld [vmem:[#allocation49 + $0x128] ss:$16 sps:$4 sm:$0xff]  }
0x142c   : > { %10825 = vmatpush1.bf16.msra.mxu1 %v19689_v28  ;;  %v19782_v28 = vld [vmem:[#allocation49 + $0x144] ss:$16 sps:$4 sm:$0xff]  }
0x142d   : > { %10911 = vmatpush1.bf16.msra.mxu0 %v19692_v36  ;;  %10826 = vmatprep.subr.bf16.mxu1 %v19697_v8  ;;  %v19785_v36 = vld [vmem:[#allocation49 + $0x14c] ss:$16 sps:$4 sm:$0xff]   ;;  %v19780_v8 = vld [vmem:[#allocation49 + $0x140] ss:$16 sps:$4 sm:$0xff]  }
0x142e   : > { %10912 = vmatprep.subr.bf16.mxu0 %v19700_v37  ;;  %v19783_v37 = vld [vmem:[#allocation49 + $0x148] ss:$16 sps:$4 sm:$0xff]  }
0x1430   : > { %10827 = vmatpush1.bf16.msra.mxu1 %v19695_v38  ;;  %v19788_v38 = vld [vmem:[#allocation49 + $0x164] ss:$16 sps:$4 sm:$0xff]  }
0x1431   : > { %10913 = vmatpush1.bf16.msra.mxu0 %v19698_v44  ;;  %10828 = vmatprep.subr.bf16.mxu1 %v19703_v39  ;;  %v19791_v44 = vld [vmem:[#allocation49 + $0x16c] ss:$16 sps:$4 sm:$0xff]   ;;  %v19786_v39 = vld [vmem:[#allocation49 + $0x160] ss:$16 sps:$4 sm:$0xff]  }
0x1432   : > { %10914 = vmatprep.subr.bf16.mxu0 %v19706_v42  ;;  %v19789_v42 = vld [vmem:[#allocation49 + $0x168] ss:$16 sps:$4 sm:$0xff]  }
0x1434   : > { %10829 = vmatpush1.bf16.msra.mxu1 %v19701_v45  ;;  %v19794_v45 = vld [vmem:[#allocation49 + $0x184] ss:$16 sps:$4 sm:$0xff]  }
0x1435   : > { %10915 = vmatpush1.bf16.msra.mxu0 %v19704_v29  ;;  %10830 = vmatprep.subr.bf16.mxu1 %v19709_v49  ;;  %v19797_v29 = vld [vmem:[#allocation49 + $0x18c] ss:$16 sps:$4 sm:$0xff]   ;;  %v19792_v49 = vld [vmem:[#allocation49 + $0x180] ss:$16 sps:$4 sm:$0xff]  }
0x1436   : > { %10916 = vmatprep.subr.bf16.mxu0 %v19712_v27  ;;  %v19795_v27 = vld [vmem:[#allocation49 + $0x188] ss:$16 sps:$4 sm:$0xff]  }
0x1438   : > { %10831 = vmatpush1.bf16.msra.mxu1 %v19707_v50  ;;  %v19800_v50 = vld [vmem:[#allocation49 + $0x1a4] ss:$16 sps:$4 sm:$0xff]  }
0x1439   : > { %10917 = vmatpush1.bf16.msra.mxu0 %v19710_v60  ;;  %10832 = vmatprep.subr.bf16.mxu1 %v19715_v51  ;;  %v19803_v60 = vld [vmem:[#allocation49 + $0x1ac] ss:$16 sps:$4 sm:$0xff]   ;;  %v19798_v51 = vld [vmem:[#allocation49 + $0x1a0] ss:$16 sps:$4 sm:$0xff]  }
0x143a   : > { %10918 = vmatprep.subr.bf16.mxu0 %v19718_v31  ;;  %v19801_v31 = vld [vmem:[#allocation49 + $0x1a8] ss:$16 sps:$4 sm:$0xff]  }
0x143c   : > { %10833 = vmatpush1.bf16.msra.mxu1 %v19713_v22  ;;  %v19806_v22 = vld [vmem:[#allocation49 + $0x1c4] ss:$16 sps:$4 sm:$0xff]  }
0x143d   : > { %10919 = vmatpush1.bf16.msra.mxu0 %v19716_v52  ;;  %17121 = vmatprep.subr.msk.bf16.mxu1 %vm2423_vm4, %v22819_v17  ;;  %v19720_v17 = vld [vmem:[#allocation49] ss:$16 sps:$4 sm:$0xff]   ;;  %v19809_v52 = vld [vmem:[#allocation49 + $0x1cc] ss:$16 sps:$4 sm:$0xff]  }
0x143e   : > { %17123 = vmatprep.subr.msk.bf16.mxu0 %vm2423_vm4, %v22847_v9  ;;  %v19728_v9 = vld [vmem:[#allocation49 + $0x24] ss:$16 sps:$4 sm:$0xff]  }
0x143f   : > { %10835 = vmatmul.mubr.bf16.vlgmr.msra.gmra.mrb[96].mxu1 %v22867_v13 }
0x1440   : > { %10921 = vmatmul.mubr.bf16.vlgmr.msra.gmra.mrb[104].mxu0 %v22867_v13  ;;  %10942 = vmatpush1.bf16.msra.mxu1 %v22822_v18  ;;  %v19726_v13 = vld [vmem:[#allocation49 + $0x20] ss:$16 sps:$4 sm:$0xff]   ;;  %v19729_v18 = vld [vmem:[#allocation49 + $0x28] ss:$16 sps:$4 sm:$0xff]  }
0x1441   : > { %10985 = vmatpush1.bf16.msra.mxu0 %v22850_v56  ;;  %10973 = vmatprep.mubr.bf16.mxu1 %v21659_v10  ;;  %v19734_v56 = vld [vmem:[#allocation49 + $0x44] ss:$16 sps:$4 sm:$0xff]  }
0x1442   : > { %11016 = vmatprep.mubr.bf16.mxu0 %v21659_v10  ;;  %11799 = vmatprep.subr.bf16.mxu1 %v19722_v53  ;;  %v19804_v53 = vld [vmem:[#allocation49 + $0x1c0] ss:$16 sps:$4 sm:$0xff]  }
0x1443   : > { %11885 = vmatprep.subr.bf16.mxu0 %v19725_v25  ;;  %v19807_v25 = vld [vmem:[#allocation49 + $0x1c8] ss:$16 sps:$4 sm:$0xff]  }
0x1447   : > { %17122 = vmatmul.mubr.msk.bf16.vlgmr.msra.gmra.mrb[100].mxu1 %vm2419_vm5, %v19719_v54 }
0x1448   : > { %17124 = vmatmul.mubr.msk.bf16.vlgmr.msra.gmra.mrb[108].mxu0 %vm2419_vm5, %v19719_v54  ;;  %11800 = vmatpush1.bf16.msra.mxu1 %v19720_v17  ;;  %v19812_v54 = vld [vmem:[#allocation49 + $0x1e4] ss:$16 sps:$4 sm:$0xff]   ;;  %v19815_v17 = vld [vmem:[#allocation49 + $0x1ec] ss:$16 sps:$4 sm:$0xff]  }
0x1449   : > { %11886 = vmatpush1.bf16.msra.mxu0 %v19723_v57  ;;  %11801 = vmatprep.subr.bf16.mxu1 %v19728_v9  ;;  %v19810_v57 = vld [vmem:[#allocation49 + $0x1e0] ss:$16 sps:$4 sm:$0xff]   ;;  %v19813_v9 = vld [vmem:[#allocation49 + $0x1e8] ss:$16 sps:$4 sm:$0xff]  }
0x144a   : > { %11887 = vmatprep.subr.bf16.mxu0 %v19731_v55  ;;  %v19818_v55 = vld [vmem:[#allocation49 + $0x204] ss:$16 sps:$4 sm:$0xff]  }
0x144c   : > { %11802 = vmatpush1.bf16.msra.mxu1 %v19726_v13  ;;  %v19821_v13 = vld [vmem:[#allocation49 + $0x20c] ss:$16 sps:$4 sm:$0xff]  }
0x144d   : > { %11888 = vmatpush1.bf16.msra.mxu0 %v19729_v18  ;;  %11803 = vmatprep.subr.bf16.mxu1 %v19734_v56 }
0x144e   : > { %11889 = vmatprep.subr.bf16.mxu0 %v19737_v58 }
0x1450   : > { %11804 = vmatpush1.bf16.msra.mxu1 %v19732_v62 }
0x1451   : > { %11890 = vmatpush1.bf16.msra.mxu0 %v19735_v63  ;;  %11805 = vmatprep.subr.bf16.mxu1 %v19740_v15 }
0x1452   : > { %11891 = vmatprep.subr.bf16.mxu0 %v19743_v2 }
0x1454   : > { %11806 = vmatpush1.bf16.msra.mxu1 %v19738_v3 }
0x1455   : > { %11892 = vmatpush1.bf16.msra.mxu0 %v19741_v4  ;;  %11807 = vmatprep.subr.bf16.mxu1 %v19746_v48  ;;  %v19816_v48 = vld [vmem:[#allocation49 + $0x200] ss:$16 sps:$4 sm:$0xff]  }
0x1456   : > { %11893 = vmatprep.subr.bf16.mxu0 %v19749_v30  ;;  %v19819_v30 = vld [vmem:[#allocation49 + $0x208] ss:$16 sps:$4 sm:$0xff]  }
0x1458   : > { %11808 = vmatpush1.bf16.msra.mxu1 %v19744_v6 }
0x1459   : > { %11894 = vmatpush1.bf16.msra.mxu0 %v19747_v7  ;;  %11809 = vmatprep.subr.bf16.mxu1 %v19752_v1  ;;  %v19824_v1 = vld [vmem:[#allocation49 + $0x224] ss:$16 sps:$4 sm:$0xff]  }
0x145a   : > { %11895 = vmatprep.subr.bf16.mxu0 %v19755_v11  ;;  %v19827_v11 = vld [vmem:[#allocation49 + $0x22c] ss:$16 sps:$4 sm:$0xff]  }
0x145c   : > { %11810 = vmatpush1.bf16.msra.mxu1 %v19750_v12 }
0x145d   : > { %11896 = vmatpush1.bf16.msra.mxu0 %v19753_v14  ;;  %11811 = vmatprep.subr.bf16.mxu1 %v19758_v40  ;;  %v19822_v14 = vld [vmem:[#allocation49 + $0x220] ss:$16 sps:$4 sm:$0xff]   ;;  %v19825_v40 = vld [vmem:[#allocation49 + $0x228] ss:$16 sps:$4 sm:$0xff]  }
0x145e   : > { %11897 = vmatprep.subr.bf16.mxu0 %v19761_v16  ;;  %v19830_v16 = vld [vmem:[#allocation49 + $0x244] ss:$16 sps:$4 sm:$0xff]  }
0x1460   : > { %11812 = vmatpush1.bf16.msra.mxu1 %v19756_v19  ;;  %v19833_v19 = vld [vmem:[#allocation49 + $0x24c] ss:$16 sps:$4 sm:$0xff]  }
0x1461   : > { %11898 = vmatpush1.bf16.msra.mxu0 %v19759_v20  ;;  %11813 = vmatprep.subr.bf16.mxu1 %v19764_v21  ;;  %v19828_v20 = vld [vmem:[#allocation49 + $0x240] ss:$16 sps:$4 sm:$0xff]   ;;  %v19831_v21 = vld [vmem:[#allocation49 + $0x248] ss:$16 sps:$4 sm:$0xff]  }
0x1462   : > { %11899 = vmatprep.subr.bf16.mxu0 %v19767_v23  ;;  %v19836_v23 = vld [vmem:[#allocation49 + $0x264] ss:$16 sps:$4 sm:$0xff]  }
0x1464   : > { %11814 = vmatpush1.bf16.msra.mxu1 %v19762_v26  ;;  %v19839_v26 = vld [vmem:[#allocation49 + $0x26c] ss:$16 sps:$4 sm:$0xff]  }
0x1465   : > { %11900 = vmatpush1.bf16.msra.mxu0 %v19765_v24  ;;  %11815 = vmatprep.subr.bf16.mxu1 %v19770_v32  ;;  %v19834_v24 = vld [vmem:[#allocation49 + $0x260] ss:$16 sps:$4 sm:$0xff]   ;;  %v19837_v32 = vld [vmem:[#allocation49 + $0x268] ss:$16 sps:$4 sm:$0xff]  }
0x1466   : > { %11901 = vmatprep.subr.bf16.mxu0 %v19773_v46  ;;  %v19842_v46 = vld [vmem:[#allocation49 + $0x284] ss:$16 sps:$4 sm:$0xff]  }
0x1468   : > { %11816 = vmatpush1.bf16.msra.mxu1 %v19768_v33  ;;  %v19845_v33 = vld [vmem:[#allocation49 + $0x28c] ss:$16 sps:$4 sm:$0xff]  }
0x1469   : > { %11902 = vmatpush1.bf16.msra.mxu0 %v19771_v34  ;;  %11817 = vmatprep.subr.bf16.mxu1 %v19776_v47  ;;  %v19840_v34 = vld [vmem:[#allocation49 + $0x280] ss:$16 sps:$4 sm:$0xff]   ;;  %v19843_v47 = vld [vmem:[#allocation49 + $0x288] ss:$16 sps:$4 sm:$0xff]  }
0x146a   : > { %11903 = vmatprep.subr.bf16.mxu0 %v19779_v0  ;;  %v19848_v0 = vld [vmem:[#allocation49 + $0x2a4] ss:$16 sps:$4 sm:$0xff]  }
0x146c   : > { %11818 = vmatpush1.bf16.msra.mxu1 %v19774_v5  ;;  %v19851_v5 = vld [vmem:[#allocation49 + $0x2ac] ss:$16 sps:$4 sm:$0xff]  }
0x146d   : > { %11904 = vmatpush1.bf16.msra.mxu0 %v19777_v35  ;;  %11819 = vmatprep.subr.bf16.mxu1 %v19782_v28  ;;  %v19846_v35 = vld [vmem:[#allocation49 + $0x2a0] ss:$16 sps:$4 sm:$0xff]   ;;  %v19849_v28 = vld [vmem:[#allocation49 + $0x2a8] ss:$16 sps:$4 sm:$0xff]  }
0x146e   : > { %11905 = vmatprep.subr.bf16.mxu0 %v19785_v36  ;;  %v19854_v36 = vld [vmem:[#allocation49 + $0x2c4] ss:$16 sps:$4 sm:$0xff]  }
0x1470   : > { %11820 = vmatpush1.bf16.msra.mxu1 %v19780_v8  ;;  %v19857_v8 = vld [vmem:[#allocation49 + $0x2cc] ss:$16 sps:$4 sm:$0xff]  }
0x1471   : > { %11906 = vmatpush1.bf16.msra.mxu0 %v19783_v37  ;;  %11821 = vmatprep.subr.bf16.mxu1 %v19788_v38  ;;  %v19852_v37 = vld [vmem:[#allocation49 + $0x2c0] ss:$16 sps:$4 sm:$0xff]   ;;  %v19855_v38 = vld [vmem:[#allocation49 + $0x2c8] ss:$16 sps:$4 sm:$0xff]  }
0x1472   : > { %11907 = vmatprep.subr.bf16.mxu0 %v19791_v44  ;;  %v19860_v44 = vld [vmem:[#allocation49 + $0x2e4] ss:$16 sps:$4 sm:$0xff]  }
0x1474   : > { %11822 = vmatpush1.bf16.msra.mxu1 %v19786_v39  ;;  %v19863_v39 = vld [vmem:[#allocation49 + $0x2ec] ss:$16 sps:$4 sm:$0xff]  }
0x1475   : > { %11908 = vmatpush1.bf16.msra.mxu0 %v19789_v42  ;;  %11823 = vmatprep.subr.bf16.mxu1 %v19794_v45  ;;  %v19858_v42 = vld [vmem:[#allocation49 + $0x2e0] ss:$16 sps:$4 sm:$0xff]   ;;  %v19861_v45 = vld [vmem:[#allocation49 + $0x2e8] ss:$16 sps:$4 sm:$0xff]  }
0x1476   : > { %11909 = vmatprep.subr.bf16.mxu0 %v19797_v29  ;;  %v19866_v29 = vld [vmem:[#allocation49 + $0x304] ss:$16 sps:$4 sm:$0xff]  }
0x1478   : > { %11824 = vmatpush1.bf16.msra.mxu1 %v19792_v49  ;;  %v19869_v49 = vld [vmem:[#allocation49 + $0x30c] ss:$16 sps:$4 sm:$0xff]  }
0x1479   : > { %11910 = vmatpush1.bf16.msra.mxu0 %v19795_v27  ;;  %11825 = vmatprep.subr.bf16.mxu1 %v19800_v50  ;;  %v19864_v27 = vld [vmem:[#allocation49 + $0x300] ss:$16 sps:$4 sm:$0xff]   ;;  %v19867_v50 = vld [vmem:[#allocation49 + $0x308] ss:$16 sps:$4 sm:$0xff]  }
0x147a   : > { %11911 = vmatprep.subr.bf16.mxu0 %v19803_v60  ;;  %v19872_v60 = vld [vmem:[#allocation49 + $0x324] ss:$16 sps:$4 sm:$0xff]  }
0x147c   : > { %11826 = vmatpush1.bf16.msra.mxu1 %v19798_v51  ;;  %v19875_v51 = vld [vmem:[#allocation49 + $0x32c] ss:$16 sps:$4 sm:$0xff]  }
0x147d   : > { %11912 = vmatpush1.bf16.msra.mxu0 %v19801_v31  ;;  %11827 = vmatprep.subr.bf16.mxu1 %v19806_v22  ;;  %v19870_v31 = vld [vmem:[#allocation49 + $0x320] ss:$16 sps:$4 sm:$0xff]   ;;  %v19873_v22 = vld [vmem:[#allocation49 + $0x328] ss:$16 sps:$4 sm:$0xff]  }
0x147e   : > { %11913 = vmatprep.subr.bf16.mxu0 %v19809_v52  ;;  %v19878_v52 = vld [vmem:[#allocation49 + $0x344] ss:$16 sps:$4 sm:$0xff]  }
0x1480   : > { %11828 = vmatpush1.bf16.msra.mxu1 %v19804_v53  ;;  %v19881_v53 = vld [vmem:[#allocation49 + $0x34c] ss:$16 sps:$4 sm:$0xff]  }
0x1481   : > { %11914 = vmatpush1.bf16.msra.mxu0 %v19807_v25  ;;  %11829 = vmatprep.subr.bf16.mxu1 %v19812_v54  ;;  %v19876_v25 = vld [vmem:[#allocation49 + $0x340] ss:$16 sps:$4 sm:$0xff]   ;;  %v19879_v54 = vld [vmem:[#allocation49 + $0x348] ss:$16 sps:$4 sm:$0xff]  }
0x1482   : > { %11915 = vmatprep.subr.bf16.mxu0 %v19815_v17  ;;  %v19884_v17 = vld [vmem:[#allocation49 + $0x364] ss:$16 sps:$4 sm:$0xff]  }
0x1484   : > { %11830 = vmatpush1.bf16.msra.mxu1 %v19810_v57  ;;  %v19887_v57 = vld [vmem:[#allocation49 + $0x36c] ss:$16 sps:$4 sm:$0xff]  }
0x1485   : > { %11916 = vmatpush1.bf16.msra.mxu0 %v19813_v9  ;;  %11842 = vmatprep.subr.bf16.mxu1 %v19818_v55  ;;  %v19882_v9 = vld [vmem:[#allocation49 + $0x360] ss:$16 sps:$4 sm:$0xff]   ;;  %v19885_v55 = vld [vmem:[#allocation49 + $0x368] ss:$16 sps:$4 sm:$0xff]  }
0x1486   : > { %11928 = vmatprep.subr.bf16.mxu0 %v19821_v13  ;;  %v19890_v13 = vld [vmem:[#allocation49 + $0x384] ss:$16 sps:$4 sm:$0xff]  }
0x151a   : > { %v10975_v18 = vpop.f32.mrb[100].mxu1 }
0x151b   : > { %v10977_v56 = vpop.f32.mrb[101].mxu1  ;;  %v11018_v58 = vpop.f32.mrb[108].mxu0 }
0x151c   : > { %v10979_v62 = vpop.f32.mrb[102].mxu1  ;;  %v11020_v63 = vpop.f32.mrb[109].mxu0 }
0x151d   : > { %v11027_v15 = vpack.c.bf16 %v10979_v62, %v10975_v18  ;;  %v10981_v2 = vpop.f32.mrb[103].mxu1  ;;  %v11022_v3 = vpop.f32.mrb[110].mxu0  ;;  %v19893_v18 = vld [vmem:[#allocation49 + $0x38c] ss:$16 sps:$4 sm:$0xff]   ;;  %v19896_v62 = vld [vmem:[#allocation49 + $0x3a4] ss:$16 sps:$4 sm:$0xff]  }
0x151e   : > { %v11028_v4 = vpack.c.bf16 %v10981_v2, %v10977_v56  ;;  %v22890_v6 = vpack.c.bf16 %v11022_v3, %v11018_v58  ;;  %v11024_v7 = vpop.f32.mrb[111].mxu0  ;;  %v19888_v56 = vld [vmem:[#allocation49 + $0x380] ss:$16 sps:$4 sm:$0xff]   ;;  %v19891_v58 = vld [vmem:[#allocation49 + $0x388] ss:$16 sps:$4 sm:$0xff]  }
0x151f   : > { %v11030_v12 = vpack.c.bf16 %v11024_v7, %v11020_v63  ;;  %v19899_v63 = vld [vmem:[#allocation49 + $0x3ac] ss:$16 sps:$4 sm:$0xff]   ;;  %v19897_v2 = vld [vmem:[#allocation49 + $0x3a8] ss:$16 sps:$4 sm:$0xff]   ;;  %v19902_v3 = vld [vmem:[#allocation49 + $0x3c4] ss:$16 sps:$4 sm:$0xff]  }
0x1520   : > { %11831 = vmatprep.mubr.bf16.mxu1 %v11028_v4  ;;  %11917 = vmatprep.mubr.bf16.mxu0 %v11028_v4  ;;  %v19905_v4 = vld [vmem:[#allocation49 + $0x3cc] ss:$16 sps:$4 sm:$0xff]   ;;  %v19908_v7 = vld [vmem:[#allocation49 + $0x3e4] ss:$16 sps:$4 sm:$0xff]  }
0x1521   : > { %11832 = vmatmul.mubr.bf16.vlgmr.msra.gmra.mrb[96].mxu1 %v11027_v15  ;;  %11918 = vmatmul.mubr.bf16.vlgmr.msra.gmra.mrb[104].mxu0 %v11027_v15  ;;  %v19894_v15 = vld [vmem:[#allocation49 + $0x3a0] ss:$16 sps:$4 sm:$0xff]  }
0x1522   : > { %11843 = vmatpush1.bf16.msra.mxu1 %v19816_v48  ;;  %11929 = vmatpush1.bf16.msra.mxu0 %v19819_v30  ;;  %v19900_v48 = vld [vmem:[#allocation49 + $0x3c0] ss:$16 sps:$4 sm:$0xff]   ;;  %v19903_v30 = vld [vmem:[#allocation49 + $0x3c8] ss:$16 sps:$4 sm:$0xff]  }
0x1523   : > { %11844 = vmatprep.subr.bf16.mxu1 %v19824_v1  ;;  %11930 = vmatprep.subr.bf16.mxu0 %v19827_v11  ;;  %v19911_v1 = vld [vmem:[#allocation49 + $0x3ec] ss:$16 sps:$4 sm:$0xff]   ;;  %v19906_v11 = vld [vmem:[#allocation49 + $0x3e0] ss:$16 sps:$4 sm:$0xff]  }
0x1524   : > { %11874 = vmatprep.mubr.bf16.mxu1 %v11030_v12  ;;  %11960 = vmatprep.mubr.bf16.mxu0 %v11030_v12  ;;  %v19909_v12 = vld [vmem:[#allocation49 + $0x3e8] ss:$16 sps:$4 sm:$0xff]  }
0x1526   : > { %11845 = vmatpush1.bf16.msra.mxu1 %v19822_v14  ;;  %11931 = vmatpush1.bf16.msra.mxu0 %v19825_v40  ;;  %v11979_v14 = vld [vmem:[%s23250_s3] sm:$0xf]  ;;  %s15539_s3 = scalar_lea.sflag [#allocation4], %s22478_s8 }
0x1527   : > { %11846 = vmatprep.subr.bf16.mxu1 %v19830_v16  ;;  %11932 = vmatprep.subr.bf16.mxu0 %v19833_v19  ;;  %v11984_v40 = vrot.slane %v11979_v14, %v22577_v41  ;;  %v11992_v16 = vrot.slane %v11979_v14, %v22695_v59  ;;  %v11988_v19 = vrot.slane %v11979_v14, %v22580_v43 }
0x152a   : > { %11847 = vmatpush1.bf16.msra.mxu1 %v19828_v20  ;;  %11933 = vmatpush1.bf16.msra.mxu0 %v19831_v21  ;;  %v11996_v20 = vrot.slane %v11979_v14, %v22699_v61  ;;  %v19952_v14 = vld [vmem:[#allocation52 + $0xc4] ss:$16 sps:$4 sm:$0xff]  }
0x152b   : > { %11848 = vmatprep.subr.bf16.mxu1 %v19836_v23  ;;  %11934 = vmatprep.subr.bf16.mxu0 %v19839_v26 }
0x152e   : > { %11849 = vmatpush1.bf16.msra.mxu1 %v19834_v24  ;;  %11935 = vmatpush1.bf16.msra.mxu0 %v19837_v32 }
0x152f   : > { %11850 = vmatprep.subr.bf16.mxu1 %v19842_v46  ;;  %11936 = vmatprep.subr.bf16.mxu0 %v19845_v33 }
0x1532   : > { %11851 = vmatpush1.bf16.msra.mxu1 %v19840_v34  ;;  %11937 = vmatpush1.bf16.msra.mxu0 %v19843_v47 }
0x1533   : > { %11852 = vmatprep.subr.bf16.mxu1 %v19848_v0  ;;  %11938 = vmatprep.subr.bf16.mxu0 %v19851_v5 }
0x1536   : > { %11853 = vmatpush1.bf16.msra.mxu1 %v19846_v35  ;;  %11939 = vmatpush1.bf16.msra.mxu0 %v19849_v28 }
0x1537   : > { %11854 = vmatprep.subr.bf16.mxu1 %v19854_v36  ;;  %11940 = vmatprep.subr.bf16.mxu0 %v19857_v8 }
0x153a   : > { %11855 = vmatpush1.bf16.msra.mxu1 %v19852_v37  ;;  %11941 = vmatpush1.bf16.msra.mxu0 %v19855_v38 }
0x153b   : > { %11856 = vmatprep.subr.bf16.mxu1 %v19860_v44  ;;  %11942 = vmatprep.subr.bf16.mxu0 %v19863_v39 }
0x153e   : > { %11857 = vmatpush1.bf16.msra.mxu1 %v19858_v42  ;;  %11943 = vmatpush1.bf16.msra.mxu0 %v19861_v45 }
0x153f   : > { %11858 = vmatprep.subr.bf16.mxu1 %v19866_v29  ;;  %11944 = vmatprep.subr.bf16.mxu0 %v19869_v49 }
0x1542   : > { %11859 = vmatpush1.bf16.msra.mxu1 %v19864_v27  ;;  %11945 = vmatpush1.bf16.msra.mxu0 %v19867_v50 }
0x1543   : > { %11860 = vmatprep.subr.bf16.mxu1 %v19872_v60  ;;  %11946 = vmatprep.subr.bf16.mxu0 %v19875_v51 }
0x1546   : > { %11861 = vmatpush1.bf16.msra.mxu1 %v19870_v31  ;;  %11947 = vmatpush1.bf16.msra.mxu0 %v19873_v22  ;;  %v19912_v31 = vld [vmem:[%s23251_s12] sm:$0xff]   ;;  %s21425_s12 = scalar_lea.vmem %s23002_s9, 256 }
0x1547   : > { %11862 = vmatprep.subr.bf16.mxu1 %v19878_v52  ;;  %11948 = vmatprep.subr.bf16.mxu0 %v19881_v53  ;;  %v19916_v22 = vld [vmem:[#allocation52 + $0x4] ss:$16 sps:$4 sm:$0xff]   ;;  %v19919_v52 = vld [vmem:[#allocation52 + $0xc] ss:$16 sps:$4 sm:$0xff]   ;;  %p21426_p10 = scmp.ne.s32.totalorder %s23002_s9, %s21425_s12 }
0x1548   : > { %v19913_v53 = vld [vmem:[%s23252_s5] sm:$0xff]   ;;  %s21431_s5 = scalar_lea.vmem %s21430_s7, 512 }
0x1549   : > { %p21427_p3 = pnand %p21426_p10, %p23255_p1  ;;  %p21433_p5 = scmp.lt.s32.totalorder %s21431_s5, %s21425_s12 }
0x154a   : > { %11863 = vmatpush1.bf16.msra.mxu1 %v19876_v25  ;;  %11949 = vmatpush1.bf16.msra.mxu0 %v19879_v54  ;;  %v19914_v25 = vld [vmem:[#allocation52] ss:$16 sps:$4 sm:$0xff]   ;;  %v19917_v54 = vld [vmem:[#allocation52 + $0x8] ss:$16 sps:$4 sm:$0xff]  }
0x154b   : > { %11864 = vmatprep.subr.bf16.mxu1 %v19884_v17  ;;  %11950 = vmatprep.subr.bf16.mxu0 %v19887_v57  ;;  %v19922_v17 = vld [vmem:[#allocation52 + $0x24] ss:$16 sps:$4 sm:$0xff]   ;;  %v19925_v57 = vld [vmem:[#allocation52 + $0x2c] ss:$16 sps:$4 sm:$0xff]   ;;  %p21428_p6 = pneg %p21427_p3  ;;  %p21434_p7 = por %p21433_p5, %p21432_p12 }
0x154d   : > { %p21435_p4 = pnand %p21434_p7, %p21428_p6 }
0x154e   : > { %11865 = vmatpush1.bf16.msra.mxu1 %v19882_v9  ;;  %11951 = vmatpush1.bf16.msra.mxu0 %v19885_v55  ;;  %v19920_v9 = vld [vmem:[#allocation52 + $0x20] ss:$16 sps:$4 sm:$0xff]   ;;  %v19923_v55 = vld [vmem:[#allocation52 + $0x28] ss:$16 sps:$4 sm:$0xff]  }
0x154f   : > { %11866 = vmatprep.subr.bf16.mxu1 %v19890_v13  ;;  %11952 = vmatprep.subr.bf16.mxu0 %v19893_v18  ;;  %v19928_v13 = vld [vmem:[#allocation52 + $0x44] ss:$16 sps:$4 sm:$0xff]   ;;  %v19931_v18 = vld [vmem:[#allocation52 + $0x4c] ss:$16 sps:$4 sm:$0xff]  }
0x1552   : > { %11867 = vmatpush1.bf16.msra.mxu1 %v19888_v56  ;;  %11953 = vmatpush1.bf16.msra.mxu0 %v19891_v58  ;;  %v19926_v56 = vld [vmem:[#allocation52 + $0x40] ss:$16 sps:$4 sm:$0xff]   ;;  %v19929_v58 = vld [vmem:[#allocation52 + $0x48] ss:$16 sps:$4 sm:$0xff]  }
0x1553   : > { %11868 = vmatprep.subr.bf16.mxu1 %v19896_v62  ;;  %11954 = vmatprep.subr.bf16.mxu0 %v19899_v63  ;;  %v19934_v62 = vld [vmem:[#allocation52 + $0x64] ss:$16 sps:$4 sm:$0xff]   ;;  %v19937_v63 = vld [vmem:[#allocation52 + $0x6c] ss:$16 sps:$4 sm:$0xff]  }
0x1556   : > { %11869 = vmatpush1.bf16.msra.mxu1 %v19894_v15  ;;  %11955 = vmatpush1.bf16.msra.mxu0 %v19897_v2  ;;  %v19932_v15 = vld [vmem:[#allocation52 + $0x60] ss:$16 sps:$4 sm:$0xff]   ;;  %v19935_v2 = vld [vmem:[#allocation52 + $0x68] ss:$16 sps:$4 sm:$0xff]  }
0x1557   : > { %11870 = vmatprep.subr.bf16.mxu1 %v19902_v3  ;;  %11956 = vmatprep.subr.bf16.mxu0 %v19905_v4  ;;  %v19940_v3 = vld [vmem:[#allocation52 + $0x84] ss:$16 sps:$4 sm:$0xff]   ;;  %v19943_v4 = vld [vmem:[#allocation52 + $0x8c] ss:$16 sps:$4 sm:$0xff]  }
0x155a   : > { %11871 = vmatpush1.bf16.msra.mxu1 %v19900_v48  ;;  %11957 = vmatpush1.bf16.msra.mxu0 %v19903_v30  ;;  %v19938_v48 = vld [vmem:[#allocation52 + $0x80] ss:$16 sps:$4 sm:$0xff]   ;;  %v19941_v30 = vld [vmem:[#allocation52 + $0x88] ss:$16 sps:$4 sm:$0xff]  }
0x155b   : > { %11872 = vmatprep.subr.bf16.mxu1 %v19908_v7  ;;  %11958 = vmatprep.subr.bf16.mxu0 %v19911_v1  ;;  %v19946_v7 = vld [vmem:[#allocation52 + $0xa4] ss:$16 sps:$4 sm:$0xff]   ;;  %v19949_v1 = vld [vmem:[#allocation52 + $0xac] ss:$16 sps:$4 sm:$0xff]  }
0x155e   : > { %11873 = vmatpush1.bf16.msra.mxu1 %v19906_v11  ;;  %11959 = vmatpush1.bf16.msra.mxu0 %v19909_v12  ;;  %v19944_v11 = vld [vmem:[#allocation52 + $0xa0] ss:$16 sps:$4 sm:$0xff]   ;;  %v19947_v12 = vld [vmem:[#allocation52 + $0xa8] ss:$16 sps:$4 sm:$0xff]  }
0x1561   : > { %11875 = vmatmul.mubr.bf16.vlgmr.msra.gmra.mrb[96].mxu1 %v22890_v6  ;;  %11961 = vmatmul.mubr.bf16.vlgmr.msra.gmra.mrb[104].mxu0 %v22890_v6 }
0x1562   : > { %12063 = vmatprep.mubr.bf16.mxu1 %v21659_v10  ;;  %12106 = vmatprep.mubr.bf16.mxu0 %v21659_v10 }
0x1634   : > { %v11876_v21 = vpop.f32.mrb[96].mxu1  ;;  %v11962_v23 = vpop.f32.mrb[104].mxu0 }
0x1635   : > { %v12001_v26 = vadd.f32 %v11984_v40, %v11876_v21  ;;  %v12003_v24 = vadd.f32 %v11992_v16, %v11962_v23  ;;  %v11878_v32 = vpop.f32.mrb[97].mxu1  ;;  %v11964_v46 = vpop.f32.mrb[105].mxu0  ;;  %v19961_v21 = vld [vmem:[#allocation52 + $0xec] ss:$16 sps:$4 sm:$0xff]   ;;  %v19956_v23 = vld [vmem:[#allocation52 + $0xe0] ss:$16 sps:$4 sm:$0xff]  }
0x1636   : > { %v12002_v6 = vadd.f32 %v11988_v19, %v11878_v32  ;;  %v12004_v33 = vadd.f32 %v11996_v20, %v11964_v46  ;;  %v11880_v34 = vpop.f32.mrb[98].mxu1  ;;  %v11966_v47 = vpop.f32.mrb[106].mxu0  ;;  %v19967_v32 = vld [vmem:[#allocation52 + $0x10c] ss:$16 sps:$4 sm:$0xff]   ;;  %v19962_v46 = vld [vmem:[#allocation52 + $0x100] ss:$16 sps:$4 sm:$0xff]  }
0x1637   : > { %v12005_v0 = vadd.f32 %v11984_v40, %v11880_v34  ;;  %v12007_v5 = vadd.f32 %v11992_v16, %v11966_v47  ;;  %v11882_v35 = vpop.f32.mrb[99].mxu1  ;;  %v11968_v28 = vpop.f32.mrb[107].mxu0  ;;  %v12009_v37 = vmax.f32 %v12001_v26, 0.0  ;;  %v12011_v38 = vmax.f32 %v12003_v24, 0.0  ;;  %v19955_v40 = vld [vmem:[#allocation52 + $0xcc] ss:$16 sps:$4 sm:$0xff]  }
0x1638   : > { %v12006_v36 = vadd.f32 %v11988_v19, %v11882_v35  ;;  %v12008_v8 = vadd.f32 %v11996_v20, %v11968_v28  ;;  %v12010_v42 = vmax.f32 %v12002_v6, 0.0  ;;  %v12012_v45 = vmax.f32 %v12004_v33, 0.0  ;;  %v19950_v16 = vld [vmem:[#allocation52 + $0xc0] ss:$16 sps:$4 sm:$0xff]   ;;  %v19953_v19 = vld [vmem:[#allocation52 + $0xc8] ss:$16 sps:$4 sm:$0xff]  }
0x1639   : > { %v12013_v44 = vmax.f32 %v12005_v0, 0.0  ;;  %v12015_v39 = vmax.f32 %v12007_v5, 0.0  ;;  %v19958_v20 = vld [vmem:[#allocation52 + $0xe4] ss:$16 sps:$4 sm:$0xff]   ;;  %v19959_v26 = vld [vmem:[#allocation52 + $0xe8] ss:$16 sps:$4 sm:$0xff]  }
0x163a   : > { %v12014_v29 = vmax.f32 %v12006_v36, 0.0  ;;  %v12016_v49 = vmax.f32 %v12008_v8, 0.0  ;;  %v19964_v24 = vld [vmem:[#allocation52 + $0x104] ss:$16 sps:$4 sm:$0xff]   ;;  %v19965_v6 = vld [vmem:[#allocation52 + $0x108] ss:$16 sps:$4 sm:$0xff]  }
0x163b   : > { %v22901_v27 = vpack.c.bf16 %v12013_v44, %v12009_v37  ;;  %v22903_v50 = vpack.c.bf16 %v12015_v39, %v12011_v38  ;;  %v19970_v33 = vld [vmem:[#allocation52 + $0x124] ss:$16 sps:$4 sm:$0xff]   ;;  %v19973_v34 = vld [vmem:[#allocation52 + $0x12c] ss:$16 sps:$4 sm:$0xff]   ;;  %v19968_v47 = vld [vmem:[#allocation52 + $0x120] ss:$16 sps:$4 sm:$0xff]  }
0x163c   : > { %v22905_v60 = vpack.c.bf16 %v12014_v29, %v12010_v42  ;;  %v22907_v51 = vpack.c.bf16 %v12016_v49, %v12012_v45  ;;  %v19971_v0 = vld [vmem:[#allocation52 + $0x128] ss:$16 sps:$4 sm:$0xff]   ;;  %v19976_v5 = vld [vmem:[#allocation52 + $0x144] ss:$16 sps:$4 sm:$0xff]   ;;  %v19979_v35 = vld [vmem:[#allocation52 + $0x14c] ss:$16 sps:$4 sm:$0xff]  }
0x163d   : > { %v19974_v28 = vld [vmem:[#allocation52 + $0x140] ss:$16 sps:$4 sm:$0xff]   ;;  %v19977_v36 = vld [vmem:[#allocation52 + $0x148] ss:$16 sps:$4 sm:$0xff]   ;;  %v19982_v8 = vld [vmem:[#allocation52 + $0x164] ss:$16 sps:$4 sm:$0xff]  }
0x163e   : > { %12031 = vmatprep.subr.bf16.mxu1 %v22905_v60  ;;  %12074 = vmatprep.subr.bf16.mxu0 %v22907_v51  ;;  %v19985_v37 = vld [vmem:[#allocation52 + $0x16c] ss:$16 sps:$4 sm:$0xff]   ;;  %v19980_v38 = vld [vmem:[#allocation52 + $0x160] ss:$16 sps:$4 sm:$0xff]   ;;  %v19983_v44 = vld [vmem:[#allocation52 + $0x168] ss:$16 sps:$4 sm:$0xff]  }
0x163f   : > { %12032 = vmatpush1.bf16.msra.mxu1 %v22901_v27  ;;  %12075 = vmatpush1.bf16.msra.mxu0 %v22903_v50  ;;  %v19988_v39 = vld [vmem:[#allocation52 + $0x184] ss:$16 sps:$4 sm:$0xff]   ;;  %v19991_v42 = vld [vmem:[#allocation52 + $0x18c] ss:$16 sps:$4 sm:$0xff]   ;;  %v19986_v45 = vld [vmem:[#allocation52 + $0x180] ss:$16 sps:$4 sm:$0xff]  }
0x1640   : > { %12259 = vmatprep.subr.bf16.mxu1 %v22905_v60  ;;  %12302 = vmatprep.subr.bf16.mxu0 %v22907_v51  ;;  %v19989_v29 = vld [vmem:[#allocation52 + $0x188] ss:$16 sps:$4 sm:$0xff]   ;;  %v19992_v49 = vld [vmem:[#allocation52 + $0x1a0] ss:$16 sps:$4 sm:$0xff]  }
0x1642   : > { %17254 = vmatmul.mubr.msk.bf16.vlgmr.msra.gmra.mrb[104].mxu1 %vm2081_vm1, %v19912_v31  ;;  %17255 = vmatmul.mubr.msk.bf16.vlgmr.msra.gmra.mrb[112].mxu0 %vm2081_vm1, %v19912_v31  ;;  %v19994_v31 = vld [vmem:[#allocation52 + $0x1a4] ss:$16 sps:$4 sm:$0xff]  }
0x1643   : > { %12260 = vmatpush1.bf16.msra.mxu1 %v22901_v27  ;;  %12303 = vmatpush1.bf16.msra.mxu0 %v22903_v50 }
0x1644   : > { %12291 = vmatprep.mubr.bf16.mxu1 %v21659_v10  ;;  %12334 = vmatprep.mubr.bf16.mxu0 %v21659_v10 }
0x1645   : > { %13117 = vmatprep.subr.bf16.mxu1 %v19916_v22  ;;  %13203 = vmatprep.subr.bf16.mxu0 %v19919_v52  ;;  %v19995_v22 = vld [vmem:[#allocation52 + $0x1a8] ss:$16 sps:$4 sm:$0xff]   ;;  %v19997_v52 = vld [vmem:[#allocation52 + $0x1ac] ss:$16 sps:$4 sm:$0xff]  }
0x164a   : > { %17257 = vmatmul.mubr.msk.bf16.vlgmr.msra.gmra.mrb[108].mxu1 %vm2081_vm1, %v19913_v53  ;;  %17258 = vmatmul.mubr.msk.bf16.vlgmr.msra.gmra.mrb[116].mxu0 %vm2081_vm1, %v19913_v53  ;;  %v19998_v53 = vld [vmem:[#allocation52 + $0x1c0] ss:$16 sps:$4 sm:$0xff]  }
0x164b   : > { %13118 = vmatpush1.bf16.msra.mxu1 %v19914_v25  ;;  %13204 = vmatpush1.bf16.msra.mxu0 %v19917_v54  ;;  %v20000_v25 = vld [vmem:[#allocation52 + $0x1c4] ss:$16 sps:$4 sm:$0xff]   ;;  %v20001_v54 = vld [vmem:[#allocation52 + $0x1c8] ss:$16 sps:$4 sm:$0xff]  }
0x164c   : > { %13119 = vmatprep.subr.bf16.mxu1 %v19922_v17  ;;  %13205 = vmatprep.subr.bf16.mxu0 %v19925_v57  ;;  %v20003_v17 = vld [vmem:[#allocation52 + $0x1cc] ss:$16 sps:$4 sm:$0xff]   ;;  %v20006_v57 = vld [vmem:[#allocation52 + $0x1e4] ss:$16 sps:$4 sm:$0xff]  }
0x164f   : > { %13120 = vmatpush1.bf16.msra.mxu1 %v19920_v9  ;;  %13206 = vmatpush1.bf16.msra.mxu0 %v19923_v55  ;;  %v20009_v9 = vld [vmem:[#allocation52 + $0x1ec] ss:$16 sps:$4 sm:$0xff]   ;;  %v20004_v55 = vld [vmem:[#allocation52 + $0x1e0] ss:$16 sps:$4 sm:$0xff]  }
0x1650   : > { %13121 = vmatprep.subr.bf16.mxu1 %v19928_v13  ;;  %13207 = vmatprep.subr.bf16.mxu0 %v19931_v18  ;;  %v20007_v13 = vld [vmem:[#allocation52 + $0x1e8] ss:$16 sps:$4 sm:$0xff]   ;;  %v20012_v18 = vld [vmem:[#allocation52 + $0x204] ss:$16 sps:$4 sm:$0xff]  }
0x1653   : > { %13122 = vmatpush1.bf16.msra.mxu1 %v19926_v56  ;;  %13208 = vmatpush1.bf16.msra.mxu0 %v19929_v58  ;;  %v20015_v56 = vld [vmem:[#allocation52 + $0x20c] ss:$16 sps:$4 sm:$0xff]  }
0x1654   : > { %13123 = vmatprep.subr.bf16.mxu1 %v19934_v62  ;;  %13209 = vmatprep.subr.bf16.mxu0 %v19937_v63 }
0x1657   : > { %13124 = vmatpush1.bf16.msra.mxu1 %v19932_v15  ;;  %13210 = vmatpush1.bf16.msra.mxu0 %v19935_v2 }
0x1658   : > { %13125 = vmatprep.subr.bf16.mxu1 %v19940_v3  ;;  %13211 = vmatprep.subr.bf16.mxu0 %v19943_v4 }
0x165b   : > { %13126 = vmatpush1.bf16.msra.mxu1 %v19938_v48  ;;  %13212 = vmatpush1.bf16.msra.mxu0 %v19941_v30 }
0x165c   : > { %13127 = vmatprep.subr.bf16.mxu1 %v19946_v7  ;;  %13213 = vmatprep.subr.bf16.mxu0 %v19949_v1 }
0x165f   : > { %13128 = vmatpush1.bf16.msra.mxu1 %v19944_v11  ;;  %13214 = vmatpush1.bf16.msra.mxu0 %v19947_v12 }
0x1660   : > { %13129 = vmatprep.subr.bf16.mxu1 %v19952_v14  ;;  %13215 = vmatprep.subr.bf16.mxu0 %v19955_v40 }
0x1663   : > { %13130 = vmatpush1.bf16.msra.mxu1 %v19950_v16  ;;  %13216 = vmatpush1.bf16.msra.mxu0 %v19953_v19 }
0x1664   : > { %13131 = vmatprep.subr.bf16.mxu1 %v19958_v20  ;;  %13217 = vmatprep.subr.bf16.mxu0 %v19961_v21 }
0x1667   : > { %13132 = vmatpush1.bf16.msra.mxu1 %v19956_v23  ;;  %13218 = vmatpush1.bf16.msra.mxu0 %v19959_v26 }
0x1668   : > { %13133 = vmatprep.subr.bf16.mxu1 %v19964_v24  ;;  %13219 = vmatprep.subr.bf16.mxu0 %v19967_v32 }
0x166b   : > { %13134 = vmatpush1.bf16.msra.mxu1 %v19962_v46  ;;  %13220 = vmatpush1.bf16.msra.mxu0 %v19965_v6  ;;  %v20010_v46 = vld [vmem:[#allocation52 + $0x200] ss:$16 sps:$4 sm:$0xff]   ;;  %v20013_v6 = vld [vmem:[#allocation52 + $0x208] ss:$16 sps:$4 sm:$0xff]  }
0x166c   : > { %13135 = vmatprep.subr.bf16.mxu1 %v19970_v33  ;;  %13221 = vmatprep.subr.bf16.mxu0 %v19973_v34  ;;  %v20018_v34 = vld [vmem:[#allocation52 + $0x224] ss:$16 sps:$4 sm:$0xff]  }
0x166f   : > { %13136 = vmatpush1.bf16.msra.mxu1 %v19968_v47  ;;  %13222 = vmatpush1.bf16.msra.mxu0 %v19971_v0  ;;  %v20021_v47 = vld [vmem:[#allocation52 + $0x22c] ss:$16 sps:$4 sm:$0xff]   ;;  %v20016_v0 = vld [vmem:[#allocation52 + $0x220] ss:$16 sps:$4 sm:$0xff]  }
0x1670   : > { %13137 = vmatprep.subr.bf16.mxu1 %v19976_v5  ;;  %13223 = vmatprep.subr.bf16.mxu0 %v19979_v35  ;;  %v20019_v5 = vld [vmem:[#allocation52 + $0x228] ss:$16 sps:$4 sm:$0xff]   ;;  %v20024_v35 = vld [vmem:[#allocation52 + $0x244] ss:$16 sps:$4 sm:$0xff]  }
0x1673   : > { %13138 = vmatpush1.bf16.msra.mxu1 %v19974_v28  ;;  %13224 = vmatpush1.bf16.msra.mxu0 %v19977_v36  ;;  %v20027_v28 = vld [vmem:[#allocation52 + $0x24c] ss:$16 sps:$4 sm:$0xff]   ;;  %v20022_v36 = vld [vmem:[#allocation52 + $0x240] ss:$16 sps:$4 sm:$0xff]  }
0x1674   : > { %13139 = vmatprep.subr.bf16.mxu1 %v19982_v8  ;;  %13225 = vmatprep.subr.bf16.mxu0 %v19985_v37  ;;  %v20025_v8 = vld [vmem:[#allocation52 + $0x248] ss:$16 sps:$4 sm:$0xff]   ;;  %v20030_v37 = vld [vmem:[#allocation52 + $0x264] ss:$16 sps:$4 sm:$0xff]  }
0x1677   : > { %13140 = vmatpush1.bf16.msra.mxu1 %v19980_v38  ;;  %13226 = vmatpush1.bf16.msra.mxu0 %v19983_v44  ;;  %v20033_v38 = vld [vmem:[#allocation52 + $0x26c] ss:$16 sps:$4 sm:$0xff]   ;;  %v20028_v44 = vld [vmem:[#allocation52 + $0x260] ss:$16 sps:$4 sm:$0xff]  }
0x1678   : > { %13141 = vmatprep.subr.bf16.mxu1 %v19988_v39  ;;  %13227 = vmatprep.subr.bf16.mxu0 %v19991_v42  ;;  %v20031_v39 = vld [vmem:[#allocation52 + $0x268] ss:$16 sps:$4 sm:$0xff]   ;;  %v20036_v42 = vld [vmem:[#allocation52 + $0x284] ss:$16 sps:$4 sm:$0xff]  }
0x167b   : > { %13142 = vmatpush1.bf16.msra.mxu1 %v19986_v45  ;;  %13228 = vmatpush1.bf16.msra.mxu0 %v19989_v29  ;;  %v20039_v45 = vld [vmem:[#allocation52 + $0x28c] ss:$16 sps:$4 sm:$0xff]   ;;  %v20034_v29 = vld [vmem:[#allocation52 + $0x280] ss:$16 sps:$4 sm:$0xff]  }
0x167c   : > { %13143 = vmatprep.subr.bf16.mxu1 %v19994_v31  ;;  %13229 = vmatprep.subr.bf16.mxu0 %v19997_v52  ;;  %v20042_v31 = vld [vmem:[#allocation52 + $0x2a4] ss:$16 sps:$4 sm:$0xff]   ;;  %v20040_v52 = vld [vmem:[#allocation52 + $0x2a0] ss:$16 sps:$4 sm:$0xff]  }
0x167f   : > { %13144 = vmatpush1.bf16.msra.mxu1 %v19992_v49  ;;  %13230 = vmatpush1.bf16.msra.mxu0 %v19995_v22  ;;  %v20037_v49 = vld [vmem:[#allocation52 + $0x288] ss:$16 sps:$4 sm:$0xff]   ;;  %v20045_v22 = vld [vmem:[#allocation52 + $0x2ac] ss:$16 sps:$4 sm:$0xff]  }
0x1680   : > { %13145 = vmatprep.subr.bf16.mxu1 %v20000_v25  ;;  %13231 = vmatprep.subr.bf16.mxu0 %v20003_v17  ;;  %v20048_v25 = vld [vmem:[#allocation52 + $0x2c4] ss:$16 sps:$4 sm:$0xff]   ;;  %v20046_v17 = vld [vmem:[#allocation52 + $0x2c0] ss:$16 sps:$4 sm:$0xff]  }
0x1683   : > { %13146 = vmatpush1.bf16.msra.mxu1 %v19998_v53  ;;  %13232 = vmatpush1.bf16.msra.mxu0 %v20001_v54  ;;  %v20043_v53 = vld [vmem:[#allocation52 + $0x2a8] ss:$16 sps:$4 sm:$0xff]   ;;  %v20051_v54 = vld [vmem:[#allocation52 + $0x2cc] ss:$16 sps:$4 sm:$0xff]  }
0x1684   : > { %13147 = vmatprep.subr.bf16.mxu1 %v20006_v57  ;;  %13233 = vmatprep.subr.bf16.mxu0 %v20009_v9  ;;  %v20049_v57 = vld [vmem:[#allocation52 + $0x2c8] ss:$16 sps:$4 sm:$0xff]   ;;  %v20054_v9 = vld [vmem:[#allocation52 + $0x2e4] ss:$16 sps:$4 sm:$0xff]  }
0x1687   : > { %13148 = vmatpush1.bf16.msra.mxu1 %v20004_v55  ;;  %13234 = vmatpush1.bf16.msra.mxu0 %v20007_v13  ;;  %v20057_v55 = vld [vmem:[#allocation52 + $0x2ec] ss:$16 sps:$4 sm:$0xff]   ;;  %v20052_v13 = vld [vmem:[#allocation52 + $0x2e0] ss:$16 sps:$4 sm:$0xff]  }
0x1688   : > { %13160 = vmatprep.subr.bf16.mxu1 %v20012_v18  ;;  %13246 = vmatprep.subr.bf16.mxu0 %v20015_v56  ;;  %v20055_v18 = vld [vmem:[#allocation52 + $0x2e8] ss:$16 sps:$4 sm:$0xff]   ;;  %v20060_v56 = vld [vmem:[#allocation52 + $0x304] ss:$16 sps:$4 sm:$0xff]  }
0x1715   : > { %v12065_v58 = vpop.f32.mrb[104].mxu1  ;;  %v12108_v62 = vpop.f32.mrb[112].mxu0 }
0x1716   : > { %v12067_v63 = vpop.f32.mrb[105].mxu1  ;;  %v12110_v15 = vpop.f32.mrb[113].mxu0 }
0x1717   : > { %v12069_v2 = vpop.f32.mrb[106].mxu1  ;;  %v12112_v3 = vpop.f32.mrb[114].mxu0 }
0x1718   : > { %v22925_v4 = vpack.c.bf16 %v12069_v2, %v12065_v58  ;;  %v12071_v48 = vpop.f32.mrb[107].mxu1  ;;  %v22927_v30 = vpack.c.bf16 %v12112_v3, %v12108_v62  ;;  %v12114_v7 = vpop.f32.mrb[115].mxu0  ;;  %v20063_v58 = vld [vmem:[#allocation52 + $0x30c] ss:$16 sps:$4 sm:$0xff]   ;;  %v20058_v62 = vld [vmem:[#allocation52 + $0x300] ss:$16 sps:$4 sm:$0xff]  }
0x1719   : > { %v22929_v1 = vpack.c.bf16 %v12071_v48, %v12067_v63  ;;  %v22931_v11 = vpack.c.bf16 %v12114_v7, %v12110_v15  ;;  %v20061_v63 = vld [vmem:[#allocation52 + $0x308] ss:$16 sps:$4 sm:$0xff]   ;;  %v20066_v15 = vld [vmem:[#allocation52 + $0x324] ss:$16 sps:$4 sm:$0xff]   ;;  %v20069_v2 = vld [vmem:[#allocation52 + $0x32c] ss:$16 sps:$4 sm:$0xff]  }
0x171a   : > { %v20064_v3 = vld [vmem:[#allocation52 + $0x320] ss:$16 sps:$4 sm:$0xff]   ;;  %v20067_v48 = vld [vmem:[#allocation52 + $0x328] ss:$16 sps:$4 sm:$0xff]   ;;  %v20072_v7 = vld [vmem:[#allocation52 + $0x344] ss:$16 sps:$4 sm:$0xff]  }
0x171d   : > { %v12293_v12 = vpop.f32.mrb[108].mxu1  ;;  %v12336_v14 = vpop.f32.mrb[116].mxu0 }
0x171e   : > { %v12295_v40 = vpop.f32.mrb[109].mxu1  ;;  %v12338_v16 = vpop.f32.mrb[117].mxu0 }
0x171f   : > { %v12297_v19 = vpop.f32.mrb[110].mxu1  ;;  %v12340_v20 = vpop.f32.mrb[118].mxu0 }
0x1720   : > { %v12345_v21 = vpack.c.bf16 %v12297_v19, %v12293_v12  ;;  %v12299_v23 = vpop.f32.mrb[111].mxu1  ;;  %v22933_v26 = vpack.c.bf16 %v12340_v20, %v12336_v14  ;;  %v12342_v24 = vpop.f32.mrb[119].mxu0  ;;  %v20075_v12 = vld [vmem:[#allocation52 + $0x34c] ss:$16 sps:$4 sm:$0xff]   ;;  %v20070_v14 = vld [vmem:[#allocation52 + $0x340] ss:$16 sps:$4 sm:$0xff]  }
0x1721   : > { %v12346_v32 = vpack.c.bf16 %v12299_v23, %v12295_v40  ;;  %v12348_v33 = vpack.c.bf16 %v12342_v24, %v12338_v16  ;;  %v20073_v40 = vld [vmem:[#allocation52 + $0x348] ss:$16 sps:$4 sm:$0xff]   ;;  %v20078_v16 = vld [vmem:[#allocation52 + $0x364] ss:$16 sps:$4 sm:$0xff]   ;;  %v20081_v19 = vld [vmem:[#allocation52 + $0x36c] ss:$16 sps:$4 sm:$0xff]  }
0x1722   : > { %v20076_v20 = vld [vmem:[#allocation52 + $0x360] ss:$16 sps:$4 sm:$0xff]   ;;  %v20084_v23 = vld [vmem:[#allocation52 + $0x384] ss:$16 sps:$4 sm:$0xff]   ;;  %v20087_v24 = vld [vmem:[#allocation52 + $0x38c] ss:$16 sps:$4 sm:$0xff]  }
0x1723   : > { %13149 = vmatprep.mubr.bf16.mxu1 %v12346_v32  ;;  %13235 = vmatprep.mubr.bf16.mxu0 %v12346_v32  ;;  %v20082_v32 = vld [vmem:[#allocation52 + $0x380] ss:$16 sps:$4 sm:$0xff]  }
0x1724   : > { %13150 = vmatmul.mubr.bf16.vlgmr.msra.gmra.mrb[112].mxu1 %v12345_v21  ;;  %13236 = vmatmul.mubr.bf16.vlgmr.msra.gmra.mrb[120].mxu0 %v12345_v21  ;;  %v20079_v21 = vld [vmem:[#allocation52 + $0x368] ss:$16 sps:$4 sm:$0xff]  }
0x1725   : > { %13161 = vmatpush1.bf16.msra.mxu1 %v20010_v46  ;;  %13247 = vmatpush1.bf16.msra.mxu0 %v20013_v6  ;;  %v20085_v46 = vld [vmem:[#allocation52 + $0x388] ss:$16 sps:$4 sm:$0xff]   ;;  %v20090_v6 = vld [vmem:[#allocation52 + $0x3a4] ss:$16 sps:$4 sm:$0xff]  }
0x1726   : > { %13162 = vmatprep.subr.bf16.mxu1 %v20018_v34  ;;  %13248 = vmatprep.subr.bf16.mxu0 %v20021_v47  ;;  %v20088_v34 = vld [vmem:[#allocation52 + $0x3a0] ss:$16 sps:$4 sm:$0xff]   ;;  %v20091_v47 = vld [vmem:[#allocation52 + $0x3a8] ss:$16 sps:$4 sm:$0xff]  }
0x1727   : > { %13192 = vmatprep.mubr.bf16.mxu1 %v12348_v33  ;;  %13278 = vmatprep.mubr.bf16.mxu0 %v12348_v33  ;;  %v20093_v33 = vld [vmem:[#allocation52 + $0x3ac] ss:$16 sps:$4 sm:$0xff]  }
0x1729   : > { %13163 = vmatpush1.bf16.msra.mxu1 %v20016_v0  ;;  %13249 = vmatpush1.bf16.msra.mxu0 %v20019_v5  ;;  %v20096_v0 = vld [vmem:[#allocation52 + $0x3c4] ss:$16 sps:$4 sm:$0xff]   ;;  %v20099_v5 = vld [vmem:[#allocation52 + $0x3cc] ss:$16 sps:$4 sm:$0xff]  }
0x172a   : > { %13164 = vmatprep.subr.bf16.mxu1 %v20024_v35  ;;  %13250 = vmatprep.subr.bf16.mxu0 %v20027_v28  ;;  %v20094_v35 = vld [vmem:[#allocation52 + $0x3c0] ss:$16 sps:$4 sm:$0xff]   ;;  %v20097_v28 = vld [vmem:[#allocation52 + $0x3c8] ss:$16 sps:$4 sm:$0xff]  }
0x172d   : > { %13165 = vmatpush1.bf16.msra.mxu1 %v20022_v36  ;;  %13251 = vmatpush1.bf16.msra.mxu0 %v20025_v8  ;;  %v20102_v36 = vld [vmem:[#allocation52 + $0x3e4] ss:$16 sps:$4 sm:$0xff]   ;;  %v20105_v8 = vld [vmem:[#allocation52 + $0x3ec] ss:$16 sps:$4 sm:$0xff]  }
0x172e   : > { %13166 = vmatprep.subr.bf16.mxu1 %v20030_v37  ;;  %13252 = vmatprep.subr.bf16.mxu0 %v20033_v38  ;;  %v20100_v37 = vld [vmem:[#allocation52 + $0x3e0] ss:$16 sps:$4 sm:$0xff]   ;;  %v20103_v38 = vld [vmem:[#allocation52 + $0x3e8] ss:$16 sps:$4 sm:$0xff]  }
0x1731   : > { %13167 = vmatpush1.bf16.msra.mxu1 %v20028_v44  ;;  %13253 = vmatpush1.bf16.msra.mxu0 %v20031_v39  ;;  %v20108_v44 = vld [vmem:[#allocation50 + $0x4] ss:$16 sps:$4 sm:$0xff]   ;;  %v20111_v39 = vld [vmem:[#allocation50 + $0xc] ss:$16 sps:$4 sm:$0xff]  }
0x1732   : > { %13168 = vmatprep.subr.bf16.mxu1 %v20036_v42  ;;  %13254 = vmatprep.subr.bf16.mxu0 %v20039_v45  ;;  %v20106_v42 = vld [vmem:[#allocation50] ss:$16 sps:$4 sm:$0xff]   ;;  %v20109_v45 = vld [vmem:[#allocation50 + $0x8] ss:$16 sps:$4 sm:$0xff]  }
0x1735   : > { %13169 = vmatpush1.bf16.msra.mxu1 %v20034_v29  ;;  %13255 = vmatpush1.bf16.msra.mxu0 %v20037_v49  ;;  %v20114_v29 = vld [vmem:[#allocation50 + $0x24] ss:$16 sps:$4 sm:$0xff]   ;;  %v20117_v49 = vld [vmem:[#allocation50 + $0x2c] ss:$16 sps:$4 sm:$0xff]  }
0x1736   : > { %13170 = vmatprep.subr.bf16.mxu1 %v20042_v31  ;;  %13256 = vmatprep.subr.bf16.mxu0 %v20045_v22  ;;  %v20112_v31 = vld [vmem:[#allocation50 + $0x20] ss:$16 sps:$4 sm:$0xff]   ;;  %v20115_v22 = vld [vmem:[#allocation50 + $0x28] ss:$16 sps:$4 sm:$0xff]  }
0x1739   : > { %13171 = vmatpush1.bf16.msra.mxu1 %v20040_v52  ;;  %13257 = vmatpush1.bf16.msra.mxu0 %v20043_v53  ;;  %v20120_v52 = vld [vmem:[#allocation50 + $0x44] ss:$16 sps:$4 sm:$0xff]   ;;  %v20123_v53 = vld [vmem:[#allocation50 + $0x4c] ss:$16 sps:$4 sm:$0xff]  }
0x173a   : > { %13172 = vmatprep.subr.bf16.mxu1 %v20048_v25  ;;  %13258 = vmatprep.subr.bf16.mxu0 %v20051_v54  ;;  %v20118_v25 = vld [vmem:[#allocation50 + $0x40] ss:$16 sps:$4 sm:$0xff]   ;;  %v20121_v54 = vld [vmem:[#allocation50 + $0x48] ss:$16 sps:$4 sm:$0xff]  }
0x173d   : > { %13173 = vmatpush1.bf16.msra.mxu1 %v20046_v17  ;;  %13259 = vmatpush1.bf16.msra.mxu0 %v20049_v57  ;;  %v20126_v17 = vld [vmem:[#allocation50 + $0x64] ss:$16 sps:$4 sm:$0xff]   ;;  %v20124_v57 = vld [vmem:[#allocation50 + $0x60] ss:$16 sps:$4 sm:$0xff]  }
0x173e   : > { %13174 = vmatprep.subr.bf16.mxu1 %v20054_v9  ;;  %13260 = vmatprep.subr.bf16.mxu0 %v20057_v55  ;;  %v20127_v9 = vld [vmem:[#allocation50 + $0x68] ss:$16 sps:$4 sm:$0xff]   ;;  %v20132_v55 = vld [vmem:[#allocation50 + $0x84] ss:$16 sps:$4 sm:$0xff]  }
0x1741   : > { %13175 = vmatpush1.bf16.msra.mxu1 %v20052_v13  ;;  %13261 = vmatpush1.bf16.msra.mxu0 %v20055_v18  ;;  %v20130_v13 = vld [vmem:[#allocation50 + $0x80] ss:$16 sps:$4 sm:$0xff]   ;;  %v20133_v18 = vld [vmem:[#allocation50 + $0x88] ss:$16 sps:$4 sm:$0xff]  }
0x1742   : > { %13176 = vmatprep.subr.bf16.mxu1 %v20060_v56  ;;  %13262 = vmatprep.subr.bf16.mxu0 %v20063_v58  ;;  %v20138_v56 = vld [vmem:[#allocation50 + $0xa4] ss:$16 sps:$4 sm:$0xff]   ;;  %v20141_v58 = vld [vmem:[#allocation50 + $0xac] ss:$16 sps:$4 sm:$0xff]  }
0x1745   : > { %13177 = vmatpush1.bf16.msra.mxu1 %v20058_v62  ;;  %13263 = vmatpush1.bf16.msra.mxu0 %v20061_v63  ;;  %v20136_v62 = vld [vmem:[#allocation50 + $0xa0] ss:$16 sps:$4 sm:$0xff]   ;;  %v20139_v63 = vld [vmem:[#allocation50 + $0xa8] ss:$16 sps:$4 sm:$0xff]  }
0x1746   : > { %13178 = vmatprep.subr.bf16.mxu1 %v20066_v15  ;;  %13264 = vmatprep.subr.bf16.mxu0 %v20069_v2  ;;  %v20144_v15 = vld [vmem:[#allocation50 + $0xc4] ss:$16 sps:$4 sm:$0xff]   ;;  %v20147_v2 = vld [vmem:[#allocation50 + $0xcc] ss:$16 sps:$4 sm:$0xff]  }
0x1749   : > { %13179 = vmatpush1.bf16.msra.mxu1 %v20064_v3  ;;  %13265 = vmatpush1.bf16.msra.mxu0 %v20067_v48  ;;  %v20142_v3 = vld [vmem:[#allocation50 + $0xc0] ss:$16 sps:$4 sm:$0xff]   ;;  %v20145_v48 = vld [vmem:[#allocation50 + $0xc8] ss:$16 sps:$4 sm:$0xff]  }
0x174a   : > { %13180 = vmatprep.subr.bf16.mxu1 %v20072_v7  ;;  %13266 = vmatprep.subr.bf16.mxu0 %v20075_v12  ;;  %v20150_v7 = vld [vmem:[#allocation50 + $0xe4] ss:$16 sps:$4 sm:$0xff]   ;;  %v20153_v12 = vld [vmem:[#allocation50 + $0xec] ss:$16 sps:$4 sm:$0xff]  }
0x174d   : > { %13181 = vmatpush1.bf16.msra.mxu1 %v20070_v14  ;;  %13267 = vmatpush1.bf16.msra.mxu0 %v20073_v40  ;;  %v20148_v14 = vld [vmem:[#allocation50 + $0xe0] ss:$16 sps:$4 sm:$0xff]   ;;  %v20151_v40 = vld [vmem:[#allocation50 + $0xe8] ss:$16 sps:$4 sm:$0xff]  }
0x174e   : > { %13182 = vmatprep.subr.bf16.mxu1 %v20078_v16  ;;  %13268 = vmatprep.subr.bf16.mxu0 %v20081_v19  ;;  %v20156_v16 = vld [vmem:[#allocation50 + $0x104] ss:$16 sps:$4 sm:$0xff]   ;;  %v20159_v19 = vld [vmem:[#allocation50 + $0x10c] ss:$16 sps:$4 sm:$0xff]  }
0x1751   : > { %13183 = vmatpush1.bf16.msra.mxu1 %v20076_v20  ;;  %13269 = vmatpush1.bf16.msra.mxu0 %v20079_v21  ;;  %v20154_v20 = vld [vmem:[#allocation50 + $0x100] ss:$16 sps:$4 sm:$0xff]   ;;  %v20157_v21 = vld [vmem:[#allocation50 + $0x108] ss:$16 sps:$4 sm:$0xff]  }
0x1752   : > { %13184 = vmatprep.subr.bf16.mxu1 %v20084_v23  ;;  %13270 = vmatprep.subr.bf16.mxu0 %v20087_v24  ;;  %v20162_v23 = vld [vmem:[#allocation50 + $0x124] ss:$16 sps:$4 sm:$0xff]   ;;  %v20165_v24 = vld [vmem:[#allocation50 + $0x12c] ss:$16 sps:$4 sm:$0xff]  }
0x1755   : > { %13185 = vmatpush1.bf16.msra.mxu1 %v20082_v32  ;;  %13271 = vmatpush1.bf16.msra.mxu0 %v20085_v46  ;;  %v20160_v32 = vld [vmem:[#allocation50 + $0x120] ss:$16 sps:$4 sm:$0xff]   ;;  %v20163_v46 = vld [vmem:[#allocation50 + $0x128] ss:$16 sps:$4 sm:$0xff]  }
0x1756   : > { %13186 = vmatprep.subr.bf16.mxu1 %v20090_v6  ;;  %13272 = vmatprep.subr.bf16.mxu0 %v20093_v33  ;;  %v20168_v6 = vld [vmem:[#allocation50 + $0x144] ss:$16 sps:$4 sm:$0xff]   ;;  %v20171_v33 = vld [vmem:[#allocation50 + $0x14c] ss:$16 sps:$4 sm:$0xff]  }
0x1759   : > { %13187 = vmatpush1.bf16.msra.mxu1 %v20088_v34  ;;  %13273 = vmatpush1.bf16.msra.mxu0 %v20091_v47  ;;  %v20166_v34 = vld [vmem:[#allocation50 + $0x140] ss:$16 sps:$4 sm:$0xff]   ;;  %v20169_v47 = vld [vmem:[#allocation50 + $0x148] ss:$16 sps:$4 sm:$0xff]  }
0x175a   : > { %13188 = vmatprep.subr.bf16.mxu1 %v20096_v0  ;;  %13274 = vmatprep.subr.bf16.mxu0 %v20099_v5  ;;  %v20174_v0 = vld [vmem:[#allocation50 + $0x164] ss:$16 sps:$4 sm:$0xff]   ;;  %v20177_v5 = vld [vmem:[#allocation50 + $0x16c] ss:$16 sps:$4 sm:$0xff]  }
0x175d   : > { %13189 = vmatpush1.bf16.msra.mxu1 %v20094_v35  ;;  %13275 = vmatpush1.bf16.msra.mxu0 %v20097_v28  ;;  %v20172_v35 = vld [vmem:[#allocation50 + $0x160] ss:$16 sps:$4 sm:$0xff]   ;;  %v20175_v28 = vld [vmem:[#allocation50 + $0x168] ss:$16 sps:$4 sm:$0xff]  }
0x175e   : > { %13190 = vmatprep.subr.bf16.mxu1 %v20102_v36  ;;  %13276 = vmatprep.subr.bf16.mxu0 %v20105_v8  ;;  %v20180_v36 = vld [vmem:[#allocation50 + $0x184] ss:$16 sps:$4 sm:$0xff]   ;;  %v20183_v8 = vld [vmem:[#allocation50 + $0x18c] ss:$16 sps:$4 sm:$0xff]  }
0x1761   : > { %13191 = vmatpush1.bf16.msra.mxu1 %v20100_v37  ;;  %13277 = vmatpush1.bf16.msra.mxu0 %v20103_v38  ;;  %v20178_v37 = vld [vmem:[#allocation50 + $0x180] ss:$16 sps:$4 sm:$0xff]   ;;  %v20181_v38 = vld [vmem:[#allocation50 + $0x188] ss:$16 sps:$4 sm:$0xff]  }
0x1762   : > { %13929 = vmatprep.subr.bf16.mxu1 %v20108_v44  ;;  %14015 = vmatprep.subr.bf16.mxu0 %v20111_v39  ;;  %v20186_v44 = vld [vmem:[#allocation50 + $0x1a4] ss:$16 sps:$4 sm:$0xff]   ;;  %v20189_v39 = vld [vmem:[#allocation50 + $0x1ac] ss:$16 sps:$4 sm:$0xff]  }
0x1764   : > { %13193 = vmatmul.mubr.bf16.vlgmr.msra.gmra.mrb[112].mxu1 %v22933_v26  ;;  %13279 = vmatmul.mubr.bf16.vlgmr.msra.gmra.mrb[120].mxu0 %v22933_v26  ;;  %v20129_v26 = vld [vmem:[#allocation50 + $0x6c] ss:$16 sps:$4 sm:$0xff]  }
0x1765   : > { %13930 = vmatpush1.bf16.msra.mxu1 %v20106_v42  ;;  %13961 = vmatprep.mubr.bf16.mxu1 %v22929_v1  ;;  %v20184_v42 = vld [vmem:[#allocation50 + $0x1a0] ss:$16 sps:$4 sm:$0xff]  }
0x1766   : > { %14016 = vmatpush1.bf16.msra.mxu0 %v20109_v45  ;;  %14047 = vmatprep.mubr.bf16.mxu0 %v22929_v1  ;;  %v20135_v1 = vld [vmem:[#allocation50 + $0x8c] ss:$16 sps:$4 sm:$0xff]   ;;  %v20187_v45 = vld [vmem:[#allocation50 + $0x1a8] ss:$16 sps:$4 sm:$0xff]  }
0x1767   : > { %13931 = vmatprep.subr.bf16.mxu1 %v20114_v29  ;;  %14017 = vmatprep.subr.bf16.mxu0 %v20117_v49  ;;  %v20192_v29 = vld [vmem:[#allocation50 + $0x1c4] ss:$16 sps:$4 sm:$0xff]   ;;  %v20195_v49 = vld [vmem:[#allocation50 + $0x1cc] ss:$16 sps:$4 sm:$0xff]  }
0x1769   : > { %13932 = vmatpush1.bf16.msra.mxu1 %v20112_v31  ;;  %v20190_v31 = vld [vmem:[#allocation50 + $0x1c0] ss:$16 sps:$4 sm:$0xff]  }
0x176a   : > { %14018 = vmatpush1.bf16.msra.mxu0 %v20115_v22  ;;  %13933 = vmatprep.subr.bf16.mxu1 %v20120_v52  ;;  %v20193_v22 = vld [vmem:[#allocation50 + $0x1c8] ss:$16 sps:$4 sm:$0xff]   ;;  %v20198_v52 = vld [vmem:[#allocation50 + $0x1e4] ss:$16 sps:$4 sm:$0xff]  }
0x176b   : > { %14019 = vmatprep.subr.bf16.mxu0 %v20123_v53  ;;  %v20201_v53 = vld [vmem:[#allocation50 + $0x1ec] ss:$16 sps:$4 sm:$0xff]  }
0x176d   : > { %13934 = vmatpush1.bf16.msra.mxu1 %v20118_v25  ;;  %v20196_v25 = vld [vmem:[#allocation50 + $0x1e0] ss:$16 sps:$4 sm:$0xff]  }
0x176e   : > { %14020 = vmatpush1.bf16.msra.mxu0 %v20121_v54  ;;  %13935 = vmatprep.subr.bf16.mxu1 %v20126_v17  ;;  %v20199_v54 = vld [vmem:[#allocation50 + $0x1e8] ss:$16 sps:$4 sm:$0xff]   ;;  %v20204_v17 = vld [vmem:[#allocation50 + $0x204] ss:$16 sps:$4 sm:$0xff]  }
0x176f   : > { %14021 = vmatprep.subr.bf16.mxu0 %v20129_v26  ;;  %v20207_v26 = vld [vmem:[#allocation50 + $0x20c] ss:$16 sps:$4 sm:$0xff]  }
0x1771   : > { %13936 = vmatpush1.bf16.msra.mxu1 %v20124_v57  ;;  %v20202_v57 = vld [vmem:[#allocation50 + $0x200] ss:$16 sps:$4 sm:$0xff]  }
0x1772   : > { %14022 = vmatpush1.bf16.msra.mxu0 %v20127_v9  ;;  %13937 = vmatprep.subr.bf16.mxu1 %v20132_v55  ;;  %v20205_v9 = vld [vmem:[#allocation50 + $0x208] ss:$16 sps:$4 sm:$0xff]   ;;  %v20210_v55 = vld [vmem:[#allocation50 + $0x224] ss:$16 sps:$4 sm:$0xff]  }
0x1773   : > { %14023 = vmatprep.subr.bf16.mxu0 %v20135_v1  ;;  %v20213_v1 = vld [vmem:[#allocation50 + $0x22c] ss:$16 sps:$4 sm:$0xff]  }
0x1775   : > { %13938 = vmatpush1.bf16.msra.mxu1 %v20130_v13  ;;  %v20208_v13 = vld [vmem:[#allocation50 + $0x220] ss:$16 sps:$4 sm:$0xff]  }
0x1776   : > { %14024 = vmatpush1.bf16.msra.mxu0 %v20133_v18  ;;  %13939 = vmatprep.subr.bf16.mxu1 %v20138_v56  ;;  %v20211_v18 = vld [vmem:[#allocation50 + $0x228] ss:$16 sps:$4 sm:$0xff]   ;;  %v20216_v56 = vld [vmem:[#allocation50 + $0x244] ss:$16 sps:$4 sm:$0xff]  }
0x1777   : > { %14025 = vmatprep.subr.bf16.mxu0 %v20141_v58  ;;  %v20219_v58 = vld [vmem:[#allocation50 + $0x24c] ss:$16 sps:$4 sm:$0xff]  }
0x1779   : > { %13940 = vmatpush1.bf16.msra.mxu1 %v20136_v62  ;;  %v20214_v62 = vld [vmem:[#allocation50 + $0x240] ss:$16 sps:$4 sm:$0xff]  }
0x177a   : > { %14026 = vmatpush1.bf16.msra.mxu0 %v20139_v63  ;;  %13941 = vmatprep.subr.bf16.mxu1 %v20144_v15  ;;  %v20217_v63 = vld [vmem:[#allocation50 + $0x248] ss:$16 sps:$4 sm:$0xff]   ;;  %v20222_v15 = vld [vmem:[#allocation50 + $0x264] ss:$16 sps:$4 sm:$0xff]  }
0x177b   : > { %14027 = vmatprep.subr.bf16.mxu0 %v20147_v2  ;;  %v20220_v2 = vld [vmem:[#allocation50 + $0x260] ss:$16 sps:$4 sm:$0xff]  }
0x177d   : > { %13942 = vmatpush1.bf16.msra.mxu1 %v20142_v3  ;;  %v20223_v3 = vld [vmem:[#allocation50 + $0x268] ss:$16 sps:$4 sm:$0xff]  }
0x177e   : > { %14028 = vmatpush1.bf16.msra.mxu0 %v20145_v48  ;;  %13943 = vmatprep.subr.bf16.mxu1 %v20150_v7  ;;  %v20228_v48 = vld [vmem:[#allocation50 + $0x284] ss:$16 sps:$4 sm:$0xff]   ;;  %v20231_v7 = vld [vmem:[#allocation50 + $0x28c] ss:$16 sps:$4 sm:$0xff]  }
0x177f   : > { %14029 = vmatprep.subr.bf16.mxu0 %v20153_v12  ;;  %v20229_v12 = vld [vmem:[#allocation50 + $0x288] ss:$16 sps:$4 sm:$0xff]  }
0x1781   : > { %13944 = vmatpush1.bf16.msra.mxu1 %v20148_v14  ;;  %v20234_v14 = vld [vmem:[#allocation50 + $0x2a4] ss:$16 sps:$4 sm:$0xff]  }
0x1782   : > { %14030 = vmatpush1.bf16.msra.mxu0 %v20151_v40  ;;  %13945 = vmatprep.subr.bf16.mxu1 %v20156_v16  ;;  %v20237_v40 = vld [vmem:[#allocation50 + $0x2ac] ss:$16 sps:$4 sm:$0xff]   ;;  %v20232_v16 = vld [vmem:[#allocation50 + $0x2a0] ss:$16 sps:$4 sm:$0xff]  }
0x1783   : > { %14031 = vmatprep.subr.bf16.mxu0 %v20159_v19  ;;  %v20235_v19 = vld [vmem:[#allocation50 + $0x2a8] ss:$16 sps:$4 sm:$0xff]  }
0x1785   : > { %13946 = vmatpush1.bf16.msra.mxu1 %v20154_v20  ;;  %v20240_v20 = vld [vmem:[#allocation50 + $0x2c4] ss:$16 sps:$4 sm:$0xff]  }
0x1786   : > { %14032 = vmatpush1.bf16.msra.mxu0 %v20157_v21  ;;  %13947 = vmatprep.subr.bf16.mxu1 %v20162_v23  ;;  %v20243_v21 = vld [vmem:[#allocation50 + $0x2cc] ss:$16 sps:$4 sm:$0xff]   ;;  %v20238_v23 = vld [vmem:[#allocation50 + $0x2c0] ss:$16 sps:$4 sm:$0xff]  }
0x1787   : > { %14033 = vmatprep.subr.bf16.mxu0 %v20165_v24  ;;  %v20241_v24 = vld [vmem:[#allocation50 + $0x2c8] ss:$16 sps:$4 sm:$0xff]  }
0x1789   : > { %13948 = vmatpush1.bf16.msra.mxu1 %v20160_v32  ;;  %v20246_v32 = vld [vmem:[#allocation50 + $0x2e4] ss:$16 sps:$4 sm:$0xff]  }
0x178a   : > { %14034 = vmatpush1.bf16.msra.mxu0 %v20163_v46  ;;  %13949 = vmatprep.subr.bf16.mxu1 %v20168_v6  ;;  %v20249_v46 = vld [vmem:[#allocation50 + $0x2ec] ss:$16 sps:$4 sm:$0xff]   ;;  %v20244_v6 = vld [vmem:[#allocation50 + $0x2e0] ss:$16 sps:$4 sm:$0xff]  }
0x178b   : > { %14035 = vmatprep.subr.bf16.mxu0 %v20171_v33  ;;  %v20247_v33 = vld [vmem:[#allocation50 + $0x2e8] ss:$16 sps:$4 sm:$0xff]  }
0x178d   : > { %13950 = vmatpush1.bf16.msra.mxu1 %v20166_v34  ;;  %v20252_v34 = vld [vmem:[#allocation50 + $0x304] ss:$16 sps:$4 sm:$0xff]  }
0x178e   : > { %14036 = vmatpush1.bf16.msra.mxu0 %v20169_v47  ;;  %13951 = vmatprep.subr.bf16.mxu1 %v20174_v0  ;;  %v20255_v47 = vld [vmem:[#allocation50 + $0x30c] ss:$16 sps:$4 sm:$0xff]   ;;  %v20250_v0 = vld [vmem:[#allocation50 + $0x300] ss:$16 sps:$4 sm:$0xff]  }
0x178f   : > { %14037 = vmatprep.subr.bf16.mxu0 %v20177_v5  ;;  %v20253_v5 = vld [vmem:[#allocation50 + $0x308] ss:$16 sps:$4 sm:$0xff]  }
0x1791   : > { %13952 = vmatpush1.bf16.msra.mxu1 %v20172_v35  ;;  %v20258_v35 = vld [vmem:[#allocation50 + $0x324] ss:$16 sps:$4 sm:$0xff]  }
0x1792   : > { %14038 = vmatpush1.bf16.msra.mxu0 %v20175_v28  ;;  %13953 = vmatprep.subr.bf16.mxu1 %v20180_v36  ;;  %v20261_v28 = vld [vmem:[#allocation50 + $0x32c] ss:$16 sps:$4 sm:$0xff]   ;;  %v20256_v36 = vld [vmem:[#allocation50 + $0x320] ss:$16 sps:$4 sm:$0xff]  }
0x1793   : > { %14039 = vmatprep.subr.bf16.mxu0 %v20183_v8  ;;  %v20259_v8 = vld [vmem:[#allocation50 + $0x328] ss:$16 sps:$4 sm:$0xff]  }
0x1795   : > { %13954 = vmatpush1.bf16.msra.mxu1 %v20178_v37  ;;  %v20264_v37 = vld [vmem:[#allocation50 + $0x344] ss:$16 sps:$4 sm:$0xff]  }
0x1796   : > { %14040 = vmatpush1.bf16.msra.mxu0 %v20181_v38  ;;  %13955 = vmatprep.subr.bf16.mxu1 %v20186_v44  ;;  %v20267_v38 = vld [vmem:[#allocation50 + $0x34c] ss:$16 sps:$4 sm:$0xff]   ;;  %v20262_v44 = vld [vmem:[#allocation50 + $0x340] ss:$16 sps:$4 sm:$0xff]  }
0x1797   : > { %14041 = vmatprep.subr.bf16.mxu0 %v20189_v39  ;;  %v20265_v39 = vld [vmem:[#allocation50 + $0x348] ss:$16 sps:$4 sm:$0xff]  }
0x1799   : > { %13956 = vmatpush1.bf16.msra.mxu1 %v20184_v42  ;;  %v20270_v42 = vld [vmem:[#allocation50 + $0x364] ss:$16 sps:$4 sm:$0xff]  }
0x179a   : > { %14042 = vmatpush1.bf16.msra.mxu0 %v20187_v45  ;;  %13957 = vmatprep.subr.bf16.mxu1 %v20192_v29  ;;  %v20273_v45 = vld [vmem:[#allocation50 + $0x36c] ss:$16 sps:$4 sm:$0xff]   ;;  %v20268_v29 = vld [vmem:[#allocation50 + $0x360] ss:$16 sps:$4 sm:$0xff]  }
0x179b   : > { %14043 = vmatprep.subr.bf16.mxu0 %v20195_v49  ;;  %v20271_v49 = vld [vmem:[#allocation50 + $0x368] ss:$16 sps:$4 sm:$0xff]  }
0x179d   : > { %13958 = vmatpush1.bf16.msra.mxu1 %v20190_v31  ;;  %v20276_v31 = vld [vmem:[#allocation50 + $0x384] ss:$16 sps:$4 sm:$0xff]  }
0x179e   : > { %14044 = vmatpush1.bf16.msra.mxu0 %v20193_v22  ;;  %13959 = vmatprep.subr.bf16.mxu1 %v20198_v52  ;;  %v20279_v22 = vld [vmem:[#allocation50 + $0x38c] ss:$16 sps:$4 sm:$0xff]   ;;  %v20274_v52 = vld [vmem:[#allocation50 + $0x380] ss:$16 sps:$4 sm:$0xff]  }
0x179f   : > { %14045 = vmatprep.subr.bf16.mxu0 %v20201_v53  ;;  %v20277_v53 = vld [vmem:[#allocation50 + $0x388] ss:$16 sps:$4 sm:$0xff]  }
0x17a1   : > { %13960 = vmatpush1.bf16.msra.mxu1 %v20196_v25  ;;  %v20282_v25 = vld [vmem:[#allocation50 + $0x3a4] ss:$16 sps:$4 sm:$0xff]  }
0x17a2   : > { %14046 = vmatpush1.bf16.msra.mxu0 %v20199_v54  ;;  %13972 = vmatprep.subr.bf16.mxu1 %v20204_v17  ;;  %v20285_v54 = vld [vmem:[#allocation50 + $0x3ac] ss:$16 sps:$4 sm:$0xff]   ;;  %v20280_v17 = vld [vmem:[#allocation50 + $0x3a0] ss:$16 sps:$4 sm:$0xff]  }
0x17a3   : > { %14058 = vmatprep.subr.bf16.mxu0 %v20207_v26  ;;  %v20283_v26 = vld [vmem:[#allocation50 + $0x3a8] ss:$16 sps:$4 sm:$0xff]  }
0x17a4   : > { %13962 = vmatmul.mubr.bf16.vlgmr.msra.gmra.mrb[112].mxu1 %v22925_v4 }
0x17a5   : > { %14048 = vmatmul.mubr.bf16.vlgmr.msra.gmra.mrb[120].mxu0 %v22925_v4  ;;  %13973 = vmatpush1.bf16.msra.mxu1 %v20202_v57  ;;  %v20225_v4 = vld [vmem:[#allocation50 + $0x26c] ss:$16 sps:$4 sm:$0xff]   ;;  %v20288_v57 = vld [vmem:[#allocation50 + $0x3c4] ss:$16 sps:$4 sm:$0xff]  }
0x17a6   : > { %14004 = vmatprep.mubr.bf16.mxu1 %v22931_v11  ;;  %14059 = vmatpush1.bf16.msra.mxu0 %v20205_v9  ;;  %v20291_v9 = vld [vmem:[#allocation50 + $0x3cc] ss:$16 sps:$4 sm:$0xff]  }
0x17a7   : > { %14090 = vmatprep.mubr.bf16.mxu0 %v22931_v11  ;;  %13974 = vmatprep.subr.bf16.mxu1 %v20210_v55  ;;  %v20226_v11 = vld [vmem:[#allocation50 + $0x280] ss:$16 sps:$4 sm:$0xff]  }
0x17a8   : > { %14060 = vmatprep.subr.bf16.mxu0 %v20213_v1  ;;  %v20286_v55 = vld [vmem:[#allocation50 + $0x3c0] ss:$16 sps:$4 sm:$0xff]   ;;  %v20289_v1 = vld [vmem:[#allocation50 + $0x3c8] ss:$16 sps:$4 sm:$0xff]  }
0x17a9   : > { %13975 = vmatpush1.bf16.msra.mxu1 %v20208_v13  ;;  %v20294_v13 = vld [vmem:[#allocation50 + $0x3e4] ss:$16 sps:$4 sm:$0xff]  }
0x17aa   : > { %14061 = vmatpush1.bf16.msra.mxu0 %v20211_v18  ;;  %13976 = vmatprep.subr.bf16.mxu1 %v20216_v56  ;;  %v20297_v18 = vld [vmem:[#allocation50 + $0x3ec] ss:$16 sps:$4 sm:$0xff]   ;;  %v20292_v56 = vld [vmem:[#allocation50 + $0x3e0] ss:$16 sps:$4 sm:$0xff]  }
0x17ab   : > { %14062 = vmatprep.subr.bf16.mxu0 %v20219_v58  ;;  %v20295_v58 = vld [vmem:[#allocation50 + $0x3e8] ss:$16 sps:$4 sm:$0xff]  }
0x17ad   : > { %13977 = vmatpush1.bf16.msra.mxu1 %v20214_v62  ;;  %v20301_v62 = vld [vmem:[#allocation53 + $0x4] ss:$16 sps:$4 sm:$0xff]  }
0x17ae   : > { %14063 = vmatpush1.bf16.msra.mxu0 %v20217_v63  ;;  %13978 = vmatprep.subr.bf16.mxu1 %v20222_v15  ;;  %v20304_v63 = vld [vmem:[#allocation53 + $0xc] ss:$16 sps:$4 sm:$0xff]   ;;  %v20298_v15 = vld [vmem:[%s23253_s11] sm:$0xff]  }
0x17af   : > { %14064 = vmatprep.subr.bf16.mxu0 %v20225_v4  ;;  %v20302_v4 = vld [vmem:[#allocation53 + $0x8] ss:$16 sps:$4 sm:$0xff]  }
0x17b1   : > { %13979 = vmatpush1.bf16.msra.mxu1 %v20220_v2  ;;  %v20310_v2 = vld [vmem:[#allocation53 + $0x2c] ss:$16 sps:$4 sm:$0xff]  }
0x17b2   : > { %14065 = vmatpush1.bf16.msra.mxu0 %v20223_v3  ;;  %13980 = vmatprep.subr.bf16.mxu1 %v20228_v48  ;;  %v20316_v3 = vld [vmem:[#allocation53 + $0x4c] ss:$16 sps:$4 sm:$0xff]   ;;  %v20314_v48 = vld [vmem:[#allocation53 + $0x48] ss:$16 sps:$4 sm:$0xff]  }
0x17b3   : > { %14066 = vmatprep.subr.bf16.mxu0 %v20231_v7  ;;  %v20319_v7 = vld [vmem:[#allocation53 + $0x64] ss:$16 sps:$4 sm:$0xff]  }
0x17b5   : > { %13981 = vmatpush1.bf16.msra.mxu1 %v20226_v11  ;;  %v20322_v11 = vld [vmem:[#allocation53 + $0x6c] ss:$16 sps:$4 sm:$0xff]  }
0x17b6   : > { %14067 = vmatpush1.bf16.msra.mxu0 %v20229_v12  ;;  %13982 = vmatprep.subr.bf16.mxu1 %v20234_v14  ;;  %v20317_v12 = vld [vmem:[#allocation53 + $0x60] ss:$16 sps:$4 sm:$0xff]   ;;  %v20320_v14 = vld [vmem:[#allocation53 + $0x68] ss:$16 sps:$4 sm:$0xff]  }
0x17b7   : > { %14068 = vmatprep.subr.bf16.mxu0 %v20237_v40  ;;  %v20325_v40 = vld [vmem:[#allocation53 + $0x84] ss:$16 sps:$4 sm:$0xff]  }
0x17b9   : > { %13983 = vmatpush1.bf16.msra.mxu1 %v20232_v16  ;;  %v20328_v16 = vld [vmem:[#allocation53 + $0x8c] ss:$16 sps:$4 sm:$0xff]  }
0x17ba   : > { %14069 = vmatpush1.bf16.msra.mxu0 %v20235_v19  ;;  %13984 = vmatprep.subr.bf16.mxu1 %v20240_v20  ;;  %v20323_v19 = vld [vmem:[#allocation53 + $0x80] ss:$16 sps:$4 sm:$0xff]   ;;  %v20326_v20 = vld [vmem:[#allocation53 + $0x88] ss:$16 sps:$4 sm:$0xff]  }
0x17bb   : > { %14070 = vmatprep.subr.bf16.mxu0 %v20243_v21  ;;  %v20331_v21 = vld [vmem:[#allocation53 + $0xa4] ss:$16 sps:$4 sm:$0xff]  }
0x17bd   : > { %13985 = vmatpush1.bf16.msra.mxu1 %v20238_v23  ;;  %v20334_v23 = vld [vmem:[#allocation53 + $0xac] ss:$16 sps:$4 sm:$0xff]  }
0x17be   : > { %14071 = vmatpush1.bf16.msra.mxu0 %v20241_v24  ;;  %13986 = vmatprep.subr.bf16.mxu1 %v20246_v32  ;;  %v20329_v24 = vld [vmem:[#allocation53 + $0xa0] ss:$16 sps:$4 sm:$0xff]   ;;  %v20332_v32 = vld [vmem:[#allocation53 + $0xa8] ss:$16 sps:$4 sm:$0xff]  }
0x17bf   : > { %14072 = vmatprep.subr.bf16.mxu0 %v20249_v46  ;;  %v20337_v46 = vld [vmem:[#allocation53 + $0xc4] ss:$16 sps:$4 sm:$0xff]  }
0x17c1   : > { %13987 = vmatpush1.bf16.msra.mxu1 %v20244_v6  ;;  %v20340_v6 = vld [vmem:[#allocation53 + $0xcc] ss:$16 sps:$4 sm:$0xff]  }
0x17c2   : > { %14073 = vmatpush1.bf16.msra.mxu0 %v20247_v33  ;;  %13988 = vmatprep.subr.bf16.mxu1 %v20252_v34  ;;  %v20335_v33 = vld [vmem:[#allocation53 + $0xc0] ss:$16 sps:$4 sm:$0xff]   ;;  %v20338_v34 = vld [vmem:[#allocation53 + $0xc8] ss:$16 sps:$4 sm:$0xff]  }
0x17c3   : > { %14074 = vmatprep.subr.bf16.mxu0 %v20255_v47  ;;  %v20343_v47 = vld [vmem:[#allocation53 + $0xe4] ss:$16 sps:$4 sm:$0xff]  }
0x17c5   : > { %13989 = vmatpush1.bf16.msra.mxu1 %v20250_v0  ;;  %v20346_v0 = vld [vmem:[#allocation53 + $0xec] ss:$16 sps:$4 sm:$0xff]  }
0x17c6   : > { %14075 = vmatpush1.bf16.msra.mxu0 %v20253_v5  ;;  %13990 = vmatprep.subr.bf16.mxu1 %v20258_v35  ;;  %v20341_v5 = vld [vmem:[#allocation53 + $0xe0] ss:$16 sps:$4 sm:$0xff]   ;;  %v20344_v35 = vld [vmem:[#allocation53 + $0xe8] ss:$16 sps:$4 sm:$0xff]  }
0x17c7   : > { %14076 = vmatprep.subr.bf16.mxu0 %v20261_v28  ;;  %v20349_v28 = vld [vmem:[#allocation53 + $0x104] ss:$16 sps:$4 sm:$0xff]  }
0x17c9   : > { %13991 = vmatpush1.bf16.msra.mxu1 %v20256_v36  ;;  %v20352_v36 = vld [vmem:[#allocation53 + $0x10c] ss:$16 sps:$4 sm:$0xff]  }
0x17ca   : > { %14077 = vmatpush1.bf16.msra.mxu0 %v20259_v8  ;;  %13992 = vmatprep.subr.bf16.mxu1 %v20264_v37  ;;  %v20347_v8 = vld [vmem:[#allocation53 + $0x100] ss:$16 sps:$4 sm:$0xff]   ;;  %v20350_v37 = vld [vmem:[#allocation53 + $0x108] ss:$16 sps:$4 sm:$0xff]  }
0x17cb   : > { %14078 = vmatprep.subr.bf16.mxu0 %v20267_v38  ;;  %v20355_v38 = vld [vmem:[#allocation53 + $0x124] ss:$16 sps:$4 sm:$0xff]  }
0x17cd   : > { %13993 = vmatpush1.bf16.msra.mxu1 %v20262_v44  ;;  %v20358_v44 = vld [vmem:[#allocation53 + $0x12c] ss:$16 sps:$4 sm:$0xff]  }
0x17ce   : > { %14079 = vmatpush1.bf16.msra.mxu0 %v20265_v39  ;;  %13994 = vmatprep.subr.bf16.mxu1 %v20270_v42  ;;  %v20353_v39 = vld [vmem:[#allocation53 + $0x120] ss:$16 sps:$4 sm:$0xff]   ;;  %v20356_v42 = vld [vmem:[#allocation53 + $0x128] ss:$16 sps:$4 sm:$0xff]  }
0x17cf   : > { %14080 = vmatprep.subr.bf16.mxu0 %v20273_v45  ;;  %v20361_v45 = vld [vmem:[#allocation53 + $0x144] ss:$16 sps:$4 sm:$0xff]  }
0x17d1   : > { %13995 = vmatpush1.bf16.msra.mxu1 %v20268_v29  ;;  %v20364_v29 = vld [vmem:[#allocation53 + $0x14c] ss:$16 sps:$4 sm:$0xff]  }
0x17d2   : > { %14081 = vmatpush1.bf16.msra.mxu0 %v20271_v49  ;;  %13996 = vmatprep.subr.bf16.mxu1 %v20276_v31  ;;  %v20359_v49 = vld [vmem:[#allocation53 + $0x140] ss:$16 sps:$4 sm:$0xff]   ;;  %v20362_v31 = vld [vmem:[#allocation53 + $0x148] ss:$16 sps:$4 sm:$0xff]  }
0x17d3   : > { %14082 = vmatprep.subr.bf16.mxu0 %v20279_v22  ;;  %v20367_v22 = vld [vmem:[#allocation53 + $0x164] ss:$16 sps:$4 sm:$0xff]  }
0x17d5   : > { %13997 = vmatpush1.bf16.msra.mxu1 %v20274_v52  ;;  %v20370_v52 = vld [vmem:[#allocation53 + $0x16c] ss:$16 sps:$4 sm:$0xff]  }
0x17d6   : > { %14083 = vmatpush1.bf16.msra.mxu0 %v20277_v53  ;;  %13998 = vmatprep.subr.bf16.mxu1 %v20282_v25  ;;  %v20365_v53 = vld [vmem:[#allocation53 + $0x160] ss:$16 sps:$4 sm:$0xff]   ;;  %v20368_v25 = vld [vmem:[#allocation53 + $0x168] ss:$16 sps:$4 sm:$0xff]  }
0x17d7   : > { %14084 = vmatprep.subr.bf16.mxu0 %v20285_v54  ;;  %v20373_v54 = vld [vmem:[#allocation53 + $0x184] ss:$16 sps:$4 sm:$0xff]  }
0x17d9   : > { %13999 = vmatpush1.bf16.msra.mxu1 %v20280_v17  ;;  %v20376_v17 = vld [vmem:[#allocation53 + $0x18c] ss:$16 sps:$4 sm:$0xff]  }
0x17da   : > { %14085 = vmatpush1.bf16.msra.mxu0 %v20283_v26  ;;  %14000 = vmatprep.subr.bf16.mxu1 %v20288_v57  ;;  %v20371_v26 = vld [vmem:[#allocation53 + $0x180] ss:$16 sps:$4 sm:$0xff]   ;;  %v20374_v57 = vld [vmem:[#allocation53 + $0x188] ss:$16 sps:$4 sm:$0xff]  }
0x17db   : > { %14086 = vmatprep.subr.bf16.mxu0 %v20291_v9  ;;  %v20379_v9 = vld [vmem:[#allocation53 + $0x1a4] ss:$16 sps:$4 sm:$0xff]  }
0x17dd   : > { %14001 = vmatpush1.bf16.msra.mxu1 %v20286_v55  ;;  %v20382_v55 = vld [vmem:[#allocation53 + $0x1ac] ss:$16 sps:$4 sm:$0xff]  }
0x17de   : > { %14087 = vmatpush1.bf16.msra.mxu0 %v20289_v1  ;;  %14002 = vmatprep.subr.bf16.mxu1 %v20294_v13  ;;  %v20377_v1 = vld [vmem:[#allocation53 + $0x1a0] ss:$16 sps:$4 sm:$0xff]   ;;  %v20380_v13 = vld [vmem:[#allocation53 + $0x1a8] ss:$16 sps:$4 sm:$0xff]  }
0x17df   : > { %14088 = vmatprep.subr.bf16.mxu0 %v20297_v18  ;;  %v20385_v18 = vld [vmem:[#allocation53 + $0x1c4] ss:$16 sps:$4 sm:$0xff]  }
0x17e1   : > { %14003 = vmatpush1.bf16.msra.mxu1 %v20292_v56  ;;  %v20388_v56 = vld [vmem:[#allocation53 + $0x1cc] ss:$16 sps:$4 sm:$0xff]  }
0x17e2   : > { %14089 = vmatpush1.bf16.msra.mxu0 %v20295_v58  ;;  %14111 = vmatprep.subr.bf16.mxu1 %v22905_v60  ;;  %v20299_v60 = vld [vmem:[#allocation53] ss:$16 sps:$4 sm:$0xff]  }
0x17e3   : > { %14154 = vmatprep.subr.bf16.mxu0 %v22907_v51  ;;  %v20307_v51 = vld [vmem:[#allocation53 + $0x24] ss:$16 sps:$4 sm:$0xff]   ;;  %v20383_v58 = vld [vmem:[#allocation53 + $0x1c0] ss:$16 sps:$4 sm:$0xff]  }
0x17e4   : > { %14005 = vmatmul.mubr.bf16.vlgmr.msra.gmra.mrb[112].mxu1 %v22927_v30 }
0x17e5   : > { %14091 = vmatmul.mubr.bf16.vlgmr.msra.gmra.mrb[120].mxu0 %v22927_v30  ;;  %14112 = vmatpush1.bf16.msra.mxu1 %v22901_v27  ;;  %v20305_v30 = vld [vmem:[#allocation53 + $0x20] ss:$16 sps:$4 sm:$0xff]   ;;  %v20308_v27 = vld [vmem:[#allocation53 + $0x28] ss:$16 sps:$4 sm:$0xff]  }
0x17e6   : > { %14155 = vmatpush1.bf16.msra.mxu0 %v22903_v50  ;;  %14143 = vmatprep.mubr.bf16.mxu1 %v21659_v10  ;;  %v20313_v50 = vld [vmem:[#allocation53 + $0x44] ss:$16 sps:$4 sm:$0xff]  }
0x17e7   : > { %14186 = vmatprep.mubr.bf16.mxu0 %v21659_v10  ;;  %14969 = vmatprep.subr.bf16.mxu1 %v20301_v62  ;;  %v20311_v10 = vld [vmem:[#allocation53 + $0x40] ss:$16 sps:$4 sm:$0xff]   ;;  %v20386_v62 = vld [vmem:[#allocation53 + $0x1c8] ss:$16 sps:$4 sm:$0xff]  }
0x17e8   : > { %15055 = vmatprep.subr.bf16.mxu0 %v20304_v63  ;;  %v20391_v63 = vld [vmem:[#allocation53 + $0x1e4] ss:$16 sps:$4 sm:$0xff]  }
0x17ec   : > { %17516 = vmatmul.mubr.msk.bf16.vlgmr.msra.gmra.mrb[116].mxu1 %vm2081_vm1, %v20298_v15 }
0x17ed   : > { %17517 = vmatmul.mubr.msk.bf16.vlgmr.msra.gmra.mrb[124].mxu0 %vm2081_vm1, %v20298_v15  ;;  %14970 = vmatpush1.bf16.msra.mxu1 %v20299_v60  ;;  %v20394_v15 = vld [vmem:[#allocation53 + $0x1ec] ss:$16 sps:$4 sm:$0xff]   ;;  %v20389_v60 = vld [vmem:[#allocation53 + $0x1e0] ss:$16 sps:$4 sm:$0xff]  }
0x17ee   : > { %15056 = vmatpush1.bf16.msra.mxu0 %v20302_v4  ;;  %14971 = vmatprep.subr.bf16.mxu1 %v20307_v51  ;;  %v20392_v4 = vld [vmem:[#allocation53 + $0x1e8] ss:$16 sps:$4 sm:$0xff]   ;;  %v20397_v51 = vld [vmem:[#allocation53 + $0x204] ss:$16 sps:$4 sm:$0xff]  }
0x17ef   : > { %15057 = vmatprep.subr.bf16.mxu0 %v20310_v2  ;;  %v20400_v2 = vld [vmem:[#allocation53 + $0x20c] ss:$16 sps:$4 sm:$0xff]  }
0x17f1   : > { %14972 = vmatpush1.bf16.msra.mxu1 %v20305_v30 }
0x17f2   : > { %15058 = vmatpush1.bf16.msra.mxu0 %v20308_v27  ;;  %14973 = vmatprep.subr.bf16.mxu1 %v20313_v50 }
0x17f3   : > { %15059 = vmatprep.subr.bf16.mxu0 %v20316_v3 }
0x17f5   : > { %14974 = vmatpush1.bf16.msra.mxu1 %v20311_v10 }
0x17f6   : > { %15060 = vmatpush1.bf16.msra.mxu0 %v20314_v48  ;;  %14975 = vmatprep.subr.bf16.mxu1 %v20319_v7 }
0x17f7   : > { %15061 = vmatprep.subr.bf16.mxu0 %v20322_v11 }
0x17f9   : > { %14976 = vmatpush1.bf16.msra.mxu1 %v20317_v12 }
0x17fa   : > { %15062 = vmatpush1.bf16.msra.mxu0 %v20320_v14  ;;  %14977 = vmatprep.subr.bf16.mxu1 %v20325_v40  ;;  %v20395_v14 = vld [vmem:[#allocation53 + $0x200] ss:$16 sps:$4 sm:$0xff]   ;;  %v20398_v40 = vld [vmem:[#allocation53 + $0x208] ss:$16 sps:$4 sm:$0xff]  }
0x17fb   : > { %15063 = vmatprep.subr.bf16.mxu0 %v20328_v16 }
0x17fd   : > { %14978 = vmatpush1.bf16.msra.mxu1 %v20323_v19 }
0x17fe   : > { %15064 = vmatpush1.bf16.msra.mxu0 %v20326_v20  ;;  %14979 = vmatprep.subr.bf16.mxu1 %v20331_v21  ;;  %v20403_v20 = vld [vmem:[#allocation53 + $0x224] ss:$16 sps:$4 sm:$0xff]   ;;  %v20406_v21 = vld [vmem:[#allocation53 + $0x22c] ss:$16 sps:$4 sm:$0xff]  }
0x17ff   : > { %15065 = vmatprep.subr.bf16.mxu0 %v20334_v23 }
0x1801   : > { %14980 = vmatpush1.bf16.msra.mxu1 %v20329_v24  ;;  %v20401_v24 = vld [vmem:[#allocation53 + $0x220] ss:$16 sps:$4 sm:$0xff]  }
0x1802   : > { %15066 = vmatpush1.bf16.msra.mxu0 %v20332_v32  ;;  %14981 = vmatprep.subr.bf16.mxu1 %v20337_v46  ;;  %v20404_v32 = vld [vmem:[#allocation53 + $0x228] ss:$16 sps:$4 sm:$0xff]   ;;  %v20409_v46 = vld [vmem:[#allocation53 + $0x244] ss:$16 sps:$4 sm:$0xff]  }
0x1803   : > { %15067 = vmatprep.subr.bf16.mxu0 %v20340_v6  ;;  %v20412_v6 = vld [vmem:[#allocation53 + $0x24c] ss:$16 sps:$4 sm:$0xff]  }
0x1805   : > { %14982 = vmatpush1.bf16.msra.mxu1 %v20335_v33  ;;  %v20407_v33 = vld [vmem:[#allocation53 + $0x240] ss:$16 sps:$4 sm:$0xff]  }
0x1806   : > { %15068 = vmatpush1.bf16.msra.mxu0 %v20338_v34  ;;  %14983 = vmatprep.subr.bf16.mxu1 %v20343_v47  ;;  %v20410_v34 = vld [vmem:[#allocation53 + $0x248] ss:$16 sps:$4 sm:$0xff]   ;;  %v20415_v47 = vld [vmem:[#allocation53 + $0x264] ss:$16 sps:$4 sm:$0xff]  }
0x1807   : > { %15069 = vmatprep.subr.bf16.mxu0 %v20346_v0  ;;  %v20418_v0 = vld [vmem:[#allocation53 + $0x26c] ss:$16 sps:$4 sm:$0xff]  }
0x1809   : > { %14984 = vmatpush1.bf16.msra.mxu1 %v20341_v5  ;;  %v20413_v5 = vld [vmem:[#allocation53 + $0x260] ss:$16 sps:$4 sm:$0xff]  }
0x180a   : > { %15070 = vmatpush1.bf16.msra.mxu0 %v20344_v35  ;;  %14985 = vmatprep.subr.bf16.mxu1 %v20349_v28  ;;  %v20416_v35 = vld [vmem:[#allocation53 + $0x268] ss:$16 sps:$4 sm:$0xff]   ;;  %v20421_v28 = vld [vmem:[#allocation53 + $0x284] ss:$16 sps:$4 sm:$0xff]  }
0x180b   : > { %15071 = vmatprep.subr.bf16.mxu0 %v20352_v36  ;;  %v20424_v36 = vld [vmem:[#allocation53 + $0x28c] ss:$16 sps:$4 sm:$0xff]  }
0x180d   : > { %14986 = vmatpush1.bf16.msra.mxu1 %v20347_v8  ;;  %v20419_v8 = vld [vmem:[#allocation53 + $0x280] ss:$16 sps:$4 sm:$0xff]  }
0x180e   : > { %15072 = vmatpush1.bf16.msra.mxu0 %v20350_v37  ;;  %14987 = vmatprep.subr.bf16.mxu1 %v20355_v38  ;;  %v20422_v37 = vld [vmem:[#allocation53 + $0x288] ss:$16 sps:$4 sm:$0xff]   ;;  %v20427_v38 = vld [vmem:[#allocation53 + $0x2a4] ss:$16 sps:$4 sm:$0xff]  }
0x180f   : > { %15073 = vmatprep.subr.bf16.mxu0 %v20358_v44  ;;  %v20430_v44 = vld [vmem:[#allocation53 + $0x2ac] ss:$16 sps:$4 sm:$0xff]  }
0x1811   : > { %14988 = vmatpush1.bf16.msra.mxu1 %v20353_v39  ;;  %v20425_v39 = vld [vmem:[#allocation53 + $0x2a0] ss:$16 sps:$4 sm:$0xff]  }
0x1812   : > { %15074 = vmatpush1.bf16.msra.mxu0 %v20356_v42  ;;  %14989 = vmatprep.subr.bf16.mxu1 %v20361_v45  ;;  %v20428_v42 = vld [vmem:[#allocation53 + $0x2a8] ss:$16 sps:$4 sm:$0xff]   ;;  %v20433_v45 = vld [vmem:[#allocation53 + $0x2c4] ss:$16 sps:$4 sm:$0xff]  }
0x1813   : > { %15075 = vmatprep.subr.bf16.mxu0 %v20364_v29  ;;  %v20436_v29 = vld [vmem:[#allocation53 + $0x2cc] ss:$16 sps:$4 sm:$0xff]  }
0x1815   : > { %14990 = vmatpush1.bf16.msra.mxu1 %v20359_v49  ;;  %v20431_v49 = vld [vmem:[#allocation53 + $0x2c0] ss:$16 sps:$4 sm:$0xff]  }
0x1816   : > { %15076 = vmatpush1.bf16.msra.mxu0 %v20362_v31  ;;  %14991 = vmatprep.subr.bf16.mxu1 %v20367_v22  ;;  %v20434_v31 = vld [vmem:[#allocation53 + $0x2c8] ss:$16 sps:$4 sm:$0xff]   ;;  %v20439_v22 = vld [vmem:[#allocation53 + $0x2e4] ss:$16 sps:$4 sm:$0xff]  }
0x1817   : > { %15077 = vmatprep.subr.bf16.mxu0 %v20370_v52  ;;  %v20442_v52 = vld [vmem:[#allocation53 + $0x2ec] ss:$16 sps:$4 sm:$0xff]  }
0x1819   : > { %14992 = vmatpush1.bf16.msra.mxu1 %v20365_v53  ;;  %v20437_v53 = vld [vmem:[#allocation53 + $0x2e0] ss:$16 sps:$4 sm:$0xff]  }
0x181a   : > { %15078 = vmatpush1.bf16.msra.mxu0 %v20368_v25  ;;  %14993 = vmatprep.subr.bf16.mxu1 %v20373_v54  ;;  %v20440_v25 = vld [vmem:[#allocation53 + $0x2e8] ss:$16 sps:$4 sm:$0xff]   ;;  %v20445_v54 = vld [vmem:[#allocation53 + $0x304] ss:$16 sps:$4 sm:$0xff]  }
0x181b   : > { %15079 = vmatprep.subr.bf16.mxu0 %v20376_v17  ;;  %v20448_v17 = vld [vmem:[#allocation53 + $0x30c] ss:$16 sps:$4 sm:$0xff]  }
0x181d   : > { %14994 = vmatpush1.bf16.msra.mxu1 %v20371_v26  ;;  %v20443_v26 = vld [vmem:[#allocation53 + $0x300] ss:$16 sps:$4 sm:$0xff]  }
0x181e   : > { %15080 = vmatpush1.bf16.msra.mxu0 %v20374_v57  ;;  %14995 = vmatprep.subr.bf16.mxu1 %v20379_v9  ;;  %v20446_v57 = vld [vmem:[#allocation53 + $0x308] ss:$16 sps:$4 sm:$0xff]   ;;  %v20451_v9 = vld [vmem:[#allocation53 + $0x324] ss:$16 sps:$4 sm:$0xff]  }
0x181f   : > { %15081 = vmatprep.subr.bf16.mxu0 %v20382_v55  ;;  %v20454_v55 = vld [vmem:[#allocation53 + $0x32c] ss:$16 sps:$4 sm:$0xff]  }
0x1821   : > { %14996 = vmatpush1.bf16.msra.mxu1 %v20377_v1  ;;  %v20449_v1 = vld [vmem:[#allocation53 + $0x320] ss:$16 sps:$4 sm:$0xff]  }
0x1822   : > { %15082 = vmatpush1.bf16.msra.mxu0 %v20380_v13  ;;  %14997 = vmatprep.subr.bf16.mxu1 %v20385_v18  ;;  %v20452_v13 = vld [vmem:[#allocation53 + $0x328] ss:$16 sps:$4 sm:$0xff]   ;;  %v20457_v18 = vld [vmem:[#allocation53 + $0x344] ss:$16 sps:$4 sm:$0xff]  }
0x1823   : > { %15083 = vmatprep.subr.bf16.mxu0 %v20388_v56  ;;  %v20460_v56 = vld [vmem:[#allocation53 + $0x34c] ss:$16 sps:$4 sm:$0xff]  }
0x1825   : > { %14998 = vmatpush1.bf16.msra.mxu1 %v20383_v58  ;;  %v20455_v58 = vld [vmem:[#allocation53 + $0x340] ss:$16 sps:$4 sm:$0xff]  }
0x1826   : > { %15084 = vmatpush1.bf16.msra.mxu0 %v20386_v62  ;;  %14999 = vmatprep.subr.bf16.mxu1 %v20391_v63  ;;  %v20458_v62 = vld [vmem:[#allocation53 + $0x348] ss:$16 sps:$4 sm:$0xff]   ;;  %v20463_v63 = vld [vmem:[#allocation53 + $0x364] ss:$16 sps:$4 sm:$0xff]  }
0x1827   : > { %15085 = vmatprep.subr.bf16.mxu0 %v20394_v15  ;;  %v20466_v15 = vld [vmem:[#allocation53 + $0x36c] ss:$16 sps:$4 sm:$0xff]  }
0x1829   : > { %15000 = vmatpush1.bf16.msra.mxu1 %v20389_v60  ;;  %v20461_v60 = vld [vmem:[#allocation53 + $0x360] ss:$16 sps:$4 sm:$0xff]  }
0x182a   : > { %15086 = vmatpush1.bf16.msra.mxu0 %v20392_v4  ;;  %15012 = vmatprep.subr.bf16.mxu1 %v20397_v51  ;;  %v20464_v4 = vld [vmem:[#allocation53 + $0x368] ss:$16 sps:$4 sm:$0xff]   ;;  %v20469_v51 = vld [vmem:[#allocation53 + $0x384] ss:$16 sps:$4 sm:$0xff]  }
0x182b   : > { %15098 = vmatprep.subr.bf16.mxu0 %v20400_v2  ;;  %v20472_v2 = vld [vmem:[#allocation53 + $0x38c] ss:$16 sps:$4 sm:$0xff]  }
0x18bf   : > { %v14145_v30 = vpop.f32.mrb[116].mxu1 }
0x18c0   : > { %v14147_v27 = vpop.f32.mrb[117].mxu1  ;;  %v14188_v50 = vpop.f32.mrb[124].mxu0 }
0x18c1   : > { %v14149_v3 = vpop.f32.mrb[118].mxu1  ;;  %v14190_v10 = vpop.f32.mrb[125].mxu0 }
0x18c2   : > { %v14197_v48 = vpack.c.bf16 %v14149_v3, %v14145_v30  ;;  %v14151_v7 = vpop.f32.mrb[119].mxu1  ;;  %v14192_v11 = vpop.f32.mrb[126].mxu0  ;;  %v20467_v30 = vld [vmem:[#allocation53 + $0x380] ss:$16 sps:$4 sm:$0xff]   ;;  %v20478_v3 = vld [vmem:[#allocation53 + $0x3ac] ss:$16 sps:$4 sm:$0xff]  }
0x18c3   : > { %v14198_v12 = vpack.c.bf16 %v14151_v7, %v14147_v27  ;;  %v22954_v16 = vpack.c.bf16 %v14192_v11, %v14188_v50  ;;  %v14194_v19 = vpop.f32.mrb[127].mxu0  ;;  %v20470_v27 = vld [vmem:[#allocation53 + $0x388] ss:$16 sps:$4 sm:$0xff]   ;;  %v20475_v50 = vld [vmem:[#allocation53 + $0x3a4] ss:$16 sps:$4 sm:$0xff]  }
0x18c4   : > { %v14200_v23 = vpack.c.bf16 %v14194_v19, %v14190_v10  ;;  %v20473_v10 = vld [vmem:[#allocation53 + $0x3a0] ss:$16 sps:$4 sm:$0xff]   ;;  %v20481_v7 = vld [vmem:[#allocation53 + $0x3c4] ss:$16 sps:$4 sm:$0xff]   ;;  %v20484_v11 = vld [vmem:[#allocation53 + $0x3cc] ss:$16 sps:$4 sm:$0xff]  }
0x18c5   : > { %15001 = vmatprep.mubr.bf16.mxu1 %v14198_v12  ;;  %15087 = vmatprep.mubr.bf16.mxu0 %v14198_v12  ;;  %v20479_v12 = vld [vmem:[#allocation53 + $0x3c0] ss:$16 sps:$4 sm:$0xff]   ;;  %v20490_v19 = vld [vmem:[#allocation53 + $0x3ec] ss:$16 sps:$4 sm:$0xff]  }
0x18c6   : > { %15002 = vmatmul.mubr.bf16.vlgmr.msra.gmra.mrb[112].mxu1 %v14197_v48  ;;  %15088 = vmatmul.mubr.bf16.vlgmr.msra.gmra.mrb[120].mxu0 %v14197_v48  ;;  %v20476_v48 = vld [vmem:[#allocation53 + $0x3a8] ss:$16 sps:$4 sm:$0xff]  }
0x18c7   : > { %15013 = vmatpush1.bf16.msra.mxu1 %v20395_v14  ;;  %15099 = vmatpush1.bf16.msra.mxu0 %v20398_v40  ;;  %v20482_v14 = vld [vmem:[#allocation53 + $0x3c8] ss:$16 sps:$4 sm:$0xff]   ;;  %v20487_v40 = vld [vmem:[#allocation53 + $0x3e4] ss:$16 sps:$4 sm:$0xff]  }
0x18c8   : > { %15014 = vmatprep.subr.bf16.mxu1 %v20403_v20  ;;  %15100 = vmatprep.subr.bf16.mxu0 %v20406_v21  ;;  %v20485_v20 = vld [vmem:[#allocation53 + $0x3e0] ss:$16 sps:$4 sm:$0xff]   ;;  %v20488_v21 = vld [vmem:[#allocation53 + $0x3e8] ss:$16 sps:$4 sm:$0xff]  }
0x18c9   : > { %15044 = vmatprep.mubr.bf16.mxu1 %v14200_v23  ;;  %15130 = vmatprep.mubr.bf16.mxu0 %v14200_v23  ;;  %v20491_v23 = vld [vmem:[%s21931_s13 + $0x40] sm:$0xff]  }
0x18cb   : > { %15015 = vmatpush1.bf16.msra.mxu1 %v20401_v24  ;;  %15101 = vmatpush1.bf16.msra.mxu0 %v20404_v32  ;;  %v20492_v24 = vld [vmem:[%s21931_s13 + $0xc0] sm:$0xff]  }
0x18cc   : > { %15016 = vmatprep.subr.bf16.mxu1 %v20409_v46  ;;  %15102 = vmatprep.subr.bf16.mxu0 %v20412_v6  ;;  %v20493_v32 = vld [vmem:[%s21931_s13] sm:$0xff]   ;;  %v20495_v6 = vld [vmem:[%s21931_s13 + $0x48] sm:$0xff]  }
0x18cd   : > { %v20494_v46 = vld [vmem:[%s21931_s13 + $0x80] sm:$0xff]  }
0x18cf   : > { %15017 = vmatpush1.bf16.msra.mxu1 %v20407_v33  ;;  %15103 = vmatpush1.bf16.msra.mxu0 %v20410_v34  ;;  %v20496_v33 = vld [vmem:[%s21931_s13 + $0xc8] sm:$0xff]  }
0x18d0   : > { %15018 = vmatprep.subr.bf16.mxu1 %v20415_v47  ;;  %15104 = vmatprep.subr.bf16.mxu0 %v20418_v0  ;;  %v20497_v34 = vld [vmem:[%s21931_s13 + $0x8] sm:$0xff]   ;;  %v20499_v0 = vld [vmem:[%s21931_s13 + $0x50] sm:$0xff]  }
0x18d1   : > { %v20498_v47 = vld [vmem:[%s21931_s13 + $0x88] sm:$0xff]  }
0x18d3   : > { %15019 = vmatpush1.bf16.msra.mxu1 %v20413_v5  ;;  %15105 = vmatpush1.bf16.msra.mxu0 %v20416_v35  ;;  %v20500_v5 = vld [vmem:[%s21931_s13 + $0xd0] sm:$0xff]  }
0x18d4   : > { %15020 = vmatprep.subr.bf16.mxu1 %v20421_v28  ;;  %15106 = vmatprep.subr.bf16.mxu0 %v20424_v36  ;;  %v20501_v35 = vld [vmem:[%s21931_s13 + $0x10] sm:$0xff]   ;;  %v20504_v36 = vld [vmem:[%s21931_s13 + $0xd8] sm:$0xff]  }
0x18d5   : > { %v20502_v28 = vld [vmem:[%s21931_s13 + $0x90] sm:$0xff]  }
0x18d7   : > { %15021 = vmatpush1.bf16.msra.mxu1 %v20419_v8  ;;  %15107 = vmatpush1.bf16.msra.mxu0 %v20422_v37  ;;  %v20505_v8 = vld [vmem:[%s21931_s13 + $0x18] sm:$0xff]  }
0x18d8   : > { %15022 = vmatprep.subr.bf16.mxu1 %v20427_v38  ;;  %15108 = vmatprep.subr.bf16.mxu0 %v20430_v44  ;;  %v20506_v37 = vld [vmem:[%s21931_s13 + $0x98] sm:$0xff]   ;;  %v20507_v38 = vld [vmem:[%s21931_s13 + $0x60] sm:$0xff]  }
0x18d9   : > { %v20508_v44 = vld [vmem:[%s21931_s13 + $0xe0] sm:$0xff]  }
0x18db   : > { %15023 = vmatpush1.bf16.msra.mxu1 %v20425_v39  ;;  %15109 = vmatpush1.bf16.msra.mxu0 %v20428_v42  ;;  %v20509_v39 = vld [vmem:[%s21931_s13 + $0x20] sm:$0xff]  }
0x18dc   : > { %15024 = vmatprep.subr.bf16.mxu1 %v20433_v45  ;;  %15110 = vmatprep.subr.bf16.mxu0 %v20436_v29  ;;  %v20510_v42 = vld [vmem:[%s21931_s13 + $0xa0] sm:$0xff]   ;;  %v20511_v45 = vld [vmem:[%s21931_s13 + $0x68] sm:$0xff]  }
0x18dd   : > { %v20512_v29 = vld [vmem:[%s21931_s13 + $0xe8] sm:$0xff]  }
0x18df   : > { %15025 = vmatpush1.bf16.msra.mxu1 %v20431_v49  ;;  %15111 = vmatpush1.bf16.msra.mxu0 %v20434_v31  ;;  %v20513_v49 = vld [vmem:[%s21931_s13 + $0x28] sm:$0xff]  }
0x18e0   : > { %15026 = vmatprep.subr.bf16.mxu1 %v20439_v22  ;;  %15112 = vmatprep.subr.bf16.mxu0 %v20442_v52  ;;  %v20514_v31 = vld [vmem:[%s21931_s13 + $0xa8] sm:$0xff]   ;;  %v20515_v22 = vld [vmem:[%s21931_s13 + $0x70] sm:$0xff]  }
0x18e1   : > { %v20516_v52 = vld [vmem:[%s21931_s13 + $0xf0] sm:$0xff]  }
0x18e3   : > { %15027 = vmatpush1.bf16.msra.mxu1 %v20437_v53  ;;  %15113 = vmatpush1.bf16.msra.mxu0 %v20440_v25  ;;  %v20517_v53 = vld [vmem:[%s21931_s13 + $0x30] sm:$0xff]  }
0x18e4   : > { %15028 = vmatprep.subr.bf16.mxu1 %v20445_v54  ;;  %15114 = vmatprep.subr.bf16.mxu0 %v20448_v17  ;;  %v20518_v25 = vld [vmem:[%s21931_s13 + $0xb0] sm:$0xff]   ;;  %v20519_v54 = vld [vmem:[%s21931_s13 + $0x78] sm:$0xff]  }
0x18e5   : > { %v20520_v17 = vld [vmem:[%s21931_s13 + $0xf8] sm:$0xff]  }
0x18e7   : > { %15029 = vmatpush1.bf16.msra.mxu1 %v20443_v26  ;;  %15115 = vmatpush1.bf16.msra.mxu0 %v20446_v57  ;;  %v20521_v26 = vld [vmem:[%s21931_s13 + $0x38] sm:$0xff]  }
0x18e8   : > { %15030 = vmatprep.subr.bf16.mxu1 %v20451_v9  ;;  %15116 = vmatprep.subr.bf16.mxu0 %v20454_v55  ;;  %v20522_v57 = vld [vmem:[%s21931_s13 + $0xb8] sm:$0xff]   ;;  %v15149_v9 = vld [vmem:[%s21926_s29] sm:$0xf] }
0x18e9   : > { %v15154_v55 = vrot.slane %v15149_v9, %v22577_v41 }
0x18eb   : > { %15031 = vmatpush1.bf16.msra.mxu1 %v20449_v1  ;;  %15117 = vmatpush1.bf16.msra.mxu0 %v20452_v13  ;;  %v15162_v1 = vrot.slane %v15149_v9, %v22695_v59  ;;  %v15158_v13 = vrot.slane %v15149_v9, %v22580_v43 }
0x18ec   : > { %15032 = vmatprep.subr.bf16.mxu1 %v20457_v18  ;;  %15118 = vmatprep.subr.bf16.mxu0 %v20460_v56  ;;  %v15166_v18 = vrot.slane %v15149_v9, %v22699_v61 }
0x18ef   : > { %15033 = vmatpush1.bf16.msra.mxu1 %v20455_v58  ;;  %15119 = vmatpush1.bf16.msra.mxu0 %v20458_v62 }
0x18f0   : > { %15034 = vmatprep.subr.bf16.mxu1 %v20463_v63  ;;  %15120 = vmatprep.subr.bf16.mxu0 %v20466_v15 }
0x18f3   : > { %15035 = vmatpush1.bf16.msra.mxu1 %v20461_v60  ;;  %15121 = vmatpush1.bf16.msra.mxu0 %v20464_v4 }
0x18f4   : > { %15036 = vmatprep.subr.bf16.mxu1 %v20469_v51  ;;  %15122 = vmatprep.subr.bf16.mxu0 %v20472_v2 }
0x18f7   : > { %15037 = vmatpush1.bf16.msra.mxu1 %v20467_v30  ;;  %15123 = vmatpush1.bf16.msra.mxu0 %v20470_v27 }
0x18f8   : > { %15038 = vmatprep.subr.bf16.mxu1 %v20475_v50  ;;  %15124 = vmatprep.subr.bf16.mxu0 %v20478_v3 }
0x18fb   : > { %15039 = vmatpush1.bf16.msra.mxu1 %v20473_v10  ;;  %15125 = vmatpush1.bf16.msra.mxu0 %v20476_v48 }
0x18fc   : > { %15040 = vmatprep.subr.bf16.mxu1 %v20481_v7  ;;  %15126 = vmatprep.subr.bf16.mxu0 %v20484_v11 }
0x18ff   : > { %15041 = vmatpush1.bf16.msra.mxu1 %v20479_v12  ;;  %15127 = vmatpush1.bf16.msra.mxu0 %v20482_v14 }
0x1900   : > { %15042 = vmatprep.subr.bf16.mxu1 %v20487_v40  ;;  %15128 = vmatprep.subr.bf16.mxu0 %v20490_v19 }
0x1903   : > { %15043 = vmatpush1.bf16.msra.mxu1 %v20485_v20  ;;  %15129 = vmatpush1.bf16.msra.mxu0 %v20488_v21 }
0x1904   : > { %17758 = vmatprep.subr.bf16.mxu1 %v20491_v23  ;;  %17780 = vmatprep.subr.bf16.mxu0 %v20492_v24 }
0x1906   : > { %15045 = vmatmul.mubr.bf16.vlgmr.msra.gmra.mrb[112].mxu1 %v22954_v16  ;;  %15131 = vmatmul.mubr.bf16.vlgmr.msra.gmra.mrb[120].mxu0 %v22954_v16  ;;  %v20503_v16 = vld [vmem:[%s21931_s13 + $0x58] sm:$0xff]  }
0x1907   : > { %17759 = vmatpush3.bf16.msra.mxu1 %v20493_v32  ;;  %17781 = vmatpush3.bf16.msra.mxu0 %v20494_v46  ;;  %v17646_v46 = vld [vmem:[%s21936_s24] ss:$0 sm:$0xff] }
0x1908   : > { %17760 = vmatprep.subr.bf16.mxu1 %v20495_v6  ;;  %17782 = vmatprep.subr.bf16.mxu0 %v20496_v33 }
0x190b   : > { %17761 = vmatpush3.bf16.msra.mxu1 %v20497_v34  ;;  %17783 = vmatpush3.bf16.msra.mxu0 %v20498_v47 }
0x190c   : > { %17762 = vmatprep.subr.bf16.mxu1 %v20499_v0  ;;  %17784 = vmatprep.subr.bf16.mxu0 %v20500_v5 }
0x190f   : > { %17763 = vmatpush3.bf16.msra.mxu1 %v20501_v35  ;;  %17785 = vmatpush3.bf16.msra.mxu0 %v20502_v28 }
0x1910   : > { %17764 = vmatprep.subr.bf16.mxu1 %v20503_v16  ;;  %17786 = vmatprep.subr.bf16.mxu0 %v20504_v36 }
0x1913   : > { %17765 = vmatpush3.bf16.msra.mxu1 %v20505_v8  ;;  %17787 = vmatpush3.bf16.msra.mxu0 %v20506_v37 }
0x1914   : > { %17766 = vmatprep.subr.bf16.mxu1 %v20507_v38  ;;  %17788 = vmatprep.subr.bf16.mxu0 %v20508_v44 }
0x1917   : > { %17767 = vmatpush3.bf16.msra.mxu1 %v20509_v39  ;;  %17789 = vmatpush3.bf16.msra.mxu0 %v20510_v42 }
0x1918   : > { %17768 = vmatprep.subr.bf16.mxu1 %v20511_v45  ;;  %17790 = vmatprep.subr.bf16.mxu0 %v20512_v29 }
0x191b   : > { %17769 = vmatpush3.bf16.msra.mxu1 %v20513_v49  ;;  %17791 = vmatpush3.bf16.msra.mxu0 %v20514_v31 }
0x191c   : > { %17770 = vmatprep.subr.bf16.mxu1 %v20515_v22  ;;  %17792 = vmatprep.subr.bf16.mxu0 %v20516_v52 }
0x191f   : > { %17771 = vmatpush3.bf16.msra.mxu1 %v20517_v53  ;;  %17793 = vmatpush3.bf16.msra.mxu0 %v20518_v25 }
0x1920   : > { %17772 = vmatprep.subr.bf16.mxu1 %v20519_v54  ;;  %17794 = vmatprep.subr.bf16.mxu0 %v20520_v17 }
0x1923   : > { %17773 = vmatpush3.bf16.msra.mxu1 %v20521_v26  ;;  %17795 = vmatpush3.bf16.msra.mxu0 %v20522_v57 }
0x19d9   : > { %v15046_v56 = vpop.f32.mrb[112].mxu1  ;;  %v15132_v58 = vpop.f32.mrb[120].mxu0 }
0x19da   : > { %v15171_v62 = vadd.f32 %v15154_v55, %v15046_v56  ;;  %v15173_v63 = vadd.f32 %v15162_v1, %v15132_v58  ;;  %v15048_v15 = vpop.f32.mrb[113].mxu1  ;;  %v15134_v60 = vpop.f32.mrb[121].mxu0 }
0x19db   : > { %v15172_v4 = vadd.f32 %v15158_v13, %v15048_v15  ;;  %v15174_v51 = vadd.f32 %v15166_v18, %v15134_v60  ;;  %v15050_v2 = vpop.f32.mrb[114].mxu1  ;;  %v15136_v30 = vpop.f32.mrb[122].mxu0 }
0x19dc   : > { %v15175_v27 = vadd.f32 %v15154_v55, %v15050_v2  ;;  %v15177_v50 = vadd.f32 %v15162_v1, %v15136_v30  ;;  %v15052_v3 = vpop.f32.mrb[115].mxu1  ;;  %v15138_v41 = vpop.f32.mrb[123].mxu0  ;;  %v15179_v48 = vmax.f32 %v15171_v62, 0.0  ;;  %v15181_v43 = vmax.f32 %v15173_v63, 0.0 }
0x19dd   : > { %v15176_v10 = vadd.f32 %v15158_v13, %v15052_v3  ;;  %v15178_v59 = vadd.f32 %v15166_v18, %v15138_v41  ;;  %v15180_v11 = vmax.f32 %v15172_v4, 0.0  ;;  %v15182_v12 = vmax.f32 %v15174_v51, 0.0 }
0x19de   : > { %v15183_v7 = vmax.f32 %v15175_v27, 0.0  ;;  %v15185_v61 = vmax.f32 %v15177_v50, 0.0 }
0x19df   : > { %v15184_v14 = vmax.f32 %v15176_v10, 0.0  ;;  %v15186_v40 = vmax.f32 %v15178_v59, 0.0 }
0x19e0   : > { %v15187_v19 = vpack.c.bf16 %v15183_v7, %v15179_v48  ;;  %v15189_v20 = vpack.c.bf16 %v15185_v61, %v15181_v43 }
0x19e1   : > { %v15188_v21 = vpack.c.bf16 %v15184_v14, %v15180_v11  ;;  %v15190_v23 = vpack.c.bf16 %v15186_v40, %v15182_v12 }
0x19e3   : > { %15486 = vmatprep.mubr.bf16.mxu1 %v15188_v21  ;;  %15527 = vmatprep.mubr.bf16.mxu0 %v15190_v23 }
0x19e4   : > { %15487 = vmatmul.mubr.bf16.vlgmr.msra.gmra.mrb[120].mxu1 %v15187_v19  ;;  %15528 = vmatmul.mubr.bf16.vlgmr.msra.gmra.mrb[128].mxu0 %v15189_v20 }
0x1ab7   : > { %v17774_v24 = vpop.f32.mrb[120].mxu1  ;;  %v17796_v32 = vpop.f32.mrb[128].mxu0 }
0x1ab8   : > { %v17775_v6 = vpop.f32.mrb[121].mxu1  ;;  %v17797_v33 = vpop.f32.mrb[129].mxu0 }
0x1ab9   : > { %v17776_v34 = vadd.f32 %v17775_v6, %v17774_v24  ;;  %v17798_v47 = vadd.f32 %v17797_v33, %v17796_v32  ;;  %v17777_v0 = vpop.f32.mrb[122].mxu1  ;;  %v17799_v5 = vpop.f32.mrb[130].mxu0 }
0x1aba   : > { %v17778_v35 = vpop.f32.mrb[123].mxu1  ;;  %v17800_v28 = vpop.f32.mrb[131].mxu0 }
0x1abb   : > { %v15489_v16 = vadd.f32 %v17776_v34, %v17646_v46  ;;  %v17779_v36 = vadd.f32 %v17778_v35, %v17777_v0  ;;  %v17801_v8 = vadd.f32 %v17800_v28, %v17799_v5 }
0x1abd   : > { %v15530_v37 = vadd.f32 %v17798_v47, %v15489_v16  ;;  %v15492_v38 = vadd.f32 %v17779_v36, %v17646_v46 }
0x1abf   : > { %15536 = vst.msk [vmem:[%s2073_s2] sm:$0xff] %vm2081_vm1, %v15530_v37  ;;  %v15533_v44 = vadd.f32 %v17801_v8, %v15492_v38 }
0x1ac1   : > { %15537 = vst.msk [vmem:[%s2073_s2 + $0x8] sm:$0xff] %vm2081_vm1, %v15533_v44 }
0x1ac2   : > { %21438 = shalt.err (!%p21435_p4)
}
0x1ac3   : > { %s21439_s11 = scalar_lea.hbm %s23000_s4, 256  ;;  %s21443_s0 = scalar_lea.hbm %s21941_s14, 512 }
0x1ac4   : > { %p21440_p0 = scmp.ne.s32.totalorder %s23000_s4, %s21439_s11  ;;  %p21444_p13 = scmp.lt.u32.totalorder %s23000_s4, %s21941_s14 }
0x1ac5   : > { %p21445_p8 = scmp.lt.u32.totalorder %s21443_s0, %s21439_s11  ;;  %p21447_p10 = scmp.lt.u32.totalorder %s21439_s11, %s23000_s4 }
0x1ac6   : > { %p21441_p2 = pnand %p21440_p0, %p23255_p1 }
0x1ac7   : > { %p21446_p9 = por %p21445_p8, %p21444_p13 }
0x1ac8   : > { %p21442_p11 = pneg %p21441_p2 }
0x1ac9   : > { %p21448_p3 = por %p21447_p10, %p21446_p9 }
0x1acb   : > { %p21449_p6 = pnand %p21448_p3, %p21442_p11 }
0x1acd   : > { %21452 = shalt.err (!%p21449_p6)
}
0x1ace   : > { %s21661_s2 = smov 128   ;;  %s21662_s12 = smov 8  }
0x1acf   : > { %18034 = dma.vmem_to_hbm [thread:$0]  (%p23255_p1), %s23002_s9, 256, %s23000_s4, %s15539_s3, %s21661_s2, %s21661_s2, %s21662_s12  }
0x1ad0 PF: > { %s23256_s22 = sld [smem:[#allocation121_spill]]  ;;  %s23257_s7 = sld [smem:[#allocation125_spill]] }
0x1ad1   : > { %p23259_p5 = scmp.ge.s32.totalorder %s21559_s18, 2 }
0x1ad6   : > { %s15567_s5 = sand.u32 1, %s23256_s22   ;;  %p23258_p12 = scmp.ne.s32.totalorder %s23257_s7, 0 }
0x1ad7   : > { %s15568_s11 = scalar_lea.sflag [#allocation4], %s15567_s5 }
0x1ad8   : > { %p18041_p7 = pnand %p23259_p5, %p23258_p12 }
0x1ada   : > { %21542 = dma.done.wait (!%p18041_p7), %s15568_s11, 256  }
0x1adb   : > { %21544 = vsyncadd (!%p18041_p7), %s15568_s11, 4294967040  ;;  %s23260_s18 = sld [smem:[#allocation122_spill]]  ;;  %s23261_s1 = sld [smem:[#allocation123_spill]] }
0x1adc   : > { %s23262_s0 = smov %s21551_s15  ;;  %s23263_s15 = smov %s21555_s16 }
0x1ae1   : > { %p139_p4 = scmp.ge.s32.totalorder %s23260_s18, 4   ;;  %s23264_s16 = smov %s23261_s1 }
0x1ae3   :  { %141 = sbr.rel (!%p139_p4) target bundleno = 126 (0x7e), region = 467 }
0x1aea   :  { %15573 = vsyncpa [#allocation3], 1 }
0x1aeb   :  { %15575 = vsyncpa [#allocation3 + $0x1], 1 }
0x1aec   :  { %15576 = vsyncpa [#allocation6], 1 }
0x1aed   :  { %15577 = vsyncpa [#allocation9], 1 }
0x1aee   :  { %15578 = vsyncpa [#allocation12], 1 }
0x1aef   :  { %15579 = vsyncpa [#allocation15], 1 }
0x1af0   :  { %15580 = vsyncpa [#allocation18], 1 }
0x1af1   :  { %15581 = vsyncpa [#allocation21], 1 }
0x1af2   :  { %15582 = vsyncpa [#allocation24], 1 }
0x1af3   :  { %15583 = vsyncpa [#allocation27], 1 }
0x1af4   :  { %15584 = vsyncpa [#allocation30], 1 }
0x1af5   :  { %15585 = vsyncpa [#allocation33], 1 }
0x1af6   :  { %15586 = vsyncpa [#allocation36], 1 }
0x1af7   :  { %15587 = vsyncpa [#allocation39], 1 }
0x1af8   :  { %15588 = vsyncpa [#allocation42], 1 }
0x1af9   :  { %15589 = vsyncpa [#allocation45], 1 }
0x1afa   :  { %15590 = vsyncpa [#allocation48], 1 }
0x1afb   :  { %15591 = vsyncpa [#allocation51], 1 }
0x1afc   :  { %15592 = vsyncpa [#allocation54], 1 }
0x1afd   :  { %15593 = vsyncpa [#allocation4], 1 }
0x1afe   :  { %15595 = vsyncpa [#allocation4 + $0x1], 1 }

</bundles_post_ra>
